<compile_context>
chip_gen: v7x
topology: tpu7x:2x2x1
jax: 0.10.0
libtpu: 0.0.40
codegen_flags: <defaults>
</compile_context>

<pallas_src>
import numpy as np
import jax
import jax.numpy as jnp
from jax.experimental import pallas as pl
from jax.experimental.pallas import tpu as pltpu


# ----------------------------- configuration --------------------------------
class Cfg:
    pass


cfg = Cfg()
cfg.task_name = "long_term_forecast"
cfg.seq_len = 67
cfg.pred_len = 35
cfg.enc_in = 3
cfg.c_out = 3
cfg.PSR_dim = 4
cfg.PSR_delay = 1
cfg.PSR_type = "indep"
cfg.level = 2
cfg.modes = 4
cfg.order = 8
cfg.Attraos_patch = True

PATCH = 8
PSR_ENC_LEN = (cfg.seq_len - (cfg.PSR_dim - 1) * cfg.PSR_delay) // PATCH   # 8
PSR_DEC_LEN = (cfg.pred_len - (cfg.PSR_dim - 1) * cfg.PSR_delay) // PATCH  # 4
D_FEAT = cfg.PSR_dim * PATCH                                               # 32
CK = D_FEAT * cfg.order                                                    # 256
T_DEC = PSR_DEC_LEN * PATCH + (cfg.PSR_dim - 1) * cfg.PSR_delay            # 35
OUT_LANES = 128                                                            # lane-dense output pad

assert PSR_ENC_LEN % (2 ** cfg.level) == 0


# ----------------------- deterministic parameter setup -----------------------
def lmu_transition(N):
    Q = np.arange(N, dtype=np.float64)
    R = (2.0 * Q + 1.0)[:, None]
    j, i = np.meshgrid(Q, Q)
    sign = np.where((i - j + 1) % 2 == 0, 1.0, -1.0)
    A = np.where(i < j, -1.0, sign) * R
    B = np.where(Q % 2 == 0, 1.0, -1.0)[:, None] * R
    return A, B


def discretize_bilinear(A, B, dt):
    N = A.shape[0]
    I = np.eye(N)
    M1 = np.linalg.inv(I - dt / 2.0 * A)
    Ad = M1 @ (I + dt / 2.0 * A)
    Bd = (M1 @ (dt * B)).reshape(-1)
    return Ad, Bd


def legendre_eval_matrix(N, num_points):
    # C[n, t] = P_n(2*(t+0.5)/num_points - 1)
    x = 2.0 * (np.arange(num_points) + 0.5) / num_points - 1.0
    P = np.zeros((N, num_points))
    P[0] = 1.0
    if N > 1:
        P[1] = x
    for nn in range(1, N - 1):
        P[nn + 1] = ((2 * nn + 1) * x * P[nn] - nn * P[nn - 1]) / (nn + 1)
    return P


_Ac, _Bc = lmu_transition(cfg.order)
_Ad, _Bd = discretize_bilinear(_Ac, _Bc, dt=1.0 / PSR_ENC_LEN)
HIPPO_A = _Ad.astype(np.float32)                                           # (k, k)
HIPPO_B = _Bd.astype(np.float32)                                           # (k,)
HIPPO_C = legendre_eval_matrix(cfg.order, PSR_DEC_LEN).astype(np.float32)  # (k, dec_len)

_pkey = jax.random.PRNGKey(0)
_k1, _k2, _k3, _k4, _k5, _k6 = jax.random.split(jax.random.fold_in(_pkey, 1), 6)
_s = 1.0 / np.sqrt(2 * cfg.order)
W_DOWN_C = np.asarray(_s * jax.random.normal(_k1, (2 * cfg.order, cfg.order), jnp.float32))
W_DOWN_S = np.asarray(_s * jax.random.normal(_k2, (2 * cfg.order, cfg.order), jnp.float32))
W_UP_0 = np.asarray(_s * jax.random.normal(_k3, (2 * cfg.order, cfg.order), jnp.float32))
W_UP_1 = np.asarray(_s * jax.random.normal(_k4, (2 * cfg.order, cfg.order), jnp.float32))

_kscale = 1.0 / (CK * CK)
K_WR = np.asarray(_kscale * jax.random.uniform(_k5, (cfg.modes, CK, CK), jnp.float32))
K_WI = np.asarray(_kscale * jax.random.uniform(_k6, (cfg.modes, CK, CK), jnp.float32))


# ---------------------- host-precomputed fused matrices ----------------------
_I_D = np.eye(D_FEAT, dtype=np.float64)

# Log-depth HiPPO recurrence: kron(I_D, (A^{2^j})^T) for shifts 1, 2, 4, ...
_scan_pows = []
_Apow = HIPPO_A.astype(np.float64)
_shift = 1
while _shift < PSR_ENC_LEN:
    _scan_pows.append(np.kron(_I_D, _Apow.T))
    _Apow = _Apow @ _Apow
    _shift *= 2
N_SCAN_STEPS = len(_scan_pows)                                             # 3 for L=8
BIGA_POWS = jnp.asarray(np.concatenate(_scan_pows, axis=0).astype(np.float32))  # (3*CK, CK) f32


# Paired down / up wavelet projections, block-diagonal per feature d.
# Feature flattening everywhere is f = d*order + k  (d = PSR_dim*8-patch index).
def _block_pair(Wa, Wb):
    o = cfg.order
    top = np.concatenate([np.kron(_I_D, Wa[:o]), np.kron(_I_D, Wb[:o])], axis=1)
    bot = np.concatenate([np.kron(_I_D, Wa[o:]), np.kron(_I_D, Wb[o:])], axis=1)
    return np.concatenate([top, bot], axis=0)                              # (2CK, 2CK)


BIGDOWN = jnp.asarray(_block_pair(W_DOWN_C.astype(np.float64),
                                  W_DOWN_S.astype(np.float64))).astype(jnp.bfloat16)
BIGUP = jnp.asarray(_block_pair(W_UP_0.astype(np.float64),
                                W_UP_1.astype(np.float64))).astype(jnp.bfloat16)


def _build_spectral_matrix(N):
    # sparseKernelFT1d (truncated rfft -> per-mode complex mix -> irfft) folded
    # into a single real (N*CK, N*CK) matrix acting on the flattened (n, d, k) axis.
    l = min(cfg.modes, N // 2 + 1)
    w = np.full((l,), 2.0)
    w[0] = 1.0
    if N % 2 == 0 and l - 1 == N // 2:
        w[N // 2] = 1.0
    n = np.arange(N, dtype=np.float64)
    mm = np.arange(l, dtype=np.float64)
    diff = n[None, :] - n[:, None]                                   # (n, n') = n' - n
    ang = 2.0 * np.pi * diff[:, :, None] * mm[None, None, :] / N     # (N, N, l)
    Cc = (w[None, None, :] / N) * np.cos(ang)
    Ss = (w[None, None, :] / N) * np.sin(ang)
    K = (np.einsum('nom,mfg->nfog', Cc, K_WR[:l].astype(np.float64))
         - np.einsum('nom,mfg->nfog', Ss, K_WI[:l].astype(np.float64)))
    return jnp.asarray(K.reshape(N * CK, N * CK).astype(np.float32))


# Lengths hit by the spectral mixer with level=2, enc_len=8 are {4, 2}.
_lens = []
_L = PSR_ENC_LEN
for _ in range(cfg.level):
    _L //= 2
    _lens.append(_L)
_lens.append(_L)
assert set(_lens) == {4, 2}, "spectral matrices precomputed for lengths 4 and 2 only"
SPECW4 = _build_spectral_matrix(4).astype(jnp.bfloat16)   # (1024, 1024)
SPECW2 = _build_spectral_matrix(2).astype(jnp.bfloat16)   # (512, 512)


def _build_final_matrix():
    # HiPPO eval (C) + inverse patch + inverse PSR (torch overwrite semantics)
    # folded into one read-out matrix, zero-padded to 128 lanes (lane-dense store).
    P = np.zeros((CK, OUT_LANES), np.float32)
    L2 = PSR_DEC_LEN * PATCH
    for t in range(T_DEC):
        i_eff, l_eff = None, None
        for i in range(cfg.PSR_dim):
            l = t - i * cfg.PSR_delay
            if 0 <= l < L2:
                i_eff, l_eff = i, l              # later i overwrites earlier ones
        d = i_eff * PATCH + (l_eff % PATCH)
        j = l_eff // PATCH
        P[d * cfg.order:(d + 1) * cfg.order, t] = HIPPO_C[:, j]
    return jnp.asarray(P)


PFIN = _build_final_matrix()                                               # (CK, 128) f32

# PSR delay-embedding + patching as a static gather index: TIDX[w, d] is the
# time index feeding HiPPO step w, feature d = i*PATCH + p.
_d = np.arange(D_FEAT)
_w = np.arange(PSR_ENC_LEN)
TIDX = (_w[:, None] * PATCH + (_d % PATCH)[None, :]
        + (_d // PATCH)[None, :] * cfg.PSR_delay).astype(np.int32)          # (L, D_FEAT)

HIPPO_B_J = jnp.asarray(HIPPO_B)


# --------------------------- the fused Pallas kernel --------------------------
def _vmem():
    return pl.BlockSpec(memory_space=pltpu.MemorySpace.VMEM)


def _fused_forecast_kernel(ub_ref, bigap_ref, bigdown_ref, bigup_ref,
                           specw4_ref, specw2_ref, pfin_ref,
                           std_ref, mean_ref, out_ref):
    f32 = jnp.float32
    L = PSR_ENC_LEN
    BCP = ub_ref.shape[0] // L

    def mm(a, b):
        # bf16 weights: cast LHS to bf16 (native MXU input), accumulate in f32.
        if b.dtype == jnp.bfloat16:
            a = a.astype(jnp.bfloat16)
        return jnp.dot(a, b, preferred_element_type=f32)

    # ---------------- HiPPO-LegT scan (MDMU.win0), log-depth form ----------------
    # slab_t[bc, d*order + k] = sum_{s<=t} u_s @ A^{t-s}; Hillis-Steele shifts 1,2,4.
    state = ub_ref[...]                                    # (L*BCP, CK) f32, time in row blocks
    shift, j = 1, 0
    while shift < L:
        apow = bigap_ref[j * CK:(j + 1) * CK, :]           # kron(I, (A^{2^j})^T), f32
        contrib = mm(state[:(L - shift) * BCP, :], apow)   # ((L-shift)*BCP, CK)
        state = jnp.concatenate(
            [state[:shift * BCP, :], state[shift * BCP:, :] + contrib], axis=0)
        shift *= 2
        j += 1

    # Wide layout: time slot t occupies lanes t*CK:(t+1)*CK.
    cur = jnp.concatenate([state[t * BCP:(t + 1) * BCP, :] for t in range(L)], axis=1)

    big_down = bigdown_ref[...]                            # (2CK, 2CK) bf16
    big_up = bigup_ref[...]                                # (2CK, 2CK) bf16

    def spectral(wide):
        # sparseKernelFT1d: one fused (iDFT . mix . DFT) matmul over (n, d, k).
        n = wide.shape[1] // CK
        w_ref = specw4_ref if n * CK == specw4_ref.shape[0] else specw2_ref
        assert n * CK == w_ref.shape[0]
        return mm(wide, w_ref[...])                        # (BCP, n*CK)

    # ---------------- multiwavelet down sweep (one stacked matmul / level) --------
    list_ms = []
    for _ in range(cfg.level):
        n = cur.shape[1] // CK
        npairs = n // 2
        # pair p LHS block = [slot 2p | slot 2p+1] -> stack pairs along sublanes
        lhs = jnp.concatenate(
            [cur[:, 2 * p * CK:(2 * p + 2) * CK] for p in range(npairs)], axis=0)
        o = mm(lhs, big_down)                              # (npairs*BCP, 2CK) = [mc | ms]
        cur = jnp.concatenate(
            [o[p * BCP:(p + 1) * BCP, 0:CK] for p in range(npairs)], axis=1)
        ms = jnp.concatenate(
            [o[p * BCP:(p + 1) * BCP, CK:2 * CK] for p in range(npairs)], axis=1)
        list_ms.append(spectral(ms))
    cur = spectral(cur)

    # ---------------- up sweep (one stacked matmul / level) -----------------------
    for lvl in range(cfg.level - 1, -1, -1):
        n = cur.shape[1] // CK
        msw = list_ms[lvl]
        lhs = jnp.concatenate(
            [jnp.concatenate([cur[:, t * CK:(t + 1) * CK],
                              msw[:, t * CK:(t + 1) * CK]], axis=1)
             for t in range(n)], axis=0)                   # (n*BCP, 2CK) = [mc | ms]
        o = mm(lhs, big_up)                                # (n*BCP, 2CK) = [even | odd]
        # block t's lanes are already [slot 2t | slot 2t+1] -> concat blocks in order
        cur = jnp.concatenate(
            [o[t * BCP:(t + 1) * BCP, :] for t in range(n)], axis=1)

    n_final = cur.shape[1] // CK
    t_sel = (PSR_DEC_LEN - 1) if PSR_ENC_LEN >= PSR_DEC_LEN else (n_final - 1)
    sel = cur[:, t_sel * CK:(t_sel + 1) * CK]              # (BCP, CK)

    # Legendre read-out + inverse patch + inverse PSR folded into PFIN (128 lanes),
    # then de-normalisation.  Lane-dense unmasked store; wrapper slices :T_DEC.
    y = mm(sel, pfin_ref[...])                             # (BCP, 128)
    out_ref[...] = y * std_ref[...] + mean_ref[...]


# ------------------------------- forward -------------------------------------
def forecast(x_enc):
    B, T, C = x_enc.shape
    x = x_enc.astype(jnp.float32)

    # instance norm over time (stats are also consumed by the kernel for de-norm)
    means = jnp.mean(x, axis=1, keepdims=True)
    xc = x - means
    var = jnp.mean(xc * xc, axis=1, keepdims=True)
    stdev = jnp.sqrt(var + 1e-5)
    xn = xc / stdev

    BC = B * C
    BCP = ((BC + 7) // 8) * 8                 # pad channel-rows to a full sublane group
    L = PSR_ENC_LEN

    # PSR delay-embedding + patching gathered straight into the HiPPO drive:
    # UB[t*BCP + bc, d*order + k] = x_norm[b, t*8 + p + i, c] * B_hippo[k]
    xt = jnp.transpose(xn, (0, 2, 1)).reshape(BC, T)                  # (BC, T)
    u = xt[:, TIDX]                                                   # (BC, L, D_FEAT)
    ub = u[:, :, :, None] * HIPPO_B_J[None, None, None, :]            # (BC, L, D, k)
    ub = jnp.transpose(ub, (1, 0, 2, 3)).reshape(L, BC, CK)
    ub = jnp.pad(ub, ((0, 0), (0, BCP - BC), (0, 0))).reshape(L * BCP, CK)

    std_bc = jnp.pad(jnp.transpose(stdev, (0, 2, 1)).reshape(BC, 1),
                     ((0, BCP - BC), (0, 0)), constant_values=1.0)
    mean_bc = jnp.pad(jnp.transpose(means, (0, 2, 1)).reshape(BC, 1),
                      ((0, BCP - BC), (0, 0)))

    y = pl.pallas_call(
        _fused_forecast_kernel,
        out_shape=jax.ShapeDtypeStruct((BCP, OUT_LANES), jnp.float32),
        in_specs=[_vmem()] * 9,
        out_specs=_vmem(),
        compiler_params=pltpu.CompilerParams(
            vmem_limit_bytes=32 * 1024 * 1024),
    )(ub, BIGA_POWS, BIGDOWN, BIGUP, SPECW4, SPECW2, PFIN, std_bc, mean_bc)

    dec_out = jnp.transpose(y[:BC, :T_DEC].reshape(B, C, T_DEC), (0, 2, 1))  # (B, T_DEC, C)
    return dec_out


def model_forward(x_enc, x_mark_enc=None, x_dec=None, x_mark_dec=None, mask=None):
    if cfg.task_name in ("long_term_forecast", "short_term_forecast"):
        dec_out = forecast(x_enc)
        return dec_out[:, -cfg.pred_len:, :]
    return None


# --------------------------------- main ---------------------------------------
if __name__ == "__main__":
    key = jax.random.PRNGKey(0)
    x_enc = jax.random.normal(key, (2, cfg.seq_len, cfg.enc_in), jnp.float32)
    out = jax.jit(model_forward)(x_enc)
    jax.block_until_ready(out)
    assert out.shape == (2, cfg.pred_len, cfg.enc_in)
    assert bool(jnp.all(jnp.isfinite(out)))
    print("KERNEL_OK")
</pallas_src>

<mosaic_0001>
module attributes {stable_mosaic.version = 11 : i64} {
  func.func @_fused_forecast_kernel(%arg0: memref<64x256xf32, #tpu.memory_space<vmem>>, %arg1: memref<768x256xf32, #tpu.memory_space<vmem>>, %arg2: memref<512x512xbf16, #tpu.memory_space<vmem>>, %arg3: memref<512x512xbf16, #tpu.memory_space<vmem>>, %arg4: memref<1024x1024xbf16, #tpu.memory_space<vmem>>, %arg5: memref<512x512xbf16, #tpu.memory_space<vmem>>, %arg6: memref<256x128xf32, #tpu.memory_space<vmem>>, %arg7: memref<8x1xf32, #tpu.memory_space<vmem>>, %arg8: memref<8x1xf32, #tpu.memory_space<vmem>>, %arg9: memref<8x128xf32, #tpu.memory_space<vmem>>) attributes {dimension_semantics = [], scalar_prefetch = 0 : i64, scratch_operands = 0 : i64, tpu.core_type = #tpu.core_type<tc>} {
    %c0 = arith.constant 0 : index
    %c0_0 = arith.constant 0 : index
    %0 = vector.load %arg0[%c0, %c0_0] : memref<64x256xf32, #tpu.memory_space<vmem>>, vector<64x256xf32>
    %c0_1 = arith.constant 0 : index
    %c0_2 = arith.constant 0 : index
    %1 = vector.load %arg1[%c0_1, %c0_2] : memref<768x256xf32, #tpu.memory_space<vmem>>, vector<256x256xf32>
    %2 = vector.extract_strided_slice %0 {offsets = [0, 0], sizes = [56, 256], strides = [1, 1]} : vector<64x256xf32> to vector<56x256xf32>
    %cst = arith.constant dense<0.000000e+00> : vector<56x256xf32>
    %3 = tpu.matmul %2, %1, %cst {dimension_numbers = #tpu.dot_dimension_numbers<[1], [0], [0], [1], [0, 0, 1, 1], [], []>} : vector<56x256xf32>, vector<256x256xf32>, vector<56x256xf32> -> vector<56x256xf32>
    %4 = vector.extract_strided_slice %0 {offsets = [0, 0], sizes = [8, 256], strides = [1, 1]} : vector<64x256xf32> to vector<8x256xf32>
    %5 = vector.extract_strided_slice %0 {offsets = [8, 0], sizes = [56, 256], strides = [1, 1]} : vector<64x256xf32> to vector<56x256xf32>
    %6 = arith.addf %5, %3 : vector<56x256xf32>
    %7 = tpu.concatenate %4, %6 in 0 : vector<8x256xf32>, vector<56x256xf32> -> vector<64x256xf32>
    %c256 = arith.constant 256 : index
    %c0_3 = arith.constant 0 : index
    %8 = vector.load %arg1[%c256, %c0_3] : memref<768x256xf32, #tpu.memory_space<vmem>>, vector<256x256xf32>
    %9 = vector.extract_strided_slice %7 {offsets = [0, 0], sizes = [48, 256], strides = [1, 1]} : vector<64x256xf32> to vector<48x256xf32>
    %cst_4 = arith.constant dense<0.000000e+00> : vector<48x256xf32>
    %10 = tpu.matmul %9, %8, %cst_4 {dimension_numbers = #tpu.dot_dimension_numbers<[1], [0], [0], [1], [0, 0, 1, 1], [], []>} : vector<48x256xf32>, vector<256x256xf32>, vector<48x256xf32> -> vector<48x256xf32>
    %11 = vector.extract_strided_slice %7 {offsets = [0, 0], sizes = [16, 256], strides = [1, 1]} : vector<64x256xf32> to vector<16x256xf32>
    %12 = vector.extract_strided_slice %7 {offsets = [16, 0], sizes = [48, 256], strides = [1, 1]} : vector<64x256xf32> to vector<48x256xf32>
    %13 = arith.addf %12, %10 : vector<48x256xf32>
    %14 = tpu.concatenate %11, %13 in 0 : vector<16x256xf32>, vector<48x256xf32> -> vector<64x256xf32>
    %c512 = arith.constant 512 : index
    %c0_5 = arith.constant 0 : index
    %15 = vector.load %arg1[%c512, %c0_5] : memref<768x256xf32, #tpu.memory_space<vmem>>, vector<256x256xf32>
    %16 = vector.extract_strided_slice %14 {offsets = [0, 0], sizes = [32, 256], strides = [1, 1]} : vector<64x256xf32> to vector<32x256xf32>
    %cst_6 = arith.constant dense<0.000000e+00> : vector<32x256xf32>
    %17 = tpu.matmul %16, %15, %cst_6 {dimension_numbers = #tpu.dot_dimension_numbers<[1], [0], [0], [1], [0, 0, 1, 1], [], []>} : vector<32x256xf32>, vector<256x256xf32>, vector<32x256xf32> -> vector<32x256xf32>
    %18 = vector.extract_strided_slice %14 {offsets = [0, 0], sizes = [32, 256], strides = [1, 1]} : vector<64x256xf32> to vector<32x256xf32>
    %19 = vector.extract_strided_slice %14 {offsets = [32, 0], sizes = [32, 256], strides = [1, 1]} : vector<64x256xf32> to vector<32x256xf32>
    %20 = arith.addf %19, %17 : vector<32x256xf32>
    %21 = tpu.concatenate %18, %20 in 0 : vector<32x256xf32>, vector<32x256xf32> -> vector<64x256xf32>
    %22 = vector.extract_strided_slice %21 {offsets = [0, 0], sizes = [8, 256], strides = [1, 1]} : vector<64x256xf32> to vector<8x256xf32>
    %23 = vector.extract_strided_slice %21 {offsets = [8, 0], sizes = [8, 256], strides = [1, 1]} : vector<64x256xf32> to vector<8x256xf32>
    %24 = vector.extract_strided_slice %21 {offsets = [16, 0], sizes = [8, 256], strides = [1, 1]} : vector<64x256xf32> to vector<8x256xf32>
    %25 = vector.extract_strided_slice %21 {offsets = [24, 0], sizes = [8, 256], strides = [1, 1]} : vector<64x256xf32> to vector<8x256xf32>
    %26 = vector.extract_strided_slice %21 {offsets = [32, 0], sizes = [8, 256], strides = [1, 1]} : vector<64x256xf32> to vector<8x256xf32>
    %27 = vector.extract_strided_slice %21 {offsets = [40, 0], sizes = [8, 256], strides = [1, 1]} : vector<64x256xf32> to vector<8x256xf32>
    %28 = vector.extract_strided_slice %21 {offsets = [48, 0], sizes = [8, 256], strides = [1, 1]} : vector<64x256xf32> to vector<8x256xf32>
    %29 = vector.extract_strided_slice %21 {offsets = [56, 0], sizes = [8, 256], strides = [1, 1]} : vector<64x256xf32> to vector<8x256xf32>
    %30 = tpu.concatenate %22, %23, %24, %25, %26, %27, %28, %29 in 1 : vector<8x256xf32>, vector<8x256xf32>, vector<8x256xf32>, vector<8x256xf32>, vector<8x256xf32>, vector<8x256xf32>, vector<8x256xf32>, vector<8x256xf32> -> vector<8x2048xf32>
    %c0_7 = arith.constant 0 : index
    %c0_8 = arith.constant 0 : index
    %31 = vector.load %arg2[%c0_7, %c0_8] : memref<512x512xbf16, #tpu.memory_space<vmem>>, vector<512x512xbf16>
    %c0_9 = arith.constant 0 : index
    %c0_10 = arith.constant 0 : index
    %32 = vector.load %arg3[%c0_9, %c0_10] : memref<512x512xbf16, #tpu.memory_space<vmem>>, vector<512x512xbf16>
    %33 = vector.extract_strided_slice %30 {offsets = [0, 0], sizes = [8, 512], strides = [1, 1]} : vector<8x2048xf32> to vector<8x512xf32>
    %34 = vector.extract_strided_slice %30 {offsets = [0, 512], sizes = [8, 512], strides = [1, 1]} : vector<8x2048xf32> to vector<8x512xf32>
    %35 = vector.extract_strided_slice %30 {offsets = [0, 1024], sizes = [8, 512], strides = [1, 1]} : vector<8x2048xf32> to vector<8x512xf32>
    %36 = vector.extract_strided_slice %30 {offsets = [0, 1536], sizes = [8, 512], strides = [1, 1]} : vector<8x2048xf32> to vector<8x512xf32>
    %37 = tpu.concatenate %33, %34, %35, %36 in 0 : vector<8x512xf32>, vector<8x512xf32>, vector<8x512xf32>, vector<8x512xf32> -> vector<32x512xf32>
    %38 = arith.truncf %37 : vector<32x512xf32> to vector<32x512xbf16>
    %cst_11 = arith.constant dense<0.000000e+00> : vector<32x512xf32>
    %39 = tpu.matmul %38, %31, %cst_11 {dimension_numbers = #tpu.dot_dimension_numbers<[1], [0], [0], [1], [0, 0, 1, 1], [], []>} : vector<32x512xbf16>, vector<512x512xbf16>, vector<32x512xf32> -> vector<32x512xf32>
    %40 = vector.extract_strided_slice %39 {offsets = [0, 0], sizes = [8, 256], strides = [1, 1]} : vector<32x512xf32> to vector<8x256xf32>
    %41 = vector.extract_strided_slice %39 {offsets = [8, 0], sizes = [8, 256], strides = [1, 1]} : vector<32x512xf32> to vector<8x256xf32>
    %42 = vector.extract_strided_slice %39 {offsets = [16, 0], sizes = [8, 256], strides = [1, 1]} : vector<32x512xf32> to vector<8x256xf32>
    %43 = vector.extract_strided_slice %39 {offsets = [24, 0], sizes = [8, 256], strides = [1, 1]} : vector<32x512xf32> to vector<8x256xf32>
    %44 = tpu.concatenate %40, %41, %42, %43 in 1 : vector<8x256xf32>, vector<8x256xf32>, vector<8x256xf32>, vector<8x256xf32> -> vector<8x1024xf32>
    %45 = vector.extract_strided_slice %39 {offsets = [0, 256], sizes = [8, 256], strides = [1, 1]} : vector<32x512xf32> to vector<8x256xf32>
    %46 = vector.extract_strided_slice %39 {offsets = [8, 256], sizes = [8, 256], strides = [1, 1]} : vector<32x512xf32> to vector<8x256xf32>
    %47 = vector.extract_strided_slice %39 {offsets = [16, 256], sizes = [8, 256], strides = [1, 1]} : vector<32x512xf32> to vector<8x256xf32>
    %48 = vector.extract_strided_slice %39 {offsets = [24, 256], sizes = [8, 256], strides = [1, 1]} : vector<32x512xf32> to vector<8x256xf32>
    %49 = tpu.concatenate %45, %46, %47, %48 in 1 : vector<8x256xf32>, vector<8x256xf32>, vector<8x256xf32>, vector<8x256xf32> -> vector<8x1024xf32>
    %c0_12 = arith.constant 0 : index
    %c0_13 = arith.constant 0 : index
    %50 = vector.load %arg4[%c0_12, %c0_13] : memref<1024x1024xbf16, #tpu.memory_space<vmem>>, vector<1024x1024xbf16>
    %51 = arith.truncf %49 : vector<8x1024xf32> to vector<8x1024xbf16>
    %cst_14 = arith.constant dense<0.000000e+00> : vector<8x1024xf32>
    %52 = tpu.matmul %51, %50, %cst_14 {dimension_numbers = #tpu.dot_dimension_numbers<[1], [0], [0], [1], [0, 0, 1, 1], [], []>} : vector<8x1024xbf16>, vector<1024x1024xbf16>, vector<8x1024xf32> -> vector<8x1024xf32>
    %53 = vector.extract_strided_slice %44 {offsets = [0, 0], sizes = [8, 512], strides = [1, 1]} : vector<8x1024xf32> to vector<8x512xf32>
    %54 = vector.extract_strided_slice %44 {offsets = [0, 512], sizes = [8, 512], strides = [1, 1]} : vector<8x1024xf32> to vector<8x512xf32>
    %55 = tpu.concatenate %53, %54 in 0 : vector<8x512xf32>, vector<8x512xf32> -> vector<16x512xf32>
    %56 = arith.truncf %55 : vector<16x512xf32> to vector<16x512xbf16>
    %cst_15 = arith.constant dense<0.000000e+00> : vector<16x512xf32>
    %57 = tpu.matmul %56, %31, %cst_15 {dimension_numbers = #tpu.dot_dimension_numbers<[1], [0], [0], [1], [0, 0, 1, 1], [], []>} : vector<16x512xbf16>, vector<512x512xbf16>, vector<16x512xf32> -> vector<16x512xf32>
    %58 = vector.extract_strided_slice %57 {offsets = [0, 0], sizes = [8, 256], strides = [1, 1]} : vector<16x512xf32> to vector<8x256xf32>
    %59 = vector.extract_strided_slice %57 {offsets = [8, 0], sizes = [8, 256], strides = [1, 1]} : vector<16x512xf32> to vector<8x256xf32>
    %60 = tpu.concatenate %58, %59 in 1 : vector<8x256xf32>, vector<8x256xf32> -> vector<8x512xf32>
    %61 = vector.extract_strided_slice %57 {offsets = [0, 256], sizes = [8, 256], strides = [1, 1]} : vector<16x512xf32> to vector<8x256xf32>
    %62 = vector.extract_strided_slice %57 {offsets = [8, 256], sizes = [8, 256], strides = [1, 1]} : vector<16x512xf32> to vector<8x256xf32>
    %63 = tpu.concatenate %61, %62 in 1 : vector<8x256xf32>, vector<8x256xf32> -> vector<8x512xf32>
    %c0_16 = arith.constant 0 : index
    %c0_17 = arith.constant 0 : index
    %64 = vector.load %arg5[%c0_16, %c0_17] : memref<512x512xbf16, #tpu.memory_space<vmem>>, vector<512x512xbf16>
    %65 = arith.truncf %63 : vector<8x512xf32> to vector<8x512xbf16>
    %cst_18 = arith.constant dense<0.000000e+00> : vector<8x512xf32>
    %66 = tpu.matmul %65, %64, %cst_18 {dimension_numbers = #tpu.dot_dimension_numbers<[1], [0], [0], [1], [0, 0, 1, 1], [], []>} : vector<8x512xbf16>, vector<512x512xbf16>, vector<8x512xf32> -> vector<8x512xf32>
    %c0_19 = arith.constant 0 : index
    %c0_20 = arith.constant 0 : index
    %67 = vector.load %arg5[%c0_19, %c0_20] : memref<512x512xbf16, #tpu.memory_space<vmem>>, vector<512x512xbf16>
    %68 = arith.truncf %60 : vector<8x512xf32> to vector<8x512xbf16>
    %cst_21 = arith.constant dense<0.000000e+00> : vector<8x512xf32>
    %69 = tpu.matmul %68, %67, %cst_21 {dimension_numbers = #tpu.dot_dimension_numbers<[1], [0], [0], [1], [0, 0, 1, 1], [], []>} : vector<8x512xbf16>, vector<512x512xbf16>, vector<8x512xf32> -> vector<8x512xf32>
    %70 = vector.extract_strided_slice %69 {offsets = [0, 0], sizes = [8, 256], strides = [1, 1]} : vector<8x512xf32> to vector<8x256xf32>
    %71 = vector.extract_strided_slice %66 {offsets = [0, 0], sizes = [8, 256], strides = [1, 1]} : vector<8x512xf32> to vector<8x256xf32>
    %72 = tpu.concatenate %70, %71 in 1 : vector<8x256xf32>, vector<8x256xf32> -> vector<8x512xf32>
    %73 = vector.extract_strided_slice %69 {offsets = [0, 256], sizes = [8, 256], strides = [1, 1]} : vector<8x512xf32> to vector<8x256xf32>
    %74 = vector.extract_strided_slice %66 {offsets = [0, 256], sizes = [8, 256], strides = [1, 1]} : vector<8x512xf32> to vector<8x256xf32>
    %75 = tpu.concatenate %73, %74 in 1 : vector<8x256xf32>, vector<8x256xf32> -> vector<8x512xf32>
    %76 = tpu.concatenate %72, %75 in 0 : vector<8x512xf32>, vector<8x512xf32> -> vector<16x512xf32>
    %77 = arith.truncf %76 : vector<16x512xf32> to vector<16x512xbf16>
    %cst_22 = arith.constant dense<0.000000e+00> : vector<16x512xf32>
    %78 = tpu.matmul %77, %32, %cst_22 {dimension_numbers = #tpu.dot_dimension_numbers<[1], [0], [0], [1], [0, 0, 1, 1], [], []>} : vector<16x512xbf16>, vector<512x512xbf16>, vector<16x512xf32> -> vector<16x512xf32>
    %79 = vector.extract_strided_slice %78 {offsets = [0, 0], sizes = [8, 512], strides = [1, 1]} : vector<16x512xf32> to vector<8x512xf32>
    %80 = vector.extract_strided_slice %78 {offsets = [8, 0], sizes = [8, 512], strides = [1, 1]} : vector<16x512xf32> to vector<8x512xf32>
    %81 = tpu.concatenate %79, %80 in 1 : vector<8x512xf32>, vector<8x512xf32> -> vector<8x1024xf32>
    %82 = vector.extract_strided_slice %81 {offsets = [0, 0], sizes = [8, 256], strides = [1, 1]} : vector<8x1024xf32> to vector<8x256xf32>
    %83 = vector.extract_strided_slice %52 {offsets = [0, 0], sizes = [8, 256], strides = [1, 1]} : vector<8x1024xf32> to vector<8x256xf32>
    %84 = tpu.concatenate %82, %83 in 1 : vector<8x256xf32>, vector<8x256xf32> -> vector<8x512xf32>
    %85 = vector.extract_strided_slice %81 {offsets = [0, 256], sizes = [8, 256], strides = [1, 1]} : vector<8x1024xf32> to vector<8x256xf32>
    %86 = vector.extract_strided_slice %52 {offsets = [0, 256], sizes = [8, 256], strides = [1, 1]} : vector<8x1024xf32> to vector<8x256xf32>
    %87 = tpu.concatenate %85, %86 in 1 : vector<8x256xf32>, vector<8x256xf32> -> vector<8x512xf32>
    %88 = vector.extract_strided_slice %81 {offsets = [0, 512], sizes = [8, 256], strides = [1, 1]} : vector<8x1024xf32> to vector<8x256xf32>
    %89 = vector.extract_strided_slice %52 {offsets = [0, 512], sizes = [8, 256], strides = [1, 1]} : vector<8x1024xf32> to vector<8x256xf32>
    %90 = tpu.concatenate %88, %89 in 1 : vector<8x256xf32>, vector<8x256xf32> -> vector<8x512xf32>
    %91 = vector.extract_strided_slice %81 {offsets = [0, 768], sizes = [8, 256], strides = [1, 1]} : vector<8x1024xf32> to vector<8x256xf32>
    %92 = vector.extract_strided_slice %52 {offsets = [0, 768], sizes = [8, 256], strides = [1, 1]} : vector<8x1024xf32> to vector<8x256xf32>
    %93 = tpu.concatenate %91, %92 in 1 : vector<8x256xf32>, vector<8x256xf32> -> vector<8x512xf32>
    %94 = tpu.concatenate %84, %87, %90, %93 in 0 : vector<8x512xf32>, vector<8x512xf32>, vector<8x512xf32>, vector<8x512xf32> -> vector<32x512xf32>
    %95 = arith.truncf %94 : vector<32x512xf32> to vector<32x512xbf16>
    %cst_23 = arith.constant dense<0.000000e+00> : vector<32x512xf32>
    %96 = tpu.matmul %95, %32, %cst_23 {dimension_numbers = #tpu.dot_dimension_numbers<[1], [0], [0], [1], [0, 0, 1, 1], [], []>} : vector<32x512xbf16>, vector<512x512xbf16>, vector<32x512xf32> -> vector<32x512xf32>
    %97 = vector.extract_strided_slice %96 {offsets = [0, 0], sizes = [8, 512], strides = [1, 1]} : vector<32x512xf32> to vector<8x512xf32>
    %98 = vector.extract_strided_slice %96 {offsets = [8, 0], sizes = [8, 512], strides = [1, 1]} : vector<32x512xf32> to vector<8x512xf32>
    %99 = vector.extract_strided_slice %96 {offsets = [16, 0], sizes = [8, 512], strides = [1, 1]} : vector<32x512xf32> to vector<8x512xf32>
    %100 = vector.extract_strided_slice %96 {offsets = [24, 0], sizes = [8, 512], strides = [1, 1]} : vector<32x512xf32> to vector<8x512xf32>
    %101 = tpu.concatenate %97, %98, %99, %100 in 1 : vector<8x512xf32>, vector<8x512xf32>, vector<8x512xf32>, vector<8x512xf32> -> vector<8x2048xf32>
    %102 = vector.extract_strided_slice %101 {offsets = [0, 768], sizes = [8, 256], strides = [1, 1]} : vector<8x2048xf32> to vector<8x256xf32>
    %c0_24 = arith.constant 0 : index
    %c0_25 = arith.constant 0 : index
    %103 = vector.load %arg6[%c0_24, %c0_25] : memref<256x128xf32, #tpu.memory_space<vmem>>, vector<256x128xf32>
    %cst_26 = arith.constant dense<0.000000e+00> : vector<8x128xf32>
    %104 = tpu.matmul %102, %103, %cst_26 {dimension_numbers = #tpu.dot_dimension_numbers<[1], [0], [0], [1], [0, 0, 1, 1], [], []>} : vector<8x256xf32>, vector<256x128xf32>, vector<8x128xf32> -> vector<8x128xf32>
    %c0_27 = arith.constant 0 : index
    %c0_28 = arith.constant 0 : index
    %105 = vector.load %arg7[%c0_27, %c0_28] : memref<8x1xf32, #tpu.memory_space<vmem>>, vector<8x1xf32>
    %106 = vector.broadcast %105 : vector<8x1xf32> to vector<8x128xf32>
    %107 = arith.mulf %104, %106 : vector<8x128xf32>
    %c0_29 = arith.constant 0 : index
    %c0_30 = arith.constant 0 : index
    %108 = vector.load %arg8[%c0_29, %c0_30] : memref<8x1xf32, #tpu.memory_space<vmem>>, vector<8x1xf32>
    %109 = vector.broadcast %108 : vector<8x1xf32> to vector<8x128xf32>
    %110 = arith.addf %107, %109 : vector<8x128xf32>
    %c0_31 = arith.constant 0 : index
    %c0_32 = arith.constant 0 : index
    %111 = vector.load %arg9[%c0_31, %c0_32] : memref<8x128xf32, #tpu.memory_space<vmem>>, vector<8x128xf32>
    tpu.vector_store %arg9[%c0_31, %c0_32], %110 {strides = array<i32>} : memref<8x128xf32, #tpu.memory_space<vmem>>, vector<8x128xf32>,
    return
  }
}

</mosaic_0001>

<bundles_post_ra>
// kernel: model_forward.1
= control target key start
LH: loop header
LB: loop body
LE: loop exit
PB: predicated region body
PF: predicated region fallthrough
CT: control target
= control target key end

     0   :  { %s14633_s1 = inlined_call_operand.vmem [shape: f32[768,256], index: 1, kind: input, shape index: {}]   ;;  %s14634_s0 = inlined_call_operand.vmem [shape: f32[64,256], index: 0, kind: input, shape index: {}]   ;;  %s14635_s2 = inlined_call_operand.vmem [shape: bf16[512,512], index: 2, kind: input, shape index: {}]   ;;  %s14636_s4 = inlined_call_operand.vmem [shape: bf16[1024,1024], index: 4, kind: input, shape index: {}]   ;;  %s14637_s5 = inlined_call_operand.vmem [shape: bf16[512,512], index: 5, kind: input, shape index: {}]   ;;  %s14638_s3 = inlined_call_operand.vmem [shape: bf16[512,512], index: 3, kind: input, shape index: {}]   ;;  %s14639_s6 = inlined_call_operand.vmem [shape: f32[256,128], index: 6, kind: input, shape index: {}]   ;;  %s14640_s7 = inlined_call_operand.vmem [shape: f32[8,1], index: 7, kind: input, shape index: {}]   ;;  %s14641_s8 = inlined_call_operand.vmem [shape: f32[8,1], index: 8, kind: input, shape index: {}]   ;;  %s14642_s9 = inlined_call_operand.vmem [shape: f32[8,128], index: 9, kind: output, shape index: {}]  }
   0x1   :  { %v49_v0 = vld [vmem:[%s14633_s1 + $0x8] sm:$0xff]  ;;  %v51_v1 = vld [vmem:[%s14633_s1 + $0x18] sm:$0xff]  ;;  %v48_v2 = vld [vmem:[%s14633_s1] sm:$0xff] }
   0x2   :  { %v8673_v3 = vpack.c.bf16 %v51_v1, %v49_v0  ;;  %v50_v4 = vld [vmem:[%s14633_s1 + $0x10] sm:$0xff]  ;;  %v53_v5 = vld [vmem:[%s14633_s1 + $0x28] sm:$0xff]  ;;  %v55_v6 = vld [vmem:[%s14633_s1 + $0x38] sm:$0xff] }
   0x3   :  { %v8675_v7 = vpack.c.bf16 %v50_v4, %v48_v2  ;;  %v8677_v8 = vpack.c.bf16 %v55_v6, %v53_v5  ;;  %v52_v9 = vld [vmem:[%s14633_s1 + $0x20] sm:$0xff]  ;;  %v54_v10 = vld [vmem:[%s14633_s1 + $0x30] sm:$0xff]  ;;  %v57_v11 = vld [vmem:[%s14633_s1 + $0x48] sm:$0xff] }
   0x4   :  { %8674 = vmatprep.subr.bf16.mxu0 %v8673_v3  ;;  %v59_v12 = vld [vmem:[%s14633_s1 + $0x58] sm:$0xff]  ;;  %v8679_v13 = vpack.c.bf16 %v54_v10, %v52_v9  ;;  %v56_v15 = vld [vmem:[%s14633_s1 + $0x40] sm:$0xff]  ;;  %v58_v16 = vld [vmem:[%s14633_s1 + $0x50] sm:$0xff] }
   0x5   :  { %8676 = vmatpush1.bf16.msra.mxu0 %v8675_v7  ;;  %v8681_v14 = vpack.c.bf16 %v59_v12, %v57_v11  ;;  %v61_v17 = vld [vmem:[%s14633_s1 + $0x68] sm:$0xff]  ;;  %v63_v18 = vld [vmem:[%s14633_s1 + $0x78] sm:$0xff]  ;;  %v8683_v19 = vpack.c.bf16 %v58_v16, %v56_v15  ;;  %v60_v21 = vld [vmem:[%s14633_s1 + $0x60] sm:$0xff] }
   0x6   :  { %8678 = vmatprep.subr.bf16.mxu0 %v8677_v8  ;;  %v8685_v20 = vpack.c.bf16 %v63_v18, %v61_v17  ;;  %v62_v22 = vld [vmem:[%s14633_s1 + $0x70] sm:$0xff]  ;;  %v65_v23 = vld [vmem:[%s14633_s1 + $0x88] sm:$0xff]  ;;  %v67_v24 = vld [vmem:[%s14633_s1 + $0x98] sm:$0xff] }
   0x7   :  { %v8687_v25 = vpack.c.bf16 %v62_v22, %v60_v21  ;;  %v8689_v26 = vpack.c.bf16 %v67_v24, %v65_v23  ;;  %v64_v27 = vld [vmem:[%s14633_s1 + $0x80] sm:$0xff]  ;;  %v66_v28 = vld [vmem:[%s14633_s1 + $0x90] sm:$0xff]  ;;  %v69_v29 = vld [vmem:[%s14633_s1 + $0xa8] sm:$0xff] }
   0x8   :  { %v71_v30 = vld [vmem:[%s14633_s1 + $0xb8] sm:$0xff]  ;;  %v8691_v31 = vpack.c.bf16 %v66_v28, %v64_v27  ;;  %v68_v33 = vld [vmem:[%s14633_s1 + $0xa0] sm:$0xff]  ;;  %v70_v34 = vld [vmem:[%s14633_s1 + $0xb0] sm:$0xff] }
   0x9   :  { %8680 = vmatpush1.bf16.msra.mxu0 %v8679_v13  ;;  %v8693_v32 = vpack.c.bf16 %v71_v30, %v69_v29  ;;  %v73_v35 = vld [vmem:[%s14633_s1 + $0xc8] sm:$0xff]  ;;  %v75_v36 = vld [vmem:[%s14633_s1 + $0xd8] sm:$0xff]  ;;  %v8695_v37 = vpack.c.bf16 %v70_v34, %v68_v33  ;;  %v72_v39 = vld [vmem:[%s14633_s1 + $0xc0] sm:$0xff] }
   0xa   :  { %8682 = vmatprep.subr.bf16.mxu0 %v8681_v14  ;;  %v8697_v38 = vpack.c.bf16 %v75_v36, %v73_v35  ;;  %v74_v40 = vld [vmem:[%s14633_s1 + $0xd0] sm:$0xff]  ;;  %v9864_v41 = vld [vmem:[%s14634_s0 + $0x8] sm:$0xff]  ;;  %v79_v43 = vld [vmem:[%s14633_s1 + $0xf8] sm:$0xff] }
   0xb   :  { %v77_v42 = vld [vmem:[%s14633_s1 + $0xe8] sm:$0xff]  ;;  %176 = vmatprep.mubr.f32.mxu0 %v9864_v41  ;;  %v8699_v44 = vpack.c.bf16 %v74_v40, %v72_v39  ;;  %v76_v46 = vld [vmem:[%s14633_s1 + $0xe0] sm:$0xff]  ;;  %v78_v47 = vld [vmem:[%s14633_s1 + $0xf0] sm:$0xff] }
   0xc   :  { %v8701_v45 = vpack.c.bf16 %v79_v43, %v77_v42  ;;  %v81_v48 = vld [vmem:[%s14633_s1 + $0x108] sm:$0xff]  ;;  %v83_v49 = vld [vmem:[%s14633_s1 + $0x118] sm:$0xff]  ;;  %v8703_v50 = vpack.c.bf16 %v78_v47, %v76_v46  ;;  %v80_v52 = vld [vmem:[%s14633_s1 + $0x100] sm:$0xff] }
   0xd   :  { %8684 = vmatpush1.bf16.msra.mxu0 %v8683_v19  ;;  %v8705_v51 = vpack.c.bf16 %v83_v49, %v81_v48  ;;  %v82_v53 = vld [vmem:[%s14633_s1 + $0x110] sm:$0xff]  ;;  %v85_v54 = vld [vmem:[%s14633_s1 + $0x128] sm:$0xff]  ;;  %v87_v55 = vld [vmem:[%s14633_s1 + $0x138] sm:$0xff] }
   0xe   :  { %8686 = vmatprep.subr.bf16.mxu0 %v8685_v20  ;;  %v8707_v56 = vpack.c.bf16 %v82_v53, %v80_v52  ;;  %v8709_v57 = vpack.c.bf16 %v87_v55, %v85_v54  ;;  %v84_v58 = vld [vmem:[%s14633_s1 + $0x120] sm:$0xff]  ;;  %v86_v59 = vld [vmem:[%s14633_s1 + $0x130] sm:$0xff]  ;;  %v89_v60 = vld [vmem:[%s14633_s1 + $0x148] sm:$0xff] }
   0xf   :  { %v91_v61 = vld [vmem:[%s14633_s1 + $0x158] sm:$0xff]  ;;  %v8711_v62 = vpack.c.bf16 %v86_v59, %v84_v58  ;;  %v88_v0 = vld [vmem:[%s14633_s1 + $0x140] sm:$0xff]  ;;  %v90_v1 = vld [vmem:[%s14633_s1 + $0x150] sm:$0xff] }
  0x10   :  { %v8713_v63 = vpack.c.bf16 %v91_v61, %v89_v60  ;;  %v93_v2 = vld [vmem:[%s14633_s1 + $0x168] sm:$0xff]  ;;  %v95_v3 = vld [vmem:[%s14633_s1 + $0x178] sm:$0xff]  ;;  %v8715_v4 = vpack.c.bf16 %v90_v1, %v88_v0  ;;  %v92_v6 = vld [vmem:[%s14633_s1 + $0x160] sm:$0xff] }
  0x11   :  { %8688 = vmatpush1.bf16.msra.mxu0 %v8687_v25  ;;  %v8717_v5 = vpack.c.bf16 %v95_v3, %v93_v2  ;;  %v94_v7 = vld [vmem:[%s14633_s1 + $0x170] sm:$0xff]  ;;  %v97_v8 = vld [vmem:[%s14633_s1 + $0x188] sm:$0xff]  ;;  %v99_v9 = vld [vmem:[%s14633_s1 + $0x198] sm:$0xff] }
  0x12   :  { %8690 = vmatprep.subr.bf16.mxu0 %v8689_v26  ;;  %v8719_v10 = vpack.c.bf16 %v94_v7, %v92_v6  ;;  %v8721_v11 = vpack.c.bf16 %v99_v9, %v97_v8  ;;  %v96_v12 = vld [vmem:[%s14633_s1 + $0x180] sm:$0xff]  ;;  %v98_v13 = vld [vmem:[%s14633_s1 + $0x190] sm:$0xff]  ;;  %v101_v14 = vld [vmem:[%s14633_s1 + $0x1a8] sm:$0xff] }
  0x13   :  { %v103_v15 = vld [vmem:[%s14633_s1 + $0x1b8] sm:$0xff]  ;;  %v8723_v16 = vpack.c.bf16 %v98_v13, %v96_v12  ;;  %v100_v18 = vld [vmem:[%s14633_s1 + $0x1a0] sm:$0xff]  ;;  %v102_v19 = vld [vmem:[%s14633_s1 + $0x1b0] sm:$0xff] }
  0x14   :  { %v8725_v17 = vpack.c.bf16 %v103_v15, %v101_v14  ;;  %v105_v20 = vld [vmem:[%s14633_s1 + $0x1c8] sm:$0xff]  ;;  %v107_v21 = vld [vmem:[%s14633_s1 + $0x1d8] sm:$0xff]  ;;  %v8727_v22 = vpack.c.bf16 %v102_v19, %v100_v18  ;;  %v104_v24 = vld [vmem:[%s14633_s1 + $0x1c0] sm:$0xff] }
  0x15   :  { %8692 = vmatpush1.bf16.msra.mxu0 %v8691_v31  ;;  %v8729_v23 = vpack.c.bf16 %v107_v21, %v105_v20  ;;  %v106_v25 = vld [vmem:[%s14633_s1 + $0x1d0] sm:$0xff]  ;;  %v109_v26 = vld [vmem:[%s14633_s1 + $0x1e8] sm:$0xff]  ;;  %v111_v27 = vld [vmem:[%s14633_s1 + $0x1f8] sm:$0xff] }
  0x16   :  { %8694 = vmatprep.subr.bf16.mxu0 %v8693_v32  ;;  %v8731_v28 = vpack.c.bf16 %v106_v25, %v104_v24  ;;  %v8733_v29 = vpack.c.bf16 %v111_v27, %v109_v26  ;;  %v108_v30 = vld [vmem:[%s14633_s1 + $0x1e0] sm:$0xff]  ;;  %v110_v31 = vld [vmem:[%s14633_s1 + $0x1f0] sm:$0xff]  ;;  %v234_v32 = vld [vmem:[%s14633_s1 + $0x208] sm:$0xff] }
  0x17   :  { %v236_v33 = vld [vmem:[%s14633_s1 + $0x218] sm:$0xff]  ;;  %v8735_v34 = vpack.c.bf16 %v110_v31, %v108_v30  ;;  %v233_v36 = vld [vmem:[%s14633_s1 + $0x200] sm:$0xff]  ;;  %v239_v46 = vld [vmem:[%s14633_s1 + $0x230] sm:$0xff] }
  0x18   :  { %v8737_v35 = vpack.c.bf16 %v236_v33, %v234_v32  ;;  %v240_v39 = vld [vmem:[%s14633_s1 + $0x238] sm:$0xff]  ;;  %v9996_v40 = vld [vmem:[%s14634_s0] sm:$0xff]  ;;  %v242_v47 = vld [vmem:[%s14633_s1 + $0x248] sm:$0xff] }
  0x19   :  { %8696 = vmatpush1.bf16.msra.mxu0 %v8695_v37  ;;  %v235_v37 = vld [vmem:[%s14633_s1 + $0x210] sm:$0xff]  ;;  %v10001_v43 = vld [vmem:[%s14634_s0 + $0x18] sm:$0xff]  ;;  %v241_v53 = vld [vmem:[%s14633_s1 + $0x240] sm:$0xff] }
  0x1a   :  { %8698 = vmatprep.subr.bf16.mxu0 %v8697_v38  ;;  %v238_v38 = vld [vmem:[%s14633_s1 + $0x228] sm:$0xff]  ;;  %v8739_v42 = vpack.c.bf16 %v235_v37, %v233_v36  ;;  %v244_v48 = vld [vmem:[%s14633_s1 + $0x258] sm:$0xff]  ;;  %v10020_v49 = vld [vmem:[%s14634_s0 + $0x10] sm:$0xff] }
  0x1b   :  { %v8745_v52 = vpack.c.bf16 %v244_v48, %v242_v47  ;;  %v243_v54 = vld [vmem:[%s14633_s1 + $0x250] sm:$0xff]  ;;  %v246_v55 = vld [vmem:[%s14633_s1 + $0x268] sm:$0xff]  ;;  %v10049_v59 = vld [vmem:[%s14634_s0 + $0x38] sm:$0xff] }
  0x1c   :  { %v8747_v58 = vpack.c.bf16 %v243_v54, %v241_v53  ;;  %v245_v61 = vld [vmem:[%s14633_s1 + $0x260] sm:$0xff]  ;;  %v252_v0 = vld [vmem:[%s14633_s1 + $0x298] sm:$0xff]  ;;  %v10068_v1 = vld [vmem:[%s14634_s0 + $0x30] sm:$0xff] }
  0x1d   :  { %8700 = vmatpush1.bf16.msra.mxu0 %v8699_v44  ;;  %v8741_v44 = vpack.c.bf16 %v240_v39, %v238_v38  ;;  %v10073_v3 = vld [vmem:[%s14634_s0 + $0x48] sm:$0xff]  ;;  %v251_v6 = vld [vmem:[%s14633_s1 + $0x290] sm:$0xff]  ;;  %v256_v8 = vld [vmem:[%s14633_s1 + $0x2b8] sm:$0xff] }
  0x1e   :  { %8702 = vmatprep.subr.bf16.mxu0 %v8701_v45  ;;  %v237_v45 = vld [vmem:[%s14633_s1 + $0x220] sm:$0xff]  ;;  %v254_v7 = vld [vmem:[%s14633_s1 + $0x2a8] sm:$0xff]  ;;  %v255_v13 = vld [vmem:[%s14633_s1 + $0x2b0] sm:$0xff] }
  0x1f   :  { %v10092_v9 = vld [vmem:[%s14634_s0 + $0x40] sm:$0xff]  ;;  %v10103_v14 = vld [vmem:[%s14634_s0 + $0x58] sm:$0xff]  ;;  %v258_v15 = vld [vmem:[%s14633_s1 + $0x2c8] sm:$0xff] }
  0x20   :  { %v253_v12 = vld [vmem:[%s14633_s1 + $0x2a0] sm:$0xff]  ;;  %v10116_v18 = vld [vmem:[%s14634_s0 + $0x50] sm:$0xff]  ;;  %v264_v24 = vld [vmem:[%s14633_s1 + $0x2f8] sm:$0xff] }
  0x21   :  { %8704 = vmatpush1.bf16.msra.mxu0 %v8703_v50  ;;  %v8743_v50 = vpack.c.bf16 %v239_v46, %v237_v45  ;;  %v257_v20 = vld [vmem:[%s14633_s1 + $0x2c0] sm:$0xff]  ;;  %v259_v21 = vld [vmem:[%s14633_s1 + $0x2d0] sm:$0xff]  ;;  %v266_v30 = vld [vmem:[%s14633_s1 + $0x308] sm:$0xff] }
  0x22   :  { %8706 = vmatprep.subr.bf16.mxu0 %v8705_v51  ;;  %v10025_v51 = vld [vmem:[%s14634_s0 + $0x28] sm:$0xff]  ;;  %v8763_v25 = vpack.c.bf16 %v259_v21, %v257_v20  ;;  %v44_v26 = vld [vmem:[%s14634_s0 + $0x60] sm:$0xff]  ;;  %v268_v31 = vld [vmem:[%s14633_s1 + $0x318] sm:$0xff] }
  0x23   :  { %v8769_v33 = vpack.c.bf16 %v268_v31, %v266_v30  ;;  %v270_v36 = vld [vmem:[%s14633_s1 + $0x328] sm:$0xff]  ;;  %v272_v37 = vld [vmem:[%s14633_s1 + $0x338] sm:$0xff]  ;;  %v269_v39 = vld [vmem:[%s14633_s1 + $0x320] sm:$0xff] }
  0x24   :  { %v8773_v38 = vpack.c.bf16 %v272_v37, %v270_v36  ;;  %v276_v45 = vld [vmem:[%s14633_s1 + $0x358] sm:$0xff]  ;;  %v273_v48 = vld [vmem:[%s14633_s1 + $0x340] sm:$0xff]  ;;  %v412_v30 = vld [vmem:[%s14633_s1 + $0x410] sm:$0xff] }
  0x25   :  { %8708 = vmatpush1.bf16.msra.mxu0 %v8707_v56  ;;  %v248_v56 = vld [vmem:[%s14633_s1 + $0x278] sm:$0xff]  ;;  %v415_v31 = vld [vmem:[%s14633_s1 + $0x428] sm:$0xff]  ;;  %v416_v36 = vld [vmem:[%s14633_s1 + $0x430] sm:$0xff] }
  0x26   :  { %8710 = vmatprep.subr.bf16.mxu0 %v8709_v57  ;;  %v10044_v57 = vld [vmem:[%s14634_s0 + $0x20] sm:$0xff]  ;;  %v8749_v60 = vpack.c.bf16 %v248_v56, %v246_v55  ;;  %v280_v53 = vld [vmem:[%s14633_s1 + $0x378] sm:$0xff]  ;;  %v419_v37 = vld [vmem:[%s14633_s1 + $0x448] sm:$0xff] }
  0x27   :  { %v277_v56 = vld [vmem:[%s14633_s1 + $0x360] sm:$0xff]  ;;  %v296_v20 = vld [vmem:[%s14633_s1 + $0x3f8] sm:$0xff] }
  0x29   :  { %8712 = vmatpush1.bf16.msra.mxu0 %v8711_v62  ;;  %v247_v62 = vld [vmem:[%s14633_s1 + $0x270] sm:$0xff] }
  0x2a   :  { %8714 = vmatprep.subr.bf16.mxu0 %v8713_v63  ;;  %v250_v63 = vld [vmem:[%s14633_s1 + $0x288] sm:$0xff]  ;;  %v8751_v2 = vpack.c.bf16 %v247_v62, %v245_v61  ;;  %v284_v61 = vld [vmem:[%s14633_s1 + $0x398] sm:$0xff] }
  0x2d   :  { %8716 = vmatpush1.bf16.msra.mxu0 %v8715_v4  ;;  %v8753_v4 = vpack.c.bf16 %v252_v0, %v250_v63  ;;  %v281_v0 = vld [vmem:[%s14633_s1 + $0x380] sm:$0xff] }
  0x2e   :  { %8718 = vmatprep.subr.bf16.mxu0 %v8717_v5  ;;  %v249_v5 = vld [vmem:[%s14633_s1 + $0x280] sm:$0xff] }
  0x31   :  { %8720 = vmatpush1.bf16.msra.mxu0 %v8719_v10  ;;  %v8755_v10 = vpack.c.bf16 %v251_v6, %v249_v5  ;;  %v288_v5 = vld [vmem:[%s14633_s1 + $0x3b8] sm:$0xff] }
  0x32   :  { %8722 = vmatprep.subr.bf16.mxu0 %v8721_v11  ;;  %v8757_v11 = vpack.c.bf16 %v256_v8, %v254_v7  ;;  %v285_v8 = vld [vmem:[%s14633_s1 + $0x3a0] sm:$0xff] }
  0x35   :  { %8724 = vmatpush1.bf16.msra.mxu0 %v8723_v16  ;;  %v260_v16 = vld [vmem:[%s14633_s1 + $0x2d8] sm:$0xff] }
  0x36   :  { %8726 = vmatprep.subr.bf16.mxu0 %v8725_v17  ;;  %v8759_v17 = vpack.c.bf16 %v255_v13, %v253_v12  ;;  %v8761_v19 = vpack.c.bf16 %v260_v16, %v258_v15  ;;  %v292_v12 = vld [vmem:[%s14633_s1 + $0x3d8] sm:$0xff]  ;;  %v289_v16 = vld [vmem:[%s14633_s1 + $0x3c0] sm:$0xff] }
  0x39   :  { %8728 = vmatpush1.bf16.msra.mxu0 %v8727_v22  ;;  %v45_v22 = vld [vmem:[%s14634_s0 + $0x68] sm:$0xff] }
  0x3a   :  { %8730 = vmatprep.subr.bf16.mxu0 %v8729_v23  ;;  %v262_v23 = vld [vmem:[%s14633_s1 + $0x2e8] sm:$0xff] }
  0x3b   :  { %v8765_v27 = vpack.c.bf16 %v264_v24, %v262_v23  ;;  %v293_v23 = vld [vmem:[%s14633_s1 + $0x3e0] sm:$0xff]  ;;  %v295_v24 = vld [vmem:[%s14633_s1 + $0x3f0] sm:$0xff] }
  0x3d   :  { %8732 = vmatpush1.bf16.msra.mxu0 %v8731_v28  ;;  %v261_v28 = vld [vmem:[%s14633_s1 + $0x2e0] sm:$0xff] }
  0x3e   :  { %8734 = vmatprep.subr.bf16.mxu0 %v8733_v29  ;;  %v263_v29 = vld [vmem:[%s14633_s1 + $0x2f0] sm:$0xff] }
  0x3f   :  { %v8767_v32 = vpack.c.bf16 %v263_v29, %v261_v28  ;;  %v410_v29 = vld [vmem:[%s14633_s1 + $0x400] sm:$0xff] }
  0x41   :  { %8736 = vmatpush1.bf16.msra.mxu0 %v8735_v34  ;;  %v265_v34 = vld [vmem:[%s14633_s1 + $0x300] sm:$0xff] }
  0x42   :  { %8738 = vmatprep.subr.bf16.mxu0 %v8737_v35  ;;  %v267_v35 = vld [vmem:[%s14633_s1 + $0x310] sm:$0xff] }
  0x44   :  { %177 = vmatmul.mubr.f32.vlgmr.msra.gmra.mrb[0].mxu0 %v9996_v40 }
  0x45   :  { %8740 = vmatpush1.bf16.msra.mxu0 %v8739_v42  ;;  %182 = vmatprep.mubr.f32.mxu0 %v10001_v43  ;;  %v271_v42 = vld [vmem:[%s14633_s1 + $0x330] sm:$0xff] }
  0x46   :  { %8742 = vmatprep.subr.bf16.mxu0 %v8741_v44  ;;  %v274_v44 = vld [vmem:[%s14633_s1 + $0x348] sm:$0xff]  ;;  %v8775_v46 = vpack.c.bf16 %v271_v42, %v269_v39  ;;  %v418_v42 = vld [vmem:[%s14633_s1 + $0x440] sm:$0xff] }
  0x47   :  { %v8777_v47 = vpack.c.bf16 %v276_v45, %v274_v44  ;;  %v420_v44 = vld [vmem:[%s14633_s1 + $0x450] sm:$0xff]  ;;  %v423_v45 = vld [vmem:[%s14633_s1 + $0x468] sm:$0xff] }
  0x48   :  { %183 = vmatmul.mubr.f32.gmra.mrb[2].mxu0 %v10020_v49 }
  0x49   :  { %8744 = vmatpush1.bf16.msra.mxu0 %v8743_v50  ;;  %188 = vmatprep.mubr.f32.mxu0 %v10025_v51  ;;  %v275_v50 = vld [vmem:[%s14633_s1 + $0x350] sm:$0xff] }
  0x4a   :  { %8746 = vmatprep.subr.bf16.mxu0 %v8745_v52  ;;  %v278_v52 = vld [vmem:[%s14633_s1 + $0x368] sm:$0xff]  ;;  %v8779_v54 = vpack.c.bf16 %v275_v50, %v273_v48  ;;  %v422_v50 = vld [vmem:[%s14633_s1 + $0x460] sm:$0xff] }
  0x4b   :  { %v8781_v55 = vpack.c.bf16 %v280_v53, %v278_v52  ;;  %v424_v52 = vld [vmem:[%s14633_s1 + $0x470] sm:$0xff]  ;;  %v427_v53 = vld [vmem:[%s14633_s1 + $0x488] sm:$0xff] }
  0x4c   :  { %189 = vmatmul.mubr.f32.gmra.mrb[4].mxu0 %v10044_v57 }
  0x4d   :  { %8748 = vmatpush1.bf16.msra.mxu0 %v8747_v58  ;;  %194 = vmatprep.mubr.f32.mxu0 %v10049_v59  ;;  %v279_v58 = vld [vmem:[%s14633_s1 + $0x370] sm:$0xff] }
  0x4e   :  { %8750 = vmatprep.subr.bf16.mxu0 %v8749_v60  ;;  %v282_v60 = vld [vmem:[%s14633_s1 + $0x388] sm:$0xff]  ;;  %v8783_v62 = vpack.c.bf16 %v279_v58, %v277_v56  ;;  %v426_v58 = vld [vmem:[%s14633_s1 + $0x480] sm:$0xff] }
  0x4f   :  { %v8785_v63 = vpack.c.bf16 %v284_v61, %v282_v60  ;;  %v428_v60 = vld [vmem:[%s14633_s1 + $0x490] sm:$0xff]  ;;  %v431_v61 = vld [vmem:[%s14633_s1 + $0x4a8] sm:$0xff] }
  0x50   :  { %195 = vmatmul.mubr.f32.gmra.mrb[6].mxu0 %v10068_v1 }
  0x51   :  { %8752 = vmatpush1.bf16.msra.mxu0 %v8751_v2  ;;  %200 = vmatprep.mubr.f32.mxu0 %v10073_v3  ;;  %v283_v2 = vld [vmem:[%s14633_s1 + $0x390] sm:$0xff] }
  0x52   :  { %8754 = vmatprep.subr.bf16.mxu0 %v8753_v4  ;;  %v286_v4 = vld [vmem:[%s14633_s1 + $0x3a8] sm:$0xff]  ;;  %v8787_v6 = vpack.c.bf16 %v283_v2, %v281_v0  ;;  %v430_v2 = vld [vmem:[%s14633_s1 + $0x4a0] sm:$0xff] }
  0x53   :  { %v8789_v7 = vpack.c.bf16 %v288_v5, %v286_v4  ;;  %v432_v4 = vld [vmem:[%s14633_s1 + $0x4b0] sm:$0xff]  ;;  %v435_v5 = vld [vmem:[%s14633_s1 + $0x4c8] sm:$0xff] }
  0x54   :  { %201 = vmatmul.mubr.f32.gmra.mrb[8].mxu0 %v10092_v9 }
  0x55   :  { %8756 = vmatpush1.bf16.msra.mxu0 %v8755_v10  ;;  %206 = vmatprep.mubr.f32.mxu0 %v10103_v14  ;;  %v287_v10 = vld [vmem:[%s14633_s1 + $0x3b0] sm:$0xff] }
  0x56   :  { %8758 = vmatprep.subr.bf16.mxu0 %v8757_v11  ;;  %v290_v11 = vld [vmem:[%s14633_s1 + $0x3c8] sm:$0xff]  ;;  %v8791_v13 = vpack.c.bf16 %v287_v10, %v285_v8  ;;  %v434_v10 = vld [vmem:[%s14633_s1 + $0x4c0] sm:$0xff] }
  0x57   :  { %v8793_v15 = vpack.c.bf16 %v292_v12, %v290_v11  ;;  %v436_v11 = vld [vmem:[%s14633_s1 + $0x4d0] sm:$0xff]  ;;  %v439_v12 = vld [vmem:[%s14633_s1 + $0x4e8] sm:$0xff] }
  0x58   :  { %207 = vmatmul.mubr.f32.gmra.mrb[10].mxu0 %v10116_v18 }
  0x59   :  { %8760 = vmatpush1.bf16.msra.mxu0 %v8759_v17  ;;  %212 = vmatprep.mubr.f32.mxu0 %v45_v22  ;;  %v291_v17 = vld [vmem:[%s14633_s1 + $0x3d0] sm:$0xff] }
  0x5a   :  { %8762 = vmatprep.subr.bf16.mxu0 %v8761_v19  ;;  %v294_v19 = vld [vmem:[%s14633_s1 + $0x3e8] sm:$0xff]  ;;  %v8795_v21 = vpack.c.bf16 %v291_v17, %v289_v16  ;;  %v438_v17 = vld [vmem:[%s14633_s1 + $0x4e0] sm:$0xff] }
  0x5b   :  { %v8797_v22 = vpack.c.bf16 %v296_v20, %v294_v19  ;;  %v440_v19 = vld [vmem:[%s14633_s1 + $0x4f0] sm:$0xff]  ;;  %v443_v20 = vld [vmem:[%s14633_s1 + $0x508] sm:$0xff] }
  0x5c   :  { %213 = vmatmul.mubr.f32.gmra.mrb[12].mxu0 %v44_v26  ;;  %v413_v26 = vld [vmem:[%s14633_s1 + $0x418] sm:$0xff] }
  0x5d   :  { %8764 = vmatpush1.bf16.msra.mxu0 %v8763_v25  ;;  %361 = vmatprep.mubr.f32.mxu0 %v9864_v41  ;;  %v8771_v41 = vpack.c.bf16 %v267_v35, %v265_v34  ;;  %v411_v25 = vld [vmem:[%s14633_s1 + $0x408] sm:$0xff]  ;;  %v414_v35 = vld [vmem:[%s14633_s1 + $0x420] sm:$0xff] }
  0x5e   :  { %8766 = vmatprep.subr.bf16.mxu0 %v8765_v27  ;;  %v8799_v27 = vpack.c.bf16 %v295_v24, %v293_v23  ;;  %v8801_v28 = vpack.c.bf16 %v413_v26, %v411_v25  ;;  %v442_v24 = vld [vmem:[%s14633_s1 + $0x500] sm:$0xff]  ;;  %v444_v25 = vld [vmem:[%s14633_s1 + $0x510] sm:$0xff]  ;;  %v447_v26 = vld [vmem:[%s14633_s1 + $0x528] sm:$0xff] }
  0x61   :  { %8768 = vmatpush1.bf16.msra.mxu0 %v8767_v32  ;;  %v417_v32 = vld [vmem:[%s14633_s1 + $0x438] sm:$0xff] }
  0x62   :  { %8770 = vmatprep.subr.bf16.mxu0 %v8769_v33  ;;  %v8803_v33 = vpack.c.bf16 %v412_v30, %v410_v29  ;;  %v8805_v34 = vpack.c.bf16 %v417_v32, %v415_v31  ;;  %v446_v30 = vld [vmem:[%s14633_s1 + $0x520] sm:$0xff]  ;;  %v448_v31 = vld [vmem:[%s14633_s1 + $0x530] sm:$0xff]  ;;  %v451_v32 = vld [vmem:[%s14633_s1 + $0x548] sm:$0xff] }
  0x65   :  { %8772 = vmatpush1.bf16.msra.mxu0 %v8771_v41  ;;  %v421_v41 = vld [vmem:[%s14633_s1 + $0x458] sm:$0xff] }
  0x66   :  { %8774 = vmatprep.subr.bf16.mxu0 %v8773_v38  ;;  %v8807_v38 = vpack.c.bf16 %v416_v36, %v414_v35  ;;  %v8809_v39 = vpack.c.bf16 %v421_v41, %v419_v37  ;;  %v450_v36 = vld [vmem:[%s14633_s1 + $0x540] sm:$0xff]  ;;  %v452_v37 = vld [vmem:[%s14633_s1 + $0x550] sm:$0xff]  ;;  %v455_v41 = vld [vmem:[%s14633_s1 + $0x568] sm:$0xff] }
  0x69   :  { %8776 = vmatpush1.bf16.msra.mxu0 %v8775_v46  ;;  %v425_v46 = vld [vmem:[%s14633_s1 + $0x478] sm:$0xff] }
  0x6a   :  { %8778 = vmatprep.subr.bf16.mxu0 %v8777_v47  ;;  %v8811_v47 = vpack.c.bf16 %v420_v44, %v418_v42  ;;  %v8813_v48 = vpack.c.bf16 %v425_v46, %v423_v45  ;;  %v454_v44 = vld [vmem:[%s14633_s1 + $0x560] sm:$0xff]  ;;  %v456_v45 = vld [vmem:[%s14633_s1 + $0x570] sm:$0xff]  ;;  %v459_v46 = vld [vmem:[%s14633_s1 + $0x588] sm:$0xff] }
  0x6d   :  { %8780 = vmatpush1.bf16.msra.mxu0 %v8779_v54  ;;  %v429_v54 = vld [vmem:[%s14633_s1 + $0x498] sm:$0xff] }
  0x6e   :  { %8782 = vmatprep.subr.bf16.mxu0 %v8781_v55  ;;  %v8815_v55 = vpack.c.bf16 %v424_v52, %v422_v50  ;;  %v8817_v56 = vpack.c.bf16 %v429_v54, %v427_v53  ;;  %v458_v52 = vld [vmem:[%s14633_s1 + $0x580] sm:$0xff]  ;;  %v460_v53 = vld [vmem:[%s14633_s1 + $0x590] sm:$0xff]  ;;  %v463_v54 = vld [vmem:[%s14633_s1 + $0x5a8] sm:$0xff] }
  0x71   :  { %8784 = vmatpush1.bf16.msra.mxu0 %v8783_v62  ;;  %v433_v62 = vld [vmem:[%s14633_s1 + $0x4b8] sm:$0xff] }
  0x72   :  { %8786 = vmatprep.subr.bf16.mxu0 %v8785_v63  ;;  %v8819_v63 = vpack.c.bf16 %v428_v60, %v426_v58  ;;  %v8821_v0 = vpack.c.bf16 %v433_v62, %v431_v61  ;;  %v462_v60 = vld [vmem:[%s14633_s1 + $0x5a0] sm:$0xff]  ;;  %v464_v61 = vld [vmem:[%s14633_s1 + $0x5b0] sm:$0xff]  ;;  %v467_v62 = vld [vmem:[%s14633_s1 + $0x5c8] sm:$0xff] }
  0x75   :  { %8788 = vmatpush1.bf16.msra.mxu0 %v8787_v6  ;;  %v437_v6 = vld [vmem:[%s14633_s1 + $0x4d8] sm:$0xff] }
  0x76   :  { %8790 = vmatprep.subr.bf16.mxu0 %v8789_v7  ;;  %v8823_v7 = vpack.c.bf16 %v432_v4, %v430_v2  ;;  %v8825_v8 = vpack.c.bf16 %v437_v6, %v435_v5  ;;  %v466_v4 = vld [vmem:[%s14633_s1 + $0x5c0] sm:$0xff]  ;;  %v468_v5 = vld [vmem:[%s14633_s1 + $0x5d0] sm:$0xff]  ;;  %v471_v6 = vld [vmem:[%s14633_s1 + $0x5e8] sm:$0xff] }
  0x79   :  { %8792 = vmatpush1.bf16.msra.mxu0 %v8791_v13  ;;  %v441_v13 = vld [vmem:[%s14633_s1 + $0x4f8] sm:$0xff] }
  0x7a   :  { %8794 = vmatprep.subr.bf16.mxu0 %v8793_v15  ;;  %v8827_v15 = vpack.c.bf16 %v436_v11, %v434_v10  ;;  %v8829_v16 = vpack.c.bf16 %v441_v13, %v439_v12  ;;  %v470_v11 = vld [vmem:[%s14633_s1 + $0x5e0] sm:$0xff]  ;;  %v472_v12 = vld [vmem:[%s14633_s1 + $0x5f0] sm:$0xff] }
  0x7b   :  { %v8863_v13 = vpack.c.bf16 %v472_v12, %v470_v11  ;;  %v9069_v11 = vld [vmem:[%s14635_s2 + $0x204] ss:$16 sps:$4 sm:$0xff]   ;;  %v9070_v12 = vld [vmem:[%s14635_s2 + $0x220] ss:$16 sps:$4 sm:$0xff]  }
  0x7d   :  { %8796 = vmatpush1.bf16.msra.mxu0 %v8795_v21  ;;  %v445_v21 = vld [vmem:[%s14633_s1 + $0x518] sm:$0xff] }
  0x7e   :  { %8798 = vmatprep.subr.bf16.mxu0 %v8797_v22  ;;  %v8831_v22 = vpack.c.bf16 %v440_v19, %v438_v17  ;;  %v8833_v23 = vpack.c.bf16 %v445_v21, %v443_v20  ;;  %v9022_v17 = vld [vmem:[%s14635_s2 + $0x24] ss:$16 sps:$4 sm:$0xff]   ;;  %v9024_v19 = vld [vmem:[%s14635_s2 + $0x20] ss:$16 sps:$4 sm:$0xff]  }
  0x7f   :  { %v9025_v20 = vld [vmem:[%s14635_s2 + $0x44] ss:$16 sps:$4 sm:$0xff]   ;;  %v9027_v21 = vld [vmem:[%s14635_s2 + $0x40] ss:$16 sps:$4 sm:$0xff]  }
  0x81   :  { %8800 = vmatpush1.bf16.msra.mxu0 %v8799_v27  ;;  %v449_v27 = vld [vmem:[%s14633_s1 + $0x538] sm:$0xff] }
  0x82   :  { %8802 = vmatprep.subr.bf16.mxu0 %v8801_v28  ;;  %v8835_v28 = vpack.c.bf16 %v444_v25, %v442_v24  ;;  %v8837_v29 = vpack.c.bf16 %v449_v27, %v447_v26  ;;  %v9031_v24 = vld [vmem:[%s14635_s2 + $0x84] ss:$16 sps:$4 sm:$0xff]   ;;  %v9033_v25 = vld [vmem:[%s14635_s2 + $0x80] ss:$16 sps:$4 sm:$0xff]  }
  0x83   :  { %v9034_v26 = vld [vmem:[%s14635_s2 + $0xa4] ss:$16 sps:$4 sm:$0xff]   ;;  %v9036_v27 = vld [vmem:[%s14635_s2 + $0xa0] ss:$16 sps:$4 sm:$0xff]  }
  0x84   :  { %362 = vmatmul.mubr.f32.vlgmr.msra.gmra.mrb[14].mxu0 %v9996_v40 }
  0x85   :  { %8804 = vmatpush1.bf16.msra.mxu0 %v8803_v33  ;;  %v453_v33 = vld [vmem:[%s14633_s1 + $0x558] sm:$0xff] }
  0x86   :  { %8806 = vmatprep.subr.bf16.mxu0 %v8805_v34  ;;  %v8839_v34 = vpack.c.bf16 %v448_v31, %v446_v30  ;;  %v8841_v35 = vpack.c.bf16 %v453_v33, %v451_v32  ;;  %v9040_v30 = vld [vmem:[%s14635_s2 + $0xe4] ss:$16 sps:$4 sm:$0xff]   ;;  %v9042_v31 = vld [vmem:[%s14635_s2 + $0xe0] ss:$16 sps:$4 sm:$0xff]  }
  0x87   :  { %v9043_v32 = vld [vmem:[%s14635_s2 + $0x104] ss:$16 sps:$4 sm:$0xff]   ;;  %v9045_v33 = vld [vmem:[%s14635_s2 + $0x100] ss:$16 sps:$4 sm:$0xff]  }
  0x89   :  { %8808 = vmatpush1.bf16.msra.mxu0 %v8807_v38  ;;  %v457_v38 = vld [vmem:[%s14633_s1 + $0x578] sm:$0xff] }
  0x8a   :  { %8810 = vmatprep.subr.bf16.mxu0 %v8809_v39  ;;  %v8843_v39 = vpack.c.bf16 %v452_v37, %v450_v36  ;;  %v8845_v42 = vpack.c.bf16 %v457_v38, %v455_v41  ;;  %v9049_v36 = vld [vmem:[%s14635_s2 + $0x144] ss:$16 sps:$4 sm:$0xff]   ;;  %v9051_v37 = vld [vmem:[%s14635_s2 + $0x140] ss:$16 sps:$4 sm:$0xff]  }
  0x8b   :  { %v9052_v41 = vld [vmem:[%s14635_s2 + $0x164] ss:$16 sps:$4 sm:$0xff]   ;;  %v9054_v38 = vld [vmem:[%s14635_s2 + $0x160] ss:$16 sps:$4 sm:$0xff]  }
  0x8d   :  { %8812 = vmatpush1.bf16.msra.mxu0 %v8811_v47  ;;  %v461_v47 = vld [vmem:[%s14633_s1 + $0x598] sm:$0xff] }
  0x8e   :  { %8814 = vmatprep.subr.bf16.mxu0 %v8813_v48  ;;  %v8847_v48 = vpack.c.bf16 %v456_v45, %v454_v44  ;;  %v8849_v50 = vpack.c.bf16 %v461_v47, %v459_v46  ;;  %v9058_v44 = vld [vmem:[%s14635_s2 + $0x1a4] ss:$16 sps:$4 sm:$0xff]   ;;  %v9060_v45 = vld [vmem:[%s14635_s2 + $0x1a0] ss:$16 sps:$4 sm:$0xff]  }
  0x8f   :  { %v9061_v46 = vld [vmem:[%s14635_s2 + $0x1c4] ss:$16 sps:$4 sm:$0xff]   ;;  %v9063_v47 = vld [vmem:[%s14635_s2 + $0x1c0] ss:$16 sps:$4 sm:$0xff]  }
  0x91   :  { %8816 = vmatpush1.bf16.msra.mxu0 %v8815_v55  ;;  %v465_v55 = vld [vmem:[%s14633_s1 + $0x5b8] sm:$0xff] }
  0x92   :  { %8818 = vmatprep.subr.bf16.mxu0 %v8817_v56  ;;  %v8851_v56 = vpack.c.bf16 %v460_v53, %v458_v52  ;;  %v8853_v58 = vpack.c.bf16 %v465_v55, %v463_v54  ;;  %v9066_v52 = vld [vmem:[%s14635_s2 + $0x1e0] ss:$16 sps:$4 sm:$0xff]  }
  0x95   :  { %8820 = vmatpush1.bf16.msra.mxu0 %v8819_v63  ;;  %v469_v63 = vld [vmem:[%s14633_s1 + $0x5d8] sm:$0xff] }
  0x96   :  { %8822 = vmatprep.subr.bf16.mxu0 %v8821_v0  ;;  %v8855_v0 = vpack.c.bf16 %v464_v61, %v462_v60  ;;  %v8857_v2 = vpack.c.bf16 %v469_v63, %v467_v62 }
  0x99   :  { %8824 = vmatpush1.bf16.msra.mxu0 %v8823_v7  ;;  %v473_v7 = vld [vmem:[%s14633_s1 + $0x5f8] sm:$0xff] }
  0x9a   :  { %8826 = vmatprep.subr.bf16.mxu0 %v8825_v8  ;;  %v8859_v8 = vpack.c.bf16 %v468_v5, %v466_v4  ;;  %v8861_v10 = vpack.c.bf16 %v473_v7, %v471_v6 }
  0x9d   :  { %8828 = vmatpush1.bf16.msra.mxu0 %v8827_v15  ;;  %v9019_v15 = vld [vmem:[%s14635_s2 + $0x4] ss:$16 sps:$4 sm:$0xff]  }
  0x9e   :  { %8830 = vmatprep.subr.bf16.mxu0 %v8829_v16  ;;  %v9021_v16 = vld [vmem:[%s14635_s2] ss:$16 sps:$4 sm:$0xff]   ;;  %1475 = vmatprep.subr.bf16.mxu1 %v9019_v15 }
  0x9f   :  { %1476 = vmatpush1.bf16.msra.mxu1 %v9021_v16  ;;  %v9073_v15 = vld [vmem:[%s14635_s2 + $0x240] ss:$16 sps:$4 sm:$0xff]   ;;  %v9078_v16 = vld [vmem:[%s14635_s2 + $0x264] ss:$16 sps:$4 sm:$0xff]  }
  0xa0   :  { %1477 = vmatprep.subr.bf16.mxu1 %v9022_v17  ;;  %v9076_v17 = vld [vmem:[%s14635_s2 + $0x260] ss:$16 sps:$4 sm:$0xff]  }
  0xa1   :  { %8832 = vmatpush1.bf16.msra.mxu0 %v8831_v22  ;;  %v9028_v22 = vld [vmem:[%s14635_s2 + $0x64] ss:$16 sps:$4 sm:$0xff]  }
  0xa2   :  { %8834 = vmatprep.subr.bf16.mxu0 %v8833_v23  ;;  %v9030_v23 = vld [vmem:[%s14635_s2 + $0x60] ss:$16 sps:$4 sm:$0xff]  }
  0xa3   :  { %1478 = vmatpush1.bf16.msra.mxu1 %v9024_v19  ;;  %v9081_v19 = vld [vmem:[%s14635_s2 + $0x284] ss:$16 sps:$4 sm:$0xff]  }
  0xa4   :  { %1479 = vmatprep.subr.bf16.mxu1 %v9025_v20  ;;  %v9079_v20 = vld [vmem:[%s14635_s2 + $0x280] ss:$16 sps:$4 sm:$0xff]  }
  0xa5   :  { %8836 = vmatpush1.bf16.msra.mxu0 %v8835_v28  ;;  %v9037_v28 = vld [vmem:[%s14635_s2 + $0xc4] ss:$16 sps:$4 sm:$0xff]  }
  0xa6   :  { %8838 = vmatprep.subr.bf16.mxu0 %v8837_v29  ;;  %v9039_v29 = vld [vmem:[%s14635_s2 + $0xc0] ss:$16 sps:$4 sm:$0xff]  }
  0xa7   :  { %1480 = vmatpush1.bf16.msra.mxu1 %v9027_v21  ;;  %v9084_v21 = vld [vmem:[%s14635_s2 + $0x2a4] ss:$16 sps:$4 sm:$0xff]  }
  0xa8   :  { %1481 = vmatprep.subr.bf16.mxu1 %v9028_v22  ;;  %v9082_v22 = vld [vmem:[%s14635_s2 + $0x2a0] ss:$16 sps:$4 sm:$0xff]  }
  0xa9   :  { %8840 = vmatpush1.bf16.msra.mxu0 %v8839_v34  ;;  %v9046_v34 = vld [vmem:[%s14635_s2 + $0x124] ss:$16 sps:$4 sm:$0xff]  }
  0xaa   :  { %8842 = vmatprep.subr.bf16.mxu0 %v8841_v35  ;;  %v9048_v35 = vld [vmem:[%s14635_s2 + $0x120] ss:$16 sps:$4 sm:$0xff]  }
  0xab   :  { %1482 = vmatpush1.bf16.msra.mxu1 %v9030_v23  ;;  %v9087_v23 = vld [vmem:[%s14635_s2 + $0x2c4] ss:$16 sps:$4 sm:$0xff]  }
  0xac   :  { %1483 = vmatprep.subr.bf16.mxu1 %v9031_v24  ;;  %v9085_v24 = vld [vmem:[%s14635_s2 + $0x2c0] ss:$16 sps:$4 sm:$0xff]  }
  0xad   :  { %8844 = vmatpush1.bf16.msra.mxu0 %v8843_v39  ;;  %v9055_v39 = vld [vmem:[%s14635_s2 + $0x184] ss:$16 sps:$4 sm:$0xff]  }
  0xae   :  { %8846 = vmatprep.subr.bf16.mxu0 %v8845_v42  ;;  %v9057_v42 = vld [vmem:[%s14635_s2 + $0x180] ss:$16 sps:$4 sm:$0xff]  }
  0xaf   :  { %1484 = vmatpush1.bf16.msra.mxu1 %v9033_v25  ;;  %v9090_v25 = vld [vmem:[%s14635_s2 + $0x2e4] ss:$16 sps:$4 sm:$0xff]  }
  0xb0   :  { %1485 = vmatprep.subr.bf16.mxu1 %v9034_v26  ;;  %v9088_v26 = vld [vmem:[%s14635_s2 + $0x2e0] ss:$16 sps:$4 sm:$0xff]  }
  0xb1   :  { %8848 = vmatpush1.bf16.msra.mxu0 %v8847_v48  ;;  %v9064_v48 = vld [vmem:[%s14635_s2 + $0x1e4] ss:$16 sps:$4 sm:$0xff]  }
  0xb2   :  { %8850 = vmatprep.subr.bf16.mxu0 %v8849_v50 }
  0xb3   :  { %1486 = vmatpush1.bf16.msra.mxu1 %v9036_v27  ;;  %v9093_v27 = vld [vmem:[%s14635_s2 + $0x304] ss:$16 sps:$4 sm:$0xff]  }
  0xb4   :  { %1487 = vmatprep.subr.bf16.mxu1 %v9037_v28  ;;  %v9091_v28 = vld [vmem:[%s14635_s2 + $0x300] ss:$16 sps:$4 sm:$0xff]  }
  0xb5   :  { %8852 = vmatpush1.bf16.msra.mxu0 %v8851_v56 }
  0xb6   :  { %8854 = vmatprep.subr.bf16.mxu0 %v8853_v58 }
  0xb7   :  { %1488 = vmatpush1.bf16.msra.mxu1 %v9039_v29  ;;  %v9096_v29 = vld [vmem:[%s14635_s2 + $0x324] ss:$16 sps:$4 sm:$0xff]  }
  0xb8   :  { %1489 = vmatprep.subr.bf16.mxu1 %v9040_v30  ;;  %v9094_v30 = vld [vmem:[%s14635_s2 + $0x320] ss:$16 sps:$4 sm:$0xff]  }
  0xb9   :  { %8856 = vmatpush1.bf16.msra.mxu0 %v8855_v0 }
  0xba   :  { %8858 = vmatprep.subr.bf16.mxu0 %v8857_v2 }
  0xbb   :  { %1490 = vmatpush1.bf16.msra.mxu1 %v9042_v31  ;;  %v9099_v31 = vld [vmem:[%s14635_s2 + $0x344] ss:$16 sps:$4 sm:$0xff]  }
  0xbc   :  { %1491 = vmatprep.subr.bf16.mxu1 %v9043_v32  ;;  %v9097_v32 = vld [vmem:[%s14635_s2 + $0x340] ss:$16 sps:$4 sm:$0xff]  }
  0xbd   :  { %8860 = vmatpush1.bf16.msra.mxu0 %v8859_v8 }
  0xbe   :  { %8862 = vmatprep.subr.bf16.mxu0 %v8861_v10  ;;  %v9067_v10 = vld [vmem:[%s14635_s2 + $0x200] ss:$16 sps:$4 sm:$0xff]  }
  0xbf   :  { %1492 = vmatpush1.bf16.msra.mxu1 %v9045_v33  ;;  %v9102_v33 = vld [vmem:[%s14635_s2 + $0x364] ss:$16 sps:$4 sm:$0xff]  }
  0xc0   :  { %1493 = vmatprep.subr.bf16.mxu1 %v9046_v34  ;;  %v9100_v34 = vld [vmem:[%s14635_s2 + $0x360] ss:$16 sps:$4 sm:$0xff]  }
  0xc1   :  { %8864 = vmatpush1.bf16.msra.mxu0 %v8863_v13  ;;  %v9075_v13 = vld [vmem:[%s14635_s2 + $0x244] ss:$16 sps:$4 sm:$0xff]  }
  0xc3   :  { %1494 = vmatpush1.bf16.msra.mxu1 %v9048_v35  ;;  %v9105_v35 = vld [vmem:[%s14635_s2 + $0x384] ss:$16 sps:$4 sm:$0xff]  }
  0xc4   :  { %1495 = vmatprep.subr.bf16.mxu1 %v9049_v36  ;;  %v9103_v36 = vld [vmem:[%s14635_s2 + $0x380] ss:$16 sps:$4 sm:$0xff]  }
  0xc7   :  { %1496 = vmatpush1.bf16.msra.mxu1 %v9051_v37  ;;  %v9108_v37 = vld [vmem:[%s14635_s2 + $0x3a4] ss:$16 sps:$4 sm:$0xff]  }
  0xc8   :  { %1497 = vmatprep.subr.bf16.mxu1 %v9052_v41  ;;  %v9106_v41 = vld [vmem:[%s14635_s2 + $0x3a0] ss:$16 sps:$4 sm:$0xff]  }
  0xcb   :  { %1498 = vmatpush1.bf16.msra.mxu1 %v9054_v38  ;;  %v9111_v38 = vld [vmem:[%s14635_s2 + $0x3c4] ss:$16 sps:$4 sm:$0xff]  }
  0xcc   :  { %1499 = vmatprep.subr.bf16.mxu1 %v9055_v39  ;;  %v9109_v39 = vld [vmem:[%s14635_s2 + $0x3c0] ss:$16 sps:$4 sm:$0xff]  }
  0xcf   :  { %1500 = vmatpush1.bf16.msra.mxu1 %v9057_v42  ;;  %v9112_v42 = vld [vmem:[%s14635_s2 + $0x3e0] ss:$16 sps:$4 sm:$0xff]  }
  0xd0   :  { %1501 = vmatprep.subr.bf16.mxu1 %v9058_v44  ;;  %v9114_v44 = vld [vmem:[%s14635_s2 + $0x3e4] ss:$16 sps:$4 sm:$0xff]  }
  0xd3   :  { %1502 = vmatpush1.bf16.msra.mxu1 %v9060_v45  ;;  %v9117_v45 = vld [vmem:[%s14635_s2 + $0xc] ss:$16 sps:$4 sm:$0xff]  }
  0xd4   :  { %1503 = vmatprep.subr.bf16.mxu1 %v9061_v46 }
  0xd7   :  { %1504 = vmatpush1.bf16.msra.mxu1 %v9063_v47 }
  0xd8   :  { %1505 = vmatprep.subr.bf16.mxu1 %v9064_v48 }
  0xdb   :  { %1506 = vmatpush1.bf16.msra.mxu1 %v9066_v52 }
  0xdc   :  { %1528 = vmatprep.subr.bf16.mxu1 %v9069_v11  ;;  %v9127_v11 = vld [vmem:[%s14635_s2 + $0x88] ss:$16 sps:$4 sm:$0xff]  }
 0x117   :  { %v178_v50 = vpop.f32.mrb[0].mxu0 }
 0x118   :  { %v180_v53 = vpop.f32.mrb[1].mxu0  ;;  %v10533_v55 = vadd.f32 %v178_v50, %v10020_v49 }
 0x119   :  { %v10530_v54 = vadd.f32 %v180_v53, %v10001_v43 }
 0x11b   :  { %v184_v56 = vpop.f32.mrb[2].mxu0  ;;  %367 = vmatprep.mubr.f32.mxu0 %v10530_v54 }
 0x11c   :  { %v221_v58 = vadd.f32 %v184_v56, %v10044_v57  ;;  %v186_v60 = vpop.f32.mrb[3].mxu0  ;;  %368 = vmatmul.mubr.f32.gmra.mrb[16].mxu0 %v10533_v55 }
 0x11d   :  { %v222_v61 = vadd.f32 %v186_v60, %v10025_v51 }
 0x11f   :  { %v190_v62 = vpop.f32.mrb[4].mxu0  ;;  %373 = vmatprep.mubr.f32.mxu0 %v222_v61 }
 0x120   :  { %v10540_v63 = vadd.f32 %v190_v62, %v10068_v1  ;;  %v192_v43 = vpop.f32.mrb[5].mxu0  ;;  %374 = vmatmul.mubr.f32.gmra.mrb[18].mxu0 %v221_v58  ;;  %v9596_v62 = vld [vmem:[%s14634_s0 + $0x60] sm:$0xff] }
 0x121   :  { %v10543_v49 = vadd.f32 %v192_v43, %v10049_v59 }
 0x123   :  { %v196_v0 = vpop.f32.mrb[6].mxu0  ;;  %379 = vmatprep.mubr.f32.mxu0 %v10543_v49 }
 0x124   :  { %v10547_v57 = vadd.f32 %v196_v0, %v10092_v9  ;;  %v198_v2 = vpop.f32.mrb[7].mxu0  ;;  %380 = vmatmul.mubr.f32.gmra.mrb[20].mxu0 %v10540_v63 }
 0x125   :  { %v10551_v51 = vadd.f32 %v198_v2, %v10073_v3  ;;  %v9595_v3 = vld [vmem:[%s14634_s0 + $0x8] sm:$0xff] }
 0x127   :  { %v202_v4 = vpop.f32.mrb[8].mxu0  ;;  %385 = vmatprep.mubr.f32.mxu0 %v10551_v51 }
 0x128   :  { %v10555_v1 = vadd.f32 %v202_v4, %v10116_v18  ;;  %v204_v59 = vpop.f32.mrb[9].mxu0  ;;  %386 = vmatmul.mubr.f32.gmra.mrb[10].mxu0 %v10547_v57 }
 0x129   :  { %v10559_v5 = vadd.f32 %v204_v59, %v10103_v14 }
 0x12b   :  { %391 = vmatprep.mubr.f32.mxu0 %v10559_v5 }
 0x12c   :  { %392 = vmatmul.mubr.f32.gmra.mrb[12].mxu0 %v10555_v1 }
 0x12d   :  { %538 = vmatprep.mubr.f32.mxu0 %v9595_v3 }
 0x130   :  { %539 = vmatmul.mubr.f32.vlgmr.msra.gmra.mrb[18].mxu0 %v9996_v40 }
 0x131   :  { %544 = vmatprep.mubr.f32.mxu0 %v10530_v54 }
 0x134   :  { %545 = vmatmul.mubr.f32.gmra.mrb[20].mxu0 %v10533_v55 }
 0x157   :  { %v363_v9 = vpop.f32.mrb[14].mxu0 }
 0x158   :  { %v398_v18 = vadd.f32 %v363_v9, %v221_v58  ;;  %v365_v6 = vpop.f32.mrb[15].mxu0  ;;  %v9120_v9 = vld [vmem:[%s14635_s2 + $0x2c] ss:$16 sps:$4 sm:$0xff]  }
 0x159   :  { %v399_v14 = vadd.f32 %v365_v6, %v222_v61  ;;  %v9126_v6 = vld [vmem:[%s14635_s2 + $0x6c] ss:$16 sps:$4 sm:$0xff]  }
 0x15a   :  { %v10570_v7 = vpack.c.bf16 %v398_v18, %v9996_v40  ;;  %v9072_v40 = vld [vmem:[%s14635_s2 + $0x224] ss:$16 sps:$4 sm:$0xff]  }
 0x15b   :  { %550 = vmatprep.mubr.f32.mxu0 %v399_v14  ;;  %v10572_v8 = vpack.c.bf16 %v399_v14, %v9595_v3  ;;  %v9124_v14 = vld [vmem:[%s14635_s2 + $0x68] ss:$16 sps:$4 sm:$0xff]  }
 0x15c   :  { %551 = vmatmul.mubr.f32.gmra.mrb[10].mxu0 %v398_v18  ;;  %v9123_v18 = vld [vmem:[%s14635_s2 + $0x4c] ss:$16 sps:$4 sm:$0xff]  }
 0x15d   :  { %1507 = vmatprep.mubr.bf16.mxu1 %v10572_v8 }
 0x15e   :  { %1508 = vmatmul.mubr.bf16.vlgmr.msra.gmra.mrb[0].mxu1 %v10570_v7 }
 0x15f   :  { %1529 = vmatpush1.bf16.msra.mxu1 %v9067_v10  ;;  %v9129_v10 = vld [vmem:[%s14635_s2 + $0x8c] ss:$16 sps:$4 sm:$0xff]  }
 0x160   :  { %1530 = vmatprep.subr.bf16.mxu1 %v9072_v40  ;;  %v9132_v40 = vld [vmem:[%s14635_s2 + $0xac] ss:$16 sps:$4 sm:$0xff]  }
 0x163   :  { %1531 = vmatpush1.bf16.msra.mxu1 %v9070_v12  ;;  %v9130_v12 = vld [vmem:[%s14635_s2 + $0xa8] ss:$16 sps:$4 sm:$0xff]  }
 0x164   :  { %1532 = vmatprep.subr.bf16.mxu1 %v9075_v13  ;;  %v9135_v13 = vld [vmem:[%s14635_s2 + $0xcc] ss:$16 sps:$4 sm:$0xff]  }
 0x167   :  { %1533 = vmatpush1.bf16.msra.mxu1 %v9073_v15  ;;  %v9133_v15 = vld [vmem:[%s14635_s2 + $0xc8] ss:$16 sps:$4 sm:$0xff]  }
 0x168   :  { %1534 = vmatprep.subr.bf16.mxu1 %v9078_v16  ;;  %v9138_v16 = vld [vmem:[%s14635_s2 + $0xec] ss:$16 sps:$4 sm:$0xff]  }
 0x16b   :  { %1535 = vmatpush1.bf16.msra.mxu1 %v9076_v17  ;;  %v9136_v17 = vld [vmem:[%s14635_s2 + $0xe8] ss:$16 sps:$4 sm:$0xff]  }
 0x16c   :  { %1536 = vmatprep.subr.bf16.mxu1 %v9081_v19  ;;  %v9141_v19 = vld [vmem:[%s14635_s2 + $0x10c] ss:$16 sps:$4 sm:$0xff]  }
 0x16f   :  { %1537 = vmatpush1.bf16.msra.mxu1 %v9079_v20  ;;  %v9139_v20 = vld [vmem:[%s14635_s2 + $0x108] ss:$16 sps:$4 sm:$0xff]  }
 0x170   :  { %1538 = vmatprep.subr.bf16.mxu1 %v9084_v21  ;;  %v9144_v21 = vld [vmem:[%s14635_s2 + $0x12c] ss:$16 sps:$4 sm:$0xff]  }
 0x173   :  { %1539 = vmatpush1.bf16.msra.mxu1 %v9082_v22  ;;  %v9142_v22 = vld [vmem:[%s14635_s2 + $0x128] ss:$16 sps:$4 sm:$0xff]  }
 0x174   :  { %1540 = vmatprep.subr.bf16.mxu1 %v9087_v23  ;;  %v9147_v23 = vld [vmem:[%s14635_s2 + $0x14c] ss:$16 sps:$4 sm:$0xff]  }
 0x177   :  { %1541 = vmatpush1.bf16.msra.mxu1 %v9085_v24  ;;  %v9145_v24 = vld [vmem:[%s14635_s2 + $0x148] ss:$16 sps:$4 sm:$0xff]  }
 0x178   :  { %1542 = vmatprep.subr.bf16.mxu1 %v9090_v25  ;;  %v9150_v25 = vld [vmem:[%s14635_s2 + $0x16c] ss:$16 sps:$4 sm:$0xff]  }
 0x17b   :  { %1543 = vmatpush1.bf16.msra.mxu1 %v9088_v26  ;;  %v9148_v26 = vld [vmem:[%s14635_s2 + $0x168] ss:$16 sps:$4 sm:$0xff]  }
 0x17c   :  { %1544 = vmatprep.subr.bf16.mxu1 %v9093_v27  ;;  %v9153_v27 = vld [vmem:[%s14635_s2 + $0x18c] ss:$16 sps:$4 sm:$0xff]  }
 0x17f   :  { %1545 = vmatpush1.bf16.msra.mxu1 %v9091_v28  ;;  %v9151_v28 = vld [vmem:[%s14635_s2 + $0x188] ss:$16 sps:$4 sm:$0xff]  }
 0x180   :  { %1546 = vmatprep.subr.bf16.mxu1 %v9096_v29  ;;  %v9156_v29 = vld [vmem:[%s14635_s2 + $0x1ac] ss:$16 sps:$4 sm:$0xff]  }
 0x183   :  { %1547 = vmatpush1.bf16.msra.mxu1 %v9094_v30  ;;  %v9154_v30 = vld [vmem:[%s14635_s2 + $0x1a8] ss:$16 sps:$4 sm:$0xff]  }
 0x184   :  { %1548 = vmatprep.subr.bf16.mxu1 %v9099_v31  ;;  %v9159_v31 = vld [vmem:[%s14635_s2 + $0x1cc] ss:$16 sps:$4 sm:$0xff]  }
 0x187   :  { %1549 = vmatpush1.bf16.msra.mxu1 %v9097_v32  ;;  %v9157_v32 = vld [vmem:[%s14635_s2 + $0x1c8] ss:$16 sps:$4 sm:$0xff]  }
 0x188   :  { %1550 = vmatprep.subr.bf16.mxu1 %v9102_v33  ;;  %v9162_v33 = vld [vmem:[%s14635_s2 + $0x1ec] ss:$16 sps:$4 sm:$0xff]  }
 0x18b   :  { %1551 = vmatpush1.bf16.msra.mxu1 %v9100_v34  ;;  %v9160_v34 = vld [vmem:[%s14635_s2 + $0x1e8] ss:$16 sps:$4 sm:$0xff]  }
 0x18c   :  { %1552 = vmatprep.subr.bf16.mxu1 %v9105_v35  ;;  %v9165_v35 = vld [vmem:[%s14635_s2 + $0x20c] ss:$16 sps:$4 sm:$0xff]  }
 0x18f   :  { %1553 = vmatpush1.bf16.msra.mxu1 %v9103_v36  ;;  %v46_v36 = vld [vmem:[%s14634_s0 + $0x70] sm:$0xff] }
 0x190   :  { %1554 = vmatprep.subr.bf16.mxu1 %v9108_v37  ;;  %v47_v37 = vld [vmem:[%s14634_s0 + $0x78] sm:$0xff] }
 0x193   :  { %1555 = vmatpush1.bf16.msra.mxu1 %v9106_v41 }
 0x194   :  { %1556 = vmatprep.subr.bf16.mxu1 %v9111_v38 }
 0x197   :  { %1557 = vmatpush1.bf16.msra.mxu1 %v9109_v39 }
 0x198   :  { %1558 = vmatprep.subr.bf16.mxu1 %v9114_v44 }
 0x19b   :  { %1559 = vmatpush1.bf16.msra.mxu1 %v9112_v42 }
 0x19c   :  { %1581 = vmatprep.subr.bf16.mxu1 %v9117_v45 }
 0x1ef   :  { %v369_v46 = vpop.f32.mrb[16].mxu0 }
 0x1f0   :  { %v371_v47 = vpop.f32.mrb[17].mxu0  ;;  %v400_v50 = vadd.f32 %v369_v46, %v10540_v63  ;;  %v9597_v63 = vld [vmem:[%s14634_s0 + $0x68] sm:$0xff] }
 0x1f1   :  { %v401_v48 = vadd.f32 %v371_v47, %v10543_v49 }
 0x1f3   :  { %556 = vmatprep.mubr.f32.mxu0 %v401_v48  ;;  %v10694_v3 = vpack.c.bf16 %v401_v48, %v10530_v54  ;;  %v9118_v54 = vld [vmem:[%s14635_s2 + $0x28] ss:$16 sps:$4 sm:$0xff]   ;;  %v9168_v48 = vld [vmem:[%s14635_s2 + $0x22c] ss:$16 sps:$4 sm:$0xff]  }
 0x1f4   :  { %557 = vmatmul.mubr.f32.gmra.mrb[12].mxu0 %v400_v50 }
 0x203   :  { %v540_v52 = vpop.f32.mrb[18].mxu0 }
 0x204   :  { %v542_v53 = vpop.f32.mrb[19].mxu0  ;;  %v8901_v61 = vadd.f32 %v540_v52, %v10547_v57  ;;  %v9115_v57 = vld [vmem:[%s14635_s2 + $0x8] ss:$16 sps:$4 sm:$0xff]  }
 0x205   :  { %v8902_v49 = vadd.f32 %v542_v53, %v10551_v51  ;;  %v10703_v51 = vpack.c.bf16 %v400_v50, %v10533_v55  ;;  %v9121_v55 = vld [vmem:[%s14635_s2 + $0x48] ss:$16 sps:$4 sm:$0xff]   ;;  %v9177_v53 = vld [vmem:[%s14635_s2 + $0x28c] ss:$16 sps:$4 sm:$0xff]  }
 0x206   :  { %v9169_v50 = vld [vmem:[%s14635_s2 + $0x248] ss:$16 sps:$4 sm:$0xff]  }
 0x207   :  { %v10677_v56 = vpop.f32.mrb[20].mxu0  ;;  %v9172_v52 = vld [vmem:[%s14635_s2 + $0x268] ss:$16 sps:$4 sm:$0xff]  }
 0x208   :  { %v10679_v58 = vpop.f32.mrb[21].mxu0  ;;  %v8903_v38 = vadd.f32 %v10677_v56, %v10555_v1  ;;  %v9163_v1 = vld [vmem:[%s14635_s2 + $0x208] ss:$16 sps:$4 sm:$0xff]  }
 0x209   :  { %v8904_v44 = vadd.f32 %v10679_v58, %v10559_v5  ;;  %v9166_v5 = vld [vmem:[%s14635_s2 + $0x228] ss:$16 sps:$4 sm:$0xff]   ;;  %v9180_v58 = vld [vmem:[%s14635_s2 + $0x2ac] ss:$16 sps:$4 sm:$0xff]  }
 0x20a   :  { %v9175_v56 = vld [vmem:[%s14635_s2 + $0x288] ss:$16 sps:$4 sm:$0xff]  }
 0x22f   :  { %v552_v60 = vpop.f32.mrb[10].mxu0 }
 0x230   :  { %v8897_v43 = vadd.f32 %v9596_v62, %v552_v60  ;;  %v554_v0 = vpop.f32.mrb[11].mxu0  ;;  %v9178_v60 = vld [vmem:[%s14635_s2 + $0x2a8] ss:$16 sps:$4 sm:$0xff]  }
 0x231   :  { %v8898_v2 = vadd.f32 %v9597_v63, %v554_v0  ;;  %v9181_v62 = vld [vmem:[%s14635_s2 + $0x2c8] ss:$16 sps:$4 sm:$0xff]  }
 0x232   :  { %v10689_v4 = vpack.c.bf16 %v8897_v43, %v8901_v61  ;;  %v9183_v61 = vld [vmem:[%s14635_s2 + $0x2cc] ss:$16 sps:$4 sm:$0xff]   ;;  %v9184_v0 = vld [vmem:[%s14635_s2 + $0x2e8] ss:$16 sps:$4 sm:$0xff]  }
 0x233   :  { %v10691_v59 = vpack.c.bf16 %v8898_v2, %v8902_v49  ;;  %v9186_v43 = vld [vmem:[%s14635_s2 + $0x2ec] ss:$16 sps:$4 sm:$0xff]   ;;  %v9187_v63 = vld [vmem:[%s14635_s2 + $0x308] ss:$16 sps:$4 sm:$0xff]  }
 0x234   :  { %v9189_v49 = vld [vmem:[%s14635_s2 + $0x30c] ss:$16 sps:$4 sm:$0xff]  }
 0x235   :  { %1517 = vmatprep.mubr.bf16.mxu1 %v10691_v59  ;;  %v9192_v2 = vld [vmem:[%s14635_s2 + $0x32c] ss:$16 sps:$4 sm:$0xff]  }
 0x236   :  { %1518 = vmatmul.mubr.bf16.gmra.mrb[4].mxu1 %v10689_v4 }
 0x237   :  { %1560 = vmatprep.mubr.bf16.mxu1 %v10694_v3 }
 0x23e   :  { %1561 = vmatmul.mubr.bf16.vlgmr.msra.gmra.mrb[0].mxu1 %v10703_v51 }
 0x23f   :  { %1582 = vmatpush1.bf16.msra.mxu1 %v9115_v57  ;;  %v9198_v57 = vld [vmem:[%s14635_s2 + $0x36c] ss:$16 sps:$4 sm:$0xff]  }
 0x240   :  { %1583 = vmatprep.subr.bf16.mxu1 %v9120_v9  ;;  %v9196_v9 = vld [vmem:[%s14635_s2 + $0x368] ss:$16 sps:$4 sm:$0xff]  }
 0x243   :  { %1584 = vmatpush1.bf16.msra.mxu1 %v9118_v54  ;;  %v9201_v54 = vld [vmem:[%s14635_s2 + $0x38c] ss:$16 sps:$4 sm:$0xff]  }
 0x244   :  { %1585 = vmatprep.subr.bf16.mxu1 %v9123_v18  ;;  %v9199_v18 = vld [vmem:[%s14635_s2 + $0x388] ss:$16 sps:$4 sm:$0xff]  }
 0x247   :  { %1586 = vmatpush1.bf16.msra.mxu1 %v9121_v55  ;;  %v9204_v55 = vld [vmem:[%s14635_s2 + $0x3ac] ss:$16 sps:$4 sm:$0xff]  }
 0x248   :  { %1587 = vmatprep.subr.bf16.mxu1 %v9126_v6  ;;  %v9202_v6 = vld [vmem:[%s14635_s2 + $0x3a8] ss:$16 sps:$4 sm:$0xff]  }
 0x24b   :  { %1588 = vmatpush1.bf16.msra.mxu1 %v9124_v14  ;;  %v9207_v14 = vld [vmem:[%s14635_s2 + $0x3cc] ss:$16 sps:$4 sm:$0xff]  }
 0x24c   :  { %1589 = vmatprep.subr.bf16.mxu1 %v9129_v10  ;;  %v9205_v10 = vld [vmem:[%s14635_s2 + $0x3c8] ss:$16 sps:$4 sm:$0xff]  }
 0x24f   :  { %1590 = vmatpush1.bf16.msra.mxu1 %v9127_v11  ;;  %v9210_v11 = vld [vmem:[%s14635_s2 + $0x3ec] ss:$16 sps:$4 sm:$0xff]  }
 0x250   :  { %1591 = vmatprep.subr.bf16.mxu1 %v9132_v40  ;;  %v9208_v40 = vld [vmem:[%s14635_s2 + $0x3e8] ss:$16 sps:$4 sm:$0xff]  }
 0x253   :  { %1592 = vmatpush1.bf16.msra.mxu1 %v9130_v12 }
 0x254   :  { %1593 = vmatprep.subr.bf16.mxu1 %v9135_v13 }
 0x257   :  { %1594 = vmatpush1.bf16.msra.mxu1 %v9133_v15 }
 0x258   :  { %1595 = vmatprep.subr.bf16.mxu1 %v9138_v16 }
 0x25b   :  { %1596 = vmatpush1.bf16.msra.mxu1 %v9136_v17  ;;  %v1687_v17 = vld [vmem:[%s14636_s4] sm:$0xff] }
 0x25c   :  { %1597 = vmatprep.subr.bf16.mxu1 %v9141_v19  ;;  %v1691_v19 = vld [vmem:[%s14636_s4 + $0x20] sm:$0xff] }
 0x25f   :  { %1598 = vmatpush1.bf16.msra.mxu1 %v9139_v20  ;;  %v1688_v20 = vld [vmem:[%s14636_s4 + $0x8] sm:$0xff] }
 0x260   :  { %1599 = vmatprep.subr.bf16.mxu1 %v9144_v21  ;;  %v7870_v21 = vcombine.low %v1687_v17, %v1691_v19 }
 0x263   :  { %1600 = vmatpush1.bf16.msra.mxu1 %v9142_v22  ;;  %v7871_v22 = vcombine.high %v1687_v17, %v1691_v19 }
 0x264   :  { %1601 = vmatprep.subr.bf16.mxu1 %v9147_v23  ;;  %v1695_v23 = vld [vmem:[%s14636_s4 + $0x40] sm:$0xff] }
 0x265   :  { %4767 = vmatprep.subr.bf16.mxu0 %v7871_v22  ;;  %v1752_v22 = vld [vmem:[%s14636_s4 + $0x208] sm:$0xff] }
 0x266   :  { %4768 = vmatpush1.bf16.msra.mxu0 %v7870_v21  ;;  %v1755_v21 = vld [vmem:[%s14636_s4 + $0x220] sm:$0xff] }
 0x267   :  { %1602 = vmatpush1.bf16.msra.mxu1 %v9145_v24  ;;  %v1699_v24 = vld [vmem:[%s14636_s4 + $0x60] sm:$0xff] }
 0x268   :  { %1603 = vmatprep.subr.bf16.mxu1 %v9150_v25 }
 0x26b   :  { %1604 = vmatpush1.bf16.msra.mxu1 %v9148_v26 }
 0x26c   :  { %1605 = vmatprep.subr.bf16.mxu1 %v9153_v27  ;;  %v7879_v27 = vcombine.high %v1695_v23, %v1699_v24 }
 0x26e   :  { %4769 = vmatprep.subr.bf16.mxu0 %v7879_v27  ;;  %v1759_v27 = vld [vmem:[%s14636_s4 + $0x240] sm:$0xff] }
 0x26f   :  { %1606 = vmatpush1.bf16.msra.mxu1 %v9151_v28  ;;  %v1696_v28 = vld [vmem:[%s14636_s4 + $0x48] sm:$0xff] }
 0x270   :  { %1607 = vmatprep.subr.bf16.mxu1 %v9156_v29  ;;  %v1700_v29 = vld [vmem:[%s14636_s4 + $0x68] sm:$0xff] }
 0x273   :  { %1608 = vmatpush1.bf16.msra.mxu1 %v9154_v30  ;;  %v1703_v30 = vld [vmem:[%s14636_s4 + $0x80] sm:$0xff] }
 0x274   :  { %1609 = vmatprep.subr.bf16.mxu1 %v9159_v31  ;;  %v7881_v31 = vcombine.high %v1696_v28, %v1700_v29 }
 0x277   :  { %1610 = vmatpush1.bf16.msra.mxu1 %v9157_v32  ;;  %v1707_v32 = vld [vmem:[%s14636_s4 + $0xa0] sm:$0xff] }
 0x278   :  { %1611 = vmatprep.subr.bf16.mxu1 %v9162_v33  ;;  %v1704_v33 = vld [vmem:[%s14636_s4 + $0x88] sm:$0xff] }
 0x27b   :  { %1612 = vmatpush1.bf16.msra.mxu1 %v9160_v34  ;;  %v1708_v34 = vld [vmem:[%s14636_s4 + $0xa8] sm:$0xff] }
 0x27c   :  { %1634 = vmatprep.subr.bf16.mxu1 %v9165_v35  ;;  %v7878_v35 = vcombine.low %v1695_v23, %v1699_v24 }
 0x27e   :  { %4770 = vmatpush1.bf16.msra.mxu0 %v7878_v35  ;;  %v1767_v35 = vld [vmem:[%s14636_s4 + $0x280] sm:$0xff] }
 0x2c7   :  { %v558_v41 = vpop.f32.mrb[12].mxu0 }
 0x2c8   :  { %v8899_v39 = vadd.f32 %v558_v41, %v46_v36  ;;  %v560_v42 = vpop.f32.mrb[13].mxu0  ;;  %v7880_v36 = vcombine.low %v1696_v28, %v1700_v29  ;;  %v7889_v41 = vcombine.high %v1704_v33, %v1708_v34  ;;  %v1763_v28 = vld [vmem:[%s14636_s4 + $0x260] sm:$0xff]  ;;  %v1760_v29 = vld [vmem:[%s14636_s4 + $0x248] sm:$0xff] }
 0x2c9   :  { %v8900_v45 = vadd.f32 %v560_v42, %v47_v37  ;;  %v7887_v37 = vcombine.high %v1703_v30, %v1707_v32  ;;  %v1712_v42 = vld [vmem:[%s14636_s4 + $0xc8] sm:$0xff] }
 0x2ca   :  { %v10809_v46 = vpack.c.bf16 %v8899_v39, %v8903_v38  ;;  %v1711_v38 = vld [vmem:[%s14636_s4 + $0xc0] sm:$0xff] }
 0x2cb   :  { %v10811_v47 = vpack.c.bf16 %v8900_v45, %v8904_v44  ;;  %v1715_v39 = vld [vmem:[%s14636_s4 + $0xe0] sm:$0xff]  ;;  %v1716_v44 = vld [vmem:[%s14636_s4 + $0xe8] sm:$0xff]  ;;  %v7886_v45 = vcombine.low %v1703_v30, %v1707_v32  ;;  %4771 = vmatprep.subr.bf16.mxu0 %v7887_v37 }
 0x2cc   :  { %v1764_v30 = vld [vmem:[%s14636_s4 + $0x268] sm:$0xff] }
 0x2cd   :  { %1570 = vmatprep.mubr.bf16.mxu1 %v10811_v47  ;;  %4772 = vmatpush1.bf16.msra.mxu0 %v7886_v45  ;;  %v1768_v37 = vld [vmem:[%s14636_s4 + $0x288] sm:$0xff]  ;;  %v1775_v45 = vld [vmem:[%s14636_s4 + $0x2c0] sm:$0xff] }
 0x2ce   :  { %1571 = vmatmul.mubr.bf16.gmra.mrb[4].mxu1 %v10809_v46 }
 0x2cf   :  { %1613 = vmatprep.mubr.bf16.mxu1 %v10572_v8  ;;  %v9171_v8 = vld [vmem:[%s14635_s2 + $0x24c] ss:$16 sps:$4 sm:$0xff]  }
 0x2d6   :  { %1614 = vmatmul.mubr.bf16.vlgmr.msra.gmra.mrb[8].mxu1 %v10570_v7  ;;  %v9174_v7 = vld [vmem:[%s14635_s2 + $0x26c] ss:$16 sps:$4 sm:$0xff]  }
 0x2d7   :  { %1635 = vmatpush1.bf16.msra.mxu1 %v9163_v1  ;;  %1623 = vmatprep.mubr.bf16.mxu1 %v10691_v59  ;;  %v9195_v59 = vld [vmem:[%s14635_s2 + $0x34c] ss:$16 sps:$4 sm:$0xff]   ;;  %v7897_v1 = vcombine.high %v1712_v42, %v1716_v44 }
 0x2d8   :  { %1636 = vmatprep.subr.bf16.mxu1 %v9168_v48  ;;  %v1719_v48 = vld [vmem:[%s14636_s4 + $0x100] sm:$0xff] }
 0x2db   :  { %1637 = vmatpush1.bf16.msra.mxu1 %v9166_v5  ;;  %v1723_v5 = vld [vmem:[%s14636_s4 + $0x120] sm:$0xff] }
 0x2dc   :  { %1638 = vmatprep.subr.bf16.mxu1 %v9171_v8  ;;  %v1720_v8 = vld [vmem:[%s14636_s4 + $0x108] sm:$0xff] }
 0x2de   :  { %1624 = vmatmul.mubr.bf16.gmra.mrb[12].mxu1 %v10689_v4  ;;  %v9190_v4 = vld [vmem:[%s14635_s2 + $0x328] ss:$16 sps:$4 sm:$0xff]  }
 0x2df   :  { %1639 = vmatpush1.bf16.msra.mxu1 %v9169_v50  ;;  %1666 = vmatprep.mubr.bf16.mxu1 %v10694_v3  ;;  %v9193_v3 = vld [vmem:[%s14635_s2 + $0x348] ss:$16 sps:$4 sm:$0xff]  }
 0x2e0   :  { %1640 = vmatprep.subr.bf16.mxu1 %v9174_v7  ;;  %v1724_v50 = vld [vmem:[%s14636_s4 + $0x128] sm:$0xff]  ;;  %v7894_v7 = vcombine.low %v1711_v38, %v1715_v39 }
 0x2e3   :  { %1641 = vmatpush1.bf16.msra.mxu1 %v9172_v52  ;;  %v7896_v52 = vcombine.low %v1712_v42, %v1716_v44 }
 0x2e4   :  { %1642 = vmatprep.subr.bf16.mxu1 %v9177_v53  ;;  %v7903_v53 = vcombine.high %v1719_v48, %v1723_v5 }
 0x2e7   :  { %1643 = vmatpush1.bf16.msra.mxu1 %v9175_v56  ;;  %v7905_v56 = vcombine.high %v1720_v8, %v1724_v50 }
 0x2e8   :  { %1644 = vmatprep.subr.bf16.mxu1 %v9180_v58  ;;  %v1727_v58 = vld [vmem:[%s14636_s4 + $0x140] sm:$0xff] }
 0x2eb   :  { %1645 = vmatpush1.bf16.msra.mxu1 %v9178_v60  ;;  %v1731_v60 = vld [vmem:[%s14636_s4 + $0x160] sm:$0xff] }
 0x2ec   :  { %1646 = vmatprep.subr.bf16.mxu1 %v9183_v61  ;;  %v1728_v61 = vld [vmem:[%s14636_s4 + $0x148] sm:$0xff] }
 0x2ef   :  { %1647 = vmatpush1.bf16.msra.mxu1 %v9181_v62  ;;  %v1732_v62 = vld [vmem:[%s14636_s4 + $0x168] sm:$0xff] }
 0x2f0   :  { %1648 = vmatprep.subr.bf16.mxu1 %v9186_v43  ;;  %v7902_v43 = vcombine.low %v1719_v48, %v1723_v5 }
 0x2f3   :  { %1649 = vmatpush1.bf16.msra.mxu1 %v9184_v0  ;;  %v7904_v0 = vcombine.low %v1720_v8, %v1724_v50 }
 0x2f4   :  { %1650 = vmatprep.subr.bf16.mxu1 %v9189_v49  ;;  %v7911_v49 = vcombine.high %v1727_v58, %v1731_v60 }
 0x2f7   :  { %1651 = vmatpush1.bf16.msra.mxu1 %v9187_v63  ;;  %v7913_v63 = vcombine.high %v1728_v61, %v1732_v62 }
 0x2f8   :  { %1652 = vmatprep.subr.bf16.mxu1 %v9192_v2  ;;  %v1735_v2 = vld [vmem:[%s14636_s4 + $0x180] sm:$0xff] }
 0x2fb   :  { %1653 = vmatpush1.bf16.msra.mxu1 %v9190_v4  ;;  %v1739_v4 = vld [vmem:[%s14636_s4 + $0x1a0] sm:$0xff] }
 0x2fc   :  { %1654 = vmatprep.subr.bf16.mxu1 %v9195_v59  ;;  %v1736_v59 = vld [vmem:[%s14636_s4 + $0x188] sm:$0xff] }
 0x2ff   :  { %1655 = vmatpush1.bf16.msra.mxu1 %v9193_v3  ;;  %v1740_v3 = vld [vmem:[%s14636_s4 + $0x1a8] sm:$0xff] }
 0x300   :  { %1656 = vmatprep.subr.bf16.mxu1 %v9198_v57  ;;  %v7910_v57 = vcombine.low %v1727_v58, %v1731_v60 }
 0x303   :  { %1657 = vmatpush1.bf16.msra.mxu1 %v9196_v9  ;;  %v7912_v9 = vcombine.low %v1728_v61, %v1732_v62 }
 0x304   :  { %1658 = vmatprep.subr.bf16.mxu1 %v9201_v54  ;;  %v7919_v54 = vcombine.high %v1735_v2, %v1739_v4 }
 0x307   :  { %1659 = vmatpush1.bf16.msra.mxu1 %v9199_v18  ;;  %v7921_v18 = vcombine.high %v1736_v59, %v1740_v3 }
 0x308   :  { %1660 = vmatprep.subr.bf16.mxu1 %v9204_v55  ;;  %v1743_v55 = vld [vmem:[%s14636_s4 + $0x1c0] sm:$0xff] }
 0x30b   :  { %1661 = vmatpush1.bf16.msra.mxu1 %v9202_v6  ;;  %v1747_v6 = vld [vmem:[%s14636_s4 + $0x1e0] sm:$0xff] }
 0x30c   :  { %1662 = vmatprep.subr.bf16.mxu1 %v9207_v14  ;;  %v1744_v14 = vld [vmem:[%s14636_s4 + $0x1c8] sm:$0xff]  ;;  %v7927_v17 = vcombine.high %v1743_v55, %v1747_v6  ;;  %v7926_v23 = vcombine.low %v1743_v55, %v1747_v6 }
 0x30f   :  { %1663 = vmatpush1.bf16.msra.mxu1 %v9205_v10  ;;  %v1748_v10 = vld [vmem:[%s14636_s4 + $0x1e8] sm:$0xff] }
 0x310   :  { %1664 = vmatprep.subr.bf16.mxu1 %v9210_v11  ;;  %v7918_v11 = vcombine.low %v1735_v2, %v1739_v4  ;;  %v7929_v19 = vcombine.high %v1744_v14, %v1748_v10  ;;  %v7928_v24 = vcombine.low %v1744_v14, %v1748_v10 }
 0x311   :  { %v10913_v12 = vpop.f32.mrb[0].mxu1 }
 0x312   :  { %v10915_v13 = vpop.f32.mrb[1].mxu1 }
 0x313   :  { %1665 = vmatpush1.bf16.msra.mxu1 %v9208_v40  ;;  %v10917_v15 = vpop.f32.mrb[2].mxu1  ;;  %v7920_v40 = vcombine.low %v1736_v59, %v1740_v3 }
 0x314   :  { %v10919_v16 = vpop.f32.mrb[3].mxu1 }
 0x316   :  { %1667 = vmatmul.mubr.bf16.vlgmr.msra.gmra.mrb[8].mxu1 %v10703_v51  ;;  %v1692_v51 = vld [vmem:[%s14636_s4 + $0x28] sm:$0xff] }
 0x317   :  { %1676 = vmatprep.mubr.bf16.mxu1 %v10811_v47  ;;  %v7872_v25 = vcombine.low %v1688_v20, %v1692_v51  ;;  %v7873_v26 = vcombine.high %v1688_v20, %v1692_v51  ;;  %v7895_v47 = vcombine.high %v1711_v38, %v1715_v39  ;;  %v1751_v20 = vld [vmem:[%s14636_s4 + $0x200] sm:$0xff]  ;;  %v1756_v51 = vld [vmem:[%s14636_s4 + $0x228] sm:$0xff]  ;;  %v7942_v38 = vcombine.low %v1759_v27, %v1763_v28 }
 0x318   :  { %v7936_v32 = vcombine.low %v1752_v22, %v1756_v51  ;;  %v7944_v39 = vcombine.low %v1760_v29, %v1764_v30 }
 0x319   :  { %4931 = vmatprep.subr.bf16.mxu1 %v7873_v26  ;;  %4773 = vmatprep.subr.bf16.mxu0 %v7895_v47  ;;  %v7937_v26 = vcombine.high %v1752_v22, %v1756_v51  ;;  %v1776_v47 = vld [vmem:[%s14636_s4 + $0x2c8] sm:$0xff] }
 0x31a   :  { %4932 = vmatpush1.bf16.msra.mxu1 %v7872_v25  ;;  %4774 = vmatpush1.bf16.msra.mxu0 %v7894_v7  ;;  %v7935_v25 = vcombine.high %v1751_v20, %v1755_v21  ;;  %v1783_v7 = vld [vmem:[%s14636_s4 + $0x300] sm:$0xff]  ;;  %v1812_v22 = vld [vmem:[%s14636_s4 + $0x3e8] sm:$0xff] }
 0x31b   :  { %4933 = vmatprep.subr.bf16.mxu1 %v7881_v31  ;;  %4775 = vmatprep.subr.bf16.mxu0 %v7903_v53  ;;  %v7934_v31 = vcombine.low %v1751_v20, %v1755_v21  ;;  %v1784_v53 = vld [vmem:[%s14636_s4 + $0x308] sm:$0xff] }
 0x31c   :  { %v1808_v20 = vld [vmem:[%s14636_s4 + $0x3c8] sm:$0xff] }
 0x31e   :  { %1677 = vmatmul.mubr.bf16.gmra.mrb[12].mxu1 %v10809_v46  ;;  %v7888_v46 = vcombine.low %v1704_v33, %v1708_v34  ;;  %4776 = vmatpush1.bf16.msra.mxu0 %v7902_v43  ;;  %v7943_v33 = vcombine.high %v1759_v27, %v1763_v28  ;;  %v7945_v34 = vcombine.high %v1760_v29, %v1764_v30  ;;  %v1791_v43 = vld [vmem:[%s14636_s4 + $0x340] sm:$0xff]  ;;  %v1816_v27 = vld [vmem:[%s14636_s4 + $0x408] sm:$0xff] }
 0x31f   :  { %4934 = vmatpush1.bf16.msra.mxu1 %v7880_v36  ;;  %4777 = vmatprep.subr.bf16.mxu0 %v7911_v49  ;;  %v1771_v36 = vld [vmem:[%s14636_s4 + $0x2a0] sm:$0xff]  ;;  %v1792_v49 = vld [vmem:[%s14636_s4 + $0x348] sm:$0xff] }
 0x320   :  { %4935 = vmatprep.subr.bf16.mxu1 %v7889_v41  ;;  %v1772_v41 = vld [vmem:[%s14636_s4 + $0x2a8] sm:$0xff]  ;;  %v7951_v42 = vcombine.high %v1767_v35, %v1771_v36  ;;  %v7950_v48 = vcombine.low %v1767_v35, %v1771_v36 }
 0x321   :  { %v7953_v44 = vcombine.high %v1768_v37, %v1772_v41  ;;  %v7952_v5 = vcombine.low %v1768_v37, %v1772_v41  ;;  %v1820_v29 = vld [vmem:[%s14636_s4 + $0x428] sm:$0xff] }
 0x322   :  { %4778 = vmatpush1.bf16.msra.mxu0 %v7910_v57  ;;  %v1799_v57 = vld [vmem:[%s14636_s4 + $0x380] sm:$0xff] }
 0x323   :  { %4936 = vmatpush1.bf16.msra.mxu1 %v7888_v46  ;;  %4779 = vmatprep.subr.bf16.mxu0 %v7919_v54  ;;  %v1779_v46 = vld [vmem:[%s14636_s4 + $0x2e0] sm:$0xff]  ;;  %v1800_v54 = vld [vmem:[%s14636_s4 + $0x388] sm:$0xff] }
 0x324   :  { %4937 = vmatprep.subr.bf16.mxu1 %v7897_v1  ;;  %v1780_v1 = vld [vmem:[%s14636_s4 + $0x2e8] sm:$0xff]  ;;  %v7959_v8 = vcombine.high %v1775_v45, %v1779_v46  ;;  %v7958_v58 = vcombine.low %v1775_v45, %v1779_v46 }
 0x325   :  { %v7961_v50 = vcombine.high %v1776_v47, %v1780_v1  ;;  %v7960_v60 = vcombine.low %v1776_v47, %v1780_v1 }
 0x326   :  { %4780 = vmatpush1.bf16.msra.mxu0 %v7918_v11 }
 0x327   :  { %4938 = vmatpush1.bf16.msra.mxu1 %v7896_v52  ;;  %4781 = vmatprep.subr.bf16.mxu0 %v7927_v17  ;;  %v1787_v52 = vld [vmem:[%s14636_s4 + $0x320] sm:$0xff] }
 0x328   :  { %4939 = vmatprep.subr.bf16.mxu1 %v7905_v56  ;;  %v1788_v56 = vld [vmem:[%s14636_s4 + $0x328] sm:$0xff]  ;;  %v7967_v61 = vcombine.high %v1783_v7, %v1787_v52  ;;  %v7966_v2 = vcombine.low %v1783_v7, %v1787_v52  ;;  %v1807_v17 = vld [vmem:[%s14636_s4 + $0x3c0] sm:$0xff] }
 0x329   :  { %v7969_v62 = vcombine.high %v1784_v53, %v1788_v56  ;;  %v7968_v4 = vcombine.low %v1784_v53, %v1788_v56  ;;  %v1835_v7 = vld [vmem:[%s14636_s4 + $0x4a0] sm:$0xff]  ;;  %v1832_v52 = vld [vmem:[%s14636_s4 + $0x488] sm:$0xff] }
 0x32a   :  { %4782 = vmatpush1.bf16.msra.mxu0 %v7926_v23  ;;  %v7992_v23 = vcombine.low %v1808_v20, %v1812_v22  ;;  %v1836_v53 = vld [vmem:[%s14636_s4 + $0x4a8] sm:$0xff] }
 0x32b   :  { %4940 = vmatpush1.bf16.msra.mxu1 %v7904_v0  ;;  %4783 = vmatprep.subr.bf16.mxu0 %v7935_v25  ;;  %v1795_v0 = vld [vmem:[%s14636_s4 + $0x360] sm:$0xff] }
 0x32c   :  { %4941 = vmatprep.subr.bf16.mxu1 %v7913_v63  ;;  %v1796_v63 = vld [vmem:[%s14636_s4 + $0x368] sm:$0xff]  ;;  %v7975_v59 = vcombine.high %v1791_v43, %v1795_v0  ;;  %v7974_v55 = vcombine.low %v1791_v43, %v1795_v0  ;;  %v1815_v25 = vld [vmem:[%s14636_s4 + $0x400] sm:$0xff] }
 0x32d   :  { %v7977_v3 = vcombine.high %v1792_v49, %v1796_v63  ;;  %v7976_v6 = vcombine.low %v1792_v49, %v1796_v63  ;;  %v1843_v0 = vld [vmem:[%s14636_s4 + $0x4e0] sm:$0xff]  ;;  %v1840_v49 = vld [vmem:[%s14636_s4 + $0x4c8] sm:$0xff] }
 0x32e   :  { %4784 = vmatpush1.bf16.msra.mxu0 %v7934_v31  ;;  %v8000_v31 = vcombine.low %v1816_v27, %v1820_v29  ;;  %v1844_v63 = vld [vmem:[%s14636_s4 + $0x4e8] sm:$0xff] }
 0x32f   :  { %4942 = vmatpush1.bf16.msra.mxu1 %v7912_v9  ;;  %4785 = vmatprep.subr.bf16.mxu0 %v7943_v33  ;;  %v1803_v9 = vld [vmem:[%s14636_s4 + $0x3a0] sm:$0xff] }
 0x330   :  { %4943 = vmatprep.subr.bf16.mxu1 %v7921_v18  ;;  %v1804_v18 = vld [vmem:[%s14636_s4 + $0x3a8] sm:$0xff]  ;;  %v7983_v14 = vcombine.high %v1799_v57, %v1803_v9  ;;  %v7982_v11 = vcombine.low %v1799_v57, %v1803_v9 }
 0x331   :  { %v7985_v10 = vcombine.high %v1800_v54, %v1804_v18 }
 0x332   :  { %4786 = vmatpush1.bf16.msra.mxu0 %v7942_v38 }
 0x333   :  { %4944 = vmatpush1.bf16.msra.mxu1 %v7920_v40  ;;  %4787 = vmatprep.subr.bf16.mxu0 %v7951_v42  ;;  %v7984_v40 = vcombine.low %v1800_v54, %v1804_v18  ;;  %v8025_v54 = vcombine.high %v1840_v49, %v1844_v63  ;;  %v1847_v18 = vld [vmem:[%s14636_s4 + $0x500] sm:$0xff] }
 0x334   :  { %4945 = vmatprep.subr.bf16.mxu1 %v7929_v19  ;;  %v1811_v19 = vld [vmem:[%s14636_s4 + $0x3e0] sm:$0xff] }
 0x335   :  { %v7991_v21 = vcombine.high %v1807_v17, %v1811_v19  ;;  %v7990_v51 = vcombine.low %v1807_v17, %v1811_v19  ;;  %v1855_v19 = vld [vmem:[%s14636_s4 + $0x540] sm:$0xff] }
 0x336   :  { %4788 = vmatpush1.bf16.msra.mxu0 %v7950_v48  ;;  %v1831_v48 = vld [vmem:[%s14636_s4 + $0x480] sm:$0xff] }
 0x337   :  { %4946 = vmatpush1.bf16.msra.mxu1 %v7928_v24  ;;  %4789 = vmatprep.subr.bf16.mxu0 %v7959_v8  ;;  %v7993_v24 = vcombine.high %v1808_v20, %v1812_v22  ;;  %v1859_v20 = vld [vmem:[%s14636_s4 + $0x560] sm:$0xff]  ;;  %v1860_v22 = vld [vmem:[%s14636_s4 + $0x568] sm:$0xff] }
 0x338   :  { %4947 = vmatprep.subr.bf16.mxu1 %v7937_v26  ;;  %v1819_v26 = vld [vmem:[%s14636_s4 + $0x420] sm:$0xff] }
 0x339   :  { %v7999_v28 = vcombine.high %v1815_v25, %v1819_v26  ;;  %v7998_v30 = vcombine.low %v1815_v25, %v1819_v26  ;;  %v1863_v26 = vld [vmem:[%s14636_s4 + $0x580] sm:$0xff] }
 0x33a   :  { %4790 = vmatpush1.bf16.msra.mxu0 %v7958_v58 }
 0x33b   :  { %4948 = vmatpush1.bf16.msra.mxu1 %v7936_v32  ;;  %4791 = vmatprep.subr.bf16.mxu0 %v7967_v61  ;;  %v8001_v32 = vcombine.high %v1816_v27, %v1820_v29  ;;  %v8017_v61 = vcombine.high %v1832_v52, %v1836_v53  ;;  %v1867_v27 = vld [vmem:[%s14636_s4 + $0x5a0] sm:$0xff]  ;;  %v1868_v29 = vld [vmem:[%s14636_s4 + $0x5a8] sm:$0xff] }
 0x33c   :  { %4949 = vmatprep.subr.bf16.mxu1 %v7945_v34 }
 0x33e   :  { %4792 = vmatpush1.bf16.msra.mxu0 %v7966_v2 }
 0x33f   :  { %4950 = vmatpush1.bf16.msra.mxu1 %v7944_v39  ;;  %4793 = vmatprep.subr.bf16.mxu0 %v7975_v59  ;;  %v8014_v59 = vcombine.low %v1831_v48, %v1835_v7 }
 0x340   :  { %4951 = vmatprep.subr.bf16.mxu1 %v7953_v44  ;;  %v1823_v44 = vld [vmem:[%s14636_s4 + $0x440] sm:$0xff] }
 0x342   :  { %4794 = vmatpush1.bf16.msra.mxu0 %v7974_v55  ;;  %v1851_v55 = vld [vmem:[%s14636_s4 + $0x520] sm:$0xff] }
 0x343   :  { %4952 = vmatpush1.bf16.msra.mxu1 %v7952_v5  ;;  %4795 = vmatprep.subr.bf16.mxu0 %v7983_v14  ;;  %v1852_v14 = vld [vmem:[%s14636_s4 + $0x528] sm:$0xff] }
 0x344   :  { %4953 = vmatprep.subr.bf16.mxu1 %v7961_v50 }
 0x346   :  { %4796 = vmatpush1.bf16.msra.mxu0 %v7982_v11  ;;  %v8024_v11 = vcombine.low %v1840_v49, %v1844_v63 }
 0x347   :  { %4954 = vmatpush1.bf16.msra.mxu1 %v7960_v60  ;;  %4797 = vmatprep.subr.bf16.mxu0 %v7991_v21  ;;  %v8015_v60 = vcombine.high %v1831_v48, %v1835_v7  ;;  %v1856_v21 = vld [vmem:[%s14636_s4 + $0x548] sm:$0xff] }
 0x348   :  { %4955 = vmatprep.subr.bf16.mxu1 %v7969_v62  ;;  %v1839_v62 = vld [vmem:[%s14636_s4 + $0x4c0] sm:$0xff]  ;;  %v8041_v25 = vcombine.high %v1856_v21, %v1860_v22  ;;  %v1880_v48 = vld [vmem:[%s14636_s4 + $0x608] sm:$0xff] }
 0x349   :  { %v8023_v9 = vcombine.high %v1839_v62, %v1843_v0 }
 0x34a   :  { %4798 = vmatpush1.bf16.msra.mxu0 %v7990_v51  ;;  %v8030_v51 = vcombine.low %v1847_v18, %v1851_v55 }
 0x34b   :  { %4956 = vmatpush1.bf16.msra.mxu1 %v7968_v4  ;;  %4808 = vmatprep.subr.bf16.mxu0 %v7999_v28  ;;  %v1864_v28 = vld [vmem:[%s14636_s4 + $0x588] sm:$0xff] }
 0x34c   :  { %4957 = vmatprep.subr.bf16.mxu1 %v7977_v3  ;;  %v8016_v3 = vcombine.low %v1832_v52, %v1836_v53 }
 0x34f   :  { %4958 = vmatpush1.bf16.msra.mxu1 %v7976_v6  ;;  %v1848_v6 = vld [vmem:[%s14636_s4 + $0x508] sm:$0xff] }
 0x350   :  { %4959 = vmatprep.subr.bf16.mxu1 %v7985_v10  ;;  %v8022_v10 = vcombine.low %v1839_v62, %v1843_v0  ;;  %v8033_v17 = vcombine.high %v1848_v6, %v1852_v14 }
 0x353   :  { %4960 = vmatpush1.bf16.msra.mxu1 %v7984_v40  ;;  %v8031_v40 = vcombine.high %v1847_v18, %v1851_v55 }
 0x354   :  { %4961 = vmatprep.subr.bf16.mxu1 %v7993_v24  ;;  %v8039_v24 = vcombine.high %v1855_v19, %v1859_v20 }
 0x357   :  { %4962 = vmatpush1.bf16.msra.mxu1 %v7992_v23  ;;  %v8032_v23 = vcombine.low %v1848_v6, %v1852_v14 }
 0x358   :  { %4972 = vmatprep.subr.bf16.mxu1 %v8001_v32  ;;  %v8047_v32 = vcombine.high %v1863_v26, %v1867_v27 }
 0x3a1   :  { %v1572_v33 = vpop.f32.mrb[4].mxu1 }
 0x3a2   :  { %v11129_v34 = vpack.c.bf16 %v1572_v33, %v10913_v12  ;;  %v1574_v35 = vpop.f32.mrb[5].mxu1  ;;  %v1827_v12 = vld [vmem:[%s14636_s4 + $0x460] sm:$0xff]  ;;  %v8049_v33 = vcombine.high %v1864_v28, %v1868_v29 }
 0x3a3   :  { %v11132_v36 = vpack.c.bf16 %v1574_v35, %v10915_v13  ;;  %v1576_v37 = vpop.f32.mrb[6].mxu1  ;;  %v1824_v13 = vld [vmem:[%s14636_s4 + $0x448] sm:$0xff]  ;;  %v8007_v8 = vcombine.high %v1823_v44, %v1827_v12  ;;  %v8006_v56 = vcombine.low %v1823_v44, %v1827_v12  ;;  %v1871_v35 = vld [vmem:[%s14636_s4 + $0x5c0] sm:$0xff]  ;;  %v8046_v44 = vcombine.low %v1863_v26, %v1867_v27 }
 0x3a4   :  { %v11135_v41 = vpack.c.bf16 %v1576_v37, %v10917_v15  ;;  %v1578_v38 = vpop.f32.mrb[7].mxu1  ;;  %v1828_v15 = vld [vmem:[%s14636_s4 + $0x468] sm:$0xff]  ;;  %v1875_v37 = vld [vmem:[%s14636_s4 + $0x5e0] sm:$0xff] }
 0x3a5   :  { %v11138_v39 = vpack.c.bf16 %v1578_v38, %v10919_v16  ;;  %v8009_v50 = vcombine.high %v1824_v13, %v1828_v15  ;;  %v8008_v58 = vcombine.low %v1824_v13, %v1828_v15  ;;  %v1872_v38 = vld [vmem:[%s14636_s4 + $0x5c8] sm:$0xff]  ;;  %v8055_v12 = vcombine.high %v1871_v35, %v1875_v37  ;;  %v1879_v15 = vld [vmem:[%s14636_s4 + $0x600] sm:$0xff] }
 0x3e9   :  { %v1668_v42 = vpop.f32.mrb[8].mxu1 }
 0x3ea   :  { %v1670_v45 = vpop.f32.mrb[9].mxu1  ;;  %v11156_v47 = vpack.c.bf16 %v1668_v42, %v1668_v42  ;;  %v1876_v42 = vld [vmem:[%s14636_s4 + $0x5e8] sm:$0xff] }
 0x3eb   :  { %v11152_v16 = vpack.c.bf16 %v1670_v45, %v1670_v45  ;;  %v11154_v46 = vpop.f32.mrb[10].mxu1  ;;  %v8048_v45 = vcombine.low %v1864_v28, %v1868_v29  ;;  %v8057_v13 = vcombine.high %v1872_v38, %v1876_v42  ;;  %v8056_v7 = vcombine.low %v1872_v38, %v1876_v42 }
 0x3ec   :  { %v1674_v1 = vpop.f32.mrb[11].mxu1 }
 0x3ed   :  { %v11161_v5 = vpack.c.bf16 %v1674_v1, %v1674_v1  ;;  %4799 = vmatprep.mubr.bf16.mxu0 %v11152_v16  ;;  %4963 = vmatprep.mubr.bf16.mxu1 %v11152_v16  ;;  %v1883_v1 = vld [vmem:[%s14636_s4 + $0x620] sm:$0xff] }
 0x3ee   :  { %4800 = vmatmul.mubr.bf16.vlgmr.msra.gmra.mrb[24].mxu0 %v11156_v47  ;;  %4964 = vmatmul.mubr.bf16.vlgmr.msra.gmra.mrb[16].mxu1 %v11156_v47  ;;  %v8063_v52 = vcombine.high %v1879_v15, %v1883_v1  ;;  %v8062_v62 = vcombine.low %v1879_v15, %v1883_v1 }
 0x3ef   :  { %4809 = vmatpush1.bf16.msra.mxu0 %v7998_v30  ;;  %4973 = vmatpush1.bf16.msra.mxu1 %v8000_v31  ;;  %v8038_v30 = vcombine.low %v1855_v19, %v1859_v20  ;;  %v8040_v31 = vcombine.low %v1856_v21, %v1860_v22 }
 0x3f0   :  { %4840 = vmatprep.mubr.bf16.mxu0 %v11161_v5  ;;  %5004 = vmatprep.mubr.bf16.mxu1 %v11161_v5 }
 0x3f1   :  { %v11181_v43 = vpop.f32.mrb[12].mxu1  ;;  %4810 = vmatprep.subr.bf16.mxu0 %v8007_v8  ;;  %4974 = vmatprep.subr.bf16.mxu1 %v8009_v50  ;;  %v1884_v8 = vld [vmem:[%s14636_s4 + $0x628] sm:$0xff]  ;;  %v8054_v50 = vcombine.low %v1871_v35, %v1875_v37 }
 0x3f2   :  { %v11192_v2 = vpop.f32.mrb[13].mxu1  ;;  %v8065_v53 = vcombine.high %v1880_v48, %v1884_v8  ;;  %v8064_v0 = vcombine.low %v1880_v48, %v1884_v8 }
 0x3f3   :  { %4811 = vmatpush1.bf16.msra.mxu0 %v8006_v56  ;;  %4975 = vmatpush1.bf16.msra.mxu1 %v8008_v58  ;;  %v11194_v4 = vpop.f32.mrb[14].mxu1  ;;  %v1887_v56 = vld [vmem:[%s14636_s4 + $0x640] sm:$0xff] }
 0x3f4   :  { %v11196_v57 = vpop.f32.mrb[15].mxu1  ;;  %4812 = vmatprep.subr.bf16.mxu0 %v8015_v60  ;;  %4976 = vmatprep.subr.bf16.mxu1 %v8017_v61  ;;  %v1891_v58 = vld [vmem:[%s14636_s4 + $0x660] sm:$0xff]  ;;  %v1888_v60 = vld [vmem:[%s14636_s4 + $0x648] sm:$0xff] }
 0x3f5   :  { %v1892_v61 = vld [vmem:[%s14636_s4 + $0x668] sm:$0xff]  ;;  %v8071_v49 = vcombine.high %v1887_v56, %v1891_v58  ;;  %v8070_v18 = vcombine.low %v1887_v56, %v1891_v58 }
 0x3f6   :  { %v8073_v63 = vcombine.high %v1888_v60, %v1892_v61  ;;  %v8072_v55 = vcombine.low %v1888_v60, %v1892_v61 }
 0x3f7   :  { %4813 = vmatpush1.bf16.msra.mxu0 %v8014_v59  ;;  %4977 = vmatpush1.bf16.msra.mxu1 %v8016_v3  ;;  %v1895_v59 = vld [vmem:[%s14636_s4 + $0x680] sm:$0xff] }
 0x3f8   :  { %4814 = vmatprep.subr.bf16.mxu0 %v8023_v9  ;;  %4978 = vmatprep.subr.bf16.mxu1 %v8025_v54  ;;  %v1899_v3 = vld [vmem:[%s14636_s4 + $0x6a0] sm:$0xff]  ;;  %v1896_v9 = vld [vmem:[%s14636_s4 + $0x688] sm:$0xff] }
 0x3f9   :  { %v1900_v54 = vld [vmem:[%s14636_s4 + $0x6a8] sm:$0xff]  ;;  %v8079_v6 = vcombine.high %v1895_v59, %v1899_v3  ;;  %v8078_v19 = vcombine.low %v1895_v59, %v1899_v3 }
 0x3fa   :  { %v8081_v14 = vcombine.high %v1896_v9, %v1900_v54  ;;  %v8080_v20 = vcombine.low %v1896_v9, %v1900_v54 }
 0x3fb   :  { %4815 = vmatpush1.bf16.msra.mxu0 %v8022_v10  ;;  %4979 = vmatpush1.bf16.msra.mxu1 %v8024_v11  ;;  %v1903_v10 = vld [vmem:[%s14636_s4 + $0x6c0] sm:$0xff] }
 0x3fc   :  { %4816 = vmatprep.subr.bf16.mxu0 %v8031_v40  ;;  %4980 = vmatprep.subr.bf16.mxu1 %v8033_v17  ;;  %v1907_v11 = vld [vmem:[%s14636_s4 + $0x6e0] sm:$0xff]  ;;  %v1904_v40 = vld [vmem:[%s14636_s4 + $0x6c8] sm:$0xff] }
 0x3fd   :  { %v1908_v17 = vld [vmem:[%s14636_s4 + $0x6e8] sm:$0xff]  ;;  %v8087_v21 = vcombine.high %v1903_v10, %v1907_v11  ;;  %v8086_v26 = vcombine.low %v1903_v10, %v1907_v11  ;;  %v11368_v11 = vpack.c.bf16 %v11154_v46, %v11154_v46 }
 0x3fe   :  { %v8089_v22 = vcombine.high %v1904_v40, %v1908_v17  ;;  %v8088_v27 = vcombine.low %v1904_v40, %v1908_v17  ;;  %v11372_v17 = vpack.c.bf16 %v11192_v2, %v11192_v2  ;;  %v1960_v46 = vld [vmem:[%s14636_s4 + $0x888] sm:$0xff] }
 0x3ff   :  { %4817 = vmatpush1.bf16.msra.mxu0 %v8030_v51  ;;  %4981 = vmatpush1.bf16.msra.mxu1 %v8032_v23  ;;  %v1911_v51 = vld [vmem:[%s14636_s4 + $0x700] sm:$0xff]  ;;  %v1964_v2 = vld [vmem:[%s14636_s4 + $0x8a8] sm:$0xff] }
 0x400   :  { %4818 = vmatprep.subr.bf16.mxu0 %v8039_v24  ;;  %4982 = vmatprep.subr.bf16.mxu1 %v8041_v25  ;;  %v1915_v23 = vld [vmem:[%s14636_s4 + $0x720] sm:$0xff]  ;;  %v1912_v24 = vld [vmem:[%s14636_s4 + $0x708] sm:$0xff] }
 0x401   :  { %v1916_v25 = vld [vmem:[%s14636_s4 + $0x728] sm:$0xff]  ;;  %v8095_v28 = vcombine.high %v1911_v51, %v1915_v23  ;;  %v8094_v35 = vcombine.low %v1911_v51, %v1915_v23 }
 0x402   :  { %v8097_v29 = vcombine.high %v1912_v24, %v1916_v25  ;;  %v8096_v37 = vcombine.low %v1912_v24, %v1916_v25  ;;  %v8145_v25 = vcombine.high %v1960_v46, %v1964_v2 }
 0x403   :  { %4819 = vmatpush1.bf16.msra.mxu0 %v8038_v30  ;;  %4983 = vmatpush1.bf16.msra.mxu1 %v8040_v31  ;;  %v1919_v30 = vld [vmem:[%s14636_s4 + $0x740] sm:$0xff] }
 0x404   :  { %4820 = vmatprep.subr.bf16.mxu0 %v8047_v32  ;;  %4984 = vmatprep.subr.bf16.mxu1 %v8049_v33  ;;  %v1923_v31 = vld [vmem:[%s14636_s4 + $0x760] sm:$0xff]  ;;  %v1920_v32 = vld [vmem:[%s14636_s4 + $0x748] sm:$0xff] }
 0x405   :  { %v1924_v33 = vld [vmem:[%s14636_s4 + $0x768] sm:$0xff]  ;;  %v8103_v38 = vcombine.high %v1919_v30, %v1923_v31  ;;  %v8102_v15 = vcombine.low %v1919_v30, %v1923_v31  ;;  %v8144_v31 = vcombine.low %v1960_v46, %v1964_v2 }
 0x406   :  { %v8105_v42 = vcombine.high %v1920_v32, %v1924_v33  ;;  %v8104_v1 = vcombine.low %v1920_v32, %v1924_v33 }
 0x407   :  { %4821 = vmatpush1.bf16.msra.mxu0 %v8046_v44  ;;  %4985 = vmatpush1.bf16.msra.mxu1 %v8048_v45  ;;  %v1927_v44 = vld [vmem:[%s14636_s4 + $0x780] sm:$0xff] }
 0x408   :  { %4822 = vmatprep.subr.bf16.mxu0 %v8055_v12  ;;  %4986 = vmatprep.subr.bf16.mxu1 %v8057_v13  ;;  %v1931_v45 = vld [vmem:[%s14636_s4 + $0x7a0] sm:$0xff]  ;;  %v1928_v12 = vld [vmem:[%s14636_s4 + $0x788] sm:$0xff] }
 0x409   :  { %v1932_v13 = vld [vmem:[%s14636_s4 + $0x7a8] sm:$0xff]  ;;  %v8111_v48 = vcombine.high %v1927_v44, %v1931_v45  ;;  %v8110_v56 = vcombine.low %v1927_v44, %v1931_v45 }
 0x40a   :  { %v8113_v8 = vcombine.high %v1928_v12, %v1932_v13  ;;  %v8112_v58 = vcombine.low %v1928_v12, %v1932_v13 }
 0x40b   :  { %4823 = vmatpush1.bf16.msra.mxu0 %v8054_v50  ;;  %4987 = vmatpush1.bf16.msra.mxu1 %v8056_v7  ;;  %v1935_v50 = vld [vmem:[%s14636_s4 + $0x7c0] sm:$0xff] }
 0x40c   :  { %4824 = vmatprep.subr.bf16.mxu0 %v8063_v52  ;;  %4988 = vmatprep.subr.bf16.mxu1 %v8065_v53  ;;  %v1939_v7 = vld [vmem:[%s14636_s4 + $0x7e0] sm:$0xff]  ;;  %v1936_v52 = vld [vmem:[%s14636_s4 + $0x7c8] sm:$0xff] }
 0x40d   :  { %v1940_v53 = vld [vmem:[%s14636_s4 + $0x7e8] sm:$0xff]  ;;  %v8119_v60 = vcombine.high %v1935_v50, %v1939_v7  ;;  %v8118_v59 = vcombine.low %v1935_v50, %v1939_v7 }
 0x40e   :  { %v8121_v61 = vcombine.high %v1936_v52, %v1940_v53  ;;  %v8120_v3 = vcombine.low %v1936_v52, %v1940_v53 }
 0x40f   :  { %4825 = vmatpush1.bf16.msra.mxu0 %v8062_v62  ;;  %4989 = vmatpush1.bf16.msra.mxu1 %v8064_v0  ;;  %v1943_v62 = vld [vmem:[%s14636_s4 + $0x800] sm:$0xff] }
 0x410   :  { %4826 = vmatprep.subr.bf16.mxu0 %v8071_v49  ;;  %4990 = vmatprep.subr.bf16.mxu1 %v8073_v63  ;;  %v1947_v0 = vld [vmem:[%s14636_s4 + $0x820] sm:$0xff]  ;;  %v1944_v49 = vld [vmem:[%s14636_s4 + $0x808] sm:$0xff] }
 0x411   :  { %v1948_v63 = vld [vmem:[%s14636_s4 + $0x828] sm:$0xff]  ;;  %v8127_v9 = vcombine.high %v1943_v62, %v1947_v0  ;;  %v8126_v10 = vcombine.low %v1943_v62, %v1947_v0 }
 0x412   :  { %v8129_v54 = vcombine.high %v1944_v49, %v1948_v63  ;;  %v8128_v40 = vcombine.low %v1944_v49, %v1948_v63 }
 0x413   :  { %4827 = vmatpush1.bf16.msra.mxu0 %v8070_v18  ;;  %4991 = vmatpush1.bf16.msra.mxu1 %v8072_v55  ;;  %v1951_v18 = vld [vmem:[%s14636_s4 + $0x840] sm:$0xff] }
 0x414   :  { %4828 = vmatprep.subr.bf16.mxu0 %v8079_v6  ;;  %4992 = vmatprep.subr.bf16.mxu1 %v8081_v14  ;;  %v1955_v55 = vld [vmem:[%s14636_s4 + $0x860] sm:$0xff]  ;;  %v1952_v6 = vld [vmem:[%s14636_s4 + $0x848] sm:$0xff] }
 0x415   :  { %v1956_v14 = vld [vmem:[%s14636_s4 + $0x868] sm:$0xff]  ;;  %v8134_v51 = vcombine.low %v1951_v18, %v1955_v55 }
 0x416   :  { %v8136_v23 = vcombine.low %v1952_v6, %v1956_v14 }
 0x417   :  { %4829 = vmatpush1.bf16.msra.mxu0 %v8078_v19  ;;  %4993 = vmatpush1.bf16.msra.mxu1 %v8080_v20  ;;  %v8135_v19 = vcombine.high %v1951_v18, %v1955_v55  ;;  %v8137_v20 = vcombine.high %v1952_v6, %v1956_v14 }
 0x418   :  { %4830 = vmatprep.subr.bf16.mxu0 %v8087_v21  ;;  %4994 = vmatprep.subr.bf16.mxu1 %v8089_v22  ;;  %v1959_v21 = vld [vmem:[%s14636_s4 + $0x880] sm:$0xff] }
 0x419   :  { %v1963_v22 = vld [vmem:[%s14636_s4 + $0x8a0] sm:$0xff] }
 0x41a   :  { %v8143_v24 = vcombine.high %v1959_v21, %v1963_v22  ;;  %v8142_v30 = vcombine.low %v1959_v21, %v1963_v22 }
 0x41b   :  { %4831 = vmatpush1.bf16.msra.mxu0 %v8086_v26  ;;  %4995 = vmatpush1.bf16.msra.mxu1 %v8088_v27  ;;  %v1967_v26 = vld [vmem:[%s14636_s4 + $0x8c0] sm:$0xff] }
 0x41c   :  { %4832 = vmatprep.subr.bf16.mxu0 %v8095_v28  ;;  %4996 = vmatprep.subr.bf16.mxu1 %v8097_v29  ;;  %v1971_v27 = vld [vmem:[%s14636_s4 + $0x8e0] sm:$0xff]  ;;  %v1968_v28 = vld [vmem:[%s14636_s4 + $0x8c8] sm:$0xff] }
 0x41d   :  { %v1972_v29 = vld [vmem:[%s14636_s4 + $0x8e8] sm:$0xff]  ;;  %v8151_v32 = vcombine.high %v1967_v26, %v1971_v27  ;;  %v8150_v44 = vcombine.low %v1967_v26, %v1971_v27 }
 0x41e   :  { %v8153_v33 = vcombine.high %v1968_v28, %v1972_v29  ;;  %v8152_v45 = vcombine.low %v1968_v28, %v1972_v29 }
 0x41f   :  { %4833 = vmatpush1.bf16.msra.mxu0 %v8094_v35  ;;  %4997 = vmatpush1.bf16.msra.mxu1 %v8096_v37  ;;  %v1975_v35 = vld [vmem:[%s14636_s4 + $0x900] sm:$0xff] }
 0x420   :  { %4834 = vmatprep.subr.bf16.mxu0 %v8103_v38  ;;  %4998 = vmatprep.subr.bf16.mxu1 %v8105_v42  ;;  %v1979_v37 = vld [vmem:[%s14636_s4 + $0x920] sm:$0xff]  ;;  %v1976_v38 = vld [vmem:[%s14636_s4 + $0x908] sm:$0xff] }
 0x421   :  { %v1980_v42 = vld [vmem:[%s14636_s4 + $0x928] sm:$0xff]  ;;  %v8159_v12 = vcombine.high %v1975_v35, %v1979_v37  ;;  %v8158_v50 = vcombine.low %v1975_v35, %v1979_v37 }
 0x422   :  { %v8161_v13 = vcombine.high %v1976_v38, %v1980_v42  ;;  %v8160_v7 = vcombine.low %v1976_v38, %v1980_v42 }
 0x423   :  { %4835 = vmatpush1.bf16.msra.mxu0 %v8102_v15  ;;  %4999 = vmatpush1.bf16.msra.mxu1 %v8104_v1  ;;  %v1983_v15 = vld [vmem:[%s14636_s4 + $0x940] sm:$0xff] }
 0x424   :  { %4836 = vmatprep.subr.bf16.mxu0 %v8111_v48  ;;  %5000 = vmatprep.subr.bf16.mxu1 %v8113_v8  ;;  %v1987_v1 = vld [vmem:[%s14636_s4 + $0x960] sm:$0xff]  ;;  %v1984_v48 = vld [vmem:[%s14636_s4 + $0x948] sm:$0xff] }
 0x425   :  { %v1988_v8 = vld [vmem:[%s14636_s4 + $0x968] sm:$0xff]  ;;  %v8167_v52 = vcombine.high %v1983_v15, %v1987_v1  ;;  %v8166_v62 = vcombine.low %v1983_v15, %v1987_v1 }
 0x426   :  { %v8169_v53 = vcombine.high %v1984_v48, %v1988_v8  ;;  %v8168_v0 = vcombine.low %v1984_v48, %v1988_v8 }
 0x427   :  { %4837 = vmatpush1.bf16.msra.mxu0 %v8110_v56  ;;  %5001 = vmatpush1.bf16.msra.mxu1 %v8112_v58  ;;  %v1991_v56 = vld [vmem:[%s14636_s4 + $0x980] sm:$0xff] }
 0x428   :  { %4838 = vmatprep.subr.bf16.mxu0 %v8119_v60  ;;  %5002 = vmatprep.subr.bf16.mxu1 %v8121_v61  ;;  %v1995_v58 = vld [vmem:[%s14636_s4 + $0x9a0] sm:$0xff]  ;;  %v1992_v60 = vld [vmem:[%s14636_s4 + $0x988] sm:$0xff] }
 0x429   :  { %v1996_v61 = vld [vmem:[%s14636_s4 + $0x9a8] sm:$0xff]  ;;  %v8175_v49 = vcombine.high %v1991_v56, %v1995_v58  ;;  %v8174_v18 = vcombine.low %v1991_v56, %v1995_v58 }
 0x42a   :  { %v8177_v63 = vcombine.high %v1992_v60, %v1996_v61  ;;  %v8176_v55 = vcombine.low %v1992_v60, %v1996_v61 }
 0x42b   :  { %4839 = vmatpush1.bf16.msra.mxu0 %v8118_v59  ;;  %5003 = vmatpush1.bf16.msra.mxu1 %v8120_v3  ;;  %v1999_v59 = vld [vmem:[%s14636_s4 + $0x9c0] sm:$0xff] }
 0x42c   :  { %4849 = vmatprep.subr.bf16.mxu0 %v8127_v9  ;;  %5013 = vmatprep.subr.bf16.mxu1 %v8129_v54  ;;  %v2003_v3 = vld [vmem:[%s14636_s4 + $0x9e0] sm:$0xff]  ;;  %v2000_v9 = vld [vmem:[%s14636_s4 + $0x9c8] sm:$0xff] }
 0x42d   :  { %v2004_v54 = vld [vmem:[%s14636_s4 + $0x9e8] sm:$0xff]  ;;  %v8183_v6 = vcombine.high %v1999_v59, %v2003_v3  ;;  %v8182_v21 = vcombine.low %v1999_v59, %v2003_v3 }
 0x42e   :  { %4841 = vmatmul.mubr.bf16.vlgmr.msra.gmra.mrb[24].mxu0 %v11368_v11  ;;  %5005 = vmatmul.mubr.bf16.vlgmr.msra.gmra.mrb[16].mxu1 %v11368_v11  ;;  %v8185_v14 = vcombine.high %v2000_v9, %v2004_v54  ;;  %v8184_v22 = vcombine.low %v2000_v9, %v2004_v54 }
 0x42f   :  { %4850 = vmatpush1.bf16.msra.mxu0 %v8126_v10  ;;  %4881 = vmatprep.mubr.bf16.mxu0 %v11372_v17  ;;  %v2007_v10 = vld [vmem:[%s14636_s4 + $0xa00] sm:$0xff] }
 0x430   :  { %5014 = vmatpush1.bf16.msra.mxu1 %v8128_v40  ;;  %5045 = vmatprep.mubr.bf16.mxu1 %v11372_v17  ;;  %v2011_v40 = vld [vmem:[%s14636_s4 + $0xa20] sm:$0xff] }
 0x431   :  { %4851 = vmatprep.subr.bf16.mxu0 %v8135_v19  ;;  %5015 = vmatprep.subr.bf16.mxu1 %v8137_v20  ;;  %v2008_v19 = vld [vmem:[%s14636_s4 + $0xa08] sm:$0xff]  ;;  %v8191_v46 = vcombine.high %v2007_v10, %v2011_v40  ;;  %v8190_v26 = vcombine.low %v2007_v10, %v2011_v40 }
 0x432   :  { %v2012_v20 = vld [vmem:[%s14636_s4 + $0xa28] sm:$0xff] }
 0x433   :  { %4852 = vmatpush1.bf16.msra.mxu0 %v8134_v51  ;;  %v8193_v2 = vcombine.high %v2008_v19, %v2012_v20  ;;  %v2015_v51 = vld [vmem:[%s14636_s4 + $0xa40] sm:$0xff]  ;;  %v8192_v27 = vcombine.low %v2008_v19, %v2012_v20 }
 0x434   :  { %5016 = vmatpush1.bf16.msra.mxu1 %v8136_v23  ;;  %4853 = vmatprep.subr.bf16.mxu0 %v8143_v24  ;;  %v2019_v23 = vld [vmem:[%s14636_s4 + $0xa60] sm:$0xff]  ;;  %v2016_v24 = vld [vmem:[%s14636_s4 + $0xa48] sm:$0xff] }
 0x435   :  { %5017 = vmatprep.subr.bf16.mxu1 %v8145_v25  ;;  %v2020_v25 = vld [vmem:[%s14636_s4 + $0xa68] sm:$0xff]  ;;  %v8199_v28 = vcombine.high %v2015_v51, %v2019_v23  ;;  %v8198_v35 = vcombine.low %v2015_v51, %v2019_v23 }
 0x436   :  { %v8201_v29 = vcombine.high %v2016_v24, %v2020_v25  ;;  %v8200_v37 = vcombine.low %v2016_v24, %v2020_v25 }
 0x437   :  { %4854 = vmatpush1.bf16.msra.mxu0 %v8142_v30  ;;  %v2023_v30 = vld [vmem:[%s14636_s4 + $0xa80] sm:$0xff] }
 0x438   :  { %5018 = vmatpush1.bf16.msra.mxu1 %v8144_v31  ;;  %4855 = vmatprep.subr.bf16.mxu0 %v8151_v32  ;;  %v2027_v31 = vld [vmem:[%s14636_s4 + $0xaa0] sm:$0xff]  ;;  %v2024_v32 = vld [vmem:[%s14636_s4 + $0xa88] sm:$0xff] }
 0x439   :  { %5019 = vmatprep.subr.bf16.mxu1 %v8153_v33  ;;  %v2028_v33 = vld [vmem:[%s14636_s4 + $0xaa8] sm:$0xff]  ;;  %v8207_v38 = vcombine.high %v2023_v30, %v2027_v31  ;;  %v8206_v15 = vcombine.low %v2023_v30, %v2027_v31 }
 0x43a   :  { %v8209_v42 = vcombine.high %v2024_v32, %v2028_v33  ;;  %v8208_v1 = vcombine.low %v2024_v32, %v2028_v33 }
 0x43b   :  { %4856 = vmatpush1.bf16.msra.mxu0 %v8150_v44  ;;  %v2031_v44 = vld [vmem:[%s14636_s4 + $0xac0] sm:$0xff] }
 0x43c   :  { %5020 = vmatpush1.bf16.msra.mxu1 %v8152_v45  ;;  %4857 = vmatprep.subr.bf16.mxu0 %v8159_v12  ;;  %v2035_v45 = vld [vmem:[%s14636_s4 + $0xae0] sm:$0xff]  ;;  %v2032_v12 = vld [vmem:[%s14636_s4 + $0xac8] sm:$0xff] }
 0x43d   :  { %5021 = vmatprep.subr.bf16.mxu1 %v8161_v13  ;;  %v2036_v13 = vld [vmem:[%s14636_s4 + $0xae8] sm:$0xff]  ;;  %v8215_v48 = vcombine.high %v2031_v44, %v2035_v45  ;;  %v8214_v56 = vcombine.low %v2031_v44, %v2035_v45  ;;  %v11572_v45 = vpack.c.bf16 %v11181_v43, %v11181_v43 }
 0x43e   :  { %v8217_v8 = vcombine.high %v2032_v12, %v2036_v13  ;;  %v8216_v58 = vcombine.low %v2032_v12, %v2036_v13  ;;  %v2084_v44 = vld [vmem:[%s14636_s4 + $0xc68] sm:$0xff] }
 0x43f   :  { %4858 = vmatpush1.bf16.msra.mxu0 %v8158_v50  ;;  %v2039_v50 = vld [vmem:[%s14636_s4 + $0xb00] sm:$0xff] }
 0x440   :  { %5022 = vmatpush1.bf16.msra.mxu1 %v8160_v7  ;;  %4859 = vmatprep.subr.bf16.mxu0 %v8167_v52  ;;  %v2043_v7 = vld [vmem:[%s14636_s4 + $0xb20] sm:$0xff]  ;;  %v2040_v52 = vld [vmem:[%s14636_s4 + $0xb08] sm:$0xff] }
 0x441   :  { %5023 = vmatprep.subr.bf16.mxu1 %v8169_v53  ;;  %v2044_v53 = vld [vmem:[%s14636_s4 + $0xb28] sm:$0xff]  ;;  %v8223_v60 = vcombine.high %v2039_v50, %v2043_v7  ;;  %v8222_v59 = vcombine.low %v2039_v50, %v2043_v7 }
 0x442   :  { %v8225_v61 = vcombine.high %v2040_v52, %v2044_v53  ;;  %v8224_v3 = vcombine.low %v2040_v52, %v2044_v53  ;;  %v2092_v50 = vld [vmem:[%s14636_s4 + $0xca8] sm:$0xff] }
 0x443   :  { %4860 = vmatpush1.bf16.msra.mxu0 %v8166_v62  ;;  %v2047_v62 = vld [vmem:[%s14636_s4 + $0xb40] sm:$0xff] }
 0x444   :  { %5024 = vmatpush1.bf16.msra.mxu1 %v8168_v0  ;;  %4861 = vmatprep.subr.bf16.mxu0 %v8175_v49  ;;  %v2051_v0 = vld [vmem:[%s14636_s4 + $0xb60] sm:$0xff]  ;;  %v2048_v49 = vld [vmem:[%s14636_s4 + $0xb48] sm:$0xff] }
 0x445   :  { %5025 = vmatprep.subr.bf16.mxu1 %v8177_v63  ;;  %v2052_v63 = vld [vmem:[%s14636_s4 + $0xb68] sm:$0xff]  ;;  %v8231_v9 = vcombine.high %v2047_v62, %v2051_v0  ;;  %v8230_v10 = vcombine.low %v2047_v62, %v2051_v0 }
 0x446   :  { %v8233_v54 = vcombine.high %v2048_v49, %v2052_v63  ;;  %v8232_v40 = vcombine.low %v2048_v49, %v2052_v63 }
 0x447   :  { %4862 = vmatpush1.bf16.msra.mxu0 %v8174_v18  ;;  %v2055_v18 = vld [vmem:[%s14636_s4 + $0xb80] sm:$0xff] }
 0x448   :  { %5026 = vmatpush1.bf16.msra.mxu1 %v8176_v55  ;;  %4863 = vmatprep.subr.bf16.mxu0 %v8183_v6  ;;  %v2059_v55 = vld [vmem:[%s14636_s4 + $0xba0] sm:$0xff]  ;;  %v2056_v6 = vld [vmem:[%s14636_s4 + $0xb88] sm:$0xff] }
 0x449   :  { %5027 = vmatprep.subr.bf16.mxu1 %v8185_v14  ;;  %v2060_v14 = vld [vmem:[%s14636_s4 + $0xba8] sm:$0xff]  ;;  %v8239_v19 = vcombine.high %v2055_v18, %v2059_v55  ;;  %v8238_v51 = vcombine.low %v2055_v18, %v2059_v55 }
 0x44a   :  { %v8241_v20 = vcombine.high %v2056_v6, %v2060_v14  ;;  %v8240_v23 = vcombine.low %v2056_v6, %v2060_v14 }
 0x44b   :  { %4864 = vmatpush1.bf16.msra.mxu0 %v8182_v21  ;;  %v2063_v21 = vld [vmem:[%s14636_s4 + $0xbc0] sm:$0xff] }
 0x44c   :  { %5028 = vmatpush1.bf16.msra.mxu1 %v8184_v22  ;;  %4865 = vmatprep.subr.bf16.mxu0 %v8191_v46  ;;  %v2067_v22 = vld [vmem:[%s14636_s4 + $0xbe0] sm:$0xff]  ;;  %v2064_v46 = vld [vmem:[%s14636_s4 + $0xbc8] sm:$0xff] }
 0x44d   :  { %5029 = vmatprep.subr.bf16.mxu1 %v8193_v2  ;;  %v2068_v2 = vld [vmem:[%s14636_s4 + $0xbe8] sm:$0xff]  ;;  %v8247_v24 = vcombine.high %v2063_v21, %v2067_v22  ;;  %v8246_v30 = vcombine.low %v2063_v21, %v2067_v22 }
 0x44e   :  { %v8249_v25 = vcombine.high %v2064_v46, %v2068_v2  ;;  %v8248_v31 = vcombine.low %v2064_v46, %v2068_v2 }
 0x44f   :  { %4866 = vmatpush1.bf16.msra.mxu0 %v8190_v26  ;;  %v2071_v26 = vld [vmem:[%s14636_s4 + $0xc00] sm:$0xff] }
 0x450   :  { %5030 = vmatpush1.bf16.msra.mxu1 %v8192_v27  ;;  %4867 = vmatprep.subr.bf16.mxu0 %v8199_v28  ;;  %v2075_v27 = vld [vmem:[%s14636_s4 + $0xc20] sm:$0xff]  ;;  %v2072_v28 = vld [vmem:[%s14636_s4 + $0xc08] sm:$0xff] }
 0x451   :  { %5031 = vmatprep.subr.bf16.mxu1 %v8201_v29  ;;  %v2076_v29 = vld [vmem:[%s14636_s4 + $0xc28] sm:$0xff]  ;;  %v8255_v32 = vcombine.high %v2071_v26, %v2075_v27 }
 0x452   :  { %v8257_v33 = vcombine.high %v2072_v28, %v2076_v29  ;;  %v8256_v12 = vcombine.low %v2072_v28, %v2076_v29 }
 0x453   :  { %4868 = vmatpush1.bf16.msra.mxu0 %v8198_v35  ;;  %v2079_v35 = vld [vmem:[%s14636_s4 + $0xc40] sm:$0xff] }
 0x454   :  { %5032 = vmatpush1.bf16.msra.mxu1 %v8200_v37  ;;  %4869 = vmatprep.subr.bf16.mxu0 %v8207_v38  ;;  %v2083_v37 = vld [vmem:[%s14636_s4 + $0xc60] sm:$0xff]  ;;  %v8254_v38 = vcombine.low %v2071_v26, %v2075_v27 }
 0x455   :  { %5033 = vmatprep.subr.bf16.mxu1 %v8209_v42  ;;  %v2080_v42 = vld [vmem:[%s14636_s4 + $0xc48] sm:$0xff]  ;;  %v8263_v13 = vcombine.high %v2079_v35, %v2083_v37  ;;  %v8262_v7 = vcombine.low %v2079_v35, %v2083_v37 }
 0x456   :  { %v8265_v43 = vcombine.high %v2080_v42, %v2084_v44 }
 0x457   :  { %4870 = vmatpush1.bf16.msra.mxu0 %v8206_v15  ;;  %v2087_v15 = vld [vmem:[%s14636_s4 + $0xc80] sm:$0xff] }
 0x458   :  { %5034 = vmatpush1.bf16.msra.mxu1 %v8208_v1  ;;  %4871 = vmatprep.subr.bf16.mxu0 %v8215_v48  ;;  %v2091_v1 = vld [vmem:[%s14636_s4 + $0xca0] sm:$0xff]  ;;  %v11582_v48 = vpack.c.bf16 %v11196_v57, %v11196_v57  ;;  %v8264_v57 = vcombine.low %v2080_v42, %v2084_v44 }
 0x459   :  { %5035 = vmatprep.subr.bf16.mxu1 %v8217_v8  ;;  %v2088_v8 = vld [vmem:[%s14636_s4 + $0xc88] sm:$0xff]  ;;  %v8271_v52 = vcombine.high %v2087_v15, %v2091_v1  ;;  %v8270_v62 = vcombine.low %v2087_v15, %v2091_v1  ;;  %v2135_v44 = vld [vmem:[%s14636_s4 + $0xe00] sm:$0xff] }
 0x45a   :  { %v8273_v53 = vcombine.high %v2088_v8, %v2092_v50  ;;  %v8272_v0 = vcombine.low %v2088_v8, %v2092_v50  ;;  %v2140_v15 = vld [vmem:[%s14636_s4 + $0xe28] sm:$0xff] }
 0x45b   :  { %4872 = vmatpush1.bf16.msra.mxu0 %v8214_v56  ;;  %v2095_v56 = vld [vmem:[%s14636_s4 + $0xcc0] sm:$0xff] }
 0x45c   :  { %5036 = vmatpush1.bf16.msra.mxu1 %v8216_v58  ;;  %4873 = vmatprep.subr.bf16.mxu0 %v8223_v60  ;;  %v2099_v58 = vld [vmem:[%s14636_s4 + $0xce0] sm:$0xff]  ;;  %v2096_v60 = vld [vmem:[%s14636_s4 + $0xcc8] sm:$0xff] }
 0x45d   :  { %5037 = vmatprep.subr.bf16.mxu1 %v8225_v61  ;;  %v2100_v61 = vld [vmem:[%s14636_s4 + $0xce8] sm:$0xff]  ;;  %v8279_v49 = vcombine.high %v2095_v56, %v2099_v58  ;;  %v8278_v18 = vcombine.low %v2095_v56, %v2099_v58 }
 0x45e   :  { %v8281_v63 = vcombine.high %v2096_v60, %v2100_v61  ;;  %v8280_v55 = vcombine.low %v2096_v60, %v2100_v61 }
 0x45f   :  { %4874 = vmatpush1.bf16.msra.mxu0 %v8222_v59  ;;  %v2103_v59 = vld [vmem:[%s14636_s4 + $0xd00] sm:$0xff] }
 0x460   :  { %5038 = vmatpush1.bf16.msra.mxu1 %v8224_v3  ;;  %4875 = vmatprep.subr.bf16.mxu0 %v8231_v9  ;;  %v2107_v3 = vld [vmem:[%s14636_s4 + $0xd20] sm:$0xff]  ;;  %v2104_v9 = vld [vmem:[%s14636_s4 + $0xd08] sm:$0xff] }
 0x461   :  { %5039 = vmatprep.subr.bf16.mxu1 %v8233_v54  ;;  %v2108_v54 = vld [vmem:[%s14636_s4 + $0xd28] sm:$0xff]  ;;  %v8287_v6 = vcombine.high %v2103_v59, %v2107_v3  ;;  %v8286_v21 = vcombine.low %v2103_v59, %v2107_v3 }
 0x462   :  { %v8289_v14 = vcombine.high %v2104_v9, %v2108_v54  ;;  %v8288_v22 = vcombine.low %v2104_v9, %v2108_v54 }
 0x463   :  { %4876 = vmatpush1.bf16.msra.mxu0 %v8230_v10  ;;  %v2111_v10 = vld [vmem:[%s14636_s4 + $0xd40] sm:$0xff] }
 0x464   :  { %5040 = vmatpush1.bf16.msra.mxu1 %v8232_v40  ;;  %4877 = vmatprep.subr.bf16.mxu0 %v8239_v19  ;;  %v2115_v40 = vld [vmem:[%s14636_s4 + $0xd60] sm:$0xff]  ;;  %v2112_v19 = vld [vmem:[%s14636_s4 + $0xd48] sm:$0xff] }
 0x465   :  { %5041 = vmatprep.subr.bf16.mxu1 %v8241_v20  ;;  %v2116_v20 = vld [vmem:[%s14636_s4 + $0xd68] sm:$0xff]  ;;  %v8295_v46 = vcombine.high %v2111_v10, %v2115_v40  ;;  %v8294_v26 = vcombine.low %v2111_v10, %v2115_v40 }
 0x466   :  { %v8297_v2 = vcombine.high %v2112_v19, %v2116_v20  ;;  %v8296_v27 = vcombine.low %v2112_v19, %v2116_v20 }
 0x467   :  { %4878 = vmatpush1.bf16.msra.mxu0 %v8238_v51  ;;  %v2119_v51 = vld [vmem:[%s14636_s4 + $0xd80] sm:$0xff] }
 0x468   :  { %5042 = vmatpush1.bf16.msra.mxu1 %v8240_v23  ;;  %4879 = vmatprep.subr.bf16.mxu0 %v8247_v24  ;;  %v2123_v23 = vld [vmem:[%s14636_s4 + $0xda0] sm:$0xff]  ;;  %v2120_v24 = vld [vmem:[%s14636_s4 + $0xd88] sm:$0xff] }
 0x469   :  { %5043 = vmatprep.subr.bf16.mxu1 %v8249_v25  ;;  %v2124_v25 = vld [vmem:[%s14636_s4 + $0xda8] sm:$0xff]  ;;  %v8303_v28 = vcombine.high %v2119_v51, %v2123_v23  ;;  %v8302_v35 = vcombine.low %v2119_v51, %v2123_v23 }
 0x46a   :  { %v8305_v29 = vcombine.high %v2120_v24, %v2124_v25  ;;  %v8304_v37 = vcombine.low %v2120_v24, %v2124_v25 }
 0x46b   :  { %4880 = vmatpush1.bf16.msra.mxu0 %v8246_v30  ;;  %v2127_v30 = vld [vmem:[%s14636_s4 + $0xdc0] sm:$0xff] }
 0x46c   :  { %5044 = vmatpush1.bf16.msra.mxu1 %v8248_v31  ;;  %4890 = vmatprep.subr.bf16.mxu0 %v8255_v32  ;;  %v2131_v31 = vld [vmem:[%s14636_s4 + $0xde0] sm:$0xff]  ;;  %v2128_v32 = vld [vmem:[%s14636_s4 + $0xdc8] sm:$0xff] }
 0x46d   :  { %5054 = vmatprep.subr.bf16.mxu1 %v8257_v33  ;;  %v2132_v33 = vld [vmem:[%s14636_s4 + $0xde8] sm:$0xff]  ;;  %v8310_v1 = vcombine.low %v2127_v30, %v2131_v31 }
 0x46e   :  { %4882 = vmatmul.mubr.bf16.vlgmr.msra.gmra.mrb[24].mxu0 %v11572_v45  ;;  %v8313_v42 = vcombine.high %v2128_v32, %v2132_v33 }
 0x46f   :  { %5046 = vmatmul.mubr.bf16.vlgmr.msra.gmra.mrb[16].mxu1 %v11572_v45  ;;  %4891 = vmatpush1.bf16.msra.mxu0 %v8254_v38  ;;  %v8311_v38 = vcombine.high %v2127_v30, %v2131_v31 }
 0x470   :  { %4922 = vmatprep.mubr.bf16.mxu0 %v11582_v48  ;;  %5055 = vmatpush1.bf16.msra.mxu1 %v8256_v12  ;;  %v2139_v12 = vld [vmem:[%s14636_s4 + $0xe20] sm:$0xff] }
 0x471   :  { %5086 = vmatprep.mubr.bf16.mxu1 %v11582_v48  ;;  %4892 = vmatprep.subr.bf16.mxu0 %v8263_v13  ;;  %v2136_v13 = vld [vmem:[%s14636_s4 + $0xe08] sm:$0xff]  ;;  %v8319_v8 = vcombine.high %v2135_v44, %v2139_v12  ;;  %v8318_v56 = vcombine.low %v2135_v44, %v2139_v12 }
 0x472   :  { %5056 = vmatprep.subr.bf16.mxu1 %v8265_v43  ;;  %v8312_v43 = vcombine.low %v2128_v32, %v2132_v33  ;;  %v8321_v50 = vcombine.high %v2136_v13, %v2140_v15  ;;  %v8320_v58 = vcombine.low %v2136_v13, %v2140_v15 }
 0x473   :  { %4893 = vmatpush1.bf16.msra.mxu0 %v8262_v7  ;;  %v2143_v7 = vld [vmem:[%s14636_s4 + $0xe40] sm:$0xff] }
 0x474   :  { %5057 = vmatpush1.bf16.msra.mxu1 %v8264_v57  ;;  %4894 = vmatprep.subr.bf16.mxu0 %v8271_v52  ;;  %v2147_v57 = vld [vmem:[%s14636_s4 + $0xe60] sm:$0xff]  ;;  %v2144_v52 = vld [vmem:[%s14636_s4 + $0xe48] sm:$0xff] }
 0x475   :  { %5058 = vmatprep.subr.bf16.mxu1 %v8273_v53  ;;  %v2148_v53 = vld [vmem:[%s14636_s4 + $0xe68] sm:$0xff]  ;;  %v8327_v60 = vcombine.high %v2143_v7, %v2147_v57  ;;  %v8326_v59 = vcombine.low %v2143_v7, %v2147_v57 }
 0x476   :  { %v8329_v61 = vcombine.high %v2144_v52, %v2148_v53  ;;  %v8328_v3 = vcombine.low %v2144_v52, %v2148_v53 }
 0x477   :  { %4895 = vmatpush1.bf16.msra.mxu0 %v8270_v62  ;;  %v2151_v62 = vld [vmem:[%s14636_s4 + $0xe80] sm:$0xff] }
 0x478   :  { %5059 = vmatpush1.bf16.msra.mxu1 %v8272_v0  ;;  %4896 = vmatprep.subr.bf16.mxu0 %v8279_v49  ;;  %v2155_v0 = vld [vmem:[%s14636_s4 + $0xea0] sm:$0xff]  ;;  %v2152_v49 = vld [vmem:[%s14636_s4 + $0xe88] sm:$0xff] }
 0x479   :  { %5060 = vmatprep.subr.bf16.mxu1 %v8281_v63  ;;  %v2156_v63 = vld [vmem:[%s14636_s4 + $0xea8] sm:$0xff]  ;;  %v8335_v9 = vcombine.high %v2151_v62, %v2155_v0  ;;  %v8334_v10 = vcombine.low %v2151_v62, %v2155_v0 }
 0x47a   :  { %v8337_v54 = vcombine.high %v2152_v49, %v2156_v63  ;;  %v8336_v40 = vcombine.low %v2152_v49, %v2156_v63 }
 0x47b   :  { %4897 = vmatpush1.bf16.msra.mxu0 %v8278_v18  ;;  %v2159_v18 = vld [vmem:[%s14636_s4 + $0xec0] sm:$0xff] }
 0x47c   :  { %5061 = vmatpush1.bf16.msra.mxu1 %v8280_v55  ;;  %4898 = vmatprep.subr.bf16.mxu0 %v8287_v6  ;;  %v2163_v55 = vld [vmem:[%s14636_s4 + $0xee0] sm:$0xff]  ;;  %v2160_v6 = vld [vmem:[%s14636_s4 + $0xec8] sm:$0xff] }
 0x47d   :  { %5062 = vmatprep.subr.bf16.mxu1 %v8289_v14  ;;  %v2164_v14 = vld [vmem:[%s14636_s4 + $0xee8] sm:$0xff]  ;;  %v8343_v19 = vcombine.high %v2159_v18, %v2163_v55  ;;  %v8342_v51 = vcombine.low %v2159_v18, %v2163_v55  ;;  %v1702_v18 = vld [vmem:[%s14636_s4 + $0x78] sm:$0xff]  ;;  %v11776_v55 = vpack.c.bf16 %v11194_v4, %v11194_v4 }
 0x47e   :  { %v8345_v20 = vcombine.high %v2160_v6, %v2164_v14  ;;  %v8344_v23 = vcombine.low %v2160_v6, %v2164_v14  ;;  %v1706_v4 = vld [vmem:[%s14636_s4 + $0x98] sm:$0xff] }
 0x47f   :  { %4899 = vmatpush1.bf16.msra.mxu0 %v8286_v21  ;;  %v2167_v21 = vld [vmem:[%s14636_s4 + $0xf00] sm:$0xff] }
 0x480   :  { %5063 = vmatpush1.bf16.msra.mxu1 %v8288_v22  ;;  %4900 = vmatprep.subr.bf16.mxu0 %v8295_v46  ;;  %v2171_v22 = vld [vmem:[%s14636_s4 + $0xf20] sm:$0xff]  ;;  %v2168_v46 = vld [vmem:[%s14636_s4 + $0xf08] sm:$0xff] }
 0x481   :  { %5064 = vmatprep.subr.bf16.mxu1 %v8297_v2  ;;  %v2172_v2 = vld [vmem:[%s14636_s4 + $0xf28] sm:$0xff]  ;;  %v8351_v24 = vcombine.high %v2167_v21, %v2171_v22  ;;  %v8350_v30 = vcombine.low %v2167_v21, %v2171_v22 }
 0x482   :  { %v8353_v25 = vcombine.high %v2168_v46, %v2172_v2  ;;  %v8352_v31 = vcombine.low %v2168_v46, %v2172_v2 }
 0x483   :  { %4901 = vmatpush1.bf16.msra.mxu0 %v8294_v26  ;;  %v2175_v26 = vld [vmem:[%s14636_s4 + $0xf40] sm:$0xff] }
 0x484   :  { %5065 = vmatpush1.bf16.msra.mxu1 %v8296_v27  ;;  %4902 = vmatprep.subr.bf16.mxu0 %v8303_v28  ;;  %v2179_v27 = vld [vmem:[%s14636_s4 + $0xf60] sm:$0xff]  ;;  %v2176_v28 = vld [vmem:[%s14636_s4 + $0xf48] sm:$0xff] }
 0x485   :  { %5066 = vmatprep.subr.bf16.mxu1 %v8305_v29  ;;  %v2180_v29 = vld [vmem:[%s14636_s4 + $0xf68] sm:$0xff]  ;;  %v8359_v32 = vcombine.high %v2175_v26, %v2179_v27  ;;  %v8358_v44 = vcombine.low %v2175_v26, %v2179_v27 }
 0x486   :  { %v8361_v33 = vcombine.high %v2176_v28, %v2180_v29  ;;  %v8360_v12 = vcombine.low %v2176_v28, %v2180_v29  ;;  %v1721_v29 = vld [vmem:[%s14636_s4 + $0x110] sm:$0xff] }
 0x487   :  { %4903 = vmatpush1.bf16.msra.mxu0 %v8302_v35  ;;  %v2183_v35 = vld [vmem:[%s14636_s4 + $0xf80] sm:$0xff] }
 0x488   :  { %5067 = vmatpush1.bf16.msra.mxu1 %v8304_v37  ;;  %4904 = vmatprep.subr.bf16.mxu0 %v8311_v38  ;;  %v2187_v37 = vld [vmem:[%s14636_s4 + $0xfa0] sm:$0xff]  ;;  %v2184_v38 = vld [vmem:[%s14636_s4 + $0xf88] sm:$0xff] }
 0x489   :  { %5068 = vmatprep.subr.bf16.mxu1 %v8313_v42  ;;  %v2188_v42 = vld [vmem:[%s14636_s4 + $0xfa8] sm:$0xff]  ;;  %v8367_v13 = vcombine.high %v2183_v35, %v2187_v37  ;;  %v8366_v7 = vcombine.low %v2183_v35, %v2187_v37 }
 0x48a   :  { %v8369_v15 = vcombine.high %v2184_v38, %v2188_v42  ;;  %v8368_v57 = vcombine.low %v2184_v38, %v2188_v42  ;;  %v1729_v42 = vld [vmem:[%s14636_s4 + $0x150] sm:$0xff] }
 0x48b   :  { %4905 = vmatpush1.bf16.msra.mxu0 %v8310_v1  ;;  %v2191_v1 = vld [vmem:[%s14636_s4 + $0xfc0] sm:$0xff] }
 0x48c   :  { %5069 = vmatpush1.bf16.msra.mxu1 %v8312_v43  ;;  %4906 = vmatprep.subr.bf16.mxu0 %v8319_v8  ;;  %v2195_v43 = vld [vmem:[%s14636_s4 + $0xfe0] sm:$0xff]  ;;  %v2192_v8 = vld [vmem:[%s14636_s4 + $0xfc8] sm:$0xff] }
 0x48d   :  { %5070 = vmatprep.subr.bf16.mxu1 %v8321_v50  ;;  %v2196_v50 = vld [vmem:[%s14636_s4 + $0xfe8] sm:$0xff]  ;;  %v8375_v52 = vcombine.high %v2191_v1, %v2195_v43  ;;  %v8374_v62 = vcombine.low %v2191_v1, %v2195_v43 }
 0x48e   :  { %v8377_v53 = vcombine.high %v2192_v8, %v2196_v50  ;;  %v8376_v0 = vcombine.low %v2192_v8, %v2196_v50  ;;  %v1737_v50 = vld [vmem:[%s14636_s4 + $0x190] sm:$0xff] }
 0x48f   :  { %4907 = vmatpush1.bf16.msra.mxu0 %v8318_v56  ;;  %v1689_v56 = vld [vmem:[%s14636_s4 + $0x10] sm:$0xff] }
 0x490   :  { %5071 = vmatpush1.bf16.msra.mxu1 %v8320_v58  ;;  %4908 = vmatprep.subr.bf16.mxu0 %v8327_v60  ;;  %v1693_v58 = vld [vmem:[%s14636_s4 + $0x30] sm:$0xff]  ;;  %v1690_v60 = vld [vmem:[%s14636_s4 + $0x18] sm:$0xff] }
 0x491   :  { %5072 = vmatprep.subr.bf16.mxu1 %v8329_v61  ;;  %v1694_v61 = vld [vmem:[%s14636_s4 + $0x38] sm:$0xff]  ;;  %v7875_v49 = vcombine.high %v1689_v56, %v1693_v58 }
 0x492   :  { %v7877_v63 = vcombine.high %v1690_v60, %v1694_v61  ;;  %v7876_v6 = vcombine.low %v1690_v60, %v1694_v61  ;;  %v1745_v61 = vld [vmem:[%s14636_s4 + $0x1d0] sm:$0xff] }
 0x493   :  { %4909 = vmatpush1.bf16.msra.mxu0 %v8326_v59  ;;  %v1697_v59 = vld [vmem:[%s14636_s4 + $0x50] sm:$0xff] }
 0x494   :  { %5073 = vmatpush1.bf16.msra.mxu1 %v8328_v3  ;;  %4910 = vmatprep.subr.bf16.mxu0 %v8335_v9  ;;  %v1701_v3 = vld [vmem:[%s14636_s4 + $0x70] sm:$0xff]  ;;  %v7874_v9 = vcombine.low %v1689_v56, %v1693_v58 }
 0x495   :  { %5074 = vmatprep.subr.bf16.mxu1 %v8337_v54  ;;  %v1698_v54 = vld [vmem:[%s14636_s4 + $0x58] sm:$0xff]  ;;  %v7883_v14 = vcombine.high %v1697_v59, %v1701_v3  ;;  %v7882_v21 = vcombine.low %v1697_v59, %v1701_v3 }
 0x496   :  { %v7884_v22 = vcombine.low %v1698_v54, %v1702_v18 }
 0x497   :  { %4911 = vmatpush1.bf16.msra.mxu0 %v8334_v10  ;;  %v1705_v10 = vld [vmem:[%s14636_s4 + $0x90] sm:$0xff] }
 0x498   :  { %5075 = vmatpush1.bf16.msra.mxu1 %v8336_v40  ;;  %4912 = vmatprep.subr.bf16.mxu0 %v8343_v19  ;;  %v1709_v40 = vld [vmem:[%s14636_s4 + $0xb0] sm:$0xff]  ;;  %v7885_v19 = vcombine.high %v1698_v54, %v1702_v18 }
 0x499   :  { %5076 = vmatprep.subr.bf16.mxu1 %v8345_v20  ;;  %v1710_v20 = vld [vmem:[%s14636_s4 + $0xb8] sm:$0xff]  ;;  %v7891_v46 = vcombine.high %v1705_v10, %v1709_v40  ;;  %v1753_v54 = vld [vmem:[%s14636_s4 + $0x210] sm:$0xff] }
 0x49a   :  { %v7893_v2 = vcombine.high %v1706_v4, %v1710_v20  ;;  %v7892_v26 = vcombine.low %v1706_v4, %v1710_v20  ;;  %v1757_v18 = vld [vmem:[%s14636_s4 + $0x230] sm:$0xff] }
 0x49b   :  { %4913 = vmatpush1.bf16.msra.mxu0 %v8342_v51  ;;  %v1713_v51 = vld [vmem:[%s14636_s4 + $0xd0] sm:$0xff] }
 0x49c   :  { %5077 = vmatpush1.bf16.msra.mxu1 %v8344_v23  ;;  %4914 = vmatprep.subr.bf16.mxu0 %v8351_v24  ;;  %v1717_v23 = vld [vmem:[%s14636_s4 + $0xf0] sm:$0xff]  ;;  %v1714_v24 = vld [vmem:[%s14636_s4 + $0xd8] sm:$0xff] }
 0x49d   :  { %5078 = vmatprep.subr.bf16.mxu1 %v8353_v25  ;;  %v1718_v25 = vld [vmem:[%s14636_s4 + $0xf8] sm:$0xff]  ;;  %v7899_v27 = vcombine.high %v1713_v51, %v1717_v23  ;;  %v1761_v20 = vld [vmem:[%s14636_s4 + $0x250] sm:$0xff] }
 0x49e   :  { %v7901_v28 = vcombine.high %v1714_v24, %v1718_v25  ;;  %v7900_v35 = vcombine.low %v1714_v24, %v1718_v25  ;;  %v1769_v25 = vld [vmem:[%s14636_s4 + $0x290] sm:$0xff] }
 0x49f   :  { %4915 = vmatpush1.bf16.msra.mxu0 %v8350_v30  ;;  %v1725_v30 = vld [vmem:[%s14636_s4 + $0x130] sm:$0xff] }
 0x4a0   :  { %5079 = vmatpush1.bf16.msra.mxu1 %v8352_v31  ;;  %4916 = vmatprep.subr.bf16.mxu0 %v8359_v32  ;;  %v1722_v31 = vld [vmem:[%s14636_s4 + $0x118] sm:$0xff]  ;;  %v7907_v37 = vcombine.high %v1721_v29, %v1725_v30 }
 0x4a1   :  { %5080 = vmatprep.subr.bf16.mxu1 %v8361_v33  ;;  %v1726_v32 = vld [vmem:[%s14636_s4 + $0x138] sm:$0xff]  ;;  %v7898_v33 = vcombine.low %v1713_v51, %v1717_v23 }
 0x4a2   :  { %v7909_v38 = vcombine.high %v1722_v31, %v1726_v32  ;;  %v7908_v1 = vcombine.low %v1722_v31, %v1726_v32  ;;  %v1777_v32 = vld [vmem:[%s14636_s4 + $0x2d0] sm:$0xff] }
 0x4a3   :  { %4917 = vmatpush1.bf16.msra.mxu0 %v8358_v44  ;;  %v1733_v44 = vld [vmem:[%s14636_s4 + $0x170] sm:$0xff] }
 0x4a4   :  { %5081 = vmatpush1.bf16.msra.mxu1 %v8360_v12  ;;  %4918 = vmatprep.subr.bf16.mxu0 %v8367_v13  ;;  %v1730_v12 = vld [vmem:[%s14636_s4 + $0x158] sm:$0xff]  ;;  %v7915_v43 = vcombine.high %v1729_v42, %v1733_v44 }
 0x4a5   :  { %5082 = vmatprep.subr.bf16.mxu1 %v8369_v15  ;;  %v1734_v13 = vld [vmem:[%s14636_s4 + $0x178] sm:$0xff]  ;;  %v7906_v15 = vcombine.low %v1721_v29, %v1725_v30 }
 0x4a6   :  { %v7917_v8 = vcombine.high %v1730_v12, %v1734_v13  ;;  %v7916_v56 = vcombine.low %v1730_v12, %v1734_v13  ;;  %v1785_v13 = vld [vmem:[%s14636_s4 + $0x310] sm:$0xff] }
 0x4a7   :  { %4919 = vmatpush1.bf16.msra.mxu0 %v8366_v7  ;;  %v1741_v7 = vld [vmem:[%s14636_s4 + $0x1b0] sm:$0xff] }
 0x4a8   :  { %5083 = vmatpush1.bf16.msra.mxu1 %v8368_v57  ;;  %4920 = vmatprep.subr.bf16.mxu0 %v8375_v52  ;;  %v1738_v57 = vld [vmem:[%s14636_s4 + $0x198] sm:$0xff]  ;;  %v7923_v58 = vcombine.high %v1737_v50, %v1741_v7 }
 0x4a9   :  { %5084 = vmatprep.subr.bf16.mxu1 %v8377_v53  ;;  %v1742_v52 = vld [vmem:[%s14636_s4 + $0x1b8] sm:$0xff]  ;;  %v7914_v53 = vcombine.low %v1729_v42, %v1733_v44 }
 0x4aa   :  { %v7925_v60 = vcombine.high %v1738_v57, %v1742_v52  ;;  %v7924_v59 = vcombine.low %v1738_v57, %v1742_v52  ;;  %v1793_v52 = vld [vmem:[%s14636_s4 + $0x350] sm:$0xff] }
 0x4ab   :  { %4921 = vmatpush1.bf16.msra.mxu0 %v8374_v62  ;;  %v1749_v62 = vld [vmem:[%s14636_s4 + $0x1f0] sm:$0xff] }
 0x4ac   :  { %5085 = vmatpush1.bf16.msra.mxu1 %v8376_v0  ;;  %5095 = vmatprep.subr.bf16.mxu0 %v7875_v49  ;;  %v1746_v0 = vld [vmem:[%s14636_s4 + $0x1d8] sm:$0xff]  ;;  %v7931_v3 = vcombine.high %v1745_v61, %v1749_v62 }
 0x4ad   :  { %5259 = vmatprep.subr.bf16.mxu1 %v7877_v63  ;;  %v1750_v49 = vld [vmem:[%s14636_s4 + $0x1f8] sm:$0xff]  ;;  %v7922_v63 = vcombine.low %v1737_v50, %v1741_v7 }
 0x4ae   :  { %4923 = vmatmul.mubr.bf16.vlgmr.msra.gmra.mrb[24].mxu0 %v11776_v55 }
 0x4af   :  { %5087 = vmatmul.mubr.bf16.vlgmr.msra.gmra.mrb[16].mxu1 %v11776_v55  ;;  %5096 = vmatpush1.bf16.msra.mxu0 %v7874_v9  ;;  %v7933_v9 = vcombine.high %v1746_v0, %v1750_v49 }
 0x4b0   :  { %5127 = vmatprep.mubr.bf16.mxu0 %v11152_v16  ;;  %5260 = vmatpush1.bf16.msra.mxu1 %v7876_v6  ;;  %v1754_v6 = vld [vmem:[%s14636_s4 + $0x218] sm:$0xff] }
 0x4b1   :  { %5291 = vmatprep.mubr.bf16.mxu1 %v11152_v16  ;;  %5097 = vmatprep.subr.bf16.mxu0 %v7883_v14  ;;  %v7890_v16 = vcombine.low %v1705_v10, %v1709_v40  ;;  %v1758_v14 = vld [vmem:[%s14636_s4 + $0x238] sm:$0xff]  ;;  %v7930_v10 = vcombine.low %v1745_v61, %v1749_v62  ;;  %v7932_v40 = vcombine.low %v1746_v0, %v1750_v49  ;;  %v1801_v49 = vld [vmem:[%s14636_s4 + $0x390] sm:$0xff] }
 0x4b2   :  { %5261 = vmatprep.subr.bf16.mxu1 %v7885_v19  ;;  %v7939_v19 = vcombine.high %v1753_v54, %v1757_v18  ;;  %v7941_v4 = vcombine.high %v1754_v6, %v1758_v14  ;;  %v7940_v51 = vcombine.low %v1754_v6, %v1758_v14  ;;  %v1809_v14 = vld [vmem:[%s14636_s4 + $0x3d0] sm:$0xff] }
 0x4b3   :  { %5098 = vmatpush1.bf16.msra.mxu0 %v7882_v21  ;;  %v1765_v21 = vld [vmem:[%s14636_s4 + $0x270] sm:$0xff] }
 0x4b4   :  { %5262 = vmatpush1.bf16.msra.mxu1 %v7884_v22  ;;  %5099 = vmatprep.subr.bf16.mxu0 %v7891_v46  ;;  %v1762_v22 = vld [vmem:[%s14636_s4 + $0x258] sm:$0xff]  ;;  %v7947_v23 = vcombine.high %v1761_v20, %v1765_v21 }
 0x4b5   :  { %5263 = vmatprep.subr.bf16.mxu1 %v7893_v2  ;;  %v1766_v46 = vld [vmem:[%s14636_s4 + $0x278] sm:$0xff]  ;;  %v7938_v2 = vcombine.low %v1753_v54, %v1757_v18 }
 0x4b6   :  { %v7949_v24 = vcombine.high %v1762_v22, %v1766_v46  ;;  %v7948_v29 = vcombine.low %v1762_v22, %v1766_v46  ;;  %v1817_v46 = vld [vmem:[%s14636_s4 + $0x410] sm:$0xff] }
 0x4b7   :  { %5100 = vmatpush1.bf16.msra.mxu0 %v7890_v16  ;;  %v1773_v16 = vld [vmem:[%s14636_s4 + $0x2b0] sm:$0xff] }
 0x4b8   :  { %5264 = vmatpush1.bf16.msra.mxu1 %v7892_v26  ;;  %5101 = vmatprep.subr.bf16.mxu0 %v7899_v27  ;;  %v1770_v26 = vld [vmem:[%s14636_s4 + $0x298] sm:$0xff]  ;;  %v7955_v30 = vcombine.high %v1769_v25, %v1773_v16 }
 0x4b9   :  { %5265 = vmatprep.subr.bf16.mxu1 %v7901_v28  ;;  %v1774_v27 = vld [vmem:[%s14636_s4 + $0x2b8] sm:$0xff]  ;;  %v7946_v28 = vcombine.low %v1761_v20, %v1765_v21 }
 0x4ba   :  { %v7957_v31 = vcombine.high %v1770_v26, %v1774_v27  ;;  %v7956_v42 = vcombine.low %v1770_v26, %v1774_v27  ;;  %v1825_v27 = vld [vmem:[%s14636_s4 + $0x450] sm:$0xff] }
 0x4bb   :  { %5102 = vmatpush1.bf16.msra.mxu0 %v7898_v33  ;;  %v1781_v33 = vld [vmem:[%s14636_s4 + $0x2f0] sm:$0xff] }
 0x4bc   :  { %5266 = vmatpush1.bf16.msra.mxu1 %v7900_v35  ;;  %5103 = vmatprep.subr.bf16.mxu0 %v7907_v37  ;;  %v1778_v35 = vld [vmem:[%s14636_s4 + $0x2d8] sm:$0xff]  ;;  %v7963_v44 = vcombine.high %v1777_v32, %v1781_v33 }
 0x4bd   :  { %5267 = vmatprep.subr.bf16.mxu1 %v7909_v38  ;;  %v1782_v37 = vld [vmem:[%s14636_s4 + $0x2f8] sm:$0xff]  ;;  %v7954_v38 = vcombine.low %v1769_v25, %v1773_v16 }
 0x4be   :  { %v7965_v12 = vcombine.high %v1778_v35, %v1782_v37  ;;  %v7964_v50 = vcombine.low %v1778_v35, %v1782_v37  ;;  %v1833_v35 = vld [vmem:[%s14636_s4 + $0x490] sm:$0xff] }
 0x4bf   :  { %5104 = vmatpush1.bf16.msra.mxu0 %v7906_v15  ;;  %v1789_v15 = vld [vmem:[%s14636_s4 + $0x330] sm:$0xff] }
 0x4c0   :  { %5268 = vmatpush1.bf16.msra.mxu1 %v7908_v1  ;;  %5105 = vmatprep.subr.bf16.mxu0 %v7915_v43  ;;  %v1786_v1 = vld [vmem:[%s14636_s4 + $0x318] sm:$0xff]  ;;  %v7971_v7 = vcombine.high %v1785_v13, %v1789_v15  ;;  %v1837_v37 = vld [vmem:[%s14636_s4 + $0x4b0] sm:$0xff] }
 0x4c1   :  { %5269 = vmatprep.subr.bf16.mxu1 %v7917_v8  ;;  %v1790_v43 = vld [vmem:[%s14636_s4 + $0x338] sm:$0xff]  ;;  %v7962_v8 = vcombine.low %v1777_v32, %v1781_v33 }
 0x4c2   :  { %v7973_v57 = vcombine.high %v1786_v1, %v1790_v43  ;;  %v7972_v61 = vcombine.low %v1786_v1, %v1790_v43  ;;  %v1841_v43 = vld [vmem:[%s14636_s4 + $0x4d0] sm:$0xff] }
 0x4c3   :  { %5106 = vmatpush1.bf16.msra.mxu0 %v7914_v53  ;;  %v1797_v53 = vld [vmem:[%s14636_s4 + $0x370] sm:$0xff] }
 0x4c4   :  { %5270 = vmatpush1.bf16.msra.mxu1 %v7916_v56  ;;  %5107 = vmatprep.subr.bf16.mxu0 %v7923_v58  ;;  %v1794_v56 = vld [vmem:[%s14636_s4 + $0x358] sm:$0xff]  ;;  %v7979_v62 = vcombine.high %v1793_v52, %v1797_v53 }
 0x4c5   :  { %5271 = vmatprep.subr.bf16.mxu1 %v7925_v60  ;;  %v1798_v58 = vld [vmem:[%s14636_s4 + $0x378] sm:$0xff]  ;;  %v7970_v60 = vcombine.low %v1785_v13, %v1789_v15  ;;  %v8019_v15 = vcombine.high %v1833_v35, %v1837_v37 }
 0x4c6   :  { %v7981_v0 = vcombine.high %v1794_v56, %v1798_v58  ;;  %v7980_v54 = vcombine.low %v1794_v56, %v1798_v58  ;;  %v1853_v56 = vld [vmem:[%s14636_s4 + $0x530] sm:$0xff]  ;;  %v1850_v58 = vld [vmem:[%s14636_s4 + $0x518] sm:$0xff] }
 0x4c7   :  { %5108 = vmatpush1.bf16.msra.mxu0 %v7922_v63  ;;  %v1805_v63 = vld [vmem:[%s14636_s4 + $0x3b0] sm:$0xff] }
 0x4c8   :  { %5272 = vmatpush1.bf16.msra.mxu1 %v7924_v59  ;;  %5109 = vmatprep.subr.bf16.mxu0 %v7931_v3  ;;  %v1802_v59 = vld [vmem:[%s14636_s4 + $0x398] sm:$0xff]  ;;  %v7987_v18 = vcombine.high %v1801_v49, %v1805_v63 }
 0x4c9   :  { %5273 = vmatprep.subr.bf16.mxu1 %v7933_v9  ;;  %v1806_v3 = vld [vmem:[%s14636_s4 + $0x3b8] sm:$0xff]  ;;  %v7978_v9 = vcombine.low %v1793_v52, %v1797_v53  ;;  %v1849_v53 = vld [vmem:[%s14636_s4 + $0x510] sm:$0xff] }
 0x4ca   :  { %v7989_v6 = vcombine.high %v1802_v59, %v1806_v3  ;;  %v7988_v20 = vcombine.low %v1802_v59, %v1806_v3  ;;  %v1861_v59 = vld [vmem:[%s14636_s4 + $0x570] sm:$0xff]  ;;  %v1858_v3 = vld [vmem:[%s14636_s4 + $0x558] sm:$0xff] }
 0x4cb   :  { %5110 = vmatpush1.bf16.msra.mxu0 %v7930_v10  ;;  %v1813_v10 = vld [vmem:[%s14636_s4 + $0x3f0] sm:$0xff] }
 0x4cc   :  { %5274 = vmatpush1.bf16.msra.mxu1 %v7932_v40  ;;  %5111 = vmatprep.subr.bf16.mxu0 %v7939_v19  ;;  %v1810_v40 = vld [vmem:[%s14636_s4 + $0x3d8] sm:$0xff]  ;;  %v7995_v21 = vcombine.high %v1809_v14, %v1813_v10 }
 0x4cd   :  { %5275 = vmatprep.subr.bf16.mxu1 %v7941_v4  ;;  %v1814_v19 = vld [vmem:[%s14636_s4 + $0x3f8] sm:$0xff]  ;;  %v7986_v4 = vcombine.low %v1801_v49, %v1805_v63  ;;  %v1857_v63 = vld [vmem:[%s14636_s4 + $0x550] sm:$0xff] }
 0x4ce   :  { %v7997_v22 = vcombine.high %v1810_v40, %v1814_v19  ;;  %v7996_v25 = vcombine.low %v1810_v40, %v1814_v19  ;;  %v1869_v40 = vld [vmem:[%s14636_s4 + $0x5b0] sm:$0xff]  ;;  %v1866_v19 = vld [vmem:[%s14636_s4 + $0x598] sm:$0xff] }
 0x4cf   :  { %5112 = vmatpush1.bf16.msra.mxu0 %v7938_v2  ;;  %v1821_v2 = vld [vmem:[%s14636_s4 + $0x430] sm:$0xff] }
 0x4d0   :  { %5276 = vmatpush1.bf16.msra.mxu1 %v7940_v51  ;;  %5113 = vmatprep.subr.bf16.mxu0 %v7947_v23  ;;  %v1818_v51 = vld [vmem:[%s14636_s4 + $0x418] sm:$0xff]  ;;  %v8003_v16 = vcombine.high %v1817_v46, %v1821_v2 }
 0x4d1   :  { %5277 = vmatprep.subr.bf16.mxu1 %v7949_v24  ;;  %v1822_v23 = vld [vmem:[%s14636_s4 + $0x438] sm:$0xff]  ;;  %v7994_v24 = vcombine.low %v1809_v14, %v1813_v10  ;;  %v1865_v10 = vld [vmem:[%s14636_s4 + $0x590] sm:$0xff] }
 0x4d2   :  { %v8005_v26 = vcombine.high %v1818_v51, %v1822_v23  ;;  %v8004_v32 = vcombine.low %v1818_v51, %v1822_v23  ;;  %v1877_v51 = vld [vmem:[%s14636_s4 + $0x5f0] sm:$0xff]  ;;  %v1874_v23 = vld [vmem:[%s14636_s4 + $0x5d8] sm:$0xff] }
 0x4d3   :  { %5114 = vmatpush1.bf16.msra.mxu0 %v7946_v28  ;;  %v1829_v28 = vld [vmem:[%s14636_s4 + $0x470] sm:$0xff] }
 0x4d4   :  { %5278 = vmatpush1.bf16.msra.mxu1 %v7948_v29  ;;  %5115 = vmatprep.subr.bf16.mxu0 %v7955_v30  ;;  %v8002_v29 = vcombine.low %v1817_v46, %v1821_v2  ;;  %v1826_v30 = vld [vmem:[%s14636_s4 + $0x458] sm:$0xff]  ;;  %v8011_v33 = vcombine.high %v1825_v27, %v1829_v28  ;;  %v1873_v2 = vld [vmem:[%s14636_s4 + $0x5d0] sm:$0xff] }
 0x4d5   :  { %5279 = vmatprep.subr.bf16.mxu1 %v7957_v31  ;;  %v1830_v31 = vld [vmem:[%s14636_s4 + $0x478] sm:$0xff] }
 0x4d6   :  { %v8012_v13 = vcombine.low %v1826_v30, %v1830_v31 }
 0x4d7   :  { %5116 = vmatpush1.bf16.msra.mxu0 %v7954_v38  ;;  %v8013_v38 = vcombine.high %v1826_v30, %v1830_v31  ;;  %v1882_v30 = vld [vmem:[%s14636_s4 + $0x618] sm:$0xff] }
 0x4d8   :  { %5280 = vmatpush1.bf16.msra.mxu1 %v7956_v42  ;;  %5117 = vmatprep.subr.bf16.mxu0 %v7963_v44  ;;  %v1834_v42 = vld [vmem:[%s14636_s4 + $0x498] sm:$0xff] }
 0x4d9   :  { %5281 = vmatprep.subr.bf16.mxu1 %v7965_v12  ;;  %v1838_v44 = vld [vmem:[%s14636_s4 + $0x4b8] sm:$0xff]  ;;  %v8010_v12 = vcombine.low %v1825_v27, %v1829_v28  ;;  %v1881_v28 = vld [vmem:[%s14636_s4 + $0x610] sm:$0xff] }
 0x4da   :  { %v8021_v1 = vcombine.high %v1834_v42, %v1838_v44  ;;  %v1886_v31 = vld [vmem:[%s14636_s4 + $0x638] sm:$0xff] }
 0x4db   :  { %5118 = vmatpush1.bf16.msra.mxu0 %v7962_v8  ;;  %v1845_v8 = vld [vmem:[%s14636_s4 + $0x4f0] sm:$0xff] }
 0x4dc   :  { %5282 = vmatpush1.bf16.msra.mxu1 %v7964_v50  ;;  %5119 = vmatprep.subr.bf16.mxu0 %v7971_v7  ;;  %v1846_v50 = vld [vmem:[%s14636_s4 + $0x4f8] sm:$0xff]  ;;  %v8020_v7 = vcombine.low %v1834_v42, %v1838_v44  ;;  %v1893_v42 = vld [vmem:[%s14636_s4 + $0x670] sm:$0xff] }
 0x4dd   :  { %5283 = vmatprep.subr.bf16.mxu1 %v7973_v57  ;;  %v8027_v57 = vcombine.high %v1841_v43, %v1845_v8  ;;  %v1890_v44 = vld [vmem:[%s14636_s4 + $0x658] sm:$0xff] }
 0x4df   :  { %5120 = vmatpush1.bf16.msra.mxu0 %v7970_v60  ;;  %v1854_v60 = vld [vmem:[%s14636_s4 + $0x538] sm:$0xff] }
 0x4e0   :  { %5284 = vmatpush1.bf16.msra.mxu1 %v7972_v61  ;;  %5121 = vmatprep.subr.bf16.mxu0 %v7979_v62  ;;  %v8026_v61 = vcombine.low %v1841_v43, %v1845_v8  ;;  %v8037_v49 = vcombine.high %v1850_v58, %v1854_v60  ;;  %v1897_v8 = vld [vmem:[%s14636_s4 + $0x690] sm:$0xff] }
 0x4e1   :  { %5285 = vmatprep.subr.bf16.mxu1 %v7981_v0  ;;  %v8035_v0 = vcombine.high %v1849_v53, %v1853_v56 }
 0x4e3   :  { %5122 = vmatpush1.bf16.msra.mxu0 %v7978_v9  ;;  %v1862_v9 = vld [vmem:[%s14636_s4 + $0x578] sm:$0xff] }
 0x4e4   :  { %5286 = vmatpush1.bf16.msra.mxu1 %v7980_v54  ;;  %5123 = vmatprep.subr.bf16.mxu0 %v7987_v18  ;;  %v8034_v54 = vcombine.low %v1849_v53, %v1853_v56  ;;  %v8036_v18 = vcombine.low %v1850_v58, %v1854_v60  ;;  %v8045_v14 = vcombine.high %v1858_v3, %v1862_v9  ;;  %v1905_v56 = vld [vmem:[%s14636_s4 + $0x6d0] sm:$0xff]  ;;  %v1906_v60 = vld [vmem:[%s14636_s4 + $0x6d8] sm:$0xff] }
 0x4e5   :  { %5287 = vmatprep.subr.bf16.mxu1 %v7989_v6  ;;  %v8043_v6 = vcombine.high %v1857_v63, %v1861_v59  ;;  %v1909_v58 = vld [vmem:[%s14636_s4 + $0x6f0] sm:$0xff] }
 0x4e7   :  { %5124 = vmatpush1.bf16.msra.mxu0 %v7986_v4  ;;  %v1870_v4 = vld [vmem:[%s14636_s4 + $0x5b8] sm:$0xff] }
 0x4e8   :  { %5288 = vmatpush1.bf16.msra.mxu1 %v7988_v20  ;;  %5125 = vmatprep.subr.bf16.mxu0 %v7995_v21  ;;  %v8042_v20 = vcombine.low %v1857_v63, %v1861_v59  ;;  %v8044_v21 = vcombine.low %v1858_v3, %v1862_v9  ;;  %v8053_v46 = vcombine.high %v1866_v19, %v1870_v4  ;;  %v1913_v59 = vld [vmem:[%s14636_s4 + $0x710] sm:$0xff]  ;;  %v1914_v9 = vld [vmem:[%s14636_s4 + $0x718] sm:$0xff] }
 0x4e9   :  { %5289 = vmatprep.subr.bf16.mxu1 %v7997_v22  ;;  %v8051_v22 = vcombine.high %v1865_v10, %v1869_v40  ;;  %v1917_v3 = vld [vmem:[%s14636_s4 + $0x730] sm:$0xff] }
 0x4eb   :  { %5126 = vmatpush1.bf16.msra.mxu0 %v7994_v24  ;;  %v1878_v24 = vld [vmem:[%s14636_s4 + $0x5f8] sm:$0xff] }
 0x4ec   :  { %5290 = vmatpush1.bf16.msra.mxu1 %v7996_v25  ;;  %5136 = vmatprep.subr.bf16.mxu0 %v8003_v16  ;;  %v8050_v25 = vcombine.low %v1865_v10, %v1869_v40  ;;  %v8052_v16 = vcombine.low %v1866_v19, %v1870_v4  ;;  %v8061_v27 = vcombine.high %v1874_v23, %v1878_v24  ;;  %v1921_v40 = vld [vmem:[%s14636_s4 + $0x750] sm:$0xff]  ;;  %v1922_v4 = vld [vmem:[%s14636_s4 + $0x758] sm:$0xff] }
 0x4ed   :  { %5300 = vmatprep.subr.bf16.mxu1 %v8005_v26  ;;  %v8059_v26 = vcombine.high %v1873_v2, %v1877_v51  ;;  %v1925_v19 = vld [vmem:[%s14636_s4 + $0x770] sm:$0xff] }
 0x4ee   :  { %5128 = vmatmul.mubr.bf16.vlgmr.msra.gmra.mrb[28].mxu0 %v11156_v47 }
 0x4ef   :  { %5292 = vmatmul.mubr.bf16.vlgmr.msra.gmra.mrb[20].mxu1 %v11156_v47  ;;  %5137 = vmatpush1.bf16.msra.mxu0 %v8002_v29  ;;  %v1842_v47 = vld [vmem:[%s14636_s4 + $0x4d8] sm:$0xff]  ;;  %v1885_v29 = vld [vmem:[%s14636_s4 + $0x630] sm:$0xff] }
 0x4f0   :  { %5168 = vmatprep.mubr.bf16.mxu0 %v11161_v5  ;;  %5301 = vmatpush1.bf16.msra.mxu1 %v8004_v32  ;;  %v8029_v52 = vcombine.high %v1842_v47, %v1846_v50  ;;  %v8028_v62 = vcombine.low %v1842_v47, %v1846_v50  ;;  %v8058_v32 = vcombine.low %v1873_v2, %v1877_v51  ;;  %v1901_v47 = vld [vmem:[%s14636_s4 + $0x6b0] sm:$0xff]  ;;  %v1898_v50 = vld [vmem:[%s14636_s4 + $0x698] sm:$0xff] }
 0x4f1   :  { %5332 = vmatprep.mubr.bf16.mxu1 %v11161_v5  ;;  %5138 = vmatprep.subr.bf16.mxu0 %v8011_v33  ;;  %v8018_v5 = vcombine.low %v1833_v35, %v1837_v37  ;;  %v8060_v33 = vcombine.low %v1874_v23, %v1878_v24  ;;  %v8067_v35 = vcombine.high %v1881_v28, %v1885_v29  ;;  %v1929_v51 = vld [vmem:[%s14636_s4 + $0x790] sm:$0xff]  ;;  %v1930_v24 = vld [vmem:[%s14636_s4 + $0x798] sm:$0xff] }
 0x4f2   :  { %5302 = vmatprep.subr.bf16.mxu1 %v8013_v38  ;;  %v8069_v37 = vcombine.high %v1882_v30, %v1886_v31  ;;  %v1889_v38 = vld [vmem:[%s14636_s4 + $0x650] sm:$0xff] }
 0x4f3   :  { %5139 = vmatpush1.bf16.msra.mxu0 %v8010_v12  ;;  %v1894_v12 = vld [vmem:[%s14636_s4 + $0x678] sm:$0xff]  ;;  %v1933_v23 = vld [vmem:[%s14636_s4 + $0x7b0] sm:$0xff] }
 0x4f4   :  { %5303 = vmatpush1.bf16.msra.mxu1 %v8012_v13  ;;  %5140 = vmatprep.subr.bf16.mxu0 %v8019_v15  ;;  %v8066_v13 = vcombine.low %v1881_v28, %v1885_v29  ;;  %v8068_v15 = vcombine.low %v1882_v30, %v1886_v31  ;;  %v8077_v43 = vcombine.high %v1890_v44, %v1894_v12  ;;  %v1937_v29 = vld [vmem:[%s14636_s4 + $0x7d0] sm:$0xff]  ;;  %v1938_v31 = vld [vmem:[%s14636_s4 + $0x7d8] sm:$0xff] }
 0x4f5   :  { %5304 = vmatprep.subr.bf16.mxu1 %v8021_v1  ;;  %v8075_v1 = vcombine.high %v1889_v38, %v1893_v42  ;;  %v1941_v30 = vld [vmem:[%s14636_s4 + $0x7f0] sm:$0xff] }
 0x4f7   :  { %5141 = vmatpush1.bf16.msra.mxu0 %v8018_v5  ;;  %v1902_v5 = vld [vmem:[%s14636_s4 + $0x6b8] sm:$0xff] }
 0x4f8   :  { %5305 = vmatpush1.bf16.msra.mxu1 %v8020_v7  ;;  %5142 = vmatprep.subr.bf16.mxu0 %v8027_v57  ;;  %v8074_v7 = vcombine.low %v1889_v38, %v1893_v42  ;;  %v8076_v57 = vcombine.low %v1890_v44, %v1894_v12  ;;  %v8085_v53 = vcombine.high %v1898_v50, %v1902_v5  ;;  %v1945_v42 = vld [vmem:[%s14636_s4 + $0x810] sm:$0xff]  ;;  %v1946_v12 = vld [vmem:[%s14636_s4 + $0x818] sm:$0xff] }
 0x4f9   :  { %5306 = vmatprep.subr.bf16.mxu1 %v8029_v52  ;;  %v8083_v52 = vcombine.high %v1897_v8, %v1901_v47  ;;  %v1949_v44 = vld [vmem:[%s14636_s4 + $0x830] sm:$0xff] }
 0x4fb   :  { %5143 = vmatpush1.bf16.msra.mxu0 %v8026_v61  ;;  %v1910_v61 = vld [vmem:[%s14636_s4 + $0x6f8] sm:$0xff] }
 0x4fc   :  { %5307 = vmatpush1.bf16.msra.mxu1 %v8028_v62  ;;  %5144 = vmatprep.subr.bf16.mxu0 %v8035_v0  ;;  %v8082_v62 = vcombine.low %v1897_v8, %v1901_v47  ;;  %v8084_v0 = vcombine.low %v1898_v50, %v1902_v5  ;;  %v8093_v63 = vcombine.high %v1906_v60, %v1910_v61  ;;  %v1953_v47 = vld [vmem:[%s14636_s4 + $0x850] sm:$0xff] }
 0x4fd   :  { %5308 = vmatprep.subr.bf16.mxu1 %v8037_v49  ;;  %v8091_v49 = vcombine.high %v1905_v56, %v1909_v58  ;;  %v1957_v50 = vld [vmem:[%s14636_s4 + $0x870] sm:$0xff]  ;;  %v8130_v5 = vcombine.low %v1945_v42, %v1949_v44 }
 0x4ff   :  { %5145 = vmatpush1.bf16.msra.mxu0 %v8034_v54  ;;  %v1918_v54 = vld [vmem:[%s14636_s4 + $0x738] sm:$0xff] }
 0x500   :  { %5309 = vmatpush1.bf16.msra.mxu1 %v8036_v18  ;;  %5146 = vmatprep.subr.bf16.mxu0 %v8043_v6  ;;  %v8090_v18 = vcombine.low %v1905_v56, %v1909_v58  ;;  %v8092_v6 = vcombine.low %v1906_v60, %v1910_v61  ;;  %v8101_v10 = vcombine.high %v1914_v9, %v1918_v54  ;;  %v1961_v56 = vld [vmem:[%s14636_s4 + $0x890] sm:$0xff]  ;;  %v1962_v61 = vld [vmem:[%s14636_s4 + $0x898] sm:$0xff] }
 0x501   :  { %5310 = vmatprep.subr.bf16.mxu1 %v8045_v14  ;;  %v8099_v14 = vcombine.high %v1913_v59, %v1917_v3  ;;  %v1965_v58 = vld [vmem:[%s14636_s4 + $0x8b0] sm:$0xff] }
 0x503   :  { %5147 = vmatpush1.bf16.msra.mxu0 %v8042_v20  ;;  %v1926_v20 = vld [vmem:[%s14636_s4 + $0x778] sm:$0xff] }
 0x504   :  { %5311 = vmatpush1.bf16.msra.mxu1 %v8044_v21  ;;  %5148 = vmatprep.subr.bf16.mxu0 %v8051_v22  ;;  %v8098_v21 = vcombine.low %v1913_v59, %v1917_v3  ;;  %v8100_v22 = vcombine.low %v1914_v9, %v1918_v54  ;;  %v8109_v2 = vcombine.high %v1922_v4, %v1926_v20  ;;  %v1969_v3 = vld [vmem:[%s14636_s4 + $0x8d0] sm:$0xff]  ;;  %v1974_v54 = vld [vmem:[%s14636_s4 + $0x8f8] sm:$0xff] }
 0x505   :  { %5312 = vmatprep.subr.bf16.mxu1 %v8053_v46  ;;  %v8107_v46 = vcombine.high %v1921_v40, %v1925_v19  ;;  %v1973_v9 = vld [vmem:[%s14636_s4 + $0x8f0] sm:$0xff] }
 0x507   :  { %5149 = vmatpush1.bf16.msra.mxu0 %v8050_v25  ;;  %v1934_v25 = vld [vmem:[%s14636_s4 + $0x7b8] sm:$0xff] }
 0x508   :  { %5313 = vmatpush1.bf16.msra.mxu1 %v8052_v16  ;;  %5150 = vmatprep.subr.bf16.mxu0 %v8059_v26  ;;  %v8106_v16 = vcombine.low %v1921_v40, %v1925_v19  ;;  %v8108_v26 = vcombine.low %v1922_v4, %v1926_v20  ;;  %v8117_v28 = vcombine.high %v1930_v24, %v1934_v25  ;;  %v1981_v40 = vld [vmem:[%s14636_s4 + $0x930] sm:$0xff]  ;;  %v1978_v19 = vld [vmem:[%s14636_s4 + $0x918] sm:$0xff] }
 0x509   :  { %5314 = vmatprep.subr.bf16.mxu1 %v8061_v27  ;;  %v8115_v27 = vcombine.high %v1929_v51, %v1933_v23  ;;  %v1982_v4 = vld [vmem:[%s14636_s4 + $0x938] sm:$0xff]  ;;  %v8154_v20 = vcombine.low %v1969_v3, %v1973_v9 }
 0x50b   :  { %5151 = vmatpush1.bf16.msra.mxu0 %v8058_v32  ;;  %v1942_v32 = vld [vmem:[%s14636_s4 + $0x7f8] sm:$0xff] }
 0x50c   :  { %5315 = vmatpush1.bf16.msra.mxu1 %v8060_v33  ;;  %5152 = vmatprep.subr.bf16.mxu0 %v8067_v35  ;;  %v8114_v33 = vcombine.low %v1929_v51, %v1933_v23  ;;  %v8116_v35 = vcombine.low %v1930_v24, %v1934_v25  ;;  %v8125_v38 = vcombine.high %v1938_v31, %v1942_v32  ;;  %v1989_v51 = vld [vmem:[%s14636_s4 + $0x970] sm:$0xff]  ;;  %v1986_v23 = vld [vmem:[%s14636_s4 + $0x958] sm:$0xff] }
 0x50d   :  { %5316 = vmatprep.subr.bf16.mxu1 %v8069_v37  ;;  %v8123_v37 = vcombine.high %v1937_v29, %v1941_v30  ;;  %v1990_v24 = vld [vmem:[%s14636_s4 + $0x978] sm:$0xff] }
 0x50f   :  { %5153 = vmatpush1.bf16.msra.mxu0 %v8066_v13  ;;  %v1950_v13 = vld [vmem:[%s14636_s4 + $0x838] sm:$0xff] }
 0x510   :  { %5317 = vmatpush1.bf16.msra.mxu1 %v8068_v15  ;;  %5154 = vmatprep.subr.bf16.mxu0 %v8075_v1  ;;  %v8122_v15 = vcombine.low %v1937_v29, %v1941_v30  ;;  %v8124_v1 = vcombine.low %v1938_v31, %v1942_v32  ;;  %v8133_v8 = vcombine.high %v1946_v12, %v1950_v13  ;;  %v1997_v29 = vld [vmem:[%s14636_s4 + $0x9b0] sm:$0xff]  ;;  %v1994_v30 = vld [vmem:[%s14636_s4 + $0x998] sm:$0xff] }
 0x511   :  { %5318 = vmatprep.subr.bf16.mxu1 %v8077_v43  ;;  %v8131_v43 = vcombine.high %v1945_v42, %v1949_v44  ;;  %v1998_v31 = vld [vmem:[%s14636_s4 + $0x9b8] sm:$0xff]  ;;  %v2005_v42 = vld [vmem:[%s14636_s4 + $0x9f0] sm:$0xff] }
 0x512   :  { %v2002_v44 = vld [vmem:[%s14636_s4 + $0x9d8] sm:$0xff] }
 0x513   :  { %5155 = vmatpush1.bf16.msra.mxu0 %v8074_v7  ;;  %v1954_v7 = vld [vmem:[%s14636_s4 + $0x858] sm:$0xff] }
 0x514   :  { %5319 = vmatpush1.bf16.msra.mxu1 %v8076_v57  ;;  %5156 = vmatprep.subr.bf16.mxu0 %v8083_v52  ;;  %v1958_v57 = vld [vmem:[%s14636_s4 + $0x878] sm:$0xff]  ;;  %v8132_v52 = vcombine.low %v1946_v12, %v1950_v13 }
 0x515   :  { %5320 = vmatprep.subr.bf16.mxu1 %v8085_v53  ;;  %v8139_v53 = vcombine.high %v1953_v47, %v1957_v50  ;;  %v8141_v60 = vcombine.high %v1954_v7, %v1958_v57  ;;  %v2006_v12 = vld [vmem:[%s14636_s4 + $0x9f8] sm:$0xff] }
 0x517   :  { %5157 = vmatpush1.bf16.msra.mxu0 %v8082_v62  ;;  %v1966_v62 = vld [vmem:[%s14636_s4 + $0x8b8] sm:$0xff] }
 0x518   :  { %5321 = vmatpush1.bf16.msra.mxu1 %v8084_v0  ;;  %5158 = vmatprep.subr.bf16.mxu0 %v8091_v49  ;;  %v8138_v0 = vcombine.low %v1953_v47, %v1957_v50  ;;  %v8140_v49 = vcombine.low %v1954_v7, %v1958_v57  ;;  %v8149_v59 = vcombine.high %v1962_v61, %v1966_v62  ;;  %v2013_v47 = vld [vmem:[%s14636_s4 + $0xa30] sm:$0xff]  ;;  %v2010_v50 = vld [vmem:[%s14636_s4 + $0xa18] sm:$0xff] }
 0x519   :  { %5322 = vmatprep.subr.bf16.mxu1 %v8093_v63  ;;  %v8147_v63 = vcombine.high %v1961_v56, %v1965_v58  ;;  %v8188_v57 = vcombine.low %v2002_v44, %v2006_v12 }
 0x51b   :  { %5159 = vmatpush1.bf16.msra.mxu0 %v8090_v18  ;;  %v8148_v18 = vcombine.low %v1962_v61, %v1966_v62  ;;  %v2022_v61 = vld [vmem:[%s14636_s4 + $0xa78] sm:$0xff] }
 0x51c   :  { %5323 = vmatpush1.bf16.msra.mxu1 %v8092_v6  ;;  %5160 = vmatprep.subr.bf16.mxu0 %v8099_v14  ;;  %v8155_v6 = vcombine.high %v1969_v3, %v1973_v9  ;;  %v2029_v3 = vld [vmem:[%s14636_s4 + $0xab0] sm:$0xff]  ;;  %v2026_v9 = vld [vmem:[%s14636_s4 + $0xa98] sm:$0xff] }
 0x51d   :  { %5324 = vmatprep.subr.bf16.mxu1 %v8101_v10  ;;  %v1977_v10 = vld [vmem:[%s14636_s4 + $0x910] sm:$0xff] }
 0x51e   :  { %v8162_v25 = vcombine.low %v1977_v10, %v1981_v40 }
 0x51f   :  { %5161 = vmatpush1.bf16.msra.mxu0 %v8098_v21 }
 0x520   :  { %5325 = vmatpush1.bf16.msra.mxu1 %v8100_v22  ;;  %5162 = vmatprep.subr.bf16.mxu0 %v8107_v46  ;;  %v8163_v22 = vcombine.high %v1977_v10, %v1981_v40  ;;  %v8165_v46 = vcombine.high %v1978_v19, %v1982_v4  ;;  %v2037_v10 = vld [vmem:[%s14636_s4 + $0xaf0] sm:$0xff]  ;;  %v2034_v40 = vld [vmem:[%s14636_s4 + $0xad8] sm:$0xff] }
 0x521   :  { %5326 = vmatprep.subr.bf16.mxu1 %v8109_v2  ;;  %v1985_v2 = vld [vmem:[%s14636_s4 + $0x950] sm:$0xff] }
 0x522   :  { %v8170_v32 = vcombine.low %v1985_v2, %v1989_v51 }
 0x523   :  { %5163 = vmatpush1.bf16.msra.mxu0 %v8106_v16  ;;  %v8164_v16 = vcombine.low %v1978_v19, %v1982_v4  ;;  %v2038_v19 = vld [vmem:[%s14636_s4 + $0xaf8] sm:$0xff] }
 0x524   :  { %5327 = vmatpush1.bf16.msra.mxu1 %v8108_v26  ;;  %5164 = vmatprep.subr.bf16.mxu0 %v8115_v27  ;;  %v8171_v26 = vcombine.high %v1985_v2, %v1989_v51  ;;  %v8173_v27 = vcombine.high %v1986_v23, %v1990_v24  ;;  %v2045_v2 = vld [vmem:[%s14636_s4 + $0xb30] sm:$0xff]  ;;  %v2042_v51 = vld [vmem:[%s14636_s4 + $0xb18] sm:$0xff] }
 0x525   :  { %5328 = vmatprep.subr.bf16.mxu1 %v8117_v28  ;;  %v1993_v28 = vld [vmem:[%s14636_s4 + $0x990] sm:$0xff] }
 0x526   :  { %v8178_v13 = vcombine.low %v1993_v28, %v1997_v29 }
 0x527   :  { %5165 = vmatpush1.bf16.msra.mxu0 %v8114_v33  ;;  %v8172_v33 = vcombine.low %v1986_v23, %v1990_v24  ;;  %v2046_v23 = vld [vmem:[%s14636_s4 + $0xb38] sm:$0xff] }
 0x528   :  { %5329 = vmatpush1.bf16.msra.mxu1 %v8116_v35  ;;  %5166 = vmatprep.subr.bf16.mxu0 %v8123_v37  ;;  %v8179_v35 = vcombine.high %v1993_v28, %v1997_v29  ;;  %v8181_v37 = vcombine.high %v1994_v30, %v1998_v31  ;;  %v2053_v28 = vld [vmem:[%s14636_s4 + $0xb70] sm:$0xff]  ;;  %v2050_v29 = vld [vmem:[%s14636_s4 + $0xb58] sm:$0xff] }
 0x529   :  { %5330 = vmatprep.subr.bf16.mxu1 %v8125_v38  ;;  %v2001_v38 = vld [vmem:[%s14636_s4 + $0x9d0] sm:$0xff] }
 0x52a   :  { %v8186_v7 = vcombine.low %v2001_v38, %v2005_v42 }
 0x52b   :  { %5167 = vmatpush1.bf16.msra.mxu0 %v8122_v15  ;;  %v8180_v15 = vcombine.low %v1994_v30, %v1998_v31  ;;  %v2054_v30 = vld [vmem:[%s14636_s4 + $0xb78] sm:$0xff] }
 0x52c   :  { %5331 = vmatpush1.bf16.msra.mxu1 %v8124_v1  ;;  %5177 = vmatprep.subr.bf16.mxu0 %v8131_v43  ;;  %v8187_v1 = vcombine.high %v2001_v38, %v2005_v42  ;;  %v8189_v43 = vcombine.high %v2002_v44, %v2006_v12  ;;  %v2061_v38 = vld [vmem:[%s14636_s4 + $0xbb0] sm:$0xff]  ;;  %v2058_v42 = vld [vmem:[%s14636_s4 + $0xb98] sm:$0xff] }
 0x52d   :  { %5341 = vmatprep.subr.bf16.mxu1 %v8133_v8  ;;  %v2009_v8 = vld [vmem:[%s14636_s4 + $0xa10] sm:$0xff]  ;;  %v2062_v44 = vld [vmem:[%s14636_s4 + $0xbb8] sm:$0xff] }
 0x52e   :  { %5169 = vmatmul.mubr.bf16.vlgmr.msra.gmra.mrb[28].mxu0 %v11368_v11  ;;  %v8194_v62 = vcombine.low %v2009_v8, %v2013_v47 }
 0x52f   :  { %5333 = vmatmul.mubr.bf16.vlgmr.msra.gmra.mrb[20].mxu1 %v11368_v11  ;;  %5178 = vmatpush1.bf16.msra.mxu0 %v8130_v5  ;;  %v1970_v11 = vld [vmem:[%s14636_s4 + $0x8d8] sm:$0xff] }
 0x530   :  { %5209 = vmatprep.mubr.bf16.mxu0 %v11372_v17  ;;  %5342 = vmatpush1.bf16.msra.mxu1 %v8132_v52  ;;  %v8157_v14 = vcombine.high %v1970_v11, %v1974_v54  ;;  %v8156_v21 = vcombine.low %v1970_v11, %v1974_v54  ;;  %v2014_v5 = vld [vmem:[%s14636_s4 + $0xa38] sm:$0xff]  ;;  %v8195_v52 = vcombine.high %v2009_v8, %v2013_v47  ;;  %v2069_v8 = vld [vmem:[%s14636_s4 + $0xbf0] sm:$0xff] }
 0x531   :  { %5373 = vmatprep.mubr.bf16.mxu1 %v11372_v17  ;;  %5179 = vmatprep.subr.bf16.mxu0 %v8139_v53  ;;  %v8146_v17 = vcombine.low %v1961_v56, %v1965_v58  ;;  %v8197_v53 = vcombine.high %v2010_v50, %v2014_v5  ;;  %v2017_v56 = vld [vmem:[%s14636_s4 + $0xa50] sm:$0xff]  ;;  %v2030_v11 = vld [vmem:[%s14636_s4 + $0xab8] sm:$0xff] }
 0x532   :  { %5343 = vmatprep.subr.bf16.mxu1 %v8141_v60  ;;  %v2021_v58 = vld [vmem:[%s14636_s4 + $0xa70] sm:$0xff]  ;;  %v2018_v60 = vld [vmem:[%s14636_s4 + $0xa58] sm:$0xff] }
 0x533   :  { %5180 = vmatpush1.bf16.msra.mxu0 %v8138_v0  ;;  %v8196_v0 = vcombine.low %v2010_v50, %v2014_v5  ;;  %v8202_v54 = vcombine.low %v2017_v56, %v2021_v58  ;;  %v2066_v47 = vld [vmem:[%s14636_s4 + $0xbd8] sm:$0xff] }
 0x534   :  { %5344 = vmatpush1.bf16.msra.mxu1 %v8140_v49  ;;  %5181 = vmatprep.subr.bf16.mxu0 %v8147_v63  ;;  %v8203_v49 = vcombine.high %v2017_v56, %v2021_v58  ;;  %v8205_v63 = vcombine.high %v2018_v60, %v2022_v61  ;;  %v2070_v50 = vld [vmem:[%s14636_s4 + $0xbf8] sm:$0xff]  ;;  %v2077_v56 = vld [vmem:[%s14636_s4 + $0xc30] sm:$0xff] }
 0x535   :  { %5345 = vmatprep.subr.bf16.mxu1 %v8149_v59  ;;  %v2025_v59 = vld [vmem:[%s14636_s4 + $0xa90] sm:$0xff]  ;;  %v2074_v58 = vld [vmem:[%s14636_s4 + $0xc18] sm:$0xff] }
 0x536   :  { %v8210_v4 = vcombine.low %v2025_v59, %v2029_v3 }
 0x537   :  { %5182 = vmatpush1.bf16.msra.mxu0 %v8146_v17  ;;  %v8204_v17 = vcombine.low %v2018_v60, %v2022_v61  ;;  %v2078_v60 = vld [vmem:[%s14636_s4 + $0xc38] sm:$0xff] }
 0x538   :  { %5346 = vmatpush1.bf16.msra.mxu1 %v8148_v18  ;;  %5183 = vmatprep.subr.bf16.mxu0 %v8155_v6  ;;  %v8211_v18 = vcombine.high %v2025_v59, %v2029_v3  ;;  %v8213_v6 = vcombine.high %v2026_v9, %v2030_v11  ;;  %v2085_v59 = vld [vmem:[%s14636_s4 + $0xc70] sm:$0xff] }
 0x539   :  { %5347 = vmatprep.subr.bf16.mxu1 %v8157_v14  ;;  %v2033_v14 = vld [vmem:[%s14636_s4 + $0xad0] sm:$0xff] }
 0x53a   :  { %v8218_v24 = vcombine.low %v2033_v14, %v2037_v10 }
 0x53b   :  { %5184 = vmatpush1.bf16.msra.mxu0 %v8154_v20  ;;  %v8212_v20 = vcombine.low %v2026_v9, %v2030_v11  ;;  %v2082_v9 = vld [vmem:[%s14636_s4 + $0xc58] sm:$0xff] }
 0x53c   :  { %5348 = vmatpush1.bf16.msra.mxu1 %v8156_v21  ;;  %5185 = vmatprep.subr.bf16.mxu0 %v8163_v22  ;;  %v8219_v21 = vcombine.high %v2033_v14, %v2037_v10  ;;  %v8221_v22 = vcombine.high %v2034_v40, %v2038_v19  ;;  %v2086_v11 = vld [vmem:[%s14636_s4 + $0xc78] sm:$0xff] }
 0x53d   :  { %5349 = vmatprep.subr.bf16.mxu1 %v8165_v46  ;;  %v2041_v46 = vld [vmem:[%s14636_s4 + $0xb10] sm:$0xff]  ;;  %v8269_v14 = vcombine.high %v2082_v9, %v2086_v11  ;;  %v2090_v10 = vld [vmem:[%s14636_s4 + $0xc98] sm:$0xff] }
 0x53e   :  { %v8226_v31 = vcombine.low %v2041_v46, %v2045_v2 }
 0x53f   :  { %5186 = vmatpush1.bf16.msra.mxu0 %v8162_v25  ;;  %v8220_v25 = vcombine.low %v2034_v40, %v2038_v19  ;;  %v2094_v40 = vld [vmem:[%s14636_s4 + $0xcb8] sm:$0xff] }
 0x540   :  { %5350 = vmatpush1.bf16.msra.mxu1 %v8164_v16  ;;  %5187 = vmatprep.subr.bf16.mxu0 %v8171_v26  ;;  %v8227_v16 = vcombine.high %v2041_v46, %v2045_v2  ;;  %v8229_v26 = vcombine.high %v2042_v51, %v2046_v23  ;;  %v2101_v46 = vld [vmem:[%s14636_s4 + $0xcf0] sm:$0xff]  ;;  %v2102_v2 = vld [vmem:[%s14636_s4 + $0xcf8] sm:$0xff] }
 0x541   :  { %5351 = vmatprep.subr.bf16.mxu1 %v8173_v27  ;;  %v2049_v27 = vld [vmem:[%s14636_s4 + $0xb50] sm:$0xff] }
 0x542   :  { %v8234_v12 = vcombine.low %v2049_v27, %v2053_v28 }
 0x543   :  { %5188 = vmatpush1.bf16.msra.mxu0 %v8170_v32  ;;  %v8228_v32 = vcombine.low %v2042_v51, %v2046_v23  ;;  %v8276_v51 = vcombine.low %v2090_v10, %v2094_v40 }
 0x544   :  { %5352 = vmatpush1.bf16.msra.mxu1 %v8172_v33  ;;  %5189 = vmatprep.subr.bf16.mxu0 %v8179_v35  ;;  %v8235_v33 = vcombine.high %v2049_v27, %v2053_v28  ;;  %v8237_v35 = vcombine.high %v2050_v29, %v2054_v30  ;;  %v2110_v27 = vld [vmem:[%s14636_s4 + $0xd38] sm:$0xff] }
 0x545   :  { %5353 = vmatprep.subr.bf16.mxu1 %v8181_v37  ;;  %v2057_v37 = vld [vmem:[%s14636_s4 + $0xb90] sm:$0xff] }
 0x546   :  { %v8242_v5 = vcombine.low %v2057_v37, %v2061_v38 }
 0x547   :  { %5190 = vmatpush1.bf16.msra.mxu0 %v8178_v13  ;;  %v8236_v13 = vcombine.low %v2050_v29, %v2054_v30 }
 0x548   :  { %5354 = vmatpush1.bf16.msra.mxu1 %v8180_v15  ;;  %5191 = vmatprep.subr.bf16.mxu0 %v8187_v1  ;;  %v8243_v15 = vcombine.high %v2057_v37, %v2061_v38  ;;  %v8245_v1 = vcombine.high %v2058_v42, %v2062_v44  ;;  %v2118_v37 = vld [vmem:[%s14636_s4 + $0xd78] sm:$0xff] }
 0x549   :  { %5355 = vmatprep.subr.bf16.mxu1 %v8189_v43  ;;  %v2065_v43 = vld [vmem:[%s14636_s4 + $0xbd0] sm:$0xff] }
 0x54a   :  { %v8250_v61 = vcombine.low %v2065_v43, %v2069_v8 }
 0x54b   :  { %5192 = vmatpush1.bf16.msra.mxu0 %v8186_v7  ;;  %v8244_v7 = vcombine.low %v2058_v42, %v2062_v44 }
 0x54c   :  { %5356 = vmatpush1.bf16.msra.mxu1 %v8188_v57  ;;  %5193 = vmatprep.subr.bf16.mxu0 %v8195_v52  ;;  %v8251_v57 = vcombine.high %v2065_v43, %v2069_v8  ;;  %v8253_v52 = vcombine.high %v2066_v47, %v2070_v50  ;;  %v2126_v43 = vld [vmem:[%s14636_s4 + $0xdb8] sm:$0xff] }
 0x54d   :  { %5357 = vmatprep.subr.bf16.mxu1 %v8197_v53  ;;  %v2073_v53 = vld [vmem:[%s14636_s4 + $0xc10] sm:$0xff] }
 0x54e   :  { %v8258_v3 = vcombine.low %v2073_v53, %v2077_v56 }
 0x54f   :  { %5194 = vmatpush1.bf16.msra.mxu0 %v8194_v62  ;;  %v8252_v62 = vcombine.low %v2066_v47, %v2070_v50 }
 0x550   :  { %5358 = vmatpush1.bf16.msra.mxu1 %v8196_v0  ;;  %5195 = vmatprep.subr.bf16.mxu0 %v8203_v49  ;;  %v8259_v0 = vcombine.high %v2073_v53, %v2077_v56  ;;  %v8261_v49 = vcombine.high %v2074_v58, %v2078_v60 }
 0x551   :  { %5359 = vmatprep.subr.bf16.mxu1 %v8205_v63  ;;  %v2081_v63 = vld [vmem:[%s14636_s4 + $0xc50] sm:$0xff] }
 0x552   :  { %v8266_v19 = vcombine.low %v2081_v63, %v2085_v59 }
 0x553   :  { %5196 = vmatpush1.bf16.msra.mxu0 %v8202_v54  ;;  %v8260_v54 = vcombine.low %v2074_v58, %v2078_v60  ;;  %v2130_v58 = vld [vmem:[%s14636_s4 + $0xdd8] sm:$0xff] }
 0x554   :  { %5360 = vmatpush1.bf16.msra.mxu1 %v8204_v17  ;;  %5197 = vmatprep.subr.bf16.mxu0 %v8211_v18  ;;  %v8267_v17 = vcombine.high %v2081_v63, %v2085_v59  ;;  %v2089_v18 = vld [vmem:[%s14636_s4 + $0xc90] sm:$0xff]  ;;  %v2134_v60 = vld [vmem:[%s14636_s4 + $0xdf8] sm:$0xff] }
 0x555   :  { %5361 = vmatprep.subr.bf16.mxu1 %v8213_v6  ;;  %v2093_v6 = vld [vmem:[%s14636_s4 + $0xcb0] sm:$0xff]  ;;  %v13299_v63 = vld [vmem:[%s14637_s5 + $0x1c8] ss:$16 sps:$4 sm:$0xff]  }
 0x556   :  { %14737 = vst [vmem:[#allocation15_spill] sm:$0xff] %v13299_v63 }
 0x557   :  { %5198 = vmatpush1.bf16.msra.mxu0 %v8210_v4  ;;  %v8268_v4 = vcombine.low %v2082_v9, %v2086_v11 }
 0x558   :  { %5362 = vmatpush1.bf16.msra.mxu1 %v8212_v20  ;;  %5199 = vmatprep.subr.bf16.mxu0 %v8219_v21  ;;  %v8275_v20 = vcombine.high %v2089_v18, %v2093_v6  ;;  %v8277_v21 = vcombine.high %v2090_v10, %v2094_v40  ;;  %v2142_v10 = vld [vmem:[%s14636_s4 + $0xe38] sm:$0xff] }
 0x559   :  { %5363 = vmatprep.subr.bf16.mxu1 %v8221_v22  ;;  %v2097_v22 = vld [vmem:[%s14636_s4 + $0xcd0] sm:$0xff] }
 0x55a   :  { %v8283_v23 = vcombine.high %v2097_v22, %v2101_v46  ;;  %v8282_v28 = vcombine.low %v2097_v22, %v2101_v46  ;;  %v2149_v22 = vld [vmem:[%s14636_s4 + $0xe70] sm:$0xff]  ;;  %v2146_v46 = vld [vmem:[%s14636_s4 + $0xe58] sm:$0xff] }
 0x55b   :  { %5200 = vmatpush1.bf16.msra.mxu0 %v8218_v24 }
 0x55c   :  { %5364 = vmatpush1.bf16.msra.mxu1 %v8220_v25  ;;  %5201 = vmatprep.subr.bf16.mxu0 %v8227_v16  ;;  %v2105_v25 = vld [vmem:[%s14636_s4 + $0xd10] sm:$0xff] }
 0x55d   :  { %5365 = vmatprep.subr.bf16.mxu1 %v8229_v26  ;;  %v2109_v16 = vld [vmem:[%s14636_s4 + $0xd30] sm:$0xff]  ;;  %v2106_v26 = vld [vmem:[%s14636_s4 + $0xd18] sm:$0xff] }
 0x55e   :  { %v8291_v30 = vcombine.high %v2105_v25, %v2109_v16  ;;  %v8290_v38 = vcombine.low %v2105_v25, %v2109_v16  ;;  %v8292_v42 = vcombine.low %v2106_v26, %v2110_v27  ;;  %v2157_v25 = vld [vmem:[%s14636_s4 + $0xeb0] sm:$0xff]  ;;  %v2154_v16 = vld [vmem:[%s14636_s4 + $0xe98] sm:$0xff] }
 0x55f   :  { %5202 = vmatpush1.bf16.msra.mxu0 %v8226_v31  ;;  %v8293_v31 = vcombine.high %v2106_v26, %v2110_v27  ;;  %v2158_v26 = vld [vmem:[%s14636_s4 + $0xeb8] sm:$0xff] }
 0x560   :  { %5366 = vmatpush1.bf16.msra.mxu1 %v8228_v32  ;;  %5203 = vmatprep.subr.bf16.mxu0 %v8235_v33  ;;  %v2113_v32 = vld [vmem:[%s14636_s4 + $0xd50] sm:$0xff] }
 0x561   :  { %5367 = vmatprep.subr.bf16.mxu1 %v8237_v35  ;;  %v2117_v33 = vld [vmem:[%s14636_s4 + $0xd70] sm:$0xff]  ;;  %v2114_v35 = vld [vmem:[%s14636_s4 + $0xd58] sm:$0xff] }
 0x562   :  { %v8299_v44 = vcombine.high %v2113_v32, %v2117_v33  ;;  %v8298_v8 = vcombine.low %v2113_v32, %v2117_v33  ;;  %v8300_v47 = vcombine.low %v2114_v35, %v2118_v37  ;;  %v2165_v32 = vld [vmem:[%s14636_s4 + $0xef0] sm:$0xff]  ;;  %v2162_v33 = vld [vmem:[%s14636_s4 + $0xed8] sm:$0xff] }
 0x563   :  { %5204 = vmatpush1.bf16.msra.mxu0 %v8234_v12  ;;  %v8301_v12 = vcombine.high %v2114_v35, %v2118_v37  ;;  %v2166_v35 = vld [vmem:[%s14636_s4 + $0xef8] sm:$0xff] }
 0x564   :  { %5368 = vmatpush1.bf16.msra.mxu1 %v8236_v13  ;;  %5205 = vmatprep.subr.bf16.mxu0 %v8243_v15  ;;  %v2121_v13 = vld [vmem:[%s14636_s4 + $0xd90] sm:$0xff] }
 0x565   :  { %5369 = vmatprep.subr.bf16.mxu1 %v8245_v1  ;;  %v2125_v15 = vld [vmem:[%s14636_s4 + $0xdb0] sm:$0xff]  ;;  %v2122_v1 = vld [vmem:[%s14636_s4 + $0xd98] sm:$0xff] }
 0x566   :  { %v8307_v50 = vcombine.high %v2121_v13, %v2125_v15  ;;  %v8308_v9 = vcombine.low %v2122_v1, %v2126_v43 }
 0x567   :  { %5206 = vmatpush1.bf16.msra.mxu0 %v8242_v5 }
 0x568   :  { %5370 = vmatpush1.bf16.msra.mxu1 %v8244_v7  ;;  %5207 = vmatprep.subr.bf16.mxu0 %v8251_v57  ;;  %v8309_v7 = vcombine.high %v2122_v1, %v2126_v43  ;;  %v2129_v57 = vld [vmem:[%s14636_s4 + $0xdd0] sm:$0xff]  ;;  %v2174_v1 = vld [vmem:[%s14636_s4 + $0xf38] sm:$0xff] }
 0x569   :  { %5371 = vmatprep.subr.bf16.mxu1 %v8253_v52  ;;  %v2133_v52 = vld [vmem:[%s14636_s4 + $0xdf0] sm:$0xff] }
 0x56a   :  { %v8315_v11 = vcombine.high %v2129_v57, %v2133_v52  ;;  %v8314_v40 = vcombine.low %v2129_v57, %v2133_v52  ;;  %v2181_v57 = vld [vmem:[%s14636_s4 + $0xf70] sm:$0xff]  ;;  %v2178_v52 = vld [vmem:[%s14636_s4 + $0xf58] sm:$0xff] }
 0x56b   :  { %5208 = vmatpush1.bf16.msra.mxu0 %v8250_v61  ;;  %v13292_v61 = vld [vmem:[%s14637_s5 + $0x1c0] ss:$16 sps:$4 sm:$0xff]  }
 0x56c   :  { %5372 = vmatpush1.bf16.msra.mxu1 %v8252_v62  ;;  %5218 = vmatprep.subr.bf16.mxu0 %v8259_v0  ;;  %14736 = vst [vmem:[#allocation14_spill] sm:$0xff] %v13292_v61 }
 0x56d   :  { %5382 = vmatprep.subr.bf16.mxu1 %v8261_v49  ;;  %v8306_v49 = vcombine.low %v2121_v13, %v2125_v15  ;;  %v2173_v13 = vld [vmem:[%s14636_s4 + $0xf30] sm:$0xff]  ;;  %v2170_v15 = vld [vmem:[%s14636_s4 + $0xf18] sm:$0xff] }
 0x56e   :  { %5210 = vmatmul.mubr.bf16.vlgmr.msra.gmra.mrb[28].mxu0 %v11572_v45 }
 0x56f   :  { %5374 = vmatmul.mubr.bf16.vlgmr.msra.gmra.mrb[20].mxu1 %v11572_v45  ;;  %5219 = vmatpush1.bf16.msra.mxu0 %v8258_v3  ;;  %v2098_v45 = vld [vmem:[%s14636_s4 + $0xcd8] sm:$0xff] }
 0x570   :  { %5250 = vmatprep.mubr.bf16.mxu0 %v11582_v48  ;;  %5383 = vmatpush1.bf16.msra.mxu1 %v8260_v54  ;;  %v8285_v24 = vcombine.high %v2098_v45, %v2102_v2  ;;  %v8284_v29 = vcombine.low %v2098_v45, %v2102_v2  ;;  %v2150_v45 = vld [vmem:[%s14636_s4 + $0xe78] sm:$0xff] }
 0x571   :  { %5414 = vmatprep.mubr.bf16.mxu1 %v11582_v48  ;;  %5220 = vmatprep.subr.bf16.mxu0 %v8267_v17  ;;  %v8274_v48 = vcombine.low %v2089_v18, %v2093_v6  ;;  %v8317_v17 = vcombine.high %v2130_v58, %v2134_v60  ;;  %v2137_v18 = vld [vmem:[%s14636_s4 + $0xe10] sm:$0xff] }
 0x572   :  { %5384 = vmatprep.subr.bf16.mxu1 %v8269_v14  ;;  %v2141_v6 = vld [vmem:[%s14636_s4 + $0xe30] sm:$0xff]  ;;  %v2138_v14 = vld [vmem:[%s14636_s4 + $0xe18] sm:$0xff] }
 0x573   :  { %5221 = vmatpush1.bf16.msra.mxu0 %v8266_v19  ;;  %v8316_v19 = vcombine.low %v2130_v58, %v2134_v60  ;;  %v8322_v2 = vcombine.low %v2137_v18, %v2141_v6  ;;  %v2182_v58 = vld [vmem:[%s14636_s4 + $0xf78] sm:$0xff] }
 0x574   :  { %5385 = vmatpush1.bf16.msra.mxu1 %v8268_v4  ;;  %5222 = vmatprep.subr.bf16.mxu0 %v8275_v20  ;;  %v8323_v4 = vcombine.high %v2137_v18, %v2141_v6  ;;  %v8325_v20 = vcombine.high %v2138_v14, %v2142_v10  ;;  %v8364_v18 = vcombine.low %v2178_v52, %v2182_v58 }
 0x575   :  { %5386 = vmatprep.subr.bf16.mxu1 %v8277_v21  ;;  %v2145_v21 = vld [vmem:[%s14636_s4 + $0xe50] sm:$0xff] }
 0x576   :  { %v8330_v27 = vcombine.low %v2145_v21, %v2149_v22 }
 0x577   :  { %5223 = vmatpush1.bf16.msra.mxu0 %v8274_v48  ;;  %v8324_v48 = vcombine.low %v2138_v14, %v2142_v10  ;;  %v2193_v10 = vld [vmem:[%s14636_s4 + $0xfd0] sm:$0xff] }
 0x578   :  { %5387 = vmatpush1.bf16.msra.mxu1 %v8276_v51  ;;  %5224 = vmatprep.subr.bf16.mxu0 %v8283_v23  ;;  %v8331_v51 = vcombine.high %v2145_v21, %v2149_v22  ;;  %v8333_v23 = vcombine.high %v2146_v46, %v2150_v45 }
 0x579   :  { %5388 = vmatprep.subr.bf16.mxu1 %v8285_v24  ;;  %v2153_v24 = vld [vmem:[%s14636_s4 + $0xe90] sm:$0xff] }
 0x57a   :  { %v8338_v37 = vcombine.low %v2153_v24, %v2157_v25 }
 0x57b   :  { %5225 = vmatpush1.bf16.msra.mxu0 %v8282_v28  ;;  %v8332_v28 = vcombine.low %v2146_v46, %v2150_v45 }
 0x57c   :  { %5389 = vmatpush1.bf16.msra.mxu1 %v8284_v29  ;;  %5226 = vmatprep.subr.bf16.mxu0 %v8291_v30  ;;  %v8339_v29 = vcombine.high %v2153_v24, %v2157_v25  ;;  %v8341_v30 = vcombine.high %v2154_v16, %v2158_v26  ;;  %v9601_v24 = vld [vmem:[%s14635_s2 + $0x8] ss:$16 sps:$4 sm:$0xff]   ;;  %v9602_v25 = vld [vmem:[%s14635_s2 + $0x24] ss:$16 sps:$4 sm:$0xff]  }
 0x57d   :  { %5390 = vmatprep.subr.bf16.mxu1 %v8293_v31  ;;  %v2161_v31 = vld [vmem:[%s14636_s4 + $0xed0] sm:$0xff] }
 0x57e   :  { %v8346_v43 = vcombine.low %v2161_v31, %v2165_v32 }
 0x57f   :  { %5227 = vmatpush1.bf16.msra.mxu0 %v8290_v38  ;;  %v8340_v38 = vcombine.low %v2154_v16, %v2158_v26  ;;  %v9604_v16 = vld [vmem:[%s14635_s2 + $0x20] ss:$16 sps:$4 sm:$0xff]   ;;  %v9605_v26 = vld [vmem:[%s14635_s2 + $0x28] ss:$16 sps:$4 sm:$0xff]  }
 0x580   :  { %5391 = vmatpush1.bf16.msra.mxu1 %v8292_v42  ;;  %5228 = vmatprep.subr.bf16.mxu0 %v8299_v44  ;;  %v8347_v42 = vcombine.high %v2161_v31, %v2165_v32  ;;  %v8349_v44 = vcombine.high %v2162_v33, %v2166_v35  ;;  %v9611_v31 = vld [vmem:[%s14635_s2 + $0x6c] ss:$16 sps:$4 sm:$0xff]   ;;  %v9612_v32 = vld [vmem:[%s14635_s2 + $0x60] ss:$16 sps:$4 sm:$0xff]  }
 0x581   :  { %v12430_v5 = vpop.f32.mrb[24].mxu0  ;;  %5392 = vmatprep.subr.bf16.mxu1 %v8301_v12  ;;  %v2169_v12 = vld [vmem:[%s14636_s4 + $0xf10] sm:$0xff] }
 0x582   :  { %14724 = vst [vmem:[#allocation2_spill] sm:$0xff] %v12430_v5  ;;  %v12438_v53 = vpop.f32.mrb[16].mxu1  ;;  %v12440_v56 = vpop.f32.mrb[25].mxu0  ;;  %v8354_v60 = vcombine.low %v2169_v12, %v2173_v13 }
 0x583   :  { %14725 = vst [vmem:[#allocation3_spill] sm:$0xff] %v12438_v53  ;;  %14726 = vst [vmem:[#allocation4_spill] sm:$0xff] %v12440_v56  ;;  %v12450_v62 = vpop.f32.mrb[17].mxu1  ;;  %v4928_v0 = vpop.f32.mrb[26].mxu0  ;;  %5229 = vmatpush1.bf16.msra.mxu0 %v8298_v8  ;;  %v8348_v8 = vcombine.low %v2162_v33, %v2166_v35  ;;  %v9613_v33 = vld [vmem:[%s14635_s2 + $0x68] ss:$16 sps:$4 sm:$0xff]  }
 0x584   :  { %14727 = vst [vmem:[#allocation5_spill] sm:$0xff] %v12450_v62  ;;  %v5092_v59 = vpop.f32.mrb[18].mxu1  ;;  %5393 = vmatpush1.bf16.msra.mxu1 %v8300_v47  ;;  %v4929_v3 = vpop.f32.mrb[27].mxu0  ;;  %5230 = vmatprep.subr.bf16.mxu0 %v8307_v50  ;;  %v8355_v47 = vcombine.high %v2169_v12, %v2173_v13  ;;  %v8357_v50 = vcombine.high %v2170_v15, %v2174_v1  ;;  %v9614_v35 = vld [vmem:[%s14635_s2 + $0x84] ss:$16 sps:$4 sm:$0xff]  }
 0x585   :  { %v5093_v54 = vpop.f32.mrb[19].mxu1  ;;  %5394 = vmatprep.subr.bf16.mxu1 %v8309_v7  ;;  %v2177_v7 = vld [vmem:[%s14636_s4 + $0xf50] sm:$0xff]  ;;  %v8356_v0 = vcombine.low %v2170_v15, %v2174_v1  ;;  %v8365_v59 = vcombine.high %v2178_v52, %v2182_v58  ;;  %v9619_v12 = vld [vmem:[%s14635_s2 + $0xac] ss:$16 sps:$4 sm:$0xff]   ;;  %v9621_v15 = vld [vmem:[%s14635_s2 + $0xa8] ss:$16 sps:$4 sm:$0xff]  }
 0x586   :  { %v2185_v3 = vld [vmem:[%s14636_s4 + $0xf90] sm:$0xff]  ;;  %v2190_v54 = vld [vmem:[%s14636_s4 + $0xfb8] sm:$0xff] }
 0x587   :  { %5231 = vmatpush1.bf16.msra.mxu0 %v8306_v49  ;;  %v8363_v49 = vcombine.high %v2177_v7, %v2181_v57  ;;  %v9620_v13 = vld [vmem:[%s14635_s2 + $0xa0] ss:$16 sps:$4 sm:$0xff]   ;;  %v9622_v1 = vld [vmem:[%s14635_s2 + $0xc4] ss:$16 sps:$4 sm:$0xff]   ;;  %v9629_v52 = vld [vmem:[%s14635_s2 + $0xe8] ss:$16 sps:$4 sm:$0xff]  }
 0x588   :  { %5395 = vmatpush1.bf16.msra.mxu1 %v8308_v9  ;;  %5232 = vmatprep.subr.bf16.mxu0 %v8315_v11  ;;  %v2189_v9 = vld [vmem:[%s14636_s4 + $0xfb0] sm:$0xff]  ;;  %v2186_v11 = vld [vmem:[%s14636_s4 + $0xf98] sm:$0xff] }
 0x589   :  { %5396 = vmatprep.subr.bf16.mxu1 %v8317_v17  ;;  %v8362_v17 = vcombine.low %v2177_v7, %v2181_v57  ;;  %v8371_v6 = vcombine.high %v2185_v3, %v2189_v9  ;;  %v8373_v14 = vcombine.high %v2186_v11, %v2190_v54  ;;  %v8372_v21 = vcombine.low %v2186_v11, %v2190_v54  ;;  %v9627_v7 = vld [vmem:[%s14635_s2 + $0xec] ss:$16 sps:$4 sm:$0xff]   ;;  %v9628_v57 = vld [vmem:[%s14635_s2 + $0xe0] ss:$16 sps:$4 sm:$0xff]   ;;  %v9630_v58 = vld [vmem:[%s14635_s2 + $0x104] ss:$16 sps:$4 sm:$0xff]  }
 0x58a   :  { %v9637_v11 = vld [vmem:[%s14635_s2 + $0x128] ss:$16 sps:$4 sm:$0xff]   ;;  %v9638_v54 = vld [vmem:[%s14635_s2 + $0x144] ss:$16 sps:$4 sm:$0xff]   ;;  %v13314_v56 = vld [vmem:[%s14637_s5 + $0x1ec] ss:$16 sps:$4 sm:$0xff]  }
 0x58b   :  { %5233 = vmatpush1.bf16.msra.mxu0 %v8314_v40  ;;  %v2197_v40 = vld [vmem:[%s14636_s4 + $0xff0] sm:$0xff] }
 0x58c   :  { %5397 = vmatpush1.bf16.msra.mxu1 %v8316_v19  ;;  %5234 = vmatprep.subr.bf16.mxu0 %v8323_v4  ;;  %v2194_v19 = vld [vmem:[%s14636_s4 + $0xfd8] sm:$0xff]  ;;  %v8379_v22 = vcombine.high %v2193_v10, %v2197_v40  ;;  %v8378_v45 = vcombine.low %v2193_v10, %v2197_v40  ;;  %v9644_v40 = vld [vmem:[%s14635_s2 + $0x160] ss:$16 sps:$4 sm:$0xff]   ;;  %v13309_v53 = vld [vmem:[%s14637_s5 + $0x1e4] ss:$16 sps:$4 sm:$0xff]  }
 0x58d   :  { %5398 = vmatprep.subr.bf16.mxu1 %v8325_v20  ;;  %v2198_v4 = vld [vmem:[%s14636_s4 + $0xff8] sm:$0xff]  ;;  %v8370_v20 = vcombine.low %v2185_v3, %v2189_v9  ;;  %v9636_v9 = vld [vmem:[%s14635_s2 + $0x120] ss:$16 sps:$4 sm:$0xff]  }
 0x58e   :  { %v8381_v46 = vcombine.high %v2194_v19, %v2198_v4  ;;  %v9635_v3 = vld [vmem:[%s14635_s2 + $0x12c] ss:$16 sps:$4 sm:$0xff]  }
 0x58f   :  { %5235 = vmatpush1.bf16.msra.mxu0 %v8322_v2  ;;  %v8380_v2 = vcombine.low %v2194_v19, %v2198_v4  ;;  %v9643_v10 = vld [vmem:[%s14635_s2 + $0x16c] ss:$16 sps:$4 sm:$0xff]   ;;  %v9645_v19 = vld [vmem:[%s14635_s2 + $0x168] ss:$16 sps:$4 sm:$0xff]   ;;  %v9646_v4 = vld [vmem:[%s14635_s2 + $0x184] ss:$16 sps:$4 sm:$0xff]  }
 0x590   :  { %5399 = vmatpush1.bf16.msra.mxu1 %v8324_v48  ;;  %5236 = vmatprep.subr.bf16.mxu0 %v8331_v51  ;;  %v9598_v48 = vld [vmem:[%s14635_s2 + $0x4] ss:$16 sps:$4 sm:$0xff]   ;;  %v9599_v51 = vld [vmem:[%s14635_s2 + $0xc] ss:$16 sps:$4 sm:$0xff]  }
 0x591   :  { %5400 = vmatprep.subr.bf16.mxu1 %v8333_v23  ;;  %v9600_v23 = vld [vmem:[%s14635_s2] ss:$16 sps:$4 sm:$0xff]  }
 0x593   :  { %5237 = vmatpush1.bf16.msra.mxu0 %v8330_v27  ;;  %v9607_v27 = vld [vmem:[%s14635_s2 + $0x4c] ss:$16 sps:$4 sm:$0xff]  }
 0x594   :  { %5401 = vmatpush1.bf16.msra.mxu1 %v8332_v28  ;;  %5238 = vmatprep.subr.bf16.mxu0 %v8339_v29  ;;  %v9608_v28 = vld [vmem:[%s14635_s2 + $0x40] ss:$16 sps:$4 sm:$0xff]   ;;  %v9609_v29 = vld [vmem:[%s14635_s2 + $0x48] ss:$16 sps:$4 sm:$0xff]  }
 0x595   :  { %5402 = vmatprep.subr.bf16.mxu1 %v8341_v30  ;;  %v9610_v30 = vld [vmem:[%s14635_s2 + $0x64] ss:$16 sps:$4 sm:$0xff]  }
 0x597   :  { %5239 = vmatpush1.bf16.msra.mxu0 %v8338_v37  ;;  %v9615_v37 = vld [vmem:[%s14635_s2 + $0x8c] ss:$16 sps:$4 sm:$0xff]  }
 0x598   :  { %5403 = vmatpush1.bf16.msra.mxu1 %v8340_v38  ;;  %5240 = vmatprep.subr.bf16.mxu0 %v8347_v42  ;;  %v9616_v38 = vld [vmem:[%s14635_s2 + $0x80] ss:$16 sps:$4 sm:$0xff]   ;;  %v9617_v42 = vld [vmem:[%s14635_s2 + $0x88] ss:$16 sps:$4 sm:$0xff]  }
 0x599   :  { %5404 = vmatprep.subr.bf16.mxu1 %v8349_v44  ;;  %v9618_v44 = vld [vmem:[%s14635_s2 + $0xa4] ss:$16 sps:$4 sm:$0xff]  }
 0x59b   :  { %5241 = vmatpush1.bf16.msra.mxu0 %v8346_v43  ;;  %v9623_v43 = vld [vmem:[%s14635_s2 + $0xcc] ss:$16 sps:$4 sm:$0xff]  }
 0x59c   :  { %5405 = vmatpush1.bf16.msra.mxu1 %v8348_v8  ;;  %5242 = vmatprep.subr.bf16.mxu0 %v8355_v47  ;;  %v9624_v8 = vld [vmem:[%s14635_s2 + $0xc0] ss:$16 sps:$4 sm:$0xff]   ;;  %v9625_v47 = vld [vmem:[%s14635_s2 + $0xc8] ss:$16 sps:$4 sm:$0xff]  }
 0x59d   :  { %5406 = vmatprep.subr.bf16.mxu1 %v8357_v50  ;;  %v9626_v50 = vld [vmem:[%s14635_s2 + $0xe4] ss:$16 sps:$4 sm:$0xff]  }
 0x59f   :  { %5243 = vmatpush1.bf16.msra.mxu0 %v8354_v60  ;;  %v9631_v60 = vld [vmem:[%s14635_s2 + $0x10c] ss:$16 sps:$4 sm:$0xff]  }
 0x5a0   :  { %5407 = vmatpush1.bf16.msra.mxu1 %v8356_v0  ;;  %5244 = vmatprep.subr.bf16.mxu0 %v8363_v49  ;;  %v9632_v0 = vld [vmem:[%s14635_s2 + $0x100] ss:$16 sps:$4 sm:$0xff]   ;;  %v9633_v49 = vld [vmem:[%s14635_s2 + $0x108] ss:$16 sps:$4 sm:$0xff]  }
 0x5a1   :  { %5408 = vmatprep.subr.bf16.mxu1 %v8365_v59  ;;  %v9634_v59 = vld [vmem:[%s14635_s2 + $0x124] ss:$16 sps:$4 sm:$0xff]  }
 0x5a3   :  { %5245 = vmatpush1.bf16.msra.mxu0 %v8362_v17  ;;  %v9639_v17 = vld [vmem:[%s14635_s2 + $0x14c] ss:$16 sps:$4 sm:$0xff]  }
 0x5a4   :  { %5409 = vmatpush1.bf16.msra.mxu1 %v8364_v18  ;;  %5246 = vmatprep.subr.bf16.mxu0 %v8371_v6  ;;  %v9640_v18 = vld [vmem:[%s14635_s2 + $0x140] ss:$16 sps:$4 sm:$0xff]   ;;  %v9641_v6 = vld [vmem:[%s14635_s2 + $0x148] ss:$16 sps:$4 sm:$0xff]  }
 0x5a5   :  { %5410 = vmatprep.subr.bf16.mxu1 %v8373_v14  ;;  %v9642_v14 = vld [vmem:[%s14635_s2 + $0x164] ss:$16 sps:$4 sm:$0xff]  }
 0x5a7   :  { %5247 = vmatpush1.bf16.msra.mxu0 %v8370_v20  ;;  %v9647_v20 = vld [vmem:[%s14635_s2 + $0x18c] ss:$16 sps:$4 sm:$0xff]  }
 0x5a8   :  { %5411 = vmatpush1.bf16.msra.mxu1 %v8372_v21  ;;  %5248 = vmatprep.subr.bf16.mxu0 %v8379_v22  ;;  %v9648_v21 = vld [vmem:[%s14635_s2 + $0x180] ss:$16 sps:$4 sm:$0xff]   ;;  %v9649_v22 = vld [vmem:[%s14635_s2 + $0x188] ss:$16 sps:$4 sm:$0xff]  }
 0x5a9   :  { %5412 = vmatprep.subr.bf16.mxu1 %v8381_v46  ;;  %v9650_v46 = vld [vmem:[%s14635_s2 + $0x1a4] ss:$16 sps:$4 sm:$0xff]  }
 0x5ab   :  { %5249 = vmatpush1.bf16.msra.mxu0 %v8378_v45  ;;  %v9651_v45 = vld [vmem:[%s14635_s2 + $0x1ac] ss:$16 sps:$4 sm:$0xff]  }
 0x5ac   :  { %5413 = vmatpush1.bf16.msra.mxu1 %v8380_v2  ;;  %5427 = vmatprep.subr.bf16.mxu0 %v9598_v48  ;;  %v9652_v2 = vld [vmem:[%s14635_s2 + $0x1a0] ss:$16 sps:$4 sm:$0xff]   ;;  %v9653_v48 = vld [vmem:[%s14635_s2 + $0x1a8] ss:$16 sps:$4 sm:$0xff]  }
 0x5ad   :  { %5513 = vmatprep.subr.bf16.mxu1 %v9599_v51  ;;  %v9654_v51 = vld [vmem:[%s14635_s2 + $0x1c4] ss:$16 sps:$4 sm:$0xff]  }
 0x5ae   :  { %5251 = vmatmul.mubr.bf16.vlgmr.msra.gmra.mrb[28].mxu0 %v11776_v55 }
 0x5af   :  { %5415 = vmatmul.mubr.bf16.vlgmr.msra.gmra.mrb[20].mxu1 %v11776_v55  ;;  %5428 = vmatpush1.bf16.msra.mxu0 %v9600_v23  ;;  %v9603_v55 = vld [vmem:[%s14635_s2 + $0x2c] ss:$16 sps:$4 sm:$0xff]  }
 0x5b0   :  { %5459 = vmatprep.mubr.bf16.mxu0 %v11132_v36  ;;  %5514 = vmatpush1.bf16.msra.mxu1 %v9601_v24  ;;  %v9655_v23 = vld [vmem:[%s14635_s2 + $0x1cc] ss:$16 sps:$4 sm:$0xff]   ;;  %v9656_v24 = vld [vmem:[%s14635_s2 + $0x1c0] ss:$16 sps:$4 sm:$0xff]  }
 0x5b1   :  { %5545 = vmatprep.mubr.bf16.mxu1 %v11132_v36  ;;  %5429 = vmatprep.subr.bf16.mxu0 %v9602_v25  ;;  %v9606_v36 = vld [vmem:[%s14635_s2 + $0x44] ss:$16 sps:$4 sm:$0xff]   ;;  %v9657_v25 = vld [vmem:[%s14635_s2 + $0x1c8] ss:$16 sps:$4 sm:$0xff]  }
 0x5b2   :  { %5515 = vmatprep.subr.bf16.mxu1 %v9603_v55  ;;  %v9658_v55 = vld [vmem:[%s14635_s2 + $0x1e4] ss:$16 sps:$4 sm:$0xff]  }
 0x5b3   :  { %5430 = vmatpush1.bf16.msra.mxu0 %v9604_v16  ;;  %v9659_v16 = vld [vmem:[%s14635_s2 + $0x1ec] ss:$16 sps:$4 sm:$0xff]  }
 0x5b4   :  { %5516 = vmatpush1.bf16.msra.mxu1 %v9605_v26  ;;  %5431 = vmatprep.subr.bf16.mxu0 %v9606_v36  ;;  %v9660_v26 = vld [vmem:[%s14635_s2 + $0x1e0] ss:$16 sps:$4 sm:$0xff]   ;;  %v9661_v36 = vld [vmem:[%s14635_s2 + $0x1e8] ss:$16 sps:$4 sm:$0xff]  }
 0x5b5   :  { %5517 = vmatprep.subr.bf16.mxu1 %v9607_v27  ;;  %v9662_v27 = vld [vmem:[%s14635_s2 + $0x204] ss:$16 sps:$4 sm:$0xff]  }
 0x5b7   :  { %5432 = vmatpush1.bf16.msra.mxu0 %v9608_v28  ;;  %v9663_v28 = vld [vmem:[%s14635_s2 + $0x20c] ss:$16 sps:$4 sm:$0xff]  }
 0x5b8   :  { %5518 = vmatpush1.bf16.msra.mxu1 %v9609_v29  ;;  %5433 = vmatprep.subr.bf16.mxu0 %v9610_v30  ;;  %v9664_v29 = vld [vmem:[%s14635_s2 + $0x200] ss:$16 sps:$4 sm:$0xff]   ;;  %v9665_v30 = vld [vmem:[%s14635_s2 + $0x208] ss:$16 sps:$4 sm:$0xff]  }
 0x5b9   :  { %5519 = vmatprep.subr.bf16.mxu1 %v9611_v31  ;;  %v9666_v31 = vld [vmem:[%s14635_s2 + $0x224] ss:$16 sps:$4 sm:$0xff]  }
 0x5bb   :  { %5434 = vmatpush1.bf16.msra.mxu0 %v9612_v32  ;;  %v9668_v32 = vld [vmem:[%s14635_s2 + $0x220] ss:$16 sps:$4 sm:$0xff]  }
 0x5bc   :  { %5520 = vmatpush1.bf16.msra.mxu1 %v9613_v33  ;;  %5435 = vmatprep.subr.bf16.mxu0 %v9614_v35  ;;  %v9669_v33 = vld [vmem:[%s14635_s2 + $0x228] ss:$16 sps:$4 sm:$0xff]   ;;  %v9671_v35 = vld [vmem:[%s14635_s2 + $0x24c] ss:$16 sps:$4 sm:$0xff]  }
 0x5bd   :  { %5521 = vmatprep.subr.bf16.mxu1 %v9615_v37  ;;  %v9672_v37 = vld [vmem:[%s14635_s2 + $0x240] ss:$16 sps:$4 sm:$0xff]  }
 0x5bf   :  { %5436 = vmatpush1.bf16.msra.mxu0 %v9616_v38  ;;  %v9673_v38 = vld [vmem:[%s14635_s2 + $0x248] ss:$16 sps:$4 sm:$0xff]  }
 0x5c0   :  { %5522 = vmatpush1.bf16.msra.mxu1 %v9617_v42  ;;  %5437 = vmatprep.subr.bf16.mxu0 %v9618_v44  ;;  %v9674_v42 = vld [vmem:[%s14635_s2 + $0x264] ss:$16 sps:$4 sm:$0xff]   ;;  %v9675_v44 = vld [vmem:[%s14635_s2 + $0x26c] ss:$16 sps:$4 sm:$0xff]  }
 0x5c1   :  { %5523 = vmatprep.subr.bf16.mxu1 %v9619_v12  ;;  %v9676_v12 = vld [vmem:[%s14635_s2 + $0x260] ss:$16 sps:$4 sm:$0xff]  }
 0x5c3   :  { %5438 = vmatpush1.bf16.msra.mxu0 %v9620_v13  ;;  %v9677_v13 = vld [vmem:[%s14635_s2 + $0x268] ss:$16 sps:$4 sm:$0xff]  }
 0x5c4   :  { %5524 = vmatpush1.bf16.msra.mxu1 %v9621_v15  ;;  %5439 = vmatprep.subr.bf16.mxu0 %v9622_v1  ;;  %v9678_v15 = vld [vmem:[%s14635_s2 + $0x284] ss:$16 sps:$4 sm:$0xff]   ;;  %v9679_v1 = vld [vmem:[%s14635_s2 + $0x28c] ss:$16 sps:$4 sm:$0xff]  }
 0x5c5   :  { %5525 = vmatprep.subr.bf16.mxu1 %v9623_v43  ;;  %v9680_v43 = vld [vmem:[%s14635_s2 + $0x280] ss:$16 sps:$4 sm:$0xff]  }
 0x5c7   :  { %5440 = vmatpush1.bf16.msra.mxu0 %v9624_v8  ;;  %v9681_v8 = vld [vmem:[%s14635_s2 + $0x288] ss:$16 sps:$4 sm:$0xff]  }
 0x5c8   :  { %5526 = vmatpush1.bf16.msra.mxu1 %v9625_v47  ;;  %5441 = vmatprep.subr.bf16.mxu0 %v9626_v50  ;;  %v9682_v47 = vld [vmem:[%s14635_s2 + $0x2a4] ss:$16 sps:$4 sm:$0xff]   ;;  %v9683_v50 = vld [vmem:[%s14635_s2 + $0x2ac] ss:$16 sps:$4 sm:$0xff]  }
 0x5c9   :  { %5527 = vmatprep.subr.bf16.mxu1 %v9627_v7  ;;  %v9684_v7 = vld [vmem:[%s14635_s2 + $0x2a0] ss:$16 sps:$4 sm:$0xff]  }
 0x5cb   :  { %5442 = vmatpush1.bf16.msra.mxu0 %v9628_v57  ;;  %v9685_v57 = vld [vmem:[%s14635_s2 + $0x2a8] ss:$16 sps:$4 sm:$0xff]  }
 0x5cc   :  { %5528 = vmatpush1.bf16.msra.mxu1 %v9629_v52  ;;  %5443 = vmatprep.subr.bf16.mxu0 %v9630_v58  ;;  %v9686_v52 = vld [vmem:[%s14635_s2 + $0x2c4] ss:$16 sps:$4 sm:$0xff]   ;;  %v9687_v58 = vld [vmem:[%s14635_s2 + $0x2cc] ss:$16 sps:$4 sm:$0xff]  }
 0x5cd   :  { %5529 = vmatprep.subr.bf16.mxu1 %v9631_v60  ;;  %v9688_v60 = vld [vmem:[%s14635_s2 + $0x2c0] ss:$16 sps:$4 sm:$0xff]  }
 0x5cf   :  { %5444 = vmatpush1.bf16.msra.mxu0 %v9632_v0  ;;  %v9689_v0 = vld [vmem:[%s14635_s2 + $0x2c8] ss:$16 sps:$4 sm:$0xff]  }
 0x5d0   :  { %5530 = vmatpush1.bf16.msra.mxu1 %v9633_v49  ;;  %5445 = vmatprep.subr.bf16.mxu0 %v9634_v59  ;;  %v9690_v49 = vld [vmem:[%s14635_s2 + $0x2e4] ss:$16 sps:$4 sm:$0xff]   ;;  %v9691_v59 = vld [vmem:[%s14635_s2 + $0x2ec] ss:$16 sps:$4 sm:$0xff]  }
 0x5d1   :  { %5531 = vmatprep.subr.bf16.mxu1 %v9635_v3  ;;  %v9692_v3 = vld [vmem:[%s14635_s2 + $0x2e0] ss:$16 sps:$4 sm:$0xff]  }
 0x5d3   :  { %5446 = vmatpush1.bf16.msra.mxu0 %v9636_v9  ;;  %v9693_v9 = vld [vmem:[%s14635_s2 + $0x2e8] ss:$16 sps:$4 sm:$0xff]  }
 0x5d4   :  { %5532 = vmatpush1.bf16.msra.mxu1 %v9637_v11  ;;  %5447 = vmatprep.subr.bf16.mxu0 %v9638_v54  ;;  %v9694_v11 = vld [vmem:[%s14635_s2 + $0x304] ss:$16 sps:$4 sm:$0xff]   ;;  %v9695_v54 = vld [vmem:[%s14635_s2 + $0x30c] ss:$16 sps:$4 sm:$0xff]  }
 0x5d5   :  { %5533 = vmatprep.subr.bf16.mxu1 %v9639_v17  ;;  %v9696_v17 = vld [vmem:[%s14635_s2 + $0x300] ss:$16 sps:$4 sm:$0xff]  }
 0x5d7   :  { %5448 = vmatpush1.bf16.msra.mxu0 %v9640_v18  ;;  %v9697_v18 = vld [vmem:[%s14635_s2 + $0x308] ss:$16 sps:$4 sm:$0xff]  }
 0x5d8   :  { %5534 = vmatpush1.bf16.msra.mxu1 %v9641_v6  ;;  %5449 = vmatprep.subr.bf16.mxu0 %v9642_v14  ;;  %v9698_v6 = vld [vmem:[%s14635_s2 + $0x324] ss:$16 sps:$4 sm:$0xff]   ;;  %v9699_v14 = vld [vmem:[%s14635_s2 + $0x32c] ss:$16 sps:$4 sm:$0xff]  }
 0x5d9   :  { %5535 = vmatprep.subr.bf16.mxu1 %v9643_v10  ;;  %v9700_v10 = vld [vmem:[%s14635_s2 + $0x320] ss:$16 sps:$4 sm:$0xff]  }
 0x5db   :  { %5450 = vmatpush1.bf16.msra.mxu0 %v9644_v40  ;;  %v9701_v40 = vld [vmem:[%s14635_s2 + $0x328] ss:$16 sps:$4 sm:$0xff]  }
 0x5dc   :  { %5536 = vmatpush1.bf16.msra.mxu1 %v9645_v19  ;;  %5451 = vmatprep.subr.bf16.mxu0 %v9646_v4  ;;  %v9702_v19 = vld [vmem:[%s14635_s2 + $0x344] ss:$16 sps:$4 sm:$0xff]   ;;  %v9703_v4 = vld [vmem:[%s14635_s2 + $0x34c] ss:$16 sps:$4 sm:$0xff]  }
 0x5dd   :  { %5537 = vmatprep.subr.bf16.mxu1 %v9647_v20  ;;  %v9704_v20 = vld [vmem:[%s14635_s2 + $0x340] ss:$16 sps:$4 sm:$0xff]  }
 0x5df   :  { %5452 = vmatpush1.bf16.msra.mxu0 %v9648_v21  ;;  %v9705_v21 = vld [vmem:[%s14635_s2 + $0x348] ss:$16 sps:$4 sm:$0xff]  }
 0x5e0   :  { %5538 = vmatpush1.bf16.msra.mxu1 %v9649_v22  ;;  %5453 = vmatprep.subr.bf16.mxu0 %v9650_v46  ;;  %v9706_v22 = vld [vmem:[%s14635_s2 + $0x364] ss:$16 sps:$4 sm:$0xff]   ;;  %v9707_v46 = vld [vmem:[%s14635_s2 + $0x36c] ss:$16 sps:$4 sm:$0xff]  }
 0x5e1   :  { %5539 = vmatprep.subr.bf16.mxu1 %v9651_v45  ;;  %v9708_v45 = vld [vmem:[%s14635_s2 + $0x360] ss:$16 sps:$4 sm:$0xff]  }
 0x5e3   :  { %5454 = vmatpush1.bf16.msra.mxu0 %v9652_v2  ;;  %v9709_v2 = vld [vmem:[%s14635_s2 + $0x368] ss:$16 sps:$4 sm:$0xff]  }
 0x5e4   :  { %5540 = vmatpush1.bf16.msra.mxu1 %v9653_v48  ;;  %5455 = vmatprep.subr.bf16.mxu0 %v9654_v51  ;;  %v9710_v48 = vld [vmem:[%s14635_s2 + $0x384] ss:$16 sps:$4 sm:$0xff]   ;;  %v9711_v51 = vld [vmem:[%s14635_s2 + $0x38c] ss:$16 sps:$4 sm:$0xff]  }
 0x5e5   :  { %5541 = vmatprep.subr.bf16.mxu1 %v9655_v23  ;;  %v9712_v23 = vld [vmem:[%s14635_s2 + $0x380] ss:$16 sps:$4 sm:$0xff]  }
 0x5e7   :  { %5456 = vmatpush1.bf16.msra.mxu0 %v9656_v24  ;;  %v9713_v24 = vld [vmem:[%s14635_s2 + $0x388] ss:$16 sps:$4 sm:$0xff]  }
 0x5e8   :  { %5542 = vmatpush1.bf16.msra.mxu1 %v9657_v25  ;;  %5457 = vmatprep.subr.bf16.mxu0 %v9658_v55  ;;  %v9714_v25 = vld [vmem:[%s14635_s2 + $0x3a4] ss:$16 sps:$4 sm:$0xff]   ;;  %v9715_v55 = vld [vmem:[%s14635_s2 + $0x3ac] ss:$16 sps:$4 sm:$0xff]  }
 0x5e9   :  { %5543 = vmatprep.subr.bf16.mxu1 %v9659_v16  ;;  %v9716_v16 = vld [vmem:[%s14635_s2 + $0x3a0] ss:$16 sps:$4 sm:$0xff]  }
 0x5eb   :  { %5458 = vmatpush1.bf16.msra.mxu0 %v9660_v26  ;;  %v9717_v26 = vld [vmem:[%s14635_s2 + $0x3a8] ss:$16 sps:$4 sm:$0xff]  }
 0x5ec   :  { %5544 = vmatpush1.bf16.msra.mxu1 %v9661_v36  ;;  %5470 = vmatprep.subr.bf16.mxu0 %v9662_v27  ;;  %v9718_v36 = vld [vmem:[%s14635_s2 + $0x3c4] ss:$16 sps:$4 sm:$0xff]   ;;  %v9719_v27 = vld [vmem:[%s14635_s2 + $0x3cc] ss:$16 sps:$4 sm:$0xff]  }
 0x5ed   :  { %5556 = vmatprep.subr.bf16.mxu1 %v9663_v28  ;;  %v9720_v28 = vld [vmem:[%s14635_s2 + $0x3c0] ss:$16 sps:$4 sm:$0xff]  }
 0x5ee   :  { %5460 = vmatmul.mubr.bf16.vlgmr.msra.gmra.mrb[32].mxu0 %v11129_v34 }
 0x5ef   :  { %5546 = vmatmul.mubr.bf16.vlgmr.msra.gmra.mrb[24].mxu1 %v11129_v34  ;;  %5471 = vmatpush1.bf16.msra.mxu0 %v9664_v29  ;;  %v9667_v34 = vld [vmem:[%s14635_s2 + $0x22c] ss:$16 sps:$4 sm:$0xff]   ;;  %v9721_v29 = vld [vmem:[%s14635_s2 + $0x3c8] ss:$16 sps:$4 sm:$0xff]  }
 0x5f0   :  { %5502 = vmatprep.mubr.bf16.mxu0 %v11138_v39  ;;  %5557 = vmatpush1.bf16.msra.mxu1 %v9665_v30  ;;  %v9722_v30 = vld [vmem:[%s14635_s2 + $0x3e4] ss:$16 sps:$4 sm:$0xff]  }
 0x5f1   :  { %5588 = vmatprep.mubr.bf16.mxu1 %v11138_v39  ;;  %5472 = vmatprep.subr.bf16.mxu0 %v9666_v31  ;;  %v9670_v39 = vld [vmem:[%s14635_s2 + $0x244] ss:$16 sps:$4 sm:$0xff]  }
 0x5f2   :  { %5558 = vmatprep.subr.bf16.mxu1 %v9667_v34  ;;  %v12936_v31 = vld [vmem:[%s14637_s5 + $0x4] ss:$16 sps:$4 sm:$0xff]   ;;  %v9723_v34 = vld [vmem:[%s14635_s2 + $0x3ec] ss:$16 sps:$4 sm:$0xff]  }
 0x5f3   :  { %5473 = vmatpush1.bf16.msra.mxu0 %v9668_v32  ;;  %v12944_v32 = vld [vmem:[%s14637_s5 + $0xc] ss:$16 sps:$4 sm:$0xff]  }
 0x5f4   :  { %5559 = vmatpush1.bf16.msra.mxu1 %v9669_v33  ;;  %5474 = vmatprep.subr.bf16.mxu0 %v9670_v39  ;;  %v9724_v33 = vld [vmem:[%s14635_s2 + $0x3e0] ss:$16 sps:$4 sm:$0xff]  }
 0x5f5   :  { %5560 = vmatprep.subr.bf16.mxu1 %v9671_v35  ;;  %v12952_v39 = vld [vmem:[%s14637_s5] ss:$16 sps:$4 sm:$0xff]   ;;  %v9725_v35 = vld [vmem:[%s14635_s2 + $0x3e8] ss:$16 sps:$4 sm:$0xff]  }
 0x5f7   :  { %5475 = vmatpush1.bf16.msra.mxu0 %v9672_v37  ;;  %v12961_v37 = vld [vmem:[%s14637_s5 + $0x8] ss:$16 sps:$4 sm:$0xff]  }
 0x5f8   :  { %5561 = vmatpush1.bf16.msra.mxu1 %v9673_v38  ;;  %5476 = vmatprep.subr.bf16.mxu0 %v9674_v42  ;;  %v12966_v38 = vld [vmem:[%s14637_s5 + $0x24] ss:$16 sps:$4 sm:$0xff]   ;;  %v12972_v42 = vld [vmem:[%s14637_s5 + $0x20] ss:$16 sps:$4 sm:$0xff]  }
 0x5f9   :  { %5562 = vmatprep.subr.bf16.mxu1 %v9675_v44  ;;  %v12977_v44 = vld [vmem:[%s14637_s5 + $0x2c] ss:$16 sps:$4 sm:$0xff]  }
 0x5fb   :  { %5477 = vmatpush1.bf16.msra.mxu0 %v9676_v12  ;;  %v12983_v12 = vld [vmem:[%s14637_s5 + $0x28] ss:$16 sps:$4 sm:$0xff]  }
 0x5fc   :  { %5563 = vmatpush1.bf16.msra.mxu1 %v9677_v13  ;;  %5478 = vmatprep.subr.bf16.mxu0 %v9678_v15  ;;  %v12988_v13 = vld [vmem:[%s14637_s5 + $0x44] ss:$16 sps:$4 sm:$0xff]   ;;  %v12995_v15 = vld [vmem:[%s14637_s5 + $0x4c] ss:$16 sps:$4 sm:$0xff]  }
 0x5fd   :  { %5564 = vmatprep.subr.bf16.mxu1 %v9679_v1  ;;  %v13003_v1 = vld [vmem:[%s14637_s5 + $0x40] ss:$16 sps:$4 sm:$0xff]  }
 0x5ff   :  { %5479 = vmatpush1.bf16.msra.mxu0 %v9680_v43  ;;  %v13013_v43 = vld [vmem:[%s14637_s5 + $0x64] ss:$16 sps:$4 sm:$0xff]  }
 0x600   :  { %5565 = vmatpush1.bf16.msra.mxu1 %v9681_v8  ;;  %5480 = vmatprep.subr.bf16.mxu0 %v9682_v47  ;;  %v13019_v8 = vld [vmem:[%s14637_s5 + $0x6c] ss:$16 sps:$4 sm:$0xff]   ;;  %v13027_v47 = vld [vmem:[%s14637_s5 + $0x60] ss:$16 sps:$4 sm:$0xff]  }
 0x601   :  { %5566 = vmatprep.subr.bf16.mxu1 %v9683_v50  ;;  %v13032_v50 = vld [vmem:[%s14637_s5 + $0x68] ss:$16 sps:$4 sm:$0xff]  }
 0x603   :  { %5481 = vmatpush1.bf16.msra.mxu0 %v9684_v7  ;;  %v13037_v7 = vld [vmem:[%s14637_s5 + $0x84] ss:$16 sps:$4 sm:$0xff]  }
 0x604   :  { %5567 = vmatpush1.bf16.msra.mxu1 %v9685_v57  ;;  %5482 = vmatprep.subr.bf16.mxu0 %v9686_v52  ;;  %v13043_v57 = vld [vmem:[%s14637_s5 + $0x8c] ss:$16 sps:$4 sm:$0xff]   ;;  %v13051_v52 = vld [vmem:[%s14637_s5 + $0x80] ss:$16 sps:$4 sm:$0xff]  }
 0x605   :  { %5568 = vmatprep.subr.bf16.mxu1 %v9687_v58  ;;  %v13056_v58 = vld [vmem:[%s14637_s5 + $0x88] ss:$16 sps:$4 sm:$0xff]  }
 0x607   :  { %5483 = vmatpush1.bf16.msra.mxu0 %v9688_v60  ;;  %v13061_v60 = vld [vmem:[%s14637_s5 + $0xa4] ss:$16 sps:$4 sm:$0xff]  }
 0x608   :  { %5569 = vmatpush1.bf16.msra.mxu1 %v9689_v0  ;;  %5484 = vmatprep.subr.bf16.mxu0 %v9690_v49  ;;  %v13067_v0 = vld [vmem:[%s14637_s5 + $0xac] ss:$16 sps:$4 sm:$0xff]   ;;  %v13075_v49 = vld [vmem:[%s14637_s5 + $0xa0] ss:$16 sps:$4 sm:$0xff]  }
 0x609   :  { %5570 = vmatprep.subr.bf16.mxu1 %v9691_v59  ;;  %v13080_v59 = vld [vmem:[%s14637_s5 + $0xa8] ss:$16 sps:$4 sm:$0xff]  }
 0x60b   :  { %5485 = vmatpush1.bf16.msra.mxu0 %v9692_v3  ;;  %v13085_v3 = vld [vmem:[%s14637_s5 + $0xc4] ss:$16 sps:$4 sm:$0xff]  }
 0x60c   :  { %5571 = vmatpush1.bf16.msra.mxu1 %v9693_v9  ;;  %5486 = vmatprep.subr.bf16.mxu0 %v9694_v11  ;;  %v13091_v9 = vld [vmem:[%s14637_s5 + $0xcc] ss:$16 sps:$4 sm:$0xff]   ;;  %v13099_v11 = vld [vmem:[%s14637_s5 + $0xc0] ss:$16 sps:$4 sm:$0xff]  }
 0x60d   :  { %5572 = vmatprep.subr.bf16.mxu1 %v9695_v54  ;;  %v13104_v54 = vld [vmem:[%s14637_s5 + $0xc8] ss:$16 sps:$4 sm:$0xff]  }
 0x60f   :  { %5487 = vmatpush1.bf16.msra.mxu0 %v9696_v17  ;;  %v13112_v17 = vld [vmem:[%s14637_s5 + $0xe4] ss:$16 sps:$4 sm:$0xff]  }
 0x610   :  { %5573 = vmatpush1.bf16.msra.mxu1 %v9697_v18  ;;  %5488 = vmatprep.subr.bf16.mxu0 %v9698_v6  ;;  %v13118_v18 = vld [vmem:[%s14637_s5 + $0xec] ss:$16 sps:$4 sm:$0xff]   ;;  %v13124_v6 = vld [vmem:[%s14637_s5 + $0xe0] ss:$16 sps:$4 sm:$0xff]  }
 0x611   :  { %5574 = vmatprep.subr.bf16.mxu1 %v9699_v14  ;;  %v13131_v14 = vld [vmem:[%s14637_s5 + $0xe8] ss:$16 sps:$4 sm:$0xff]  }
 0x613   :  { %5489 = vmatpush1.bf16.msra.mxu0 %v9700_v10  ;;  %v13136_v10 = vld [vmem:[%s14637_s5 + $0x104] ss:$16 sps:$4 sm:$0xff]  }
 0x614   :  { %5575 = vmatpush1.bf16.msra.mxu1 %v9701_v40  ;;  %5490 = vmatprep.subr.bf16.mxu0 %v9702_v19  ;;  %v13142_v40 = vld [vmem:[%s14637_s5 + $0x10c] ss:$16 sps:$4 sm:$0xff]   ;;  %v13148_v19 = vld [vmem:[%s14637_s5 + $0x100] ss:$16 sps:$4 sm:$0xff]  }
 0x615   :  { %5576 = vmatprep.subr.bf16.mxu1 %v9703_v4  ;;  %v13155_v4 = vld [vmem:[%s14637_s5 + $0x108] ss:$16 sps:$4 sm:$0xff]  }
 0x617   :  { %5491 = vmatpush1.bf16.msra.mxu0 %v9704_v20  ;;  %v13160_v20 = vld [vmem:[%s14637_s5 + $0x124] ss:$16 sps:$4 sm:$0xff]  }
 0x618   :  { %5577 = vmatpush1.bf16.msra.mxu1 %v9705_v21  ;;  %5492 = vmatprep.subr.bf16.mxu0 %v9706_v22  ;;  %v13166_v21 = vld [vmem:[%s14637_s5 + $0x12c] ss:$16 sps:$4 sm:$0xff]   ;;  %v13172_v22 = vld [vmem:[%s14637_s5 + $0x120] ss:$16 sps:$4 sm:$0xff]  }
 0x619   :  { %5578 = vmatprep.subr.bf16.mxu1 %v9707_v46  ;;  %v13179_v46 = vld [vmem:[%s14637_s5 + $0x128] ss:$16 sps:$4 sm:$0xff]  }
 0x61b   :  { %5493 = vmatpush1.bf16.msra.mxu0 %v9708_v45  ;;  %v13184_v45 = vld [vmem:[%s14637_s5 + $0x144] ss:$16 sps:$4 sm:$0xff]  }
 0x61c   :  { %5579 = vmatpush1.bf16.msra.mxu1 %v9709_v2  ;;  %5494 = vmatprep.subr.bf16.mxu0 %v9710_v48  ;;  %v13190_v2 = vld [vmem:[%s14637_s5 + $0x14c] ss:$16 sps:$4 sm:$0xff]   ;;  %v13196_v48 = vld [vmem:[%s14637_s5 + $0x140] ss:$16 sps:$4 sm:$0xff]  }
 0x61d   :  { %5580 = vmatprep.subr.bf16.mxu1 %v9711_v51  ;;  %v13203_v51 = vld [vmem:[%s14637_s5 + $0x148] ss:$16 sps:$4 sm:$0xff]  }
 0x61f   :  { %5495 = vmatpush1.bf16.msra.mxu0 %v9712_v23  ;;  %v13208_v23 = vld [vmem:[%s14637_s5 + $0x164] ss:$16 sps:$4 sm:$0xff]  }
 0x620   :  { %5581 = vmatpush1.bf16.msra.mxu1 %v9713_v24  ;;  %5496 = vmatprep.subr.bf16.mxu0 %v9714_v25  ;;  %v13214_v24 = vld [vmem:[%s14637_s5 + $0x16c] ss:$16 sps:$4 sm:$0xff]   ;;  %v13220_v25 = vld [vmem:[%s14637_s5 + $0x160] ss:$16 sps:$4 sm:$0xff]  }
 0x621   :  { %5582 = vmatprep.subr.bf16.mxu1 %v9715_v55  ;;  %v13227_v55 = vld [vmem:[%s14637_s5 + $0x168] ss:$16 sps:$4 sm:$0xff]  }
 0x623   :  { %5497 = vmatpush1.bf16.msra.mxu0 %v9716_v16  ;;  %v13232_v16 = vld [vmem:[%s14637_s5 + $0x184] ss:$16 sps:$4 sm:$0xff]  }
 0x624   :  { %5583 = vmatpush1.bf16.msra.mxu1 %v9717_v26  ;;  %5498 = vmatprep.subr.bf16.mxu0 %v9718_v36  ;;  %v13238_v26 = vld [vmem:[%s14637_s5 + $0x18c] ss:$16 sps:$4 sm:$0xff]   ;;  %v13244_v36 = vld [vmem:[%s14637_s5 + $0x180] ss:$16 sps:$4 sm:$0xff]  }
 0x625   :  { %5584 = vmatprep.subr.bf16.mxu1 %v9719_v27  ;;  %14728 = vst [vmem:[#allocation6_spill] sm:$0xff] %v13244_v36  ;;  %v13251_v27 = vld [vmem:[%s14637_s5 + $0x188] ss:$16 sps:$4 sm:$0xff]  }
 0x626   :  { %14729 = vst [vmem:[#allocation7_spill] sm:$0xff] %v13251_v27 }
 0x627   :  { %5499 = vmatpush1.bf16.msra.mxu0 %v9720_v28  ;;  %v13256_v28 = vld [vmem:[%s14637_s5 + $0x1a4] ss:$16 sps:$4 sm:$0xff]  }
 0x628   :  { %5585 = vmatpush1.bf16.msra.mxu1 %v9721_v29  ;;  %5500 = vmatprep.subr.bf16.mxu0 %v9722_v30  ;;  %14730 = vst [vmem:[#allocation8_spill] sm:$0xff] %v13256_v28  ;;  %v13262_v29 = vld [vmem:[%s14637_s5 + $0x1ac] ss:$16 sps:$4 sm:$0xff]   ;;  %v13268_v30 = vld [vmem:[%s14637_s5 + $0x1a0] ss:$16 sps:$4 sm:$0xff]  }
 0x629   :  { %5586 = vmatprep.subr.bf16.mxu1 %v9723_v34  ;;  %14731 = vst [vmem:[#allocation9_spill] sm:$0xff] %v13262_v29  ;;  %14732 = vst [vmem:[#allocation10_spill] sm:$0xff] %v13268_v30  ;;  %v13275_v34 = vld [vmem:[%s14637_s5 + $0x1a8] ss:$16 sps:$4 sm:$0xff]  }
 0x62a   :  { %14733 = vst [vmem:[#allocation11_spill] sm:$0xff] %v13275_v34 }
 0x62b   :  { %5501 = vmatpush1.bf16.msra.mxu0 %v9724_v33  ;;  %v13280_v33 = vld [vmem:[%s14637_s5 + $0x1c4] ss:$16 sps:$4 sm:$0xff]  }
 0x62c   :  { %5587 = vmatpush1.bf16.msra.mxu1 %v9725_v35  ;;  %6371 = vmatprep.subr.bf16.mxu0 %v12936_v31  ;;  %14734 = vst [vmem:[#allocation12_spill] sm:$0xff] %v13280_v33  ;;  %v13286_v35 = vld [vmem:[%s14637_s5 + $0x1cc] ss:$16 sps:$4 sm:$0xff]  }
 0x62d   :  { %6453 = vmatprep.subr.bf16.mxu1 %v12944_v32  ;;  %14735 = vst [vmem:[#allocation13_spill] sm:$0xff] %v13286_v35 }
 0x62e   :  { %5503 = vmatmul.mubr.bf16.vlgmr.msra.gmra.mrb[32].mxu0 %v11135_v41 }
 0x62f   :  { %5589 = vmatmul.mubr.bf16.vlgmr.msra.gmra.mrb[24].mxu1 %v11135_v41  ;;  %6372 = vmatpush1.bf16.msra.mxu0 %v12952_v39  ;;  %v13008_v41 = vld [vmem:[%s14637_s5 + $0x48] ss:$16 sps:$4 sm:$0xff]  }
 0x630   :  { %6454 = vmatpush1.bf16.msra.mxu1 %v12961_v37  ;;  %6373 = vmatprep.subr.bf16.mxu0 %v12966_v38 }
 0x631   :  { %6455 = vmatprep.subr.bf16.mxu1 %v12977_v44 }
 0x633   :  { %6374 = vmatpush1.bf16.msra.mxu0 %v12972_v42 }
 0x634   :  { %6456 = vmatpush1.bf16.msra.mxu1 %v12983_v12  ;;  %6375 = vmatprep.subr.bf16.mxu0 %v12988_v13 }
 0x635   :  { %6457 = vmatprep.subr.bf16.mxu1 %v12995_v15 }
 0x637   :  { %6376 = vmatpush1.bf16.msra.mxu0 %v13003_v1 }
 0x638   :  { %6458 = vmatpush1.bf16.msra.mxu1 %v13008_v41  ;;  %6377 = vmatprep.subr.bf16.mxu0 %v13013_v43 }
 0x639   :  { %6459 = vmatprep.subr.bf16.mxu1 %v13019_v8 }
 0x63b   :  { %6378 = vmatpush1.bf16.msra.mxu0 %v13027_v47 }
 0x63c   :  { %6460 = vmatpush1.bf16.msra.mxu1 %v13032_v50  ;;  %6379 = vmatprep.subr.bf16.mxu0 %v13037_v7 }
 0x63d   :  { %6461 = vmatprep.subr.bf16.mxu1 %v13043_v57 }
 0x63f   :  { %6380 = vmatpush1.bf16.msra.mxu0 %v13051_v52 }
 0x640   :  { %6462 = vmatpush1.bf16.msra.mxu1 %v13056_v58  ;;  %6381 = vmatprep.subr.bf16.mxu0 %v13061_v60 }
 0x641   :  { %6463 = vmatprep.subr.bf16.mxu1 %v13067_v0 }
 0x643   :  { %6382 = vmatpush1.bf16.msra.mxu0 %v13075_v49 }
 0x644   :  { %6464 = vmatpush1.bf16.msra.mxu1 %v13080_v59  ;;  %6383 = vmatprep.subr.bf16.mxu0 %v13085_v3 }
 0x645   :  { %6465 = vmatprep.subr.bf16.mxu1 %v13091_v9 }
 0x647   :  { %6384 = vmatpush1.bf16.msra.mxu0 %v13099_v11 }
 0x648   :  { %6466 = vmatpush1.bf16.msra.mxu1 %v13104_v54  ;;  %6385 = vmatprep.subr.bf16.mxu0 %v13112_v17 }
 0x649   :  { %6467 = vmatprep.subr.bf16.mxu1 %v13118_v18 }
 0x64b   :  { %6386 = vmatpush1.bf16.msra.mxu0 %v13124_v6 }
 0x64c   :  { %6468 = vmatpush1.bf16.msra.mxu1 %v13131_v14  ;;  %6387 = vmatprep.subr.bf16.mxu0 %v13136_v10 }
 0x64d   :  { %6469 = vmatprep.subr.bf16.mxu1 %v13142_v40 }
 0x64f   :  { %6388 = vmatpush1.bf16.msra.mxu0 %v13148_v19 }
 0x650   :  { %6470 = vmatpush1.bf16.msra.mxu1 %v13155_v4  ;;  %6389 = vmatprep.subr.bf16.mxu0 %v13160_v20 }
 0x651   :  { %6471 = vmatprep.subr.bf16.mxu1 %v13166_v21 }
 0x653   :  { %6390 = vmatpush1.bf16.msra.mxu0 %v13172_v22 }
 0x654   :  { %6472 = vmatpush1.bf16.msra.mxu1 %v13179_v46  ;;  %6391 = vmatprep.subr.bf16.mxu0 %v13184_v45 }
 0x655   :  { %6473 = vmatprep.subr.bf16.mxu1 %v13190_v2 }
 0x657   :  { %6392 = vmatpush1.bf16.msra.mxu0 %v13196_v48 }
 0x658   :  { %6474 = vmatpush1.bf16.msra.mxu1 %v13203_v51  ;;  %6393 = vmatprep.subr.bf16.mxu0 %v13208_v23 }
 0x659   :  { %6475 = vmatprep.subr.bf16.mxu1 %v13214_v24 }
 0x65b   :  { %6394 = vmatpush1.bf16.msra.mxu0 %v13220_v25 }
 0x65c   :  { %6476 = vmatpush1.bf16.msra.mxu1 %v13227_v55  ;;  %6395 = vmatprep.subr.bf16.mxu0 %v13232_v16 }
 0x65d   :  { %6477 = vmatprep.subr.bf16.mxu1 %v13238_v26 }
 0x65f   :  { %6396 = vmatpush1.bf16.msra.mxu0 %v13244_v36 }
 0x660   :  { %6478 = vmatpush1.bf16.msra.mxu1 %v13251_v27  ;;  %6397 = vmatprep.subr.bf16.mxu0 %v13256_v28 }
 0x661   :  { %6479 = vmatprep.subr.bf16.mxu1 %v13262_v29 }
 0x663   :  { %6398 = vmatpush1.bf16.msra.mxu0 %v13268_v30 }
 0x664   :  { %6480 = vmatpush1.bf16.msra.mxu1 %v13275_v34  ;;  %6399 = vmatprep.subr.bf16.mxu0 %v13280_v33 }
 0x665   :  { %6481 = vmatprep.subr.bf16.mxu1 %v13286_v35  ;;  %v13343_v35 = vld [vmem:[%s14637_s5 + $0x204] ss:$16 sps:$4 sm:$0xff]  }
 0x666   :  { %14744 = vst [vmem:[#allocation22_spill] sm:$0xff] %v13343_v35 }
 0x667   :  { %6400 = vmatpush1.bf16.msra.mxu0 %v13292_v61  ;;  %v13328_v61 = vld [vmem:[%s14637_s5 + $0x1e8] ss:$16 sps:$4 sm:$0xff]  }
 0x668   :  { %6482 = vmatpush1.bf16.msra.mxu1 %v13299_v63  ;;  %v13323_v63 = vld [vmem:[%s14637_s5 + $0x1e0] ss:$16 sps:$4 sm:$0xff]   ;;  %14742 = vst [vmem:[#allocation20_spill] sm:$0xff] %v13328_v61  ;;  %6401 = vmatprep.subr.bf16.mxu0 %v13309_v53 }
 0x669   :  { %14741 = vst [vmem:[#allocation19_spill] sm:$0xff] %v13323_v63  ;;  %6483 = vmatprep.subr.bf16.mxu1 %v13314_v56 }
 0x66b   :  { %6402 = vmatpush1.bf16.msra.mxu0 %v13323_v63 }
 0x66c   :  { %6484 = vmatpush1.bf16.msra.mxu1 %v13328_v61  ;;  %6412 = vmatprep.subr.bf16.mxu0 %v13343_v35  ;;  %v13365_v61 = vld [vmem:[%s14637_s5 + $0x200] ss:$16 sps:$4 sm:$0xff]  }
 0x681   :  { %v13304_v5 = vpop.f32.mrb[28].mxu0 }
 0x682   :  { %14738 = vst [vmem:[#allocation16_spill] sm:$0xff] %v13304_v5  ;;  %v13316_v62 = vpop.f32.mrb[20].mxu1  ;;  %v13318_v33 = vpop.f32.mrb[29].mxu0 }
 0x683   :  { %14739 = vst [vmem:[#allocation17_spill] sm:$0xff] %v13316_v62  ;;  %14740 = vst [vmem:[#allocation18_spill] sm:$0xff] %v13318_v33  ;;  %v13332_v34 = vpop.f32.mrb[21].mxu1  ;;  %v5256_v30 = vpop.f32.mrb[30].mxu0 }
 0x684   :  { %14743 = vst [vmem:[#allocation21_spill] sm:$0xff] %v13332_v34  ;;  %v5420_v28 = vpop.f32.mrb[22].mxu1  ;;  %v5257_v27 = vpop.f32.mrb[31].mxu0  ;;  %v13348_v30 = vld [vmem:[%s14637_s5 + $0x20c] ss:$16 sps:$4 sm:$0xff]  }
 0x685   :  { %v5421_v36 = vpop.f32.mrb[23].mxu1  ;;  %14745 = vst [vmem:[#allocation23_spill] sm:$0xff] %v13348_v30  ;;  %6494 = vmatprep.subr.bf16.mxu1 %v13348_v30  ;;  %v13370_v30 = vld [vmem:[%s14637_s5 + $0x208] ss:$16 sps:$4 sm:$0xff]  }
 0x686   :  { %14748 = vst [vmem:[#allocation26_spill] sm:$0xff] %v13370_v30 }
 0x701   :  { %v13352_v27 = vpop.f32.mrb[32].mxu0 }
 0x702   :  { %14746 = vst [vmem:[#allocation24_spill] sm:$0xff] %v13352_v27  ;;  %v5590_v28 = vpop.f32.mrb[24].mxu1  ;;  %v13354_v29 = vpop.f32.mrb[33].mxu0 }
 0x703   :  { %v5592_v36 = vpop.f32.mrb[25].mxu1  ;;  %v13356_v5 = vpop.f32.mrb[34].mxu0  ;;  %v5727_v35 = vpack.c.bf16 %v5590_v28, %v5590_v28  ;;  %v13402_v28 = vld [vmem:[%s14637_s5 + $0x24c] ss:$16 sps:$4 sm:$0xff]  }
 0x704   :  { %14747 = vst [vmem:[#allocation25_spill] sm:$0xff] %v13356_v5  ;;  %v5728_v62 = vpack.c.bf16 %v5592_v36, %v5592_v36  ;;  %v13358_v33 = vpop.f32.mrb[26].mxu1  ;;  %v13360_v34 = vpop.f32.mrb[35].mxu0  ;;  %v13375_v36 = vld [vmem:[%s14637_s5 + $0x224] ss:$16 sps:$4 sm:$0xff]   ;;  %14752 = vst [vmem:[#allocation30_spill] sm:$0xff] %v13402_v28 }
 0x705   :  { %v5596_v27 = vpop.f32.mrb[27].mxu1  ;;  %v13380_v5 = vld [vmem:[%s14637_s5 + $0x22c] ss:$16 sps:$4 sm:$0xff]  }
 0x706   :  { %v5730_v63 = vpack.c.bf16 %v5596_v27, %v5596_v27  ;;  %6403 = vmatprep.mubr.bf16.mxu0 %v5728_v62  ;;  %6485 = vmatprep.mubr.bf16.mxu1 %v5728_v62  ;;  %v13387_v62 = vld [vmem:[%s14637_s5 + $0x220] ss:$16 sps:$4 sm:$0xff]   ;;  %v13392_v27 = vld [vmem:[%s14637_s5 + $0x228] ss:$16 sps:$4 sm:$0xff]  }
 0x707   :  { %6404 = vmatmul.mubr.bf16.vlgmr.msra.gmra.mrb[36].mxu0 %v5727_v35  ;;  %6486 = vmatmul.mubr.bf16.vlgmr.msra.gmra.mrb[28].mxu1 %v5727_v35  ;;  %14749 = vst [vmem:[#allocation27_spill] sm:$0xff] %v13387_v62  ;;  %14750 = vst [vmem:[#allocation28_spill] sm:$0xff] %v13392_v27  ;;  %v13397_v35 = vld [vmem:[%s14637_s5 + $0x244] ss:$16 sps:$4 sm:$0xff]  }
 0x708   :  { %6413 = vmatpush1.bf16.msra.mxu0 %v13365_v61  ;;  %6495 = vmatpush1.bf16.msra.mxu1 %v13370_v30  ;;  %14751 = vst [vmem:[#allocation29_spill] sm:$0xff] %v13397_v35  ;;  %v13416_v30 = vld [vmem:[%s14637_s5 + $0x248] ss:$16 sps:$4 sm:$0xff]  }
 0x709   :  { %6444 = vmatprep.mubr.bf16.mxu0 %v5730_v63  ;;  %6526 = vmatprep.mubr.bf16.mxu1 %v5730_v63  ;;  %v13411_v63 = vld [vmem:[%s14637_s5 + $0x240] ss:$16 sps:$4 sm:$0xff]   ;;  %14754 = vst [vmem:[#allocation32_spill] sm:$0xff] %v13416_v30 }
 0x70a   :  { %6414 = vmatprep.subr.bf16.mxu0 %v13375_v36  ;;  %6496 = vmatprep.subr.bf16.mxu1 %v13380_v5  ;;  %14753 = vst [vmem:[#allocation31_spill] sm:$0xff] %v13411_v63 }
 0x70c   :  { %6415 = vmatpush1.bf16.msra.mxu0 %v13387_v62  ;;  %6497 = vmatpush1.bf16.msra.mxu1 %v13392_v27  ;;  %v13423_v62 = vld [vmem:[%s14637_s5 + $0x264] ss:$16 sps:$4 sm:$0xff]   ;;  %v13428_v27 = vld [vmem:[%s14637_s5 + $0x26c] ss:$16 sps:$4 sm:$0xff]  }
 0x70d   :  { %6416 = vmatprep.subr.bf16.mxu0 %v13397_v35  ;;  %6498 = vmatprep.subr.bf16.mxu1 %v13402_v28  ;;  %14755 = vst [vmem:[#allocation33_spill] sm:$0xff] %v13423_v62  ;;  %14756 = vst [vmem:[#allocation34_spill] sm:$0xff] %v13428_v27  ;;  %v13435_v35 = vld [vmem:[%s14637_s5 + $0x260] ss:$16 sps:$4 sm:$0xff]   ;;  %v13440_v28 = vld [vmem:[%s14637_s5 + $0x268] ss:$16 sps:$4 sm:$0xff]  }
 0x70e   :  { %14757 = vst [vmem:[#allocation35_spill] sm:$0xff] %v13435_v35  ;;  %14758 = vst [vmem:[#allocation36_spill] sm:$0xff] %v13440_v28 }
 0x710   :  { %6417 = vmatpush1.bf16.msra.mxu0 %v13411_v63  ;;  %6499 = vmatpush1.bf16.msra.mxu1 %v13416_v30  ;;  %v13447_v63 = vld [vmem:[%s14637_s5 + $0x284] ss:$16 sps:$4 sm:$0xff]   ;;  %v13452_v30 = vld [vmem:[%s14637_s5 + $0x28c] ss:$16 sps:$4 sm:$0xff]  }
 0x711   :  { %6418 = vmatprep.subr.bf16.mxu0 %v13423_v62  ;;  %6500 = vmatprep.subr.bf16.mxu1 %v13428_v27  ;;  %14759 = vst [vmem:[#allocation37_spill] sm:$0xff] %v13447_v63  ;;  %14760 = vst [vmem:[#allocation38_spill] sm:$0xff] %v13452_v30  ;;  %v13459_v62 = vld [vmem:[%s14637_s5 + $0x280] ss:$16 sps:$4 sm:$0xff]   ;;  %v13464_v27 = vld [vmem:[%s14637_s5 + $0x288] ss:$16 sps:$4 sm:$0xff]  }
 0x712   :  { %14761 = vst [vmem:[#allocation39_spill] sm:$0xff] %v13459_v62  ;;  %14762 = vst [vmem:[#allocation40_spill] sm:$0xff] %v13464_v27 }
 0x714   :  { %6419 = vmatpush1.bf16.msra.mxu0 %v13435_v35  ;;  %6501 = vmatpush1.bf16.msra.mxu1 %v13440_v28  ;;  %v13471_v35 = vld [vmem:[%s14637_s5 + $0x2a4] ss:$16 sps:$4 sm:$0xff]   ;;  %v13476_v28 = vld [vmem:[%s14637_s5 + $0x2ac] ss:$16 sps:$4 sm:$0xff]  }
 0x715   :  { %6420 = vmatprep.subr.bf16.mxu0 %v13447_v63  ;;  %6502 = vmatprep.subr.bf16.mxu1 %v13452_v30  ;;  %14763 = vst [vmem:[#allocation41_spill] sm:$0xff] %v13471_v35  ;;  %14764 = vst [vmem:[#allocation42_spill] sm:$0xff] %v13476_v28  ;;  %v13483_v63 = vld [vmem:[%s14637_s5 + $0x2a0] ss:$16 sps:$4 sm:$0xff]   ;;  %v13488_v30 = vld [vmem:[%s14637_s5 + $0x2a8] ss:$16 sps:$4 sm:$0xff]  }
 0x716   :  { %14765 = vst [vmem:[#allocation43_spill] sm:$0xff] %v13483_v63  ;;  %14766 = vst [vmem:[#allocation44_spill] sm:$0xff] %v13488_v30 }
 0x718   :  { %6421 = vmatpush1.bf16.msra.mxu0 %v13459_v62  ;;  %6503 = vmatpush1.bf16.msra.mxu1 %v13464_v27  ;;  %v13495_v62 = vld [vmem:[%s14637_s5 + $0x2c4] ss:$16 sps:$4 sm:$0xff]   ;;  %v13500_v27 = vld [vmem:[%s14637_s5 + $0x2cc] ss:$16 sps:$4 sm:$0xff]  }
 0x719   :  { %6422 = vmatprep.subr.bf16.mxu0 %v13471_v35  ;;  %6504 = vmatprep.subr.bf16.mxu1 %v13476_v28  ;;  %14767 = vst [vmem:[#allocation45_spill] sm:$0xff] %v13495_v62  ;;  %14768 = vst [vmem:[#allocation46_spill] sm:$0xff] %v13500_v27  ;;  %v13507_v35 = vld [vmem:[%s14637_s5 + $0x2c0] ss:$16 sps:$4 sm:$0xff]   ;;  %v13512_v28 = vld [vmem:[%s14637_s5 + $0x2c8] ss:$16 sps:$4 sm:$0xff]  }
 0x71a   :  { %14769 = vst [vmem:[#allocation47_spill] sm:$0xff] %v13507_v35  ;;  %14770 = vst [vmem:[#allocation48_spill] sm:$0xff] %v13512_v28 }
 0x71c   :  { %6423 = vmatpush1.bf16.msra.mxu0 %v13483_v63  ;;  %6505 = vmatpush1.bf16.msra.mxu1 %v13488_v30  ;;  %v13519_v63 = vld [vmem:[%s14637_s5 + $0x2e4] ss:$16 sps:$4 sm:$0xff]   ;;  %v13524_v30 = vld [vmem:[%s14637_s5 + $0x2ec] ss:$16 sps:$4 sm:$0xff]  }
 0x71d   :  { %6424 = vmatprep.subr.bf16.mxu0 %v13495_v62  ;;  %6506 = vmatprep.subr.bf16.mxu1 %v13500_v27  ;;  %14771 = vst [vmem:[#allocation49_spill] sm:$0xff] %v13519_v63  ;;  %14772 = vst [vmem:[#allocation50_spill] sm:$0xff] %v13524_v30  ;;  %v13531_v62 = vld [vmem:[%s14637_s5 + $0x2e0] ss:$16 sps:$4 sm:$0xff]   ;;  %v13536_v27 = vld [vmem:[%s14637_s5 + $0x2e8] ss:$16 sps:$4 sm:$0xff]  }
 0x71e   :  { %14773 = vst [vmem:[#allocation51_spill] sm:$0xff] %v13531_v62  ;;  %14774 = vst [vmem:[#allocation52_spill] sm:$0xff] %v13536_v27 }
 0x720   :  { %6425 = vmatpush1.bf16.msra.mxu0 %v13507_v35  ;;  %6507 = vmatpush1.bf16.msra.mxu1 %v13512_v28  ;;  %v13543_v35 = vld [vmem:[%s14637_s5 + $0x304] ss:$16 sps:$4 sm:$0xff]   ;;  %v13548_v28 = vld [vmem:[%s14637_s5 + $0x30c] ss:$16 sps:$4 sm:$0xff]  }
 0x721   :  { %6426 = vmatprep.subr.bf16.mxu0 %v13519_v63  ;;  %6508 = vmatprep.subr.bf16.mxu1 %v13524_v30  ;;  %14775 = vst [vmem:[#allocation53_spill] sm:$0xff] %v13543_v35  ;;  %14776 = vst [vmem:[#allocation54_spill] sm:$0xff] %v13548_v28  ;;  %v13555_v63 = vld [vmem:[%s14637_s5 + $0x300] ss:$16 sps:$4 sm:$0xff]   ;;  %v13560_v30 = vld [vmem:[%s14637_s5 + $0x308] ss:$16 sps:$4 sm:$0xff]  }
 0x722   :  { %14777 = vst [vmem:[#allocation55_spill] sm:$0xff] %v13555_v63  ;;  %14778 = vst [vmem:[#allocation56_spill] sm:$0xff] %v13560_v30 }
 0x724   :  { %6427 = vmatpush1.bf16.msra.mxu0 %v13531_v62  ;;  %6509 = vmatpush1.bf16.msra.mxu1 %v13536_v27  ;;  %v13567_v62 = vld [vmem:[%s14637_s5 + $0x324] ss:$16 sps:$4 sm:$0xff]   ;;  %v13572_v27 = vld [vmem:[%s14637_s5 + $0x32c] ss:$16 sps:$4 sm:$0xff]  }
 0x725   :  { %6428 = vmatprep.subr.bf16.mxu0 %v13543_v35  ;;  %6510 = vmatprep.subr.bf16.mxu1 %v13548_v28  ;;  %14779 = vst [vmem:[#allocation57_spill] sm:$0xff] %v13567_v62  ;;  %14780 = vst [vmem:[#allocation58_spill] sm:$0xff] %v13572_v27  ;;  %v13579_v35 = vld [vmem:[%s14637_s5 + $0x320] ss:$16 sps:$4 sm:$0xff]   ;;  %v13584_v28 = vld [vmem:[%s14637_s5 + $0x328] ss:$16 sps:$4 sm:$0xff]  }
 0x726   :  { %14781 = vst [vmem:[#allocation59_spill] sm:$0xff] %v13579_v35  ;;  %14782 = vst [vmem:[#allocation60_spill] sm:$0xff] %v13584_v28 }
 0x728   :  { %6429 = vmatpush1.bf16.msra.mxu0 %v13555_v63  ;;  %6511 = vmatpush1.bf16.msra.mxu1 %v13560_v30  ;;  %v13591_v63 = vld [vmem:[%s14637_s5 + $0x344] ss:$16 sps:$4 sm:$0xff]   ;;  %v13596_v30 = vld [vmem:[%s14637_s5 + $0x34c] ss:$16 sps:$4 sm:$0xff]  }
 0x729   :  { %6430 = vmatprep.subr.bf16.mxu0 %v13567_v62  ;;  %6512 = vmatprep.subr.bf16.mxu1 %v13572_v27  ;;  %14783 = vst [vmem:[#allocation61_spill] sm:$0xff] %v13591_v63  ;;  %14784 = vst [vmem:[#allocation62_spill] sm:$0xff] %v13596_v30  ;;  %v13603_v62 = vld [vmem:[%s14637_s5 + $0x340] ss:$16 sps:$4 sm:$0xff]   ;;  %v13608_v27 = vld [vmem:[%s14637_s5 + $0x348] ss:$16 sps:$4 sm:$0xff]  }
 0x72a   :  { %14785 = vst [vmem:[#allocation63_spill] sm:$0xff] %v13603_v62  ;;  %14786 = vst [vmem:[#allocation64_spill] sm:$0xff] %v13608_v27 }
 0x72c   :  { %6431 = vmatpush1.bf16.msra.mxu0 %v13579_v35  ;;  %6513 = vmatpush1.bf16.msra.mxu1 %v13584_v28  ;;  %v13615_v35 = vld [vmem:[%s14637_s5 + $0x364] ss:$16 sps:$4 sm:$0xff]   ;;  %v13620_v28 = vld [vmem:[%s14637_s5 + $0x36c] ss:$16 sps:$4 sm:$0xff]  }
 0x72d   :  { %6432 = vmatprep.subr.bf16.mxu0 %v13591_v63  ;;  %6514 = vmatprep.subr.bf16.mxu1 %v13596_v30  ;;  %14787 = vst [vmem:[#allocation65_spill] sm:$0xff] %v13615_v35  ;;  %14788 = vst [vmem:[#allocation66_spill] sm:$0xff] %v13620_v28  ;;  %v13627_v63 = vld [vmem:[%s14637_s5 + $0x360] ss:$16 sps:$4 sm:$0xff]   ;;  %v13632_v30 = vld [vmem:[%s14637_s5 + $0x368] ss:$16 sps:$4 sm:$0xff]  }
 0x72e   :  { %14789 = vst [vmem:[#allocation67_spill] sm:$0xff] %v13627_v63  ;;  %14790 = vst [vmem:[#allocation68_spill] sm:$0xff] %v13632_v30 }
 0x730   :  { %6433 = vmatpush1.bf16.msra.mxu0 %v13603_v62  ;;  %6515 = vmatpush1.bf16.msra.mxu1 %v13608_v27  ;;  %v13639_v62 = vld [vmem:[%s14637_s5 + $0x384] ss:$16 sps:$4 sm:$0xff]   ;;  %v13644_v27 = vld [vmem:[%s14637_s5 + $0x38c] ss:$16 sps:$4 sm:$0xff]  }
 0x731   :  { %6434 = vmatprep.subr.bf16.mxu0 %v13615_v35  ;;  %6516 = vmatprep.subr.bf16.mxu1 %v13620_v28  ;;  %14791 = vst [vmem:[#allocation69_spill] sm:$0xff] %v13639_v62  ;;  %14792 = vst [vmem:[#allocation70_spill] sm:$0xff] %v13644_v27  ;;  %v13651_v35 = vld [vmem:[%s14637_s5 + $0x380] ss:$16 sps:$4 sm:$0xff]   ;;  %v13656_v28 = vld [vmem:[%s14637_s5 + $0x388] ss:$16 sps:$4 sm:$0xff]  }
 0x732   :  { %14793 = vst [vmem:[#allocation71_spill] sm:$0xff] %v13651_v35  ;;  %14794 = vst [vmem:[#allocation72_spill] sm:$0xff] %v13656_v28 }
 0x734   :  { %6435 = vmatpush1.bf16.msra.mxu0 %v13627_v63  ;;  %6517 = vmatpush1.bf16.msra.mxu1 %v13632_v30  ;;  %v13663_v63 = vld [vmem:[%s14637_s5 + $0x3a4] ss:$16 sps:$4 sm:$0xff]   ;;  %v13668_v30 = vld [vmem:[%s14637_s5 + $0x3ac] ss:$16 sps:$4 sm:$0xff]  }
 0x735   :  { %6436 = vmatprep.subr.bf16.mxu0 %v13639_v62  ;;  %6518 = vmatprep.subr.bf16.mxu1 %v13644_v27  ;;  %14795 = vst [vmem:[#allocation73_spill] sm:$0xff] %v13663_v63  ;;  %14796 = vst [vmem:[#allocation74_spill] sm:$0xff] %v13668_v30  ;;  %v13675_v62 = vld [vmem:[%s14637_s5 + $0x3a0] ss:$16 sps:$4 sm:$0xff]   ;;  %v13680_v27 = vld [vmem:[%s14637_s5 + $0x3a8] ss:$16 sps:$4 sm:$0xff]  }
 0x736   :  { %14797 = vst [vmem:[#allocation75_spill] sm:$0xff] %v13675_v62  ;;  %14798 = vst [vmem:[#allocation76_spill] sm:$0xff] %v13680_v27 }
 0x738   :  { %6437 = vmatpush1.bf16.msra.mxu0 %v13651_v35  ;;  %6519 = vmatpush1.bf16.msra.mxu1 %v13656_v28  ;;  %v13687_v35 = vld [vmem:[%s14637_s5 + $0x3c4] ss:$16 sps:$4 sm:$0xff]   ;;  %v13692_v28 = vld [vmem:[%s14637_s5 + $0x3cc] ss:$16 sps:$4 sm:$0xff]  }
 0x739   :  { %6438 = vmatprep.subr.bf16.mxu0 %v13663_v63  ;;  %6520 = vmatprep.subr.bf16.mxu1 %v13668_v30  ;;  %14799 = vst [vmem:[#allocation77_spill] sm:$0xff] %v13687_v35  ;;  %14800 = vst [vmem:[#allocation78_spill] sm:$0xff] %v13692_v28  ;;  %v13699_v63 = vld [vmem:[%s14637_s5 + $0x3c0] ss:$16 sps:$4 sm:$0xff]   ;;  %v13704_v30 = vld [vmem:[%s14637_s5 + $0x3c8] ss:$16 sps:$4 sm:$0xff]  }
 0x73a   :  { %14801 = vst [vmem:[#allocation79_spill] sm:$0xff] %v13699_v63  ;;  %14802 = vst [vmem:[#allocation80_spill] sm:$0xff] %v13704_v30 }
 0x73c   :  { %6439 = vmatpush1.bf16.msra.mxu0 %v13675_v62  ;;  %6521 = vmatpush1.bf16.msra.mxu1 %v13680_v27  ;;  %v13711_v62 = vld [vmem:[%s14637_s5 + $0x3e4] ss:$16 sps:$4 sm:$0xff]   ;;  %v13716_v27 = vld [vmem:[%s14637_s5 + $0x3ec] ss:$16 sps:$4 sm:$0xff]  }
 0x73d   :  { %6440 = vmatprep.subr.bf16.mxu0 %v13687_v35  ;;  %6522 = vmatprep.subr.bf16.mxu1 %v13692_v28  ;;  %v13723_v35 = vld [vmem:[%s14637_s5 + $0x3e0] ss:$16 sps:$4 sm:$0xff]   ;;  %v13728_v28 = vld [vmem:[%s14637_s5 + $0x3e8] ss:$16 sps:$4 sm:$0xff]  }
 0x740   :  { %6441 = vmatpush1.bf16.msra.mxu0 %v13699_v63  ;;  %6523 = vmatpush1.bf16.msra.mxu1 %v13704_v30  ;;  %v5729_v30 = vpack.c.bf16 %v13358_v33, %v13358_v33  ;;  %v6536_v63 = vpack.c.bf16 %v13354_v29, %v13354_v29  ;;  %v14855_v29 = vld [vmem:[#allocation63_spill] sm:$0xff]  ;;  %v14857_v33 = vld [vmem:[#allocation65_spill] sm:$0xff] }
 0x741   :  { %6442 = vmatprep.subr.bf16.mxu0 %v13711_v62  ;;  %6524 = vmatprep.subr.bf16.mxu1 %v13716_v27 }
 0x744   :  { %6443 = vmatpush1.bf16.msra.mxu0 %v13723_v35  ;;  %6525 = vmatpush1.bf16.msra.mxu1 %v13728_v28 }
 0x745   :  { %6539 = vmatprep.subr.bf16.mxu0 %v12936_v31  ;;  %6621 = vmatprep.subr.bf16.mxu1 %v12944_v32  ;;  %v14803_v31 = vld [vmem:[#allocation6_spill] sm:$0xff]  ;;  %v14804_v32 = vld [vmem:[#allocation7_spill] sm:$0xff] }
 0x747   :  { %6445 = vmatmul.mubr.bf16.vlgmr.msra.gmra.mrb[36].mxu0 %v5729_v30  ;;  %6527 = vmatmul.mubr.bf16.vlgmr.msra.gmra.mrb[28].mxu1 %v5729_v30  ;;  %v14858_v30 = vld [vmem:[#allocation66_spill] sm:$0xff] }
 0x748   :  { %6540 = vmatpush1.bf16.msra.mxu0 %v12952_v39  ;;  %6571 = vmatprep.mubr.bf16.mxu0 %v6536_v63  ;;  %v14805_v39 = vld [vmem:[#allocation8_spill] sm:$0xff] }
 0x749   :  { %6622 = vmatpush1.bf16.msra.mxu1 %v12961_v37  ;;  %6653 = vmatprep.mubr.bf16.mxu1 %v6536_v63  ;;  %v14806_v37 = vld [vmem:[#allocation9_spill] sm:$0xff]  ;;  %v14860_v63 = vld [vmem:[#allocation68_spill] sm:$0xff] }
 0x74a   :  { %6541 = vmatprep.subr.bf16.mxu0 %v12966_v38  ;;  %6623 = vmatprep.subr.bf16.mxu1 %v12977_v44  ;;  %v14807_v38 = vld [vmem:[#allocation10_spill] sm:$0xff]  ;;  %v14809_v44 = vld [vmem:[#allocation12_spill] sm:$0xff] }
 0x74c   :  { %6542 = vmatpush1.bf16.msra.mxu0 %v12972_v42  ;;  %v14808_v42 = vld [vmem:[#allocation11_spill] sm:$0xff] }
 0x74d   :  { %6624 = vmatpush1.bf16.msra.mxu1 %v12983_v12  ;;  %6543 = vmatprep.subr.bf16.mxu0 %v12988_v13  ;;  %v14810_v12 = vld [vmem:[#allocation13_spill] sm:$0xff]  ;;  %v14811_v13 = vld [vmem:[#allocation14_spill] sm:$0xff] }
 0x74e   :  { %6625 = vmatprep.subr.bf16.mxu1 %v12995_v15  ;;  %v14812_v15 = vld [vmem:[#allocation15_spill] sm:$0xff] }
 0x750   :  { %6544 = vmatpush1.bf16.msra.mxu0 %v13003_v1  ;;  %v14813_v1 = vld [vmem:[#allocation19_spill] sm:$0xff] }
 0x751   :  { %6626 = vmatpush1.bf16.msra.mxu1 %v13008_v41  ;;  %6545 = vmatprep.subr.bf16.mxu0 %v13013_v43  ;;  %v14814_v41 = vld [vmem:[#allocation24_spill] sm:$0xff] }
 0x752   :  { %6627 = vmatprep.subr.bf16.mxu1 %v13019_v8  ;;  %v6535_v43 = vpack.c.bf16 %v14814_v41, %v14814_v41  ;;  %v14815_v8 = vld [vmem:[#allocation20_spill] sm:$0xff] }
 0x753   :  { %v14872_v41 = vld [vmem:[#allocation80_spill] sm:$0xff] }
 0x754   :  { %6546 = vmatpush1.bf16.msra.mxu0 %v13027_v47  ;;  %v14816_v47 = vld [vmem:[#allocation22_spill] sm:$0xff] }
 0x755   :  { %6628 = vmatpush1.bf16.msra.mxu1 %v13032_v50  ;;  %6547 = vmatprep.subr.bf16.mxu0 %v13037_v7  ;;  %v14817_v50 = vld [vmem:[#allocation23_spill] sm:$0xff]  ;;  %v6538_v7 = vpack.c.bf16 %v13360_v34, %v13360_v34  ;;  %v14856_v34 = vld [vmem:[#allocation64_spill] sm:$0xff] }
 0x756   :  { %6629 = vmatprep.subr.bf16.mxu1 %v13043_v57  ;;  %v14820_v57 = vld [vmem:[#allocation28_spill] sm:$0xff] }
 0x758   :  { %6548 = vmatpush1.bf16.msra.mxu0 %v13051_v52  ;;  %v14821_v52 = vld [vmem:[#allocation29_spill] sm:$0xff] }
 0x759   :  { %6630 = vmatpush1.bf16.msra.mxu1 %v13056_v58  ;;  %6549 = vmatprep.subr.bf16.mxu0 %v13061_v60  ;;  %v14822_v58 = vld [vmem:[#allocation30_spill] sm:$0xff]  ;;  %v14823_v60 = vld [vmem:[#allocation31_spill] sm:$0xff] }
 0x75a   :  { %6631 = vmatprep.subr.bf16.mxu1 %v13067_v0  ;;  %v14824_v0 = vld [vmem:[#allocation32_spill] sm:$0xff] }
 0x75c   :  { %6550 = vmatpush1.bf16.msra.mxu0 %v13075_v49  ;;  %v14826_v49 = vld [vmem:[#allocation34_spill] sm:$0xff] }
 0x75d   :  { %6632 = vmatpush1.bf16.msra.mxu1 %v13080_v59  ;;  %6551 = vmatprep.subr.bf16.mxu0 %v13085_v3  ;;  %v14827_v59 = vld [vmem:[#allocation35_spill] sm:$0xff]  ;;  %v14828_v3 = vld [vmem:[#allocation36_spill] sm:$0xff] }
 0x75e   :  { %6633 = vmatprep.subr.bf16.mxu1 %v13091_v9  ;;  %v14830_v9 = vld [vmem:[#allocation38_spill] sm:$0xff] }
 0x760   :  { %6552 = vmatpush1.bf16.msra.mxu0 %v13099_v11  ;;  %v14831_v11 = vld [vmem:[#allocation39_spill] sm:$0xff] }
 0x761   :  { %6634 = vmatpush1.bf16.msra.mxu1 %v13104_v54  ;;  %6553 = vmatprep.subr.bf16.mxu0 %v13112_v17  ;;  %v14832_v54 = vld [vmem:[#allocation40_spill] sm:$0xff]  ;;  %v14833_v17 = vld [vmem:[#allocation41_spill] sm:$0xff] }
 0x762   :  { %6635 = vmatprep.subr.bf16.mxu1 %v13118_v18  ;;  %v14834_v18 = vld [vmem:[#allocation42_spill] sm:$0xff] }
 0x764   :  { %6554 = vmatpush1.bf16.msra.mxu0 %v13124_v6  ;;  %v14835_v6 = vld [vmem:[#allocation43_spill] sm:$0xff] }
 0x765   :  { %6636 = vmatpush1.bf16.msra.mxu1 %v13131_v14  ;;  %6555 = vmatprep.subr.bf16.mxu0 %v13136_v10  ;;  %v14836_v14 = vld [vmem:[#allocation44_spill] sm:$0xff]  ;;  %v14837_v10 = vld [vmem:[#allocation45_spill] sm:$0xff] }
 0x766   :  { %6637 = vmatprep.subr.bf16.mxu1 %v13142_v40  ;;  %v14838_v40 = vld [vmem:[#allocation46_spill] sm:$0xff] }
 0x768   :  { %6556 = vmatpush1.bf16.msra.mxu0 %v13148_v19  ;;  %v14839_v19 = vld [vmem:[#allocation47_spill] sm:$0xff] }
 0x769   :  { %6638 = vmatpush1.bf16.msra.mxu1 %v13155_v4  ;;  %6557 = vmatprep.subr.bf16.mxu0 %v13160_v20  ;;  %v14840_v4 = vld [vmem:[#allocation48_spill] sm:$0xff]  ;;  %v14841_v20 = vld [vmem:[#allocation49_spill] sm:$0xff] }
 0x76a   :  { %6639 = vmatprep.subr.bf16.mxu1 %v13166_v21  ;;  %v14842_v21 = vld [vmem:[#allocation50_spill] sm:$0xff] }
 0x76c   :  { %6558 = vmatpush1.bf16.msra.mxu0 %v13172_v22  ;;  %v14843_v22 = vld [vmem:[#allocation51_spill] sm:$0xff] }
 0x76d   :  { %6640 = vmatpush1.bf16.msra.mxu1 %v13179_v46  ;;  %6559 = vmatprep.subr.bf16.mxu0 %v13184_v45  ;;  %v14844_v46 = vld [vmem:[#allocation52_spill] sm:$0xff]  ;;  %v14845_v45 = vld [vmem:[#allocation53_spill] sm:$0xff] }
 0x76e   :  { %6641 = vmatprep.subr.bf16.mxu1 %v13190_v2  ;;  %v14846_v2 = vld [vmem:[#allocation54_spill] sm:$0xff] }
 0x770   :  { %6560 = vmatpush1.bf16.msra.mxu0 %v13196_v48  ;;  %v14847_v48 = vld [vmem:[#allocation55_spill] sm:$0xff] }
 0x771   :  { %6642 = vmatpush1.bf16.msra.mxu1 %v13203_v51  ;;  %6561 = vmatprep.subr.bf16.mxu0 %v13208_v23  ;;  %v14848_v51 = vld [vmem:[#allocation56_spill] sm:$0xff]  ;;  %v14849_v23 = vld [vmem:[#allocation57_spill] sm:$0xff] }
 0x772   :  { %6643 = vmatprep.subr.bf16.mxu1 %v13214_v24  ;;  %v14850_v24 = vld [vmem:[#allocation58_spill] sm:$0xff] }
 0x774   :  { %6562 = vmatpush1.bf16.msra.mxu0 %v13220_v25  ;;  %v14851_v25 = vld [vmem:[#allocation59_spill] sm:$0xff] }
 0x775   :  { %6644 = vmatpush1.bf16.msra.mxu1 %v13227_v55  ;;  %6563 = vmatprep.subr.bf16.mxu0 %v13232_v16  ;;  %v14852_v55 = vld [vmem:[#allocation60_spill] sm:$0xff]  ;;  %v14853_v16 = vld [vmem:[#allocation61_spill] sm:$0xff] }
 0x776   :  { %6645 = vmatprep.subr.bf16.mxu1 %v13238_v26  ;;  %v14854_v26 = vld [vmem:[#allocation62_spill] sm:$0xff] }
 0x778   :  { %6564 = vmatpush1.bf16.msra.mxu0 %v14803_v31  ;;  %v14861_v31 = vld [vmem:[#allocation69_spill] sm:$0xff] }
 0x779   :  { %6646 = vmatpush1.bf16.msra.mxu1 %v14804_v32  ;;  %6565 = vmatprep.subr.bf16.mxu0 %v14805_v39  ;;  %v14862_v32 = vld [vmem:[#allocation70_spill] sm:$0xff]  ;;  %v14863_v39 = vld [vmem:[#allocation71_spill] sm:$0xff] }
 0x77a   :  { %6647 = vmatprep.subr.bf16.mxu1 %v14806_v37  ;;  %v14864_v37 = vld [vmem:[#allocation72_spill] sm:$0xff] }
 0x77c   :  { %6566 = vmatpush1.bf16.msra.mxu0 %v14807_v38  ;;  %v14865_v38 = vld [vmem:[#allocation73_spill] sm:$0xff] }
 0x77d   :  { %6648 = vmatpush1.bf16.msra.mxu1 %v14808_v42  ;;  %6567 = vmatprep.subr.bf16.mxu0 %v14809_v44  ;;  %v14866_v42 = vld [vmem:[#allocation74_spill] sm:$0xff]  ;;  %v14867_v44 = vld [vmem:[#allocation75_spill] sm:$0xff] }
 0x77e   :  { %6649 = vmatprep.subr.bf16.mxu1 %v14810_v12  ;;  %v14868_v12 = vld [vmem:[#allocation76_spill] sm:$0xff] }
 0x780   :  { %6568 = vmatpush1.bf16.msra.mxu0 %v14811_v13  ;;  %v14869_v13 = vld [vmem:[#allocation77_spill] sm:$0xff] }
 0x781   :  { %6650 = vmatpush1.bf16.msra.mxu1 %v14812_v15  ;;  %6569 = vmatprep.subr.bf16.mxu0 %v13309_v53  ;;  %v14818_v53 = vld [vmem:[#allocation26_spill] sm:$0xff] }
 0x782   :  { %6651 = vmatprep.subr.bf16.mxu1 %v13314_v56  ;;  %v14819_v56 = vld [vmem:[#allocation27_spill] sm:$0xff]  ;;  %v14870_v15 = vld [vmem:[#allocation78_spill] sm:$0xff] }
 0x784   :  { %6570 = vmatpush1.bf16.msra.mxu0 %v14813_v1  ;;  %v14871_v1 = vld [vmem:[#allocation79_spill] sm:$0xff] }
 0x785   :  { %6652 = vmatpush1.bf16.msra.mxu1 %v14815_v8  ;;  %6580 = vmatprep.subr.bf16.mxu0 %v14816_v47  ;;  %v13874_v8 = vld [vmem:[%s14638_s3 + $0xc] ss:$16 sps:$4 sm:$0xff]   ;;  %v9403_v47 = vld [vmem:[%s14638_s3] ss:$16 sps:$4 sm:$0xff]  }
 0x786   :  { %6662 = vmatprep.subr.bf16.mxu1 %v14817_v50  ;;  %v14873_v50 = vld [vmem:[#allocation25_spill] sm:$0xff] }
 0x787   :  { %6572 = vmatmul.mubr.bf16.vlgmr.msra.gmra.mrb[40].mxu0 %v6535_v43 }
 0x788   :  { %6654 = vmatmul.mubr.bf16.vlgmr.msra.gmra.mrb[32].mxu1 %v6535_v43  ;;  %6581 = vmatpush1.bf16.msra.mxu0 %v13365_v61  ;;  %v14825_v61 = vld [vmem:[#allocation33_spill] sm:$0xff]  ;;  %v9405_v43 = vld [vmem:[%s14638_s3 + $0x4] ss:$16 sps:$4 sm:$0xff]  }
 0x789   :  { %6612 = vmatprep.mubr.bf16.mxu0 %v6538_v7  ;;  %6663 = vmatpush1.bf16.msra.mxu1 %v14818_v53  ;;  %v9409_v53 = vld [vmem:[%s14638_s3 + $0x20] ss:$16 sps:$4 sm:$0xff]  }
 0x78a   :  { %6694 = vmatprep.mubr.bf16.mxu1 %v6538_v7  ;;  %6582 = vmatprep.subr.bf16.mxu0 %v13375_v36  ;;  %v14859_v36 = vld [vmem:[#allocation67_spill] sm:$0xff]  ;;  %v6537_v7 = vpack.c.bf16 %v14873_v50, %v14873_v50 }
 0x78b   :  { %6664 = vmatprep.subr.bf16.mxu1 %v13380_v5  ;;  %v14829_v5 = vld [vmem:[#allocation37_spill] sm:$0xff] }
 0x78c   :  { %6583 = vmatpush1.bf16.msra.mxu0 %v14819_v56  ;;  %v9417_v56 = vld [vmem:[%s14638_s3 + $0x44] ss:$16 sps:$4 sm:$0xff]  }
 0x78d   :  { %6665 = vmatpush1.bf16.msra.mxu1 %v14820_v57  ;;  %6584 = vmatprep.subr.bf16.mxu0 %v14821_v52  ;;  %v13911_v57 = vld [vmem:[%s14638_s3 + $0x4c] ss:$16 sps:$4 sm:$0xff]   ;;  %v9415_v52 = vld [vmem:[%s14638_s3 + $0x40] ss:$16 sps:$4 sm:$0xff]  }
 0x78e   :  { %6666 = vmatprep.subr.bf16.mxu1 %v14822_v58  ;;  %v13921_v58 = vld [vmem:[%s14638_s3 + $0x48] ss:$16 sps:$4 sm:$0xff]  }
 0x790   :  { %6585 = vmatpush1.bf16.msra.mxu0 %v14823_v60  ;;  %v9423_v60 = vld [vmem:[%s14638_s3 + $0x64] ss:$16 sps:$4 sm:$0xff]  }
 0x791   :  { %6667 = vmatpush1.bf16.msra.mxu1 %v14824_v0  ;;  %6586 = vmatprep.subr.bf16.mxu0 %v14825_v61  ;;  %v13929_v0 = vld [vmem:[%s14638_s3 + $0x6c] ss:$16 sps:$4 sm:$0xff]   ;;  %v9421_v61 = vld [vmem:[%s14638_s3 + $0x60] ss:$16 sps:$4 sm:$0xff]  }
 0x792   :  { %6668 = vmatprep.subr.bf16.mxu1 %v14826_v49  ;;  %v13939_v49 = vld [vmem:[%s14638_s3 + $0x68] ss:$16 sps:$4 sm:$0xff]  }
 0x794   :  { %6587 = vmatpush1.bf16.msra.mxu0 %v14827_v59  ;;  %v9429_v59 = vld [vmem:[%s14638_s3 + $0x84] ss:$16 sps:$4 sm:$0xff]  }
 0x795   :  { %6669 = vmatpush1.bf16.msra.mxu1 %v14828_v3  ;;  %6588 = vmatprep.subr.bf16.mxu0 %v14829_v5  ;;  %v13947_v3 = vld [vmem:[%s14638_s3 + $0x8c] ss:$16 sps:$4 sm:$0xff]   ;;  %v9427_v5 = vld [vmem:[%s14638_s3 + $0x80] ss:$16 sps:$4 sm:$0xff]  }
 0x796   :  { %6670 = vmatprep.subr.bf16.mxu1 %v14830_v9  ;;  %v13957_v9 = vld [vmem:[%s14638_s3 + $0x88] ss:$16 sps:$4 sm:$0xff]  }
 0x798   :  { %6589 = vmatpush1.bf16.msra.mxu0 %v14831_v11  ;;  %v9435_v11 = vld [vmem:[%s14638_s3 + $0xa4] ss:$16 sps:$4 sm:$0xff]  }
 0x799   :  { %6671 = vmatpush1.bf16.msra.mxu1 %v14832_v54  ;;  %6590 = vmatprep.subr.bf16.mxu0 %v14833_v17  ;;  %v13965_v54 = vld [vmem:[%s14638_s3 + $0xac] ss:$16 sps:$4 sm:$0xff]   ;;  %v9433_v17 = vld [vmem:[%s14638_s3 + $0xa0] ss:$16 sps:$4 sm:$0xff]  }
 0x79a   :  { %6672 = vmatprep.subr.bf16.mxu1 %v14834_v18  ;;  %v13975_v18 = vld [vmem:[%s14638_s3 + $0xa8] ss:$16 sps:$4 sm:$0xff]  }
 0x79c   :  { %6591 = vmatpush1.bf16.msra.mxu0 %v14835_v6  ;;  %v9441_v6 = vld [vmem:[%s14638_s3 + $0xc4] ss:$16 sps:$4 sm:$0xff]  }
 0x79d   :  { %6673 = vmatpush1.bf16.msra.mxu1 %v14836_v14  ;;  %6592 = vmatprep.subr.bf16.mxu0 %v14837_v10  ;;  %v13983_v14 = vld [vmem:[%s14638_s3 + $0xcc] ss:$16 sps:$4 sm:$0xff]   ;;  %v9439_v10 = vld [vmem:[%s14638_s3 + $0xc0] ss:$16 sps:$4 sm:$0xff]  }
 0x79e   :  { %6674 = vmatprep.subr.bf16.mxu1 %v14838_v40  ;;  %v13994_v40 = vld [vmem:[%s14638_s3 + $0xc8] ss:$16 sps:$4 sm:$0xff]  }
 0x7a0   :  { %6593 = vmatpush1.bf16.msra.mxu0 %v14839_v19  ;;  %v9447_v19 = vld [vmem:[%s14638_s3 + $0xe4] ss:$16 sps:$4 sm:$0xff]  }
 0x7a1   :  { %6675 = vmatpush1.bf16.msra.mxu1 %v14840_v4  ;;  %6594 = vmatprep.subr.bf16.mxu0 %v14841_v20  ;;  %v14003_v4 = vld [vmem:[%s14638_s3 + $0xec] ss:$16 sps:$4 sm:$0xff]   ;;  %v9445_v20 = vld [vmem:[%s14638_s3 + $0xe0] ss:$16 sps:$4 sm:$0xff]  }
 0x7a2   :  { %6676 = vmatprep.subr.bf16.mxu1 %v14842_v21  ;;  %v14012_v21 = vld [vmem:[%s14638_s3 + $0xe8] ss:$16 sps:$4 sm:$0xff]  }
 0x7a4   :  { %6595 = vmatpush1.bf16.msra.mxu0 %v14843_v22  ;;  %v9453_v22 = vld [vmem:[%s14638_s3 + $0x104] ss:$16 sps:$4 sm:$0xff]  }
 0x7a5   :  { %6677 = vmatpush1.bf16.msra.mxu1 %v14844_v46  ;;  %6596 = vmatprep.subr.bf16.mxu0 %v14845_v45  ;;  %v14021_v46 = vld [vmem:[%s14638_s3 + $0x10c] ss:$16 sps:$4 sm:$0xff]   ;;  %v9451_v45 = vld [vmem:[%s14638_s3 + $0x100] ss:$16 sps:$4 sm:$0xff]  }
 0x7a6   :  { %6678 = vmatprep.subr.bf16.mxu1 %v14846_v2  ;;  %v14030_v2 = vld [vmem:[%s14638_s3 + $0x108] ss:$16 sps:$4 sm:$0xff]  }
 0x7a8   :  { %6597 = vmatpush1.bf16.msra.mxu0 %v14847_v48  ;;  %v9459_v48 = vld [vmem:[%s14638_s3 + $0x124] ss:$16 sps:$4 sm:$0xff]  }
 0x7a9   :  { %6679 = vmatpush1.bf16.msra.mxu1 %v14848_v51  ;;  %6598 = vmatprep.subr.bf16.mxu0 %v14849_v23  ;;  %v14039_v51 = vld [vmem:[%s14638_s3 + $0x12c] ss:$16 sps:$4 sm:$0xff]   ;;  %v9457_v23 = vld [vmem:[%s14638_s3 + $0x120] ss:$16 sps:$4 sm:$0xff]  }
 0x7aa   :  { %6680 = vmatprep.subr.bf16.mxu1 %v14850_v24  ;;  %v14048_v24 = vld [vmem:[%s14638_s3 + $0x128] ss:$16 sps:$4 sm:$0xff]  }
 0x7ac   :  { %6599 = vmatpush1.bf16.msra.mxu0 %v14851_v25  ;;  %v9465_v25 = vld [vmem:[%s14638_s3 + $0x144] ss:$16 sps:$4 sm:$0xff]  }
 0x7ad   :  { %6681 = vmatpush1.bf16.msra.mxu1 %v14852_v55  ;;  %6600 = vmatprep.subr.bf16.mxu0 %v14853_v16  ;;  %v14057_v55 = vld [vmem:[%s14638_s3 + $0x14c] ss:$16 sps:$4 sm:$0xff]   ;;  %v9463_v16 = vld [vmem:[%s14638_s3 + $0x140] ss:$16 sps:$4 sm:$0xff]  }
 0x7ae   :  { %6682 = vmatprep.subr.bf16.mxu1 %v14854_v26  ;;  %v14066_v26 = vld [vmem:[%s14638_s3 + $0x148] ss:$16 sps:$4 sm:$0xff]  }
 0x7b0   :  { %6601 = vmatpush1.bf16.msra.mxu0 %v14855_v29  ;;  %v9471_v29 = vld [vmem:[%s14638_s3 + $0x164] ss:$16 sps:$4 sm:$0xff]  }
 0x7b1   :  { %6683 = vmatpush1.bf16.msra.mxu1 %v14856_v34  ;;  %6602 = vmatprep.subr.bf16.mxu0 %v14857_v33  ;;  %v14075_v34 = vld [vmem:[%s14638_s3 + $0x16c] ss:$16 sps:$4 sm:$0xff]   ;;  %v9469_v33 = vld [vmem:[%s14638_s3 + $0x160] ss:$16 sps:$4 sm:$0xff]  }
 0x7b2   :  { %6684 = vmatprep.subr.bf16.mxu1 %v14858_v30  ;;  %v14084_v30 = vld [vmem:[%s14638_s3 + $0x168] ss:$16 sps:$4 sm:$0xff]  }
 0x7b4   :  { %6603 = vmatpush1.bf16.msra.mxu0 %v14859_v36  ;;  %v9477_v36 = vld [vmem:[%s14638_s3 + $0x184] ss:$16 sps:$4 sm:$0xff]  }
 0x7b5   :  { %6685 = vmatpush1.bf16.msra.mxu1 %v14860_v63  ;;  %6604 = vmatprep.subr.bf16.mxu0 %v14861_v31  ;;  %v14093_v63 = vld [vmem:[%s14638_s3 + $0x18c] ss:$16 sps:$4 sm:$0xff]   ;;  %v9475_v31 = vld [vmem:[%s14638_s3 + $0x180] ss:$16 sps:$4 sm:$0xff]  }
 0x7b6   :  { %6686 = vmatprep.subr.bf16.mxu1 %v14862_v32  ;;  %v14102_v32 = vld [vmem:[%s14638_s3 + $0x188] ss:$16 sps:$4 sm:$0xff]  }
 0x7b8   :  { %6605 = vmatpush1.bf16.msra.mxu0 %v14863_v39  ;;  %v9483_v39 = vld [vmem:[%s14638_s3 + $0x1a4] ss:$16 sps:$4 sm:$0xff]  }
 0x7b9   :  { %6687 = vmatpush1.bf16.msra.mxu1 %v14864_v37  ;;  %6606 = vmatprep.subr.bf16.mxu0 %v14865_v38  ;;  %v14111_v37 = vld [vmem:[%s14638_s3 + $0x1ac] ss:$16 sps:$4 sm:$0xff]   ;;  %v9481_v38 = vld [vmem:[%s14638_s3 + $0x1a0] ss:$16 sps:$4 sm:$0xff]  }
 0x7ba   :  { %6688 = vmatprep.subr.bf16.mxu1 %v14866_v42  ;;  %v14120_v42 = vld [vmem:[%s14638_s3 + $0x1a8] ss:$16 sps:$4 sm:$0xff]  }
 0x7bc   :  { %6607 = vmatpush1.bf16.msra.mxu0 %v14867_v44  ;;  %v9489_v44 = vld [vmem:[%s14638_s3 + $0x1c4] ss:$16 sps:$4 sm:$0xff]  }
 0x7bd   :  { %6689 = vmatpush1.bf16.msra.mxu1 %v14868_v12  ;;  %6608 = vmatprep.subr.bf16.mxu0 %v14869_v13  ;;  %v14129_v12 = vld [vmem:[%s14638_s3 + $0x1cc] ss:$16 sps:$4 sm:$0xff]   ;;  %v9487_v13 = vld [vmem:[%s14638_s3 + $0x1c0] ss:$16 sps:$4 sm:$0xff]  }
 0x7be   :  { %6690 = vmatprep.subr.bf16.mxu1 %v14870_v15  ;;  %v14138_v15 = vld [vmem:[%s14638_s3 + $0x1c8] ss:$16 sps:$4 sm:$0xff]  }
 0x7c0   :  { %6609 = vmatpush1.bf16.msra.mxu0 %v14871_v1 }
 0x7c1   :  { %6691 = vmatpush1.bf16.msra.mxu1 %v14872_v41  ;;  %6610 = vmatprep.subr.bf16.mxu0 %v13711_v62  ;;  %v13883_v62 = vld [vmem:[%s14638_s3 + $0x8] ss:$16 sps:$4 sm:$0xff]  }
 0x7c2   :  { %6692 = vmatprep.subr.bf16.mxu1 %v13716_v27  ;;  %v9411_v27 = vld [vmem:[%s14638_s3 + $0x24] ss:$16 sps:$4 sm:$0xff]  }
 0x7c4   :  { %6611 = vmatpush1.bf16.msra.mxu0 %v13723_v35  ;;  %v13894_v35 = vld [vmem:[%s14638_s3 + $0x2c] ss:$16 sps:$4 sm:$0xff]  }
 0x7c5   :  { %6693 = vmatpush1.bf16.msra.mxu1 %v13728_v28  ;;  %7347 = vmatprep.subr.bf16.mxu0 %v9405_v43  ;;  %v13903_v28 = vld [vmem:[%s14638_s3 + $0x28] ss:$16 sps:$4 sm:$0xff]   ;;  %v9495_v43 = vld [vmem:[%s14638_s3 + $0x1e4] ss:$16 sps:$4 sm:$0xff]  }
 0x7c6   :  { %7433 = vmatprep.subr.bf16.mxu1 %v13874_v8 }
 0x7c7   :  { %6613 = vmatmul.mubr.bf16.vlgmr.msra.gmra.mrb[40].mxu0 %v6537_v7 }
 0x7c8   :  { %6695 = vmatmul.mubr.bf16.vlgmr.msra.gmra.mrb[32].mxu1 %v6537_v7  ;;  %7348 = vmatpush1.bf16.msra.mxu0 %v9403_v47  ;;  %v14148_v47 = vld [vmem:[%s14638_s3 + $0x1ec] ss:$16 sps:$4 sm:$0xff]  }
 0x7c9   :  { %7434 = vmatpush1.bf16.msra.mxu1 %v13883_v62  ;;  %7349 = vmatprep.subr.bf16.mxu0 %v9411_v27 }
 0x7ca   :  { %7435 = vmatprep.subr.bf16.mxu1 %v13894_v35 }
 0x7cc   :  { %7350 = vmatpush1.bf16.msra.mxu0 %v9409_v53  ;;  %v9493_v53 = vld [vmem:[%s14638_s3 + $0x1e0] ss:$16 sps:$4 sm:$0xff]  }
 0x7cd   :  { %7436 = vmatpush1.bf16.msra.mxu1 %v13903_v28  ;;  %7351 = vmatprep.subr.bf16.mxu0 %v9417_v56  ;;  %v14158_v56 = vld [vmem:[%s14638_s3 + $0x1e8] ss:$16 sps:$4 sm:$0xff]  }
 0x7ce   :  { %7437 = vmatprep.subr.bf16.mxu1 %v13911_v57 }
 0x7d0   :  { %7352 = vmatpush1.bf16.msra.mxu0 %v9415_v52 }
 0x7d1   :  { %7438 = vmatpush1.bf16.msra.mxu1 %v13921_v58  ;;  %7353 = vmatprep.subr.bf16.mxu0 %v9423_v60 }
 0x7d2   :  { %7439 = vmatprep.subr.bf16.mxu1 %v13929_v0 }
 0x7d4   :  { %7354 = vmatpush1.bf16.msra.mxu0 %v9421_v61 }
 0x7d5   :  { %7440 = vmatpush1.bf16.msra.mxu1 %v13939_v49  ;;  %7355 = vmatprep.subr.bf16.mxu0 %v9429_v59 }
 0x7d6   :  { %7441 = vmatprep.subr.bf16.mxu1 %v13947_v3 }
 0x7d8   :  { %7356 = vmatpush1.bf16.msra.mxu0 %v9427_v5 }
 0x7d9   :  { %7442 = vmatpush1.bf16.msra.mxu1 %v13957_v9  ;;  %7357 = vmatprep.subr.bf16.mxu0 %v9435_v11  ;;  %v9501_v11 = vld [vmem:[%s14638_s3 + $0x204] ss:$16 sps:$4 sm:$0xff]  }
 0x7da   :  { %7443 = vmatprep.subr.bf16.mxu1 %v13965_v54 }
 0x7dc   :  { %7358 = vmatpush1.bf16.msra.mxu0 %v9433_v17  ;;  %v14168_v17 = vld [vmem:[%s14638_s3 + $0x20c] ss:$16 sps:$4 sm:$0xff]  }
 0x7dd   :  { %7444 = vmatpush1.bf16.msra.mxu1 %v13975_v18  ;;  %7359 = vmatprep.subr.bf16.mxu0 %v9441_v6 }
 0x7de   :  { %7445 = vmatprep.subr.bf16.mxu1 %v13983_v14 }
 0x7e0   :  { %7360 = vmatpush1.bf16.msra.mxu0 %v9439_v10 }
 0x7e1   :  { %7446 = vmatpush1.bf16.msra.mxu1 %v13994_v40  ;;  %7361 = vmatprep.subr.bf16.mxu0 %v9447_v19 }
 0x7e2   :  { %7447 = vmatprep.subr.bf16.mxu1 %v14003_v4 }
 0x7e4   :  { %7362 = vmatpush1.bf16.msra.mxu0 %v9445_v20 }
 0x7e5   :  { %7448 = vmatpush1.bf16.msra.mxu1 %v14012_v21  ;;  %7363 = vmatprep.subr.bf16.mxu0 %v9453_v22 }
 0x7e6   :  { %7449 = vmatprep.subr.bf16.mxu1 %v14021_v46 }
 0x7e8   :  { %7364 = vmatpush1.bf16.msra.mxu0 %v9451_v45 }
 0x7e9   :  { %7450 = vmatpush1.bf16.msra.mxu1 %v14030_v2  ;;  %7365 = vmatprep.subr.bf16.mxu0 %v9459_v48 }
 0x7ea   :  { %7451 = vmatprep.subr.bf16.mxu1 %v14039_v51 }
 0x7ec   :  { %7366 = vmatpush1.bf16.msra.mxu0 %v9457_v23 }
 0x7ed   :  { %7452 = vmatpush1.bf16.msra.mxu1 %v14048_v24  ;;  %7367 = vmatprep.subr.bf16.mxu0 %v9465_v25 }
 0x7ee   :  { %7453 = vmatprep.subr.bf16.mxu1 %v14057_v55 }
 0x7f0   :  { %7368 = vmatpush1.bf16.msra.mxu0 %v9463_v16  ;;  %v9499_v16 = vld [vmem:[%s14638_s3 + $0x200] ss:$16 sps:$4 sm:$0xff]  }
 0x7f1   :  { %7454 = vmatpush1.bf16.msra.mxu1 %v14066_v26  ;;  %7369 = vmatprep.subr.bf16.mxu0 %v9471_v29  ;;  %v14177_v29 = vld [vmem:[%s14638_s3 + $0x208] ss:$16 sps:$4 sm:$0xff]  }
 0x7f2   :  { %7455 = vmatprep.subr.bf16.mxu1 %v14075_v34 }
 0x7f4   :  { %7370 = vmatpush1.bf16.msra.mxu0 %v9469_v33 }
 0x7f5   :  { %7456 = vmatpush1.bf16.msra.mxu1 %v14084_v30  ;;  %7371 = vmatprep.subr.bf16.mxu0 %v9477_v36  ;;  %v9507_v36 = vld [vmem:[%s14638_s3 + $0x224] ss:$16 sps:$4 sm:$0xff]  }
 0x7f6   :  { %7457 = vmatprep.subr.bf16.mxu1 %v14093_v63 }
 0x7f8   :  { %7372 = vmatpush1.bf16.msra.mxu0 %v9475_v31  ;;  %v14185_v31 = vld [vmem:[%s14638_s3 + $0x22c] ss:$16 sps:$4 sm:$0xff]  }
 0x7f9   :  { %7458 = vmatpush1.bf16.msra.mxu1 %v14102_v32  ;;  %7373 = vmatprep.subr.bf16.mxu0 %v9483_v39  ;;  %v9505_v39 = vld [vmem:[%s14638_s3 + $0x220] ss:$16 sps:$4 sm:$0xff]  }
 0x7fa   :  { %7459 = vmatprep.subr.bf16.mxu1 %v14111_v37 }
 0x7fc   :  { %7374 = vmatpush1.bf16.msra.mxu0 %v9481_v38  ;;  %v14194_v38 = vld [vmem:[%s14638_s3 + $0x228] ss:$16 sps:$4 sm:$0xff]  }
 0x7fd   :  { %7460 = vmatpush1.bf16.msra.mxu1 %v14120_v42  ;;  %7375 = vmatprep.subr.bf16.mxu0 %v9489_v44  ;;  %v9513_v44 = vld [vmem:[%s14638_s3 + $0x244] ss:$16 sps:$4 sm:$0xff]  }
 0x7fe   :  { %7461 = vmatprep.subr.bf16.mxu1 %v14129_v12 }
 0x800   :  { %7376 = vmatpush1.bf16.msra.mxu0 %v9487_v13  ;;  %v14202_v13 = vld [vmem:[%s14638_s3 + $0x24c] ss:$16 sps:$4 sm:$0xff]  }
 0x801   :  { %7462 = vmatpush1.bf16.msra.mxu1 %v14138_v15  ;;  %7377 = vmatprep.subr.bf16.mxu0 %v9495_v43  ;;  %v9519_v43 = vld [vmem:[%s14638_s3 + $0x264] ss:$16 sps:$4 sm:$0xff]  }
 0x802   :  { %7463 = vmatprep.subr.bf16.mxu1 %v14148_v47 }
 0x804   :  { %7378 = vmatpush1.bf16.msra.mxu0 %v9493_v53  ;;  %v14230_v53 = vld [vmem:[%s14638_s3 + $0x268] ss:$16 sps:$4 sm:$0xff]  }
 0x805   :  { %7464 = vmatpush1.bf16.msra.mxu1 %v14158_v56  ;;  %7390 = vmatprep.subr.bf16.mxu0 %v9501_v11  ;;  %v14257_v11 = vld [vmem:[%s14638_s3 + $0x2ac] ss:$16 sps:$4 sm:$0xff]  }
 0x806   :  { %7476 = vmatprep.subr.bf16.mxu1 %v14168_v17 }
 0x81a   :  { %v6446_v1 = vpop.f32.mrb[36].mxu0  ;;  %v6528_v41 = vpop.f32.mrb[28].mxu1 }
 0x81b   :  { %v14150_v50 = vpack.c.bf16 %v6528_v41, %v6446_v1  ;;  %v6448_v7 = vpop.f32.mrb[37].mxu0  ;;  %v6530_v27 = vpop.f32.mrb[29].mxu1  ;;  %v9511_v1 = vld [vmem:[%s14638_s3 + $0x240] ss:$16 sps:$4 sm:$0xff]   ;;  %v14212_v41 = vld [vmem:[%s14638_s3 + $0x248] ss:$16 sps:$4 sm:$0xff]  }
 0x81c   :  { %v6706_v52 = vpack.c.bf16 %v6530_v27, %v6448_v7  ;;  %v6450_v60 = vpop.f32.mrb[38].mxu0  ;;  %v6532_v61 = vpop.f32.mrb[30].mxu1  ;;  %v14221_v7 = vld [vmem:[%s14638_s3 + $0x26c] ss:$16 sps:$4 sm:$0xff]   ;;  %v9517_v27 = vld [vmem:[%s14638_s3 + $0x260] ss:$16 sps:$4 sm:$0xff]  }
 0x81d   :  { %v6451_v59 = vpop.f32.mrb[39].mxu0  ;;  %v6533_v5 = vpop.f32.mrb[31].mxu1  ;;  %v14239_v60 = vld [vmem:[%s14638_s3 + $0x28c] ss:$16 sps:$4 sm:$0xff]   ;;  %v9523_v61 = vld [vmem:[%s14638_s3 + $0x280] ss:$16 sps:$4 sm:$0xff]  }
 0x81e   :  { %v14248_v59 = vld [vmem:[%s14638_s3 + $0x288] ss:$16 sps:$4 sm:$0xff]   ;;  %v9531_v5 = vld [vmem:[%s14638_s3 + $0x2a4] ss:$16 sps:$4 sm:$0xff]  }
 0x89a   :  { %v6614_v6 = vpop.f32.mrb[40].mxu0 }
 0x89b   :  { %v6696_v10 = vpop.f32.mrb[32].mxu1  ;;  %v6616_v19 = vpop.f32.mrb[41].mxu0 }
 0x89c   :  { %v6703_v20 = vpack.c.bf16 %v6696_v10, %v6614_v6  ;;  %v6698_v22 = vpop.f32.mrb[33].mxu1  ;;  %v6618_v45 = vpop.f32.mrb[42].mxu0  ;;  %v9529_v6 = vld [vmem:[%s14638_s3 + $0x2a0] ss:$16 sps:$4 sm:$0xff]   ;;  %v14266_v10 = vld [vmem:[%s14638_s3 + $0x2a8] ss:$16 sps:$4 sm:$0xff]  }
 0x89d   :  { %v6704_v48 = vpack.c.bf16 %v6698_v22, %v6616_v19  ;;  %v6700_v23 = vpop.f32.mrb[34].mxu1  ;;  %v6619_v25 = vpop.f32.mrb[43].mxu0  ;;  %v9537_v19 = vld [vmem:[%s14638_s3 + $0x2c4] ss:$16 sps:$4 sm:$0xff]   ;;  %v9535_v22 = vld [vmem:[%s14638_s3 + $0x2c0] ss:$16 sps:$4 sm:$0xff]  }
 0x89e   :  { %v6701_v33 = vpop.f32.mrb[35].mxu1  ;;  %v14284_v45 = vld [vmem:[%s14638_s3 + $0x2c8] ss:$16 sps:$4 sm:$0xff]   ;;  %v14293_v23 = vld [vmem:[%s14638_s3 + $0x2ec] ss:$16 sps:$4 sm:$0xff]  }
 0x89f   :  { %7379 = vmatprep.mubr.bf16.mxu0 %v6704_v48  ;;  %7465 = vmatprep.mubr.bf16.mxu1 %v6704_v48  ;;  %v9543_v48 = vld [vmem:[%s14638_s3 + $0x2e4] ss:$16 sps:$4 sm:$0xff]   ;;  %v9541_v25 = vld [vmem:[%s14638_s3 + $0x2e0] ss:$16 sps:$4 sm:$0xff]  }
 0x8a0   :  { %7380 = vmatmul.mubr.bf16.vlgmr.msra.gmra.mrb[44].mxu0 %v6703_v20  ;;  %7466 = vmatmul.mubr.bf16.vlgmr.msra.gmra.mrb[36].mxu1 %v6703_v20  ;;  %v14275_v20 = vld [vmem:[%s14638_s3 + $0x2cc] ss:$16 sps:$4 sm:$0xff]   ;;  %v9549_v33 = vld [vmem:[%s14638_s3 + $0x304] ss:$16 sps:$4 sm:$0xff]  }
 0x8a1   :  { %7391 = vmatpush1.bf16.msra.mxu0 %v9499_v16  ;;  %7477 = vmatpush1.bf16.msra.mxu1 %v14177_v29  ;;  %v14302_v16 = vld [vmem:[%s14638_s3 + $0x2e8] ss:$16 sps:$4 sm:$0xff]  }
 0x8a2   :  { %7422 = vmatprep.mubr.bf16.mxu0 %v6706_v52  ;;  %7508 = vmatprep.mubr.bf16.mxu1 %v6706_v52  ;;  %v9525_v52 = vld [vmem:[%s14638_s3 + $0x284] ss:$16 sps:$4 sm:$0xff]  }
 0x8a3   :  { %7392 = vmatprep.subr.bf16.mxu0 %v9507_v36  ;;  %7478 = vmatprep.subr.bf16.mxu1 %v14185_v31  ;;  %v14311_v36 = vld [vmem:[%s14638_s3 + $0x30c] ss:$16 sps:$4 sm:$0xff]  }
 0x8a5   :  { %7393 = vmatpush1.bf16.msra.mxu0 %v9505_v39  ;;  %7479 = vmatpush1.bf16.msra.mxu1 %v14194_v38  ;;  %v9547_v39 = vld [vmem:[%s14638_s3 + $0x300] ss:$16 sps:$4 sm:$0xff]  }
 0x8a6   :  { %7394 = vmatprep.subr.bf16.mxu0 %v9513_v44  ;;  %7480 = vmatprep.subr.bf16.mxu1 %v14202_v13  ;;  %v14320_v44 = vld [vmem:[%s14638_s3 + $0x308] ss:$16 sps:$4 sm:$0xff]  }
 0x8a9   :  { %7395 = vmatpush1.bf16.msra.mxu0 %v9511_v1  ;;  %7481 = vmatpush1.bf16.msra.mxu1 %v14212_v41  ;;  %v9555_v1 = vld [vmem:[%s14638_s3 + $0x324] ss:$16 sps:$4 sm:$0xff]  }
 0x8aa   :  { %7396 = vmatprep.subr.bf16.mxu0 %v9519_v43  ;;  %7482 = vmatprep.subr.bf16.mxu1 %v14221_v7  ;;  %v14329_v43 = vld [vmem:[%s14638_s3 + $0x32c] ss:$16 sps:$4 sm:$0xff]  }
 0x8ad   :  { %7397 = vmatpush1.bf16.msra.mxu0 %v9517_v27  ;;  %7483 = vmatpush1.bf16.msra.mxu1 %v14230_v53  ;;  %v9553_v27 = vld [vmem:[%s14638_s3 + $0x320] ss:$16 sps:$4 sm:$0xff]  }
 0x8ae   :  { %7398 = vmatprep.subr.bf16.mxu0 %v9525_v52  ;;  %7484 = vmatprep.subr.bf16.mxu1 %v14239_v60  ;;  %v14338_v52 = vld [vmem:[%s14638_s3 + $0x328] ss:$16 sps:$4 sm:$0xff]  }
 0x8b1   :  { %7399 = vmatpush1.bf16.msra.mxu0 %v9523_v61  ;;  %7485 = vmatpush1.bf16.msra.mxu1 %v14248_v59  ;;  %v9561_v61 = vld [vmem:[%s14638_s3 + $0x344] ss:$16 sps:$4 sm:$0xff]  }
 0x8b2   :  { %7400 = vmatprep.subr.bf16.mxu0 %v9531_v5  ;;  %7486 = vmatprep.subr.bf16.mxu1 %v14257_v11  ;;  %v14347_v5 = vld [vmem:[%s14638_s3 + $0x34c] ss:$16 sps:$4 sm:$0xff]  }
 0x8b5   :  { %7401 = vmatpush1.bf16.msra.mxu0 %v9529_v6  ;;  %7487 = vmatpush1.bf16.msra.mxu1 %v14266_v10  ;;  %v9559_v6 = vld [vmem:[%s14638_s3 + $0x340] ss:$16 sps:$4 sm:$0xff]  }
 0x8b6   :  { %7402 = vmatprep.subr.bf16.mxu0 %v9537_v19  ;;  %7488 = vmatprep.subr.bf16.mxu1 %v14275_v20  ;;  %v14356_v19 = vld [vmem:[%s14638_s3 + $0x348] ss:$16 sps:$4 sm:$0xff]  }
 0x8b9   :  { %7403 = vmatpush1.bf16.msra.mxu0 %v9535_v22  ;;  %7489 = vmatpush1.bf16.msra.mxu1 %v14284_v45  ;;  %v9567_v22 = vld [vmem:[%s14638_s3 + $0x364] ss:$16 sps:$4 sm:$0xff]  }
 0x8ba   :  { %7404 = vmatprep.subr.bf16.mxu0 %v9543_v48  ;;  %7490 = vmatprep.subr.bf16.mxu1 %v14293_v23  ;;  %v14365_v48 = vld [vmem:[%s14638_s3 + $0x36c] ss:$16 sps:$4 sm:$0xff]  }
 0x8bd   :  { %7405 = vmatpush1.bf16.msra.mxu0 %v9541_v25  ;;  %7491 = vmatpush1.bf16.msra.mxu1 %v14302_v16  ;;  %v9565_v25 = vld [vmem:[%s14638_s3 + $0x360] ss:$16 sps:$4 sm:$0xff]  }
 0x8be   :  { %7406 = vmatprep.subr.bf16.mxu0 %v9549_v33  ;;  %7492 = vmatprep.subr.bf16.mxu1 %v14311_v36  ;;  %v14374_v33 = vld [vmem:[%s14638_s3 + $0x368] ss:$16 sps:$4 sm:$0xff]  }
 0x8c1   :  { %7407 = vmatpush1.bf16.msra.mxu0 %v9547_v39  ;;  %7493 = vmatpush1.bf16.msra.mxu1 %v14320_v44  ;;  %v9573_v39 = vld [vmem:[%s14638_s3 + $0x384] ss:$16 sps:$4 sm:$0xff]  }
 0x8c2   :  { %7408 = vmatprep.subr.bf16.mxu0 %v9555_v1  ;;  %7494 = vmatprep.subr.bf16.mxu1 %v14329_v43  ;;  %v14383_v1 = vld [vmem:[%s14638_s3 + $0x38c] ss:$16 sps:$4 sm:$0xff]  }
 0x8c3   :  { %14874 = vst [vmem:[#allocation6_spill] sm:$0xff] %v14383_v1 }
 0x8c5   :  { %7409 = vmatpush1.bf16.msra.mxu0 %v9553_v27  ;;  %7495 = vmatpush1.bf16.msra.mxu1 %v14338_v52  ;;  %v9571_v27 = vld [vmem:[%s14638_s3 + $0x380] ss:$16 sps:$4 sm:$0xff]  }
 0x8c6   :  { %7410 = vmatprep.subr.bf16.mxu0 %v9561_v61  ;;  %7496 = vmatprep.subr.bf16.mxu1 %v14347_v5  ;;  %v14392_v61 = vld [vmem:[%s14638_s3 + $0x388] ss:$16 sps:$4 sm:$0xff]  }
 0x8c7   :  { %14875 = vst [vmem:[#allocation7_spill] sm:$0xff] %v14392_v61 }
 0x8c9   :  { %7411 = vmatpush1.bf16.msra.mxu0 %v9559_v6  ;;  %7497 = vmatpush1.bf16.msra.mxu1 %v14356_v19  ;;  %v9579_v6 = vld [vmem:[%s14638_s3 + $0x3a4] ss:$16 sps:$4 sm:$0xff]  }
 0x8ca   :  { %7412 = vmatprep.subr.bf16.mxu0 %v9567_v22  ;;  %7498 = vmatprep.subr.bf16.mxu1 %v14365_v48  ;;  %v14401_v22 = vld [vmem:[%s14638_s3 + $0x3ac] ss:$16 sps:$4 sm:$0xff]  }
 0x8cb   :  { %14876 = vst [vmem:[#allocation8_spill] sm:$0xff] %v14401_v22 }
 0x8cd   :  { %7413 = vmatpush1.bf16.msra.mxu0 %v9565_v25  ;;  %7499 = vmatpush1.bf16.msra.mxu1 %v14374_v33  ;;  %v9577_v25 = vld [vmem:[%s14638_s3 + $0x3a0] ss:$16 sps:$4 sm:$0xff]  }
 0x8ce   :  { %7414 = vmatprep.subr.bf16.mxu0 %v9573_v39  ;;  %7500 = vmatprep.subr.bf16.mxu1 %v14383_v1  ;;  %v14410_v39 = vld [vmem:[%s14638_s3 + $0x3a8] ss:$16 sps:$4 sm:$0xff]   ;;  %v9585_v1 = vld [vmem:[%s14638_s3 + $0x3c4] ss:$16 sps:$4 sm:$0xff]  }
 0x8cf   :  { %14877 = vst [vmem:[#allocation9_spill] sm:$0xff] %v14410_v39 }
 0x8d1   :  { %7415 = vmatpush1.bf16.msra.mxu0 %v9571_v27  ;;  %7501 = vmatpush1.bf16.msra.mxu1 %v14392_v61  ;;  %v14419_v27 = vld [vmem:[%s14638_s3 + $0x3cc] ss:$16 sps:$4 sm:$0xff]   ;;  %v9583_v61 = vld [vmem:[%s14638_s3 + $0x3c0] ss:$16 sps:$4 sm:$0xff]  }
 0x8d2   :  { %7416 = vmatprep.subr.bf16.mxu0 %v9579_v6  ;;  %7502 = vmatprep.subr.bf16.mxu1 %v14401_v22  ;;  %v14428_v6 = vld [vmem:[%s14638_s3 + $0x3c8] ss:$16 sps:$4 sm:$0xff]   ;;  %v9591_v22 = vld [vmem:[%s14638_s3 + $0x3e4] ss:$16 sps:$4 sm:$0xff]  }
 0x8d5   :  { %7417 = vmatpush1.bf16.msra.mxu0 %v9577_v25  ;;  %7503 = vmatpush1.bf16.msra.mxu1 %v14410_v39  ;;  %v14437_v25 = vld [vmem:[%s14638_s3 + $0x3ec] ss:$16 sps:$4 sm:$0xff]   ;;  %v9589_v39 = vld [vmem:[%s14638_s3 + $0x3e0] ss:$16 sps:$4 sm:$0xff]  }
 0x8d6   :  { %7418 = vmatprep.subr.bf16.mxu0 %v9585_v1  ;;  %7504 = vmatprep.subr.bf16.mxu1 %v14419_v27  ;;  %v14446_v1 = vld [vmem:[%s14638_s3 + $0x3e8] ss:$16 sps:$4 sm:$0xff]  }
 0x8d9   :  { %7419 = vmatpush1.bf16.msra.mxu0 %v9583_v61  ;;  %7505 = vmatpush1.bf16.msra.mxu1 %v14428_v6  ;;  %v7647_v61 = vld [vmem:[%s14639_s6 + $0xd0] sm:$0xff] }
 0x8da   :  { %7420 = vmatprep.subr.bf16.mxu0 %v9591_v22  ;;  %7506 = vmatprep.subr.bf16.mxu1 %v14437_v25  ;;  %v7648_v22 = vld [vmem:[%s14639_s6 + $0xd8] sm:$0xff] }
 0x8dd   :  { %7421 = vmatpush1.bf16.msra.mxu0 %v9589_v39  ;;  %7507 = vmatpush1.bf16.msra.mxu1 %v14446_v1 }
 0x8de   :  { %7527 = vmatprep.subr.bf16.mxu0 %v13874_v8 }
 0x8e0   :  { %7423 = vmatmul.mubr.bf16.vlgmr.msra.gmra.mrb[44].mxu0 %v14150_v50  ;;  %7509 = vmatmul.mubr.bf16.vlgmr.msra.gmra.mrb[36].mxu1 %v14150_v50 }
 0x8e1   :  { %7528 = vmatpush1.bf16.msra.mxu0 %v13883_v62 }
 0x8e2   :  { %7529 = vmatprep.subr.bf16.mxu0 %v13894_v35 }
 0x8e5   :  { %7530 = vmatpush1.bf16.msra.mxu0 %v13903_v28 }
 0x8e6   :  { %7531 = vmatprep.subr.bf16.mxu0 %v13911_v57 }
 0x8e9   :  { %7532 = vmatpush1.bf16.msra.mxu0 %v13921_v58 }
 0x8ea   :  { %7533 = vmatprep.subr.bf16.mxu0 %v13929_v0 }
 0x8ed   :  { %7534 = vmatpush1.bf16.msra.mxu0 %v13939_v49 }
 0x8ee   :  { %7535 = vmatprep.subr.bf16.mxu0 %v13947_v3 }
 0x8f1   :  { %7536 = vmatpush1.bf16.msra.mxu0 %v13957_v9 }
 0x8f2   :  { %7537 = vmatprep.subr.bf16.mxu0 %v13965_v54 }
 0x8f5   :  { %7538 = vmatpush1.bf16.msra.mxu0 %v13975_v18 }
 0x8f6   :  { %7539 = vmatprep.subr.bf16.mxu0 %v13983_v14  ;;  %v14878_v14 = vld [vmem:[#allocation5_spill] sm:$0xff] }
 0x8f9   :  { %7540 = vmatpush1.bf16.msra.mxu0 %v13994_v40  ;;  %v14879_v40 = vld [vmem:[#allocation4_spill] sm:$0xff] }
 0x8fa   :  { %7541 = vmatprep.subr.bf16.mxu0 %v14003_v4  ;;  %v14880_v4 = vpack.c.bf16 %v14878_v14, %v14879_v40  ;;  %v9726_v14 = vmov 0   ;;  %v7723_v40 = vld [vmem:[%s14640_s7] sm:$0xff] }
 0x8fb   :  { %9018 = vset.pattern.permute.xlu0 %v9726_v14 }
 0x8fc   :  { %7726 = vperm.xlu0 %9018, %v7723_v40  }
 0x8fd   :  { %7542 = vmatpush1.bf16.msra.mxu0 %v14012_v21  ;;  %v14881_v21 = vld [vmem:[#allocation6_spill] sm:$0xff] }
 0x8fe   :  { %7543 = vmatprep.subr.bf16.mxu0 %v14021_v46  ;;  %v14882_v46 = vld [vmem:[#allocation7_spill] sm:$0xff] }
 0x901   :  { %7544 = vmatpush1.bf16.msra.mxu0 %v14030_v2  ;;  %v14883_v2 = vld [vmem:[#allocation8_spill] sm:$0xff] }
 0x902   :  { %7545 = vmatprep.subr.bf16.mxu0 %v14039_v51  ;;  %v14884_v51 = vld [vmem:[#allocation9_spill] sm:$0xff] }
 0x905   :  { %7546 = vmatpush1.bf16.msra.mxu0 %v14048_v24  ;;  %v14885_v24 = vld [vmem:[#allocation3_spill] sm:$0xff] }
 0x906   :  { %7547 = vmatprep.subr.bf16.mxu0 %v14057_v55  ;;  %v14886_v55 = vld [vmem:[#allocation2_spill] sm:$0xff] }
 0x909   :  { %7548 = vmatpush1.bf16.msra.mxu0 %v14066_v26  ;;  %v14887_v26 = vpack.c.bf16 %v14885_v24, %v14886_v55 }
 0x90a   :  { %7549 = vmatprep.subr.bf16.mxu0 %v14075_v34  ;;  %v14888_v34 = vld [vmem:[#allocation21_spill] sm:$0xff] }
 0x90d   :  { %7550 = vmatpush1.bf16.msra.mxu0 %v14084_v30  ;;  %v14889_v30 = vld [vmem:[#allocation18_spill] sm:$0xff] }
 0x90e   :  { %7551 = vmatprep.subr.bf16.mxu0 %v14093_v63  ;;  %v14890_v63 = vpack.c.bf16 %v14888_v34, %v14889_v30 }
 0x911   :  { %7552 = vmatpush1.bf16.msra.mxu0 %v14102_v32  ;;  %v14891_v32 = vld [vmem:[#allocation17_spill] sm:$0xff] }
 0x912   :  { %7553 = vmatprep.subr.bf16.mxu0 %v14111_v37  ;;  %v14892_v37 = vld [vmem:[#allocation16_spill] sm:$0xff] }
 0x915   :  { %7554 = vmatpush1.bf16.msra.mxu0 %v14120_v42  ;;  %v14893_v42 = vpack.c.bf16 %v14891_v32, %v14892_v37 }
 0x916   :  { %7555 = vmatprep.subr.bf16.mxu0 %v14129_v12  ;;  %v7637_v12 = vld [vmem:[%s14639_s6 + $0x80] sm:$0xff] }
 0x919   :  { %7556 = vmatpush1.bf16.msra.mxu0 %v14138_v15  ;;  %v7638_v15 = vld [vmem:[%s14639_s6 + $0x88] sm:$0xff] }
 0x91a   :  { %7557 = vmatprep.subr.bf16.mxu0 %v14148_v47  ;;  %v7621_v47 = vld [vmem:[%s14639_s6] sm:$0xff]  ;;  %v8865_v50 = vpack.c.bf16 %v7638_v15, %v7637_v12 }
 0x91c   :  { %8866 = vmatprep.subr.bf16.mxu1 %v8865_v50 }
 0x91d   :  { %7558 = vmatpush1.bf16.msra.mxu0 %v14158_v56  ;;  %v7622_v56 = vld [vmem:[%s14639_s6 + $0x8] sm:$0xff] }
 0x91e   :  { %7574 = vmatprep.subr.bf16.mxu0 %v14168_v17  ;;  %v7639_v17 = vld [vmem:[%s14639_s6 + $0x90] sm:$0xff] }
 0x9b3   :  { %v7424_v8 = vpop.f32.mrb[44].mxu0  ;;  %v7510_v62 = vpop.f32.mrb[36].mxu1 }
 0x9b4   :  { %v7519_v35 = vpack.c.bf16 %v7510_v62, %v7424_v8  ;;  %v7426_v28 = vpop.f32.mrb[45].mxu0  ;;  %v7512_v57 = vpop.f32.mrb[37].mxu1  ;;  %v7650_v8 = vld [vmem:[%s14639_s6 + $0xe8] sm:$0xff] }
 0x9b5   :  { %v7520_v58 = vpack.c.bf16 %v7512_v57, %v7426_v28  ;;  %v7428_v0 = vpop.f32.mrb[46].mxu0  ;;  %v7514_v49 = vpop.f32.mrb[38].mxu1  ;;  %v7633_v28 = vld [vmem:[%s14639_s6 + $0x60] sm:$0xff]  ;;  %v7634_v57 = vld [vmem:[%s14639_s6 + $0x68] sm:$0xff] }
 0x9b6   :  { %v7523_v3 = vpack.c.bf16 %v7514_v49, %v7428_v0  ;;  %v7430_v9 = vpop.f32.mrb[47].mxu0  ;;  %v7516_v54 = vpop.f32.mrb[39].mxu1  ;;  %v7651_v0 = vld [vmem:[%s14639_s6 + $0xf0] sm:$0xff]  ;;  %v7652_v49 = vld [vmem:[%s14639_s6 + $0xf8] sm:$0xff] }
 0x9b7   :  { %v7524_v18 = vpack.c.bf16 %v7516_v54, %v7430_v9  ;;  %7559 = vmatprep.mubr.bf16.mxu0 %v7520_v58  ;;  %v8891_v58 = vpack.c.bf16 %v7634_v57, %v7633_v28  ;;  %v7635_v9 = vld [vmem:[%s14639_s6 + $0x70] sm:$0xff]  ;;  %v7636_v54 = vld [vmem:[%s14639_s6 + $0x78] sm:$0xff] }
 0x9b8   :  { %7560 = vmatmul.mubr.bf16.vlgmr.msra.gmra.mrb[48].mxu0 %v7519_v35 }
 0x9b9   :  { %7575 = vmatpush1.bf16.msra.mxu0 %v14177_v29  ;;  %7567 = vmatprep.mubr.bf16.mxu0 %v7524_v18  ;;  %v7640_v29 = vld [vmem:[%s14639_s6 + $0x98] sm:$0xff]  ;;  %v8895_v18 = vpack.c.bf16 %v7636_v54, %v7635_v9 }
 0x9ba   :  { %7576 = vmatprep.subr.bf16.mxu0 %v14185_v31  ;;  %v8867_v31 = vpack.c.bf16 %v7622_v56, %v7621_v47 }
 0x9bc   :  { %8868 = vmatpush3.bf16.msra.mxu1 %v8867_v31 }
 0x9bd   :  { %7577 = vmatpush1.bf16.msra.mxu0 %v14194_v38  ;;  %v8869_v38 = vpack.c.bf16 %v7640_v29, %v7639_v17 }
 0x9be   :  { %7578 = vmatprep.subr.bf16.mxu0 %v14202_v13  ;;  %v7623_v13 = vld [vmem:[%s14639_s6 + $0x10] sm:$0xff] }
 0x9bf   :  { %8870 = vmatprep.subr.bf16.mxu1 %v8869_v38 }
 0x9c0   :  { %7568 = vmatmul.mubr.bf16.gmra.mrb[52].mxu0 %v7523_v3  ;;  %v8893_v3 = vpack.c.bf16 %v7652_v49, %v7651_v0 }
 0x9c1   :  { %7579 = vmatpush1.bf16.msra.mxu0 %v14212_v41  ;;  %7606 = vmatprep.mubr.bf16.mxu0 %v14880_v4  ;;  %v7624_v41 = vld [vmem:[%s14639_s6 + $0x18] sm:$0xff]  ;;  %v7730_v4 = vld [vmem:[%s14641_s8] sm:$0xff] }
 0x9c2   :  { %7580 = vmatprep.subr.bf16.mxu0 %v14221_v7  ;;  %v7641_v7 = vld [vmem:[%s14639_s6 + $0xa0] sm:$0xff]  ;;  %7733 = vperm.xlu0 %9018, %v7730_v4  }
 0x9c5   :  { %7581 = vmatpush1.bf16.msra.mxu0 %v14230_v53  ;;  %v7642_v53 = vld [vmem:[%s14639_s6 + $0xa8] sm:$0xff] }
 0x9c6   :  { %7582 = vmatprep.subr.bf16.mxu0 %v14239_v60  ;;  %v8871_v60 = vpack.c.bf16 %v7624_v41, %v7623_v13 }
 0x9c8   :  { %8872 = vmatpush3.bf16.msra.mxu1 %v8871_v60 }
 0x9c9   :  { %7583 = vmatpush1.bf16.msra.mxu0 %v14248_v59  ;;  %v8873_v59 = vpack.c.bf16 %v7642_v53, %v7641_v7 }
 0x9ca   :  { %7584 = vmatprep.subr.bf16.mxu0 %v14257_v11  ;;  %v7625_v11 = vld [vmem:[%s14639_s6 + $0x20] sm:$0xff] }
 0x9cb   :  { %8874 = vmatprep.subr.bf16.mxu1 %v8873_v59 }
 0x9cd   :  { %7585 = vmatpush1.bf16.msra.mxu0 %v14266_v10  ;;  %v7626_v10 = vld [vmem:[%s14639_s6 + $0x28] sm:$0xff] }
 0x9ce   :  { %7586 = vmatprep.subr.bf16.mxu0 %v14275_v20  ;;  %v7643_v20 = vld [vmem:[%s14639_s6 + $0xb0] sm:$0xff] }
 0x9d1   :  { %7587 = vmatpush1.bf16.msra.mxu0 %v14284_v45  ;;  %v7644_v45 = vld [vmem:[%s14639_s6 + $0xb8] sm:$0xff] }
 0x9d2   :  { %7588 = vmatprep.subr.bf16.mxu0 %v14293_v23  ;;  %v8875_v23 = vpack.c.bf16 %v7626_v10, %v7625_v11 }
 0x9d4   :  { %8876 = vmatpush3.bf16.msra.mxu1 %v8875_v23 }
 0x9d5   :  { %7589 = vmatpush1.bf16.msra.mxu0 %v14302_v16  ;;  %v8877_v16 = vpack.c.bf16 %v7644_v45, %v7643_v20 }
 0x9d6   :  { %7590 = vmatprep.subr.bf16.mxu0 %v14311_v36  ;;  %v7627_v36 = vld [vmem:[%s14639_s6 + $0x30] sm:$0xff] }
 0x9d7   :  { %8878 = vmatprep.subr.bf16.mxu1 %v8877_v16 }
 0x9d9   :  { %7591 = vmatpush1.bf16.msra.mxu0 %v14320_v44  ;;  %v7628_v44 = vld [vmem:[%s14639_s6 + $0x38] sm:$0xff] }
 0x9da   :  { %7592 = vmatprep.subr.bf16.mxu0 %v14329_v43  ;;  %v7645_v43 = vld [vmem:[%s14639_s6 + $0xc0] sm:$0xff] }
 0x9dd   :  { %7593 = vmatpush1.bf16.msra.mxu0 %v14338_v52  ;;  %v7646_v52 = vld [vmem:[%s14639_s6 + $0xc8] sm:$0xff] }
 0x9de   :  { %7594 = vmatprep.subr.bf16.mxu0 %v14347_v5  ;;  %v8879_v5 = vpack.c.bf16 %v7628_v44, %v7627_v36 }
 0x9e0   :  { %8880 = vmatpush3.bf16.msra.mxu1 %v8879_v5 }
 0x9e1   :  { %7595 = vmatpush1.bf16.msra.mxu0 %v14356_v19  ;;  %v8881_v19 = vpack.c.bf16 %v7646_v52, %v7645_v43 }
 0x9e2   :  { %7596 = vmatprep.subr.bf16.mxu0 %v14365_v48  ;;  %v7629_v48 = vld [vmem:[%s14639_s6 + $0x40] sm:$0xff] }
 0x9e3   :  { %8882 = vmatprep.subr.bf16.mxu1 %v8881_v19 }
 0x9e5   :  { %7597 = vmatpush1.bf16.msra.mxu0 %v14374_v33  ;;  %v7630_v33 = vld [vmem:[%s14639_s6 + $0x48] sm:$0xff] }
 0x9e6   :  { %7598 = vmatprep.subr.bf16.mxu0 %v14881_v21  ;;  %v8883_v39 = vpack.c.bf16 %v7630_v33, %v7629_v48 }
 0x9e8   :  { %8884 = vmatpush3.bf16.msra.mxu1 %v8883_v39 }
 0x9e9   :  { %7599 = vmatpush1.bf16.msra.mxu0 %v14882_v46 }
 0x9ea   :  { %7600 = vmatprep.subr.bf16.mxu0 %v14883_v2 }
 0x9ed   :  { %7601 = vmatpush1.bf16.msra.mxu0 %v14884_v51 }
 0x9ee   :  { %7602 = vmatprep.subr.bf16.mxu0 %v14419_v27  ;;  %v8885_v27 = vpack.c.bf16 %v7648_v22, %v7647_v61 }
 0x9f0   :  { %8886 = vmatprep.subr.bf16.mxu1 %v8885_v27 }
 0x9f1   :  { %7603 = vmatpush1.bf16.msra.mxu0 %v14428_v6  ;;  %v7631_v6 = vld [vmem:[%s14639_s6 + $0x50] sm:$0xff] }
 0x9f2   :  { %7604 = vmatprep.subr.bf16.mxu0 %v14437_v25  ;;  %v7632_v25 = vld [vmem:[%s14639_s6 + $0x58] sm:$0xff] }
 0x9f3   :  { %v8887_v62 = vpack.c.bf16 %v7632_v25, %v7631_v6 }
 0x9f5   :  { %7605 = vmatpush1.bf16.msra.mxu0 %v14446_v1  ;;  %v7649_v1 = vld [vmem:[%s14639_s6 + $0xe0] sm:$0xff]  ;;  %8888 = vmatpush3.bf16.msra.mxu1 %v8887_v62 }
 0x9f6   :  { %v8889_v35 = vpack.c.bf16 %v7650_v8, %v7649_v1 }
 0x9f8   :  { %7607 = vmatmul.mubr.bf16.vlgmr.msra.gmra.mrb[48].mxu0 %v14887_v26  ;;  %8890 = vmatprep.subr.bf16.mxu1 %v8889_v35 }
 0x9f9   :  { %7614 = vmatprep.mubr.bf16.mxu0 %v14890_v63  ;;  %8892 = vmatpush3.bf16.msra.mxu1 %v8891_v58 }
 0x9fa   :  { %8894 = vmatprep.subr.bf16.mxu1 %v8893_v3 }
 0x9fd   :  { %8896 = vmatpush3.bf16.msra.mxu1 %v8895_v18 }
 0xa00   :  { %7615 = vmatmul.mubr.bf16.gmra.mrb[56].mxu0 %v14893_v42  ;;  %v7727_v42 = vpop.permute.xlu0 %7726 }
 0xa41   :  { %v7734_v56 = vpop.permute.xlu0 %7733 }
 0xa93   :  { %v7569_v21 = vpop.f32.mrb[52].mxu0 }
 0xa94   :  { %v7570_v46 = vpop.f32.mrb[53].mxu0 }
 0xa95   :  { %v7571_v2 = vpop.f32.mrb[54].mxu0 }
 0xa96   :  { %v7572_v51 = vpop.f32.mrb[55].mxu0 }
 0xacb   :  { %v7608_v24 = vpop.f32.mrb[48].mxu0 }
 0xacc   :  { %v7609_v55 = vpop.f32.mrb[49].mxu0 }
 0xacd   :  { %v7610_v26 = vpop.f32.mrb[50].mxu0 }
 0xace   :  { %v7612_v34 = vpop.f32.mrb[51].mxu0 }
 0xacf   :  { %7717 = vmatprep.mubr.f32.mxu1 %v7612_v34 }
 0xad0   :  { %7718 = vmatmul.mubr.f32.vlgmr.msra.gmra.mrb[40].mxu1 %v7610_v26 }
 0xad3   :  { %v7616_v30 = vpop.f32.mrb[56].mxu0 }
 0xad4   :  { %v7617_v63 = vpop.f32.mrb[57].mxu0 }
 0xad5   :  { %v7618_v32 = vpop.f32.mrb[58].mxu0 }
 0xad6   :  { %v7619_v37 = vpop.f32.mrb[59].mxu0 }
 0xba3   :  { %v8670_v12 = vpop.f32.mrb[40].mxu1 }
 0xba4   :  { %v8671_v15 = vpop.f32.mrb[41].mxu1 }
 0xba5   :  { %v8672_v47 = vadd.f32 %v8671_v15, %v8670_v12 }
 0xba7   :  { %v7729_v50 = vmul.f32 %v8672_v47, %v7727_v42 }
 0xba9   :  { %v7736_v17 = vadd.f32 %v7734_v56, %v7729_v50 }
 0xbab   :  { %7737 = vst [vmem:[%s14642_s9] sm:$0xff] %v7736_v17 }

</bundles_post_ra>
